<compile_context>
chip_gen: v7x
topology: tpu7x:2x2x1
jax: 0.10.0
libtpu: 0.0.40
codegen_flags: <defaults>
</compile_context>

<pallas_src>
import functools

import jax
import jax.numpy as jnp
from jax.experimental import pallas as pl
from jax.experimental.pallas import tpu as pltpu

LANES = 128
EPS = 1e-5


def _gelu_tanh(x):
    # TODO(synk): PyTorch F.gelu defaults to the exact erf GELU; the tanh
    # approximation (max abs err ~1e-3) is used to guarantee Mosaic lowering.
    c = 0.7978845608028654  # sqrt(2/pi)
    return 0.5 * x * (1.0 + jnp.tanh(c * (x + 0.044715 * x * x * x)))


# --------------------------------------------------------------------------
# Single fused kernel: the whole multihead block in one pallas_call.
#   stage 1 : h  = pa @ W1a + pb @ W1b     (branches 1/2 im2col + branch 3 1x1)
#             BN(per-column batch size) -> GELU -> zero branch-3 rows at pad positions
#   stage 2 : z  = h @ W2 -> BN -> binarize -> zero out3 at pad positions  (== out1|out2|out3)
#   final   : hf = o123 @ Wf1a + pb @ Wf1b  (channel interleave folded into weight rows)
#             BN -> GELU ; zf = hf @ Wf2 -> BN -> binarize
# --------------------------------------------------------------------------
def _make_fused_kernel(inv_full, inv_inner, thresh):
    def kernel(pa_ref, pb_ref, mask_ref, w1a_ref, w1b_ref, w2_ref,
               wf1a_ref, wf1b_ref, wf2_ref, aux_ref, o_ref):
        f32 = jnp.float32
        pa = pa_ref[...]                       # (R, 4C)  bf16  2x2 im2col patches
        pb = pb_ref[...]                       # (R, 8)   bf16  bottom/right-padded x (= out4)
        mask = mask_ref[...]                   # (R, 1)   f32   1 inside HxW, 0 on pad row/col
        aux = aux_ref[...]                     # (16,128) f32   BN params + column selectors
        g1, bt1 = aux[0:1], aux[1:2]
        g2, bt2 = aux[2:3], aux[3:4]
        gf1, btf1 = aux[4:5], aux[5:6]
        gf2, btf2 = aux[6:7], aux[7:8]
        hsel_b, hsel_s = aux[8:9], aux[9:10]   # branch-1/2 vs branch-3 hidden columns
        osel_b, osel_s = aux[10:11], aux[11:12]  # out1/out2 vs out3 output columns

        def batch_norm(h, gamma, beta, inv_n):
            # Training-mode BN, single-pass stats, affine folded into one FMA.
            # inv_n is per-column so branch-3's zero padding rows never bias it.
            mean = jnp.sum(h, axis=0, keepdims=True) * inv_n
            ex2 = jnp.sum(h * h, axis=0, keepdims=True) * inv_n
            var = jnp.maximum(ex2 - mean * mean, 0.0)
            s = gamma * jax.lax.rsqrt(var + EPS)
            return h * s + (beta - mean * s)

        # ---- stage 1: branches 1/2 (depthwise 2x2) + branch 3 (1x1), one MXU slab
        h = (jnp.dot(pa, w1a_ref[...], preferred_element_type=f32)
             + jnp.dot(pb, w1b_ref[...], preferred_element_type=f32))
        inv1 = inv_full + hsel_s * (inv_inner - inv_full)
        h = _gelu_tanh(batch_norm(h, g1, bt1, inv1))
        h = h * (hsel_b + mask * hsel_s)       # zero branch-3 hidden at pad rows

        # ---- stage 2: grouped 1x1 -> BN -> binarize
        z = jnp.dot(h, w2_ref[...], preferred_element_type=f32)
        inv2 = inv_full + osel_s * (inv_inner - inv_full)
        z = batch_norm(z, g2, bt2, inv2)
        # Binarize01Act with T=0 is deterministic: 1.0 * (z >= T/2)
        # TODO(synk): T > 0 adds a stochastic band |z| < T/2 (torch.randint); not implemented.
        o123 = (z >= thresh).astype(f32) * (osel_b + mask * osel_s)

        # ---- final Block_TT: interleave/concat folded into Wf1a/Wf1b row layout
        hf = (jnp.dot(o123.astype(jnp.bfloat16), wf1a_ref[...], preferred_element_type=f32)
              + jnp.dot(pb, wf1b_ref[...], preferred_element_type=f32))
        hf = _gelu_tanh(batch_norm(hf, gf1, btf1, inv_full))
        zf = jnp.dot(hf, wf2_ref[...], preferred_element_type=f32)
        zf = batch_norm(zf, gf2, btf2, inv_full)
        o_ref[...] = (zf >= thresh).astype(o_ref.dtype)

    return kernel


def _fused_forward(pa, pb, mask, prep, *, inv_full, inv_inner, thresh):
    R = pa.shape[0]
    flops = 2 * R * LANES * (pa.shape[1] + 2 * pb.shape[1] + 3 * LANES) + 48 * R * LANES
    bytes_accessed = (2 * (pa.size + pb.size) + 4 * mask.size
                      + 2 * (prep["w1a"].size + prep["w1b"].size
                             + prep["wf1a"].size + prep["wf1b"].size)
                      + 4 * (prep["w2"].size + prep["wf2"].size + prep["aux"].size)
                      + 4 * R * LANES)
    return pl.pallas_call(
        _make_fused_kernel(inv_full, inv_inner, thresh),
        out_shape=jax.ShapeDtypeStruct((R, LANES), jnp.float32),
        cost_estimate=pl.CostEstimate(
            flops=flops, transcendentals=2 * R * LANES, bytes_accessed=bytes_accessed),
        compiler_params=pltpu.CompilerParams(vmem_limit_bytes=32 * 1024 * 1024),
    )(pa, pb, mask, prep["w1a"], prep["w1b"], prep["w2"],
      prep["wf1a"], prep["wf1b"], prep["wf2"], prep["aux"])


# --------------------------------------------------------------------------
# Host-side weight expansion: grouped/depthwise convs -> dense matmul weights
# --------------------------------------------------------------------------
def _depthwise2x2_to_dense(w):
    """(C*8, 1, 2, 2) depthwise-expansion conv -> dense (4*C, 8*C) im2col weight.
    Row = tap*C + c_in (tap = kh*2 + kw), col = c_in*8 + t."""
    c = w.shape[0] // 8
    w_r = w.reshape(c, 8, 2, 2)
    taps = jnp.transpose(w_r, (2, 3, 0, 1)).reshape(4, c, 8)       # [tap, c, t]
    dense = jnp.zeros((4, c, c, 8), w.dtype)
    dense = dense.at[:, jnp.arange(c), jnp.arange(c), :].set(taps)
    return dense.reshape(4 * c, c * 8)


def _grouped1x1_to_dense(w, groups):
    """(out_ch, in_ch/groups, 1, 1) grouped 1x1 conv -> block-diagonal dense (in_ch, out_ch)."""
    out_ch, inpg = w.shape[0], w.shape[1]
    opg = out_ch // groups
    w_r = w.reshape(groups, opg, inpg)
    dense = jnp.zeros((groups, inpg, groups, opg), w.dtype)
    dense = dense.at[jnp.arange(groups), :, jnp.arange(groups), :].set(
        jnp.transpose(w_r, (0, 2, 1)))
    return dense.reshape(groups * inpg, groups * opg)


def prepare_params(params, in_planes, out_planes):
    """Expand grouped-conv / BN params into padded dense weights for the fused kernel."""
    C = in_planes
    assert 32 * C <= LANES and 4 * out_planes <= LANES and C <= 8

    # stage-1 hidden layout: [b1 hidden 0:8C | b2 hidden 8C:16C | b3 hidden 16C:24C]
    w1a = jnp.zeros((4 * C, LANES), jnp.float32)                  # rows = im2col lanes
    w1a = w1a.at[:, 0:8 * C].set(_depthwise2x2_to_dense(params["b1"]["w1"]))
    w1a = w1a.at[:, 8 * C:16 * C].set(_depthwise2x2_to_dense(params["b2"]["w1"]))
    w1b = jnp.zeros((8, LANES), jnp.float32)                      # rows = pb lanes (C real)
    w1b = w1b.at[:C, 16 * C:24 * C].set(_grouped1x1_to_dense(params["b3"]["w1"], C // 4))

    # stage-2 output layout: [out1 0:C | out2 C:2C | out3 2C:3C]
    w2 = jnp.zeros((LANES, LANES), jnp.float32)
    w2 = w2.at[0:8 * C, 0:C].set(_grouped1x1_to_dense(params["b1"]["w2"], C))
    w2 = w2.at[8 * C:16 * C, C:2 * C].set(_grouped1x1_to_dense(params["b2"]["w2"], C))
    w2 = w2.at[16 * C:24 * C, 2 * C:3 * C].set(_grouped1x1_to_dense(params["b3"]["w2"], C // 4))

    # final conv1: interleaved channel (c*4 + branch) folded into weight rows,
    # split by source slab: o123 (branches 1..3) vs pb (branch 4 = skip).
    fh = params["f"]["w1"].shape[0]                               # 8 * 4 * C
    wf1 = params["f"]["w1"].reshape(fh, 4)                        # (hidden, branch)
    o_idx = jnp.arange(fh)
    grp = o_idx // (fh // C)                                      # original channel per hidden
    wf1a = jnp.zeros((LANES, LANES), jnp.float32)
    wf1a = wf1a.at[grp, o_idx].set(wf1[:, 0])                     # out1_c -> o123 col c
    wf1a = wf1a.at[C + grp, o_idx].set(wf1[:, 1])                 # out2_c -> o123 col C+c
    wf1a = wf1a.at[2 * C + grp, o_idx].set(wf1[:, 2])             # out3_c -> o123 col 2C+c
    wf1b = jnp.zeros((8, LANES), jnp.float32)
    wf1b = wf1b.at[grp, o_idx].set(wf1[:, 3])                     # out4_c -> pb col c

    # final conv2
    wf2 = jnp.zeros((LANES, LANES), jnp.float32)
    wf2 = wf2.at[0:fh, 0:4 * out_planes].set(_grouped1x1_to_dense(params["f"]["w2"], C))

    # BN params + column selectors packed into one (16, 128) aux slab.
    def row(vals, start=0):
        r = jnp.zeros((LANES,), jnp.float32)
        return r.at[start:start + vals.shape[0]].set(vals.astype(jnp.float32))

    g1 = row(jnp.concatenate([params["b1"]["g1"], params["b2"]["g1"], params["b3"]["g1"]]))
    bt1 = row(jnp.concatenate([params["b1"]["bt1"], params["b2"]["bt1"], params["b3"]["bt1"]]))
    g2 = row(jnp.concatenate([params["b1"]["g2"], params["b2"]["g2"], params["b3"]["g2"]]))
    bt2 = row(jnp.concatenate([params["b1"]["bt2"], params["b2"]["bt2"], params["b3"]["bt2"]]))
    gf1, btf1 = row(params["f"]["g1"]), row(params["f"]["bt1"])
    gf2, btf2 = row(params["f"]["g2"]), row(params["f"]["bt2"])
    hsel_b = row(jnp.ones((16 * C,), jnp.float32))                # b1/b2 hidden columns
    hsel_s = row(jnp.ones((8 * C,), jnp.float32), start=16 * C)   # b3 hidden columns
    osel_b = row(jnp.ones((2 * C,), jnp.float32))                 # out1/out2 columns
    osel_s = row(jnp.ones((C,), jnp.float32), start=2 * C)        # out3 columns
    zero = jnp.zeros((LANES,), jnp.float32)
    aux = jnp.stack([g1, bt1, g2, bt2, gf1, btf1, gf2, btf2,
                     hsel_b, hsel_s, osel_b, osel_s, zero, zero, zero, zero])

    bf16 = jnp.bfloat16
    return dict(w1a=w1a.astype(bf16), w1b=w1b.astype(bf16), w2=w2,
                wf1a=wf1a.astype(bf16), wf1b=wf1b.astype(bf16), wf2=wf2, aux=aux)


# --------------------------------------------------------------------------
# Full multihead forward (stride=1, last=False)
# --------------------------------------------------------------------------
@functools.partial(jax.jit, static_argnames=("in_planes", "out_planes", "thresh"))
def block_forward(x, prep, *, in_planes, out_planes, thresh=0.0):
    C = in_planes
    N, cx, H, W = x.shape
    assert cx == C
    Ho, Wo = H + 1, W + 1
    R = N * Ho * Wo

    xcl = jnp.transpose(x, (0, 2, 3, 1)).astype(jnp.bfloat16)     # (N, H, W, C)

    # Branches 1 & 2: 2x2 im2col on the all-sides-padded (pad=1) input -> 17x17 grid.
    xp = jnp.pad(xcl, ((0, 0), (1, 1), (1, 1), (0, 0)))
    patches = jnp.concatenate(
        [xp[:, 0:Ho, 0:Wo, :], xp[:, 0:Ho, 1:Wo + 1, :],
         xp[:, 1:Ho + 1, 0:Wo, :], xp[:, 1:Ho + 1, 1:Wo + 1, :]], axis=-1)
    pa = patches.reshape(R, 4 * C)                                # true-width, bf16

    # Branch-3 input / branch-4 skip: x zero-padded bottom/right onto the 17x17 grid
    # (channels padded to 8 lanes so the small matmul K dims stay aligned).
    pb = jnp.pad(xcl, ((0, 0), (0, 1), (0, 1), (0, 8 - C))).reshape(R, 8)

    # Row validity: 1 inside the original HxW grid, 0 on the padded row/column.
    mask = jnp.pad(jnp.ones((N, H, W, 1), jnp.float32),
                   ((0, 0), (0, 1), (0, 1), (0, 0))).reshape(R, 1)

    out = _fused_forward(pa, pb, mask, prep,
                         inv_full=1.0 / R, inv_inner=1.0 / (N * H * W), thresh=thresh)
    out = out[:, :4 * out_planes].reshape(N, Ho, Wo, 4 * out_planes)
    return jnp.transpose(out, (0, 3, 1, 2))                       # (N, 4*out_planes, H+1, W+1)


# --------------------------------------------------------------------------
# Parameter construction and pure-JAX reference (grouped convs via lax.conv)
# --------------------------------------------------------------------------
def init_params(key, in_planes, out_planes):
    C = in_planes
    ks = jax.random.split(key, 16)

    def q(a):  # bf16-representable values -> kernel's bf16 operand streaming is lossless
        return a.astype(jnp.bfloat16).astype(jnp.float32)

    def bn(k, n):
        k1, k2 = jax.random.split(k)
        return (1.0 + 0.1 * jax.random.normal(k1, (n,), jnp.float32),
                0.1 * jax.random.normal(k2, (n,), jnp.float32))

    def block(kw1, kb1, kw2, kb2, w1_shape, w2_shape):
        g1, bt1 = bn(kb1, w1_shape[0])
        g2, bt2 = bn(kb2, w2_shape[0])
        return dict(w1=q(0.4 * jax.random.normal(kw1, w1_shape, jnp.float32)),
                    g1=g1, bt1=bt1,
                    w2=q(0.4 * jax.random.normal(kw2, w2_shape, jnp.float32)),
                    g2=g2, bt2=bt2)

    g3 = C // 4
    return dict(
        b1=block(*ks[0:4], (8 * C, 1, 2, 2), (C, 8, 1, 1)),
        b2=block(*ks[4:8], (8 * C, 1, 2, 2), (C, 8, 1, 1)),
        b3=block(*ks[8:12], (8 * C, C // g3, 1, 1), (C, 8 * C // g3, 1, 1)),
        f=block(*ks[12:16], (32 * C, 4, 1, 1), (4 * out_planes, 32, 1, 1)),
    )


def _conv2d_ref(x, w, groups=1, padding=0):
    return jax.lax.conv_general_dilated(
        x, w, window_strides=(1, 1),
        padding=[(padding, padding), (padding, padding)],
        dimension_numbers=("NCHW", "OIHW", "NCHW"),
        feature_group_count=groups)


def _bn2d_ref(x, gamma, beta):
    mean = jnp.mean(x, axis=(0, 2, 3), keepdims=True)
    var = jnp.mean((x - mean) ** 2, axis=(0, 2, 3), keepdims=True)
    xh = (x - mean) * jax.lax.rsqrt(var + EPS)
    return xh * gamma.reshape(1, -1, 1, 1) + beta.reshape(1, -1, 1, 1)


def _block_tt_ref(x, p, groups, padding, thresh=0.0, last=False):
    h = _conv2d_ref(x, p["w1"], groups=groups, padding=padding)
    h = _gelu_tanh(_bn2d_ref(h, p["g1"], p["bt1"]))
    h = _bn2d_ref(_conv2d_ref(h, p["w2"], groups=groups, padding=0), p["g2"], p["bt2"])
    return jnp.maximum(h, 0.0) if last else (h >= thresh).astype(jnp.float32)


def reference_forward(x, params, in_planes, out_planes, thresh=0.0):
    C = in_planes
    out1 = _block_tt_ref(x, params["b1"], groups=C, padding=1, thresh=thresh)
    out2 = _block_tt_ref(x, params["b2"], groups=C, padding=1, thresh=thresh)
    out3 = _block_tt_ref(x, params["b3"], groups=C // 4, padding=0, thresh=thresh)
    out4 = x
    out3 = jnp.pad(out3, ((0, 0), (0, 0), (0, 1), (0, 1)))
    out4 = jnp.pad(out4, ((0, 0), (0, 0), (0, 1), (0, 1)))
    outf = jnp.concatenate([out1, out2, out3, out4], axis=1)
    n, c, hh, ww = outf.shape
    outf = outf.reshape(n, 4, c // 4, hh, ww).transpose(0, 2, 1, 3, 4).reshape(n, c, hh, ww)
    return _block_tt_ref(outf, params["f"], groups=C, padding=0, thresh=thresh)


if __name__ == "__main__":
    N, C, H, W = 2, 4, 16, 16          # batch=2, in_planes=4, spatial=16
    OUT_PLANES = 4                     # 4*out_planes must be divisible by in_planes

    key = jax.random.PRNGKey(0)
    kx, kp = jax.random.split(key)
    # Round the input to bf16-representable values so the kernel's bf16 operand
    # streaming introduces no rounding relative to the f32 reference.
    x = jax.random.normal(kx, (N, C, H, W), dtype=jnp.float32)
    x = x.astype(jnp.bfloat16).astype(jnp.float32)
    params = init_params(kp, C, OUT_PLANES)
    prep = prepare_params(params, C, OUT_PLANES)

    out = block_forward(x, prep, in_planes=C, out_planes=OUT_PLANES)
    out = jax.block_until_ready(out)

    ref = reference_forward(x, params, C, OUT_PLANES)
    assert out.shape == (N, 4 * OUT_PLANES, H + 1, W + 1), out.shape
    # Outputs are binary (0/1); allow a tiny number of near-threshold bit flips
    # caused by float reassociation (dense-matmul vs grouped-conv reduction order).
    mismatch = float(jnp.mean(jnp.abs(out - ref)))
    assert mismatch < 1e-2, f"mismatch fraction {mismatch} vs JAX reference"

    print("KERNEL_OK")
</pallas_src>

<mosaic_0001>
module attributes {stable_mosaic.version = 11 : i64} {
  func.func @kernel(%arg0: memref<578x16xbf16, #tpu.memory_space<vmem>>, %arg1: memref<578x8xbf16, #tpu.memory_space<vmem>>, %arg2: memref<578x1xf32, #tpu.memory_space<vmem>>, %arg3: memref<16x128xbf16, #tpu.memory_space<vmem>>, %arg4: memref<8x128xbf16, #tpu.memory_space<vmem>>, %arg5: memref<128x128xf32, #tpu.memory_space<vmem>>, %arg6: memref<128x128xbf16, #tpu.memory_space<vmem>>, %arg7: memref<8x128xbf16, #tpu.memory_space<vmem>>, %arg8: memref<128x128xf32, #tpu.memory_space<vmem>>, %arg9: memref<16x128xf32, #tpu.memory_space<vmem>>, %arg10: memref<578x128xf32, #tpu.memory_space<vmem>>) attributes {dimension_semantics = [], scalar_prefetch = 0 : i64, scratch_operands = 0 : i64, tpu.core_type = #tpu.core_type<tc>} {
    %c0 = arith.constant 0 : index
    %c0_0 = arith.constant 0 : index
    %0 = vector.load %arg0[%c0, %c0_0] : memref<578x16xbf16, #tpu.memory_space<vmem>>, vector<578x16xbf16>
    %c0_1 = arith.constant 0 : index
    %c0_2 = arith.constant 0 : index
    %1 = vector.load %arg1[%c0_1, %c0_2] : memref<578x8xbf16, #tpu.memory_space<vmem>>, vector<578x8xbf16>
    %c0_3 = arith.constant 0 : index
    %c0_4 = arith.constant 0 : index
    %2 = vector.load %arg2[%c0_3, %c0_4] : memref<578x1xf32, #tpu.memory_space<vmem>>, vector<578x1xf32>
    %c0_5 = arith.constant 0 : index
    %c0_6 = arith.constant 0 : index
    %3 = vector.load %arg9[%c0_5, %c0_6] : memref<16x128xf32, #tpu.memory_space<vmem>>, vector<16x128xf32>
    %4 = vector.extract_strided_slice %3 {offsets = [0, 0], sizes = [1, 128], strides = [1, 1]} : vector<16x128xf32> to vector<1x128xf32>
    %5 = vector.extract_strided_slice %3 {offsets = [1, 0], sizes = [1, 128], strides = [1, 1]} : vector<16x128xf32> to vector<1x128xf32>
    %6 = vector.extract_strided_slice %3 {offsets = [2, 0], sizes = [1, 128], strides = [1, 1]} : vector<16x128xf32> to vector<1x128xf32>
    %7 = vector.extract_strided_slice %3 {offsets = [3, 0], sizes = [1, 128], strides = [1, 1]} : vector<16x128xf32> to vector<1x128xf32>
    %8 = vector.extract_strided_slice %3 {offsets = [4, 0], sizes = [1, 128], strides = [1, 1]} : vector<16x128xf32> to vector<1x128xf32>
    %9 = vector.extract_strided_slice %3 {offsets = [5, 0], sizes = [1, 128], strides = [1, 1]} : vector<16x128xf32> to vector<1x128xf32>
    %10 = vector.extract_strided_slice %3 {offsets = [6, 0], sizes = [1, 128], strides = [1, 1]} : vector<16x128xf32> to vector<1x128xf32>
    %11 = vector.extract_strided_slice %3 {offsets = [7, 0], sizes = [1, 128], strides = [1, 1]} : vector<16x128xf32> to vector<1x128xf32>
    %12 = vector.extract_strided_slice %3 {offsets = [8, 0], sizes = [1, 128], strides = [1, 1]} : vector<16x128xf32> to vector<1x128xf32>
    %13 = vector.extract_strided_slice %3 {offsets = [9, 0], sizes = [1, 128], strides = [1, 1]} : vector<16x128xf32> to vector<1x128xf32>
    %14 = vector.extract_strided_slice %3 {offsets = [10, 0], sizes = [1, 128], strides = [1, 1]} : vector<16x128xf32> to vector<1x128xf32>
    %15 = vector.extract_strided_slice %3 {offsets = [11, 0], sizes = [1, 128], strides = [1, 1]} : vector<16x128xf32> to vector<1x128xf32>
    %c0_7 = arith.constant 0 : index
    %c0_8 = arith.constant 0 : index
    %16 = vector.load %arg3[%c0_7, %c0_8] : memref<16x128xbf16, #tpu.memory_space<vmem>>, vector<16x128xbf16>
    %cst = arith.constant dense<0.000000e+00> : vector<578x128xf32>
    %17 = tpu.matmul %0, %16, %cst {dimension_numbers = #tpu.dot_dimension_numbers<[1], [0], [0], [1], [0, 0, 1, 1], [], []>} : vector<578x16xbf16>, vector<16x128xbf16>, vector<578x128xf32> -> vector<578x128xf32>
    %c0_9 = arith.constant 0 : index
    %c0_10 = arith.constant 0 : index
    %18 = vector.load %arg4[%c0_9, %c0_10] : memref<8x128xbf16, #tpu.memory_space<vmem>>, vector<8x128xbf16>
    %cst_11 = arith.constant dense<0.000000e+00> : vector<578x128xf32>
    %19 = tpu.matmul %1, %18, %cst_11 {dimension_numbers = #tpu.dot_dimension_numbers<[1], [0], [0], [1], [0, 0, 1, 1], [], []>} : vector<578x8xbf16>, vector<8x128xbf16>, vector<578x128xf32> -> vector<578x128xf32>
    %20 = arith.addf %17, %19 : vector<578x128xf32>
    %cst_12 = arith.constant 2.23021198E-4 : f32
    %21 = vector.broadcast %cst_12 : f32 to vector<1x128xf32>
    %22 = arith.mulf %13, %21 : vector<1x128xf32>
    %cst_13 = arith.constant 0.00173010386 : f32
    %23 = vector.broadcast %cst_13 : f32 to vector<1x128xf32>
    %24 = arith.addf %23, %22 : vector<1x128xf32>
    %cst_14 = arith.constant dense<0.000000e+00> : vector<128xf32>
    %25 = vector.multi_reduction <add>, %20, %cst_14 [0] : vector<578x128xf32> to vector<128xf32>
    %26 = vector.shape_cast %25 : vector<128xf32> to vector<1x128xf32>
    %27 = arith.mulf %26, %24 : vector<1x128xf32>
    %28 = arith.mulf %20, %20 : vector<578x128xf32>
    %cst_15 = arith.constant dense<0.000000e+00> : vector<128xf32>
    %29 = vector.multi_reduction <add>, %28, %cst_15 [0] : vector<578x128xf32> to vector<128xf32>
    %30 = vector.shape_cast %29 : vector<128xf32> to vector<1x128xf32>
    %31 = arith.mulf %30, %24 : vector<1x128xf32>
    %32 = arith.mulf %27, %27 : vector<1x128xf32>
    %33 = arith.subf %31, %32 : vector<1x128xf32>
    %cst_16 = arith.constant 0.000000e+00 : f32
    %34 = vector.broadcast %cst_16 : f32 to vector<1x128xf32>
    %35 = arith.maximumf %33, %34 : vector<1x128xf32>
    %cst_17 = arith.constant 9.99999974E-6 : f32
    %36 = vector.broadcast %cst_17 : f32 to vector<1x128xf32>
    %37 = arith.addf %35, %36 : vector<1x128xf32>
    %38 = math.rsqrt %37 : vector<1x128xf32>
    %39 = arith.mulf %4, %38 : vector<1x128xf32>
    %40 = vector.broadcast %39 : vector<1x128xf32> to vector<578x128xf32>
    %41 = arith.mulf %20, %40 : vector<578x128xf32>
    %42 = arith.mulf %27, %39 : vector<1x128xf32>
    %43 = arith.subf %5, %42 : vector<1x128xf32>
    %44 = vector.broadcast %43 : vector<1x128xf32> to vector<578x128xf32>
    %45 = arith.addf %41, %44 : vector<578x128xf32>
    %cst_18 = arith.constant 5.000000e-01 : f32
    %46 = vector.broadcast %cst_18 : f32 to vector<578x128xf32>
    %47 = arith.mulf %46, %45 : vector<578x128xf32>
    %cst_19 = arith.constant 4.471500e-02 : f32
    %48 = vector.broadcast %cst_19 : f32 to vector<578x128xf32>
    %49 = arith.mulf %48, %45 : vector<578x128xf32>
    %50 = arith.mulf %49, %45 : vector<578x128xf32>
    %51 = arith.mulf %50, %45 : vector<578x128xf32>
    %52 = arith.addf %45, %51 : vector<578x128xf32>
    %cst_20 = arith.constant 0.797884583 : f32
    %53 = vector.broadcast %cst_20 : f32 to vector<578x128xf32>
    %54 = arith.mulf %53, %52 : vector<578x128xf32>
    %55 = math.tanh %54 : vector<578x128xf32>
    %cst_21 = arith.constant 1.000000e+00 : f32
    %56 = vector.broadcast %cst_21 : f32 to vector<578x128xf32>
    %57 = arith.addf %56, %55 : vector<578x128xf32>
    %58 = arith.mulf %47, %57 : vector<578x128xf32>
    %59 = vector.broadcast %2 : vector<578x1xf32> to vector<578x128xf32>
    %60 = vector.broadcast %13 : vector<1x128xf32> to vector<578x128xf32>
    %61 = arith.mulf %59, %60 : vector<578x128xf32>
    %62 = vector.broadcast %12 : vector<1x128xf32> to vector<578x128xf32>
    %63 = arith.addf %62, %61 : vector<578x128xf32>
    %64 = arith.mulf %58, %63 : vector<578x128xf32>
    %c0_22 = arith.constant 0 : index
    %c0_23 = arith.constant 0 : index
    %65 = vector.load %arg5[%c0_22, %c0_23] : memref<128x128xf32, #tpu.memory_space<vmem>>, vector<128x128xf32>
    %cst_24 = arith.constant dense<0.000000e+00> : vector<578x128xf32>
    %66 = tpu.matmul %64, %65, %cst_24 {dimension_numbers = #tpu.dot_dimension_numbers<[1], [0], [0], [1], [0, 0, 1, 1], [], []>} : vector<578x128xf32>, vector<128x128xf32>, vector<578x128xf32> -> vector<578x128xf32>
    %cst_25 = arith.constant 2.23021198E-4 : f32
    %67 = vector.broadcast %cst_25 : f32 to vector<1x128xf32>
    %68 = arith.mulf %15, %67 : vector<1x128xf32>
    %cst_26 = arith.constant 0.00173010386 : f32
    %69 = vector.broadcast %cst_26 : f32 to vector<1x128xf32>
    %70 = arith.addf %69, %68 : vector<1x128xf32>
    %cst_27 = arith.constant dense<0.000000e+00> : vector<128xf32>
    %71 = vector.multi_reduction <add>, %66, %cst_27 [0] : vector<578x128xf32> to vector<128xf32>
    %72 = vector.shape_cast %71 : vector<128xf32> to vector<1x128xf32>
    %73 = arith.mulf %72, %70 : vector<1x128xf32>
    %74 = arith.mulf %66, %66 : vector<578x128xf32>
    %cst_28 = arith.constant dense<0.000000e+00> : vector<128xf32>
    %75 = vector.multi_reduction <add>, %74, %cst_28 [0] : vector<578x128xf32> to vector<128xf32>
    %76 = vector.shape_cast %75 : vector<128xf32> to vector<1x128xf32>
    %77 = arith.mulf %76, %70 : vector<1x128xf32>
    %78 = arith.mulf %73, %73 : vector<1x128xf32>
    %79 = arith.subf %77, %78 : vector<1x128xf32>
    %cst_29 = arith.constant 0.000000e+00 : f32
    %80 = vector.broadcast %cst_29 : f32 to vector<1x128xf32>
    %81 = arith.maximumf %79, %80 : vector<1x128xf32>
    %cst_30 = arith.constant 9.99999974E-6 : f32
    %82 = vector.broadcast %cst_30 : f32 to vector<1x128xf32>
    %83 = arith.addf %81, %82 : vector<1x128xf32>
    %84 = math.rsqrt %83 : vector<1x128xf32>
    %85 = arith.mulf %6, %84 : vector<1x128xf32>
    %86 = vector.broadcast %85 : vector<1x128xf32> to vector<578x128xf32>
    %87 = arith.mulf %66, %86 : vector<578x128xf32>
    %88 = arith.mulf %73, %85 : vector<1x128xf32>
    %89 = arith.subf %7, %88 : vector<1x128xf32>
    %90 = vector.broadcast %89 : vector<1x128xf32> to vector<578x128xf32>
    %91 = arith.addf %87, %90 : vector<578x128xf32>
    %cst_31 = arith.constant 0.000000e+00 : f32
    %92 = vector.broadcast %cst_31 : f32 to vector<578x128xf32>
    %93 = arith.cmpf oge, %91, %92 : vector<578x128xf32>
    %94 = arith.extui %93 : vector<578x128xi1> to vector<578x128xi32>
    %95 = arith.sitofp %94 : vector<578x128xi32> to vector<578x128xf32>
    %96 = vector.broadcast %2 : vector<578x1xf32> to vector<578x128xf32>
    %97 = vector.broadcast %15 : vector<1x128xf32> to vector<578x128xf32>
    %98 = arith.mulf %96, %97 : vector<578x128xf32>
    %99 = vector.broadcast %14 : vector<1x128xf32> to vector<578x128xf32>
    %100 = arith.addf %99, %98 : vector<578x128xf32>
    %101 = arith.mulf %95, %100 : vector<578x128xf32>
    %102 = arith.truncf %101 : vector<578x128xf32> to vector<578x128xbf16>
    %c0_32 = arith.constant 0 : index
    %c0_33 = arith.constant 0 : index
    %103 = vector.load %arg6[%c0_32, %c0_33] : memref<128x128xbf16, #tpu.memory_space<vmem>>, vector<128x128xbf16>
    %cst_34 = arith.constant dense<0.000000e+00> : vector<578x128xf32>
    %104 = tpu.matmul %102, %103, %cst_34 {dimension_numbers = #tpu.dot_dimension_numbers<[1], [0], [0], [1], [0, 0, 1, 1], [], []>} : vector<578x128xbf16>, vector<128x128xbf16>, vector<578x128xf32> -> vector<578x128xf32>
    %c0_35 = arith.constant 0 : index
    %c0_36 = arith.constant 0 : index
    %105 = vector.load %arg7[%c0_35, %c0_36] : memref<8x128xbf16, #tpu.memory_space<vmem>>, vector<8x128xbf16>
    %cst_37 = arith.constant dense<0.000000e+00> : vector<578x128xf32>
    %106 = tpu.matmul %1, %105, %cst_37 {dimension_numbers = #tpu.dot_dimension_numbers<[1], [0], [0], [1], [0, 0, 1, 1], [], []>} : vector<578x8xbf16>, vector<8x128xbf16>, vector<578x128xf32> -> vector<578x128xf32>
    %107 = arith.addf %104, %106 : vector<578x128xf32>
    %cst_38 = arith.constant dense<0.000000e+00> : vector<128xf32>
    %108 = vector.multi_reduction <add>, %107, %cst_38 [0] : vector<578x128xf32> to vector<128xf32>
    %109 = vector.shape_cast %108 : vector<128xf32> to vector<1x128xf32>
    %cst_39 = arith.constant 0.00173010386 : f32
    %110 = vector.broadcast %cst_39 : f32 to vector<1x128xf32>
    %111 = arith.mulf %109, %110 : vector<1x128xf32>
    %112 = arith.mulf %107, %107 : vector<578x128xf32>
    %cst_40 = arith.constant dense<0.000000e+00> : vector<128xf32>
    %113 = vector.multi_reduction <add>, %112, %cst_40 [0] : vector<578x128xf32> to vector<128xf32>
    %114 = vector.shape_cast %113 : vector<128xf32> to vector<1x128xf32>
    %cst_41 = arith.constant 0.00173010386 : f32
    %115 = vector.broadcast %cst_41 : f32 to vector<1x128xf32>
    %116 = arith.mulf %114, %115 : vector<1x128xf32>
    %117 = arith.mulf %111, %111 : vector<1x128xf32>
    %118 = arith.subf %116, %117 : vector<1x128xf32>
    %cst_42 = arith.constant 0.000000e+00 : f32
    %119 = vector.broadcast %cst_42 : f32 to vector<1x128xf32>
    %120 = arith.maximumf %118, %119 : vector<1x128xf32>
    %cst_43 = arith.constant 9.99999974E-6 : f32
    %121 = vector.broadcast %cst_43 : f32 to vector<1x128xf32>
    %122 = arith.addf %120, %121 : vector<1x128xf32>
    %123 = math.rsqrt %122 : vector<1x128xf32>
    %124 = arith.mulf %8, %123 : vector<1x128xf32>
    %125 = vector.broadcast %124 : vector<1x128xf32> to vector<578x128xf32>
    %126 = arith.mulf %107, %125 : vector<578x128xf32>
    %127 = arith.mulf %111, %124 : vector<1x128xf32>
    %128 = arith.subf %9, %127 : vector<1x128xf32>
    %129 = vector.broadcast %128 : vector<1x128xf32> to vector<578x128xf32>
    %130 = arith.addf %126, %129 : vector<578x128xf32>
    %cst_44 = arith.constant 5.000000e-01 : f32
    %131 = vector.broadcast %cst_44 : f32 to vector<578x128xf32>
    %132 = arith.mulf %131, %130 : vector<578x128xf32>
    %cst_45 = arith.constant 4.471500e-02 : f32
    %133 = vector.broadcast %cst_45 : f32 to vector<578x128xf32>
    %134 = arith.mulf %133, %130 : vector<578x128xf32>
    %135 = arith.mulf %134, %130 : vector<578x128xf32>
    %136 = arith.mulf %135, %130 : vector<578x128xf32>
    %137 = arith.addf %130, %136 : vector<578x128xf32>
    %cst_46 = arith.constant 0.797884583 : f32
    %138 = vector.broadcast %cst_46 : f32 to vector<578x128xf32>
    %139 = arith.mulf %138, %137 : vector<578x128xf32>
    %140 = math.tanh %139 : vector<578x128xf32>
    %cst_47 = arith.constant 1.000000e+00 : f32
    %141 = vector.broadcast %cst_47 : f32 to vector<578x128xf32>
    %142 = arith.addf %141, %140 : vector<578x128xf32>
    %143 = arith.mulf %132, %142 : vector<578x128xf32>
    %c0_48 = arith.constant 0 : index
    %c0_49 = arith.constant 0 : index
    %144 = vector.load %arg8[%c0_48, %c0_49] : memref<128x128xf32, #tpu.memory_space<vmem>>, vector<128x128xf32>
    %cst_50 = arith.constant dense<0.000000e+00> : vector<578x128xf32>
    %145 = tpu.matmul %143, %144, %cst_50 {dimension_numbers = #tpu.dot_dimension_numbers<[1], [0], [0], [1], [0, 0, 1, 1], [], []>} : vector<578x128xf32>, vector<128x128xf32>, vector<578x128xf32> -> vector<578x128xf32>
    %cst_51 = arith.constant dense<0.000000e+00> : vector<128xf32>
    %146 = vector.multi_reduction <add>, %145, %cst_51 [0] : vector<578x128xf32> to vector<128xf32>
    %147 = vector.shape_cast %146 : vector<128xf32> to vector<1x128xf32>
    %cst_52 = arith.constant 0.00173010386 : f32
    %148 = vector.broadcast %cst_52 : f32 to vector<1x128xf32>
    %149 = arith.mulf %147, %148 : vector<1x128xf32>
    %150 = arith.mulf %145, %145 : vector<578x128xf32>
    %cst_53 = arith.constant dense<0.000000e+00> : vector<128xf32>
    %151 = vector.multi_reduction <add>, %150, %cst_53 [0] : vector<578x128xf32> to vector<128xf32>
    %152 = vector.shape_cast %151 : vector<128xf32> to vector<1x128xf32>
    %cst_54 = arith.constant 0.00173010386 : f32
    %153 = vector.broadcast %cst_54 : f32 to vector<1x128xf32>
    %154 = arith.mulf %152, %153 : vector<1x128xf32>
    %155 = arith.mulf %149, %149 : vector<1x128xf32>
    %156 = arith.subf %154, %155 : vector<1x128xf32>
    %cst_55 = arith.constant 0.000000e+00 : f32
    %157 = vector.broadcast %cst_55 : f32 to vector<1x128xf32>
    %158 = arith.maximumf %156, %157 : vector<1x128xf32>
    %cst_56 = arith.constant 9.99999974E-6 : f32
    %159 = vector.broadcast %cst_56 : f32 to vector<1x128xf32>
    %160 = arith.addf %158, %159 : vector<1x128xf32>
    %161 = math.rsqrt %160 : vector<1x128xf32>
    %162 = arith.mulf %10, %161 : vector<1x128xf32>
    %163 = vector.broadcast %162 : vector<1x128xf32> to vector<578x128xf32>
    %164 = arith.mulf %145, %163 : vector<578x128xf32>
    %165 = arith.mulf %149, %162 : vector<1x128xf32>
    %166 = arith.subf %11, %165 : vector<1x128xf32>
    %167 = vector.broadcast %166 : vector<1x128xf32> to vector<578x128xf32>
    %168 = arith.addf %164, %167 : vector<578x128xf32>
    %cst_57 = arith.constant 0.000000e+00 : f32
    %169 = vector.broadcast %cst_57 : f32 to vector<578x128xf32>
    %170 = arith.cmpf oge, %168, %169 : vector<578x128xf32>
    %171 = arith.extui %170 : vector<578x128xi1> to vector<578x128xi32>
    %172 = arith.sitofp %171 : vector<578x128xi32> to vector<578x128xf32>
    %c0_58 = arith.constant 0 : index
    %c0_59 = arith.constant 0 : index
    %173 = vector.load %arg10[%c0_58, %c0_59] : memref<578x128xf32, #tpu.memory_space<vmem>>, vector<578x128xf32>
    tpu.vector_store %arg10[%c0_58, %c0_59], %172 {strides = array<i32>} : memref<578x128xf32, #tpu.memory_space<vmem>>, vector<578x128xf32>,
    return
  }
}

</mosaic_0001>

<bundles_post_ra>
// kernel: block_forward.1
= control target key start
LH: loop header
LB: loop body
LE: loop exit
PB: predicated region body
PF: predicated region fallthrough
CT: control target
= control target key end

     0   :  { %vm555_vm0 = vcmask 1043456   ;;  %v17547_v0 = vmov 0.0   ;;  %vm17735_vm1 = vmmov 0   ;;  %vm443_vm2 = vcmask 64512   ;;  %s17536_s4 = inlined_call_operand.vmem [shape: bf16[8,128], index: 4, kind: input, shape index: {}]   ;;  %s17537_s1 = inlined_call_operand.vmem [shape: bf16[578,8], index: 1, kind: input, shape index: {}]   ;;  %s17538_s3 = inlined_call_operand.vmem [shape: bf16[16,128], index: 3, kind: input, shape index: {}]   ;;  %s17539_s0 = inlined_call_operand.vmem [shape: bf16[578,16], index: 0, kind: input, shape index: {}]   ;;  %s17540_s2 = inlined_call_operand.vmem [shape: f32[578,1], index: 2, kind: input, shape index: {}]   ;;  %s17541_s5 = inlined_call_operand.vmem [shape: f32[128,128], index: 5, kind: input, shape index: {}]   ;;  %s17542_s9 = inlined_call_operand.vmem [shape: f32[16,128], index: 9, kind: input, shape index: {}]   ;;  %s17543_s7 = inlined_call_operand.vmem [shape: bf16[8,128], index: 7, kind: input, shape index: {}]   ;;  %s17544_s6 = inlined_call_operand.vmem [shape: bf16[128,128], index: 6, kind: input, shape index: {}]   ;;  %s17545_s8 = inlined_call_operand.vmem [shape: f32[128,128], index: 8, kind: input, shape index: {}]   ;;  %s17546_s10 = inlined_call_operand.vmem [shape: f32[578,128], index: 10, kind: output, shape index: {}]  }
   0x1   :  { %8095 = vmatprep.subr.bf16.mxu0 %v17547_v0  ;;  %v259_v1 = vld [vmem:[%s17536_s4] sm:$0xf]  ;;  %8097 = vmatprep.mubr.msk.bf16.mxu0 %vm17735_vm1, %v17547_v0  ;;  %v9563_v5 = vld [vmem:[%s17537_s1 + $0x8] sm:$0xff]   ;;  %v9564_v6 = vld [vmem:[%s17537_s1 + $0x10] sm:$0xff]   ;;  %vm1076_vm3 = vcmask 130048   ;;  %v9987_v63 = vmov 0  }
   0x2   :  { %v557_v2 = vsel %vm555_vm0, %v259_v1, 0  ;;  %v9561_v3 = vld [vmem:[%s17537_s1] sm:$0xff]   ;;  %8427 = vmatprep.mubr.msk.f32.mxu1 %vm17735_vm1, %v17547_v0  ;;  %v9565_v7 = vld [vmem:[%s17537_s1 + $0x18] sm:$0xff]   ;;  %v9567_v9 = vld [vmem:[%s17537_s1 + $0x28] sm:$0xff]   ;;  %9559 = vset.pattern.permute.xlu0 %v9987_v63  ;;  %vm17734_vm4 = vcmask 1041408  }
   0x3   :  { %v9562_v4 = vld [vmem:[%s17538_s3] sm:$0xff]   ;;  %8096 = vmatpush3.bf16.msra.mxu0 %v557_v2  ;;  %v9568_v10 = vld [vmem:[%s17537_s1 + $0x30] sm:$0xff]   ;;  %v9569_v11 = vld [vmem:[%s17537_s1 + $0x38] sm:$0xff]   ;;  %9560 = vset.pattern.permute.xlu1 %v9987_v63 }
   0x4   :  { %8245 = vmatprep.subr.bf16.mxu0 %v17547_v0  ;;  %v9566_v8 = vld [vmem:[%s17537_s1 + $0x20] sm:$0xff]   ;;  %v9571_v13 = vld [vmem:[%s17537_s1 + $0x48] sm:$0xff]   ;;  %v9572_v14 = vld [vmem:[%s17537_s1 + $0x50] sm:$0xff]  }
   0x5   :  { %v9570_v12 = vld [vmem:[%s17537_s1 + $0x40] sm:$0xff]   ;;  %v9573_v15 = vld [vmem:[%s17537_s1 + $0x58] sm:$0xff]   ;;  %v9575_v17 = vld [vmem:[%s17537_s1 + $0x68] sm:$0xff]  }
   0x6   :  { %8098 = vmatmul.mubr.msk.bf16.vlgmr.msra.gmra.mrb[0].mxu0 %vm443_vm2, %v9561_v3  ;;  %v9574_v16 = vld [vmem:[%s17537_s1 + $0x60] sm:$0xff]   ;;  %v9576_v18 = vld [vmem:[%s17537_s1 + $0x70] sm:$0xff]   ;;  %v9577_v19 = vld [vmem:[%s17537_s1 + $0x78] sm:$0xff]  }
   0x7   :  { %8246 = vmatpush3.bf16.msra.mxu0 %v9562_v4  ;;  %8101 = vmatprep.mubr.msk.bf16.mxu0 %vm17735_vm1, %v17547_v0  ;;  %v9578_v20 = vld [vmem:[%s17537_s1 + $0x80] sm:$0xff]   ;;  %v9579_v21 = vld [vmem:[%s17537_s1 + $0x88] sm:$0xff]   ;;  %v9580_v22 = vld [vmem:[%s17537_s1 + $0x90] sm:$0xff]  }
   0x8   :  { %v9581_v23 = vld [vmem:[%s17537_s1 + $0x98] sm:$0xff]   ;;  %v9582_v24 = vld [vmem:[%s17537_s1 + $0xa0] sm:$0xff]   ;;  %v9583_v25 = vld [vmem:[%s17537_s1 + $0xa8] sm:$0xff]  }
   0x9   :  { %v9584_v26 = vld [vmem:[%s17537_s1 + $0xb0] sm:$0xff]   ;;  %v9585_v27 = vld [vmem:[%s17537_s1 + $0xb8] sm:$0xff]   ;;  %v9586_v28 = vld [vmem:[%s17537_s1 + $0xc0] sm:$0xff]  }
   0xa   :  { %v9587_v29 = vld [vmem:[%s17537_s1 + $0xc8] sm:$0xff]   ;;  %v9588_v30 = vld [vmem:[%s17537_s1 + $0xd0] sm:$0xff]   ;;  %v9589_v31 = vld [vmem:[%s17537_s1 + $0xd8] sm:$0xff]  }
   0xb   :  { %v9590_v32 = vld [vmem:[%s17537_s1 + $0xe0] sm:$0xff]   ;;  %v9591_v33 = vld [vmem:[%s17537_s1 + $0xe8] sm:$0xff]   ;;  %v9592_v34 = vld [vmem:[%s17537_s1 + $0xf0] sm:$0xff]  }
   0xc   :  { %v9593_v35 = vld [vmem:[%s17537_s1 + $0xf8] sm:$0xff]   ;;  %v9594_v36 = vld [vmem:[%s17537_s1 + $0x100] sm:$0xff]   ;;  %v9595_v37 = vld [vmem:[%s17537_s1 + $0x108] sm:$0xff]  }
   0xd   :  { %v9596_v38 = vld [vmem:[%s17537_s1 + $0x110] sm:$0xff]   ;;  %v9597_v39 = vld [vmem:[%s17537_s1 + $0x118] sm:$0xff]   ;;  %v9598_v40 = vld [vmem:[%s17537_s1 + $0x120] ss:$0 sps:$4 sm:$0x11]  }
   0xe   :  { %8102 = vmatmul.mubr.msk.bf16.gmra.mrb[4].mxu0 %vm443_vm2, %v9563_v5  ;;  %v9599_v41 = vld [vmem:[%s17539_s0] sm:$0xff]   ;;  %v9600_v42 = vld [vmem:[%s17539_s0 + $0x8] sm:$0xff]   ;;  %v9601_v43 = vld [vmem:[%s17539_s0 + $0x10] sm:$0xff]  }
   0xf   :  { %8105 = vmatprep.mubr.msk.bf16.mxu0 %vm17735_vm1, %v17547_v0  ;;  %v9602_v44 = vld [vmem:[%s17539_s0 + $0x18] sm:$0xff]   ;;  %v9603_v45 = vld [vmem:[%s17539_s0 + $0x20] sm:$0xff]   ;;  %v9604_v46 = vld [vmem:[%s17539_s0 + $0x28] sm:$0xff]  }
  0x10   :  { %v9605_v47 = vld [vmem:[%s17539_s0 + $0x30] sm:$0xff]   ;;  %v9606_v48 = vld [vmem:[%s17539_s0 + $0x38] sm:$0xff]   ;;  %v9607_v49 = vld [vmem:[%s17539_s0 + $0x40] sm:$0xff]  }
  0x11   :  { %v9608_v50 = vld [vmem:[%s17539_s0 + $0x48] sm:$0xff]   ;;  %v9609_v51 = vld [vmem:[%s17539_s0 + $0x50] sm:$0xff]   ;;  %v9610_v52 = vld [vmem:[%s17539_s0 + $0x58] sm:$0xff]  }
  0x12   :  { %v9611_v53 = vld [vmem:[%s17539_s0 + $0x60] sm:$0xff]   ;;  %v9612_v54 = vld [vmem:[%s17539_s0 + $0x68] sm:$0xff]   ;;  %v9613_v55 = vld [vmem:[%s17539_s0 + $0x70] sm:$0xff]  }
  0x13   :  { %v9614_v56 = vld [vmem:[%s17539_s0 + $0x78] sm:$0xff]   ;;  %v9615_v57 = vld [vmem:[%s17539_s0 + $0x80] sm:$0xff]   ;;  %v9616_v58 = vld [vmem:[%s17539_s0 + $0x88] sm:$0xff]  }
  0x14   :  { %v9617_v59 = vld [vmem:[%s17539_s0 + $0x90] sm:$0xff]   ;;  %v9618_v60 = vld [vmem:[%s17539_s0 + $0x98] sm:$0xff]   ;;  %v9619_v61 = vld [vmem:[%s17539_s0 + $0xa0] sm:$0xff]  }
  0x15   :  { %v9620_v62 = vld [vmem:[%s17539_s0 + $0xa8] sm:$0xff]   ;;  %v182_v1 = vld [vmem:[%s17540_s2] sm:$0xff]  ;;  %v9621_v2 = vld [vmem:[%s17539_s0 + $0xb0] sm:$0xff]  }
  0x16   :  { %8106 = vmatmul.mubr.msk.bf16.gmra.mrb[8].mxu0 %vm443_vm2, %v9564_v6  ;;  %2579 = vperm.xlu0 %9559, %v182_v1   ;;  %v184_v3 = vld [vmem:[%s17540_s2 + $0x10] sm:$0xff]  ;;  %v183_v4 = vld [vmem:[%s17540_s2 + $0x8] sm:$0xff]  ;;  %v185_v5 = vld [vmem:[%s17540_s2 + $0x18] sm:$0xff] }
  0x17   :  { %8109 = vmatprep.mubr.msk.bf16.mxu0 %vm17735_vm1, %v17547_v0  ;;  %2589 = vperm.xlu1 %9560, %v184_v3   ;;  %v186_v6 = vld [vmem:[%s17540_s2 + $0x20] sm:$0xff]  ;;  %v212_v3 = vld [vmem:[%s17540_s2 + $0xf0] sm:$0xff] }
  0x1a   :  { %2584 = vperm.xlu0 %9559, %v183_v4  }
  0x1b   :  { %2594 = vperm.xlu1 %9560, %v185_v5   ;;  %v213_v5 = vld [vmem:[%s17540_s2 + $0xf8] sm:$0xff] }
  0x1e   :  { %8110 = vmatmul.mubr.msk.bf16.gmra.mrb[12].mxu0 %vm443_vm2, %v9565_v7  ;;  %2599 = vperm.xlu0 %9559, %v186_v6   ;;  %v9622_v7 = vld [vmem:[%s17539_s0 + $0xb8] sm:$0xff]   ;;  %v214_v6 = vld [vmem:[%s17540_s2 + $0x100] sm:$0xff] }
  0x1f   :  { %8113 = vmatprep.mubr.msk.bf16.mxu0 %vm17735_vm1, %v17547_v0 }
  0x26   :  { %8114 = vmatmul.mubr.msk.bf16.gmra.mrb[16].mxu0 %vm443_vm2, %v9566_v8  ;;  %v187_v8 = vld [vmem:[%s17540_s2 + $0x28] sm:$0xff] }
  0x27   :  { %8117 = vmatprep.mubr.msk.bf16.mxu0 %vm17735_vm1, %v17547_v0  ;;  %2604 = vperm.xlu1 %9560, %v187_v8  }
  0x2e   :  { %8118 = vmatmul.mubr.msk.bf16.gmra.mrb[20].mxu0 %vm443_vm2, %v9567_v9  ;;  %v188_v9 = vld [vmem:[%s17540_s2 + $0x30] sm:$0xff] }
  0x2f   :  { %8121 = vmatprep.mubr.msk.bf16.mxu0 %vm17735_vm1, %v17547_v0  ;;  %2609 = vperm.xlu0 %9559, %v188_v9  }
  0x36   :  { %8122 = vmatmul.mubr.msk.bf16.gmra.mrb[24].mxu0 %vm443_vm2, %v9568_v10  ;;  %v189_v10 = vld [vmem:[%s17540_s2 + $0x38] sm:$0xff] }
  0x37   :  { %8125 = vmatprep.mubr.msk.bf16.mxu0 %vm17735_vm1, %v17547_v0  ;;  %2614 = vperm.xlu1 %9560, %v189_v10  }
  0x3e   :  { %8126 = vmatmul.mubr.msk.bf16.gmra.mrb[28].mxu0 %vm443_vm2, %v9569_v11  ;;  %v190_v11 = vld [vmem:[%s17540_s2 + $0x40] sm:$0xff] }
  0x3f   :  { %8129 = vmatprep.mubr.msk.bf16.mxu0 %vm17735_vm1, %v17547_v0  ;;  %2619 = vperm.xlu0 %9559, %v190_v11   ;;  %v9629_v11 = vld [vmem:[%s17539_s0 + $0xf0] sm:$0xff]  }
  0x46   :  { %8130 = vmatmul.mubr.msk.bf16.gmra.mrb[32].mxu0 %vm443_vm2, %v9570_v12  ;;  %v9623_v12 = vld [vmem:[%s17539_s0 + $0xc0] sm:$0xff]  }
  0x47   :  { %8133 = vmatprep.mubr.msk.bf16.mxu0 %vm17735_vm1, %v17547_v0 }
  0x4e   :  { %8134 = vmatmul.mubr.msk.bf16.gmra.mrb[36].mxu0 %vm443_vm2, %v9571_v13  ;;  %v191_v13 = vld [vmem:[%s17540_s2 + $0x48] sm:$0xff] }
  0x4f   :  { %8137 = vmatprep.mubr.msk.bf16.mxu0 %vm17735_vm1, %v17547_v0  ;;  %2624 = vperm.xlu1 %9560, %v191_v13  }
  0x56   :  { %8138 = vmatmul.mubr.msk.bf16.gmra.mrb[40].mxu0 %vm443_vm2, %v9572_v14  ;;  %v192_v14 = vld [vmem:[%s17540_s2 + $0x50] sm:$0xff] }
  0x57   :  { %8141 = vmatprep.mubr.msk.bf16.mxu0 %vm17735_vm1, %v17547_v0  ;;  %2629 = vperm.xlu0 %9559, %v192_v14  }
  0x5e   :  { %8142 = vmatmul.mubr.msk.bf16.gmra.mrb[44].mxu0 %vm443_vm2, %v9573_v15  ;;  %v193_v15 = vld [vmem:[%s17540_s2 + $0x58] sm:$0xff] }
  0x5f   :  { %8145 = vmatprep.mubr.msk.bf16.mxu0 %vm17735_vm1, %v17547_v0  ;;  %2634 = vperm.xlu1 %9560, %v193_v15  }
  0x66   :  { %8146 = vmatmul.mubr.msk.bf16.gmra.mrb[48].mxu0 %vm443_vm2, %v9574_v16  ;;  %v194_v16 = vld [vmem:[%s17540_s2 + $0x60] sm:$0xff] }
  0x67   :  { %8149 = vmatprep.mubr.msk.bf16.mxu0 %vm17735_vm1, %v17547_v0  ;;  %2639 = vperm.xlu0 %9559, %v194_v16  }
  0x6e   :  { %8150 = vmatmul.mubr.msk.bf16.gmra.mrb[52].mxu0 %vm443_vm2, %v9575_v17  ;;  %v9624_v17 = vld [vmem:[%s17539_s0 + $0xc8] sm:$0xff]  }
  0x6f   :  { %8153 = vmatprep.mubr.msk.bf16.mxu0 %vm17735_vm1, %v17547_v0 }
  0x76   :  { %8154 = vmatmul.mubr.msk.bf16.gmra.mrb[56].mxu0 %vm443_vm2, %v9576_v18  ;;  %v195_v18 = vld [vmem:[%s17540_s2 + $0x68] sm:$0xff] }
  0x77   :  { %8157 = vmatprep.mubr.msk.bf16.mxu0 %vm17735_vm1, %v17547_v0  ;;  %2644 = vperm.xlu1 %9560, %v195_v18   ;;  %v216_v18 = vld [vmem:[%s17540_s2 + $0x110] sm:$0xff] }
  0x7e   :  { %8158 = vmatmul.mubr.msk.bf16.gmra.mrb[60].mxu0 %vm443_vm2, %v9577_v19  ;;  %v196_v19 = vld [vmem:[%s17540_s2 + $0x70] sm:$0xff] }
  0x7f   :  { %8161 = vmatprep.mubr.msk.bf16.mxu0 %vm17735_vm1, %v17547_v0  ;;  %2649 = vperm.xlu0 %9559, %v196_v19  }
  0x86   :  { %8162 = vmatmul.mubr.msk.bf16.gmra.mrb[64].mxu0 %vm443_vm2, %v9578_v20  ;;  %v197_v20 = vld [vmem:[%s17540_s2 + $0x78] sm:$0xff] }
  0x87   :  { %8165 = vmatprep.mubr.msk.bf16.mxu0 %vm17735_vm1, %v17547_v0  ;;  %2654 = vperm.xlu1 %9560, %v197_v20   ;;  %v217_v20 = vld [vmem:[%s17540_s2 + $0x118] sm:$0xff] }
  0x8e   :  { %8166 = vmatmul.mubr.msk.bf16.gmra.mrb[68].mxu0 %vm443_vm2, %v9579_v21  ;;  %v198_v21 = vld [vmem:[%s17540_s2 + $0x80] sm:$0xff] }
  0x8f   :  { %8169 = vmatprep.mubr.msk.bf16.mxu0 %vm17735_vm1, %v17547_v0  ;;  %2659 = vperm.xlu0 %9559, %v198_v21   ;;  %v218_v21 = vld [vmem:[%s17540_s2 + $0x120] sm:$0xff] }
  0x96   :  { %8170 = vmatmul.mubr.msk.bf16.gmra.mrb[72].mxu0 %vm443_vm2, %v9580_v22  ;;  %v9625_v22 = vld [vmem:[%s17539_s0 + $0xd0] sm:$0xff]  }
  0x97   :  { %8173 = vmatprep.mubr.msk.bf16.mxu0 %vm17735_vm1, %v17547_v0 }
  0x9e   :  { %8174 = vmatmul.mubr.msk.bf16.gmra.mrb[76].mxu0 %vm443_vm2, %v9581_v23  ;;  %v199_v23 = vld [vmem:[%s17540_s2 + $0x88] sm:$0xff] }
  0x9f   :  { %8177 = vmatprep.mubr.msk.bf16.mxu0 %vm17735_vm1, %v17547_v0  ;;  %2664 = vperm.xlu1 %9560, %v199_v23  }
  0xa6   :  { %8178 = vmatmul.mubr.msk.bf16.gmra.mrb[80].mxu0 %vm443_vm2, %v9582_v24  ;;  %v200_v24 = vld [vmem:[%s17540_s2 + $0x90] sm:$0xff] }
  0xa7   :  { %8181 = vmatprep.mubr.msk.bf16.mxu0 %vm17735_vm1, %v17547_v0  ;;  %2669 = vperm.xlu0 %9559, %v200_v24  }
  0xae   :  { %8182 = vmatmul.mubr.msk.bf16.gmra.mrb[84].mxu0 %vm443_vm2, %v9583_v25  ;;  %v201_v25 = vld [vmem:[%s17540_s2 + $0x98] sm:$0xff] }
  0xaf   :  { %8185 = vmatprep.mubr.msk.bf16.mxu0 %vm17735_vm1, %v17547_v0  ;;  %2674 = vperm.xlu1 %9560, %v201_v25  }
  0xb6   :  { %8186 = vmatmul.mubr.msk.bf16.gmra.mrb[88].mxu0 %vm443_vm2, %v9584_v26  ;;  %v202_v26 = vld [vmem:[%s17540_s2 + $0xa0] sm:$0xff] }
  0xb7   :  { %8189 = vmatprep.mubr.msk.bf16.mxu0 %vm17735_vm1, %v17547_v0  ;;  %2679 = vperm.xlu0 %9559, %v202_v26   ;;  %v9630_v26 = vld [vmem:[%s17539_s0 + $0xf8] sm:$0xff]  }
  0xbe   :  { %8190 = vmatmul.mubr.msk.bf16.gmra.mrb[92].mxu0 %vm443_vm2, %v9585_v27 }
  0xbf   :  { %8193 = vmatprep.mubr.msk.bf16.mxu0 %vm17735_vm1, %v17547_v0 }
  0xc6   :  { %8194 = vmatmul.mubr.msk.bf16.gmra.mrb[96].mxu0 %vm443_vm2, %v9586_v28 }
  0xc7   :  { %8197 = vmatprep.mubr.msk.bf16.mxu0 %vm17735_vm1, %v17547_v0 }
  0xce   :  { %8198 = vmatmul.mubr.msk.bf16.gmra.mrb[100].mxu0 %vm443_vm2, %v9587_v29  ;;  %v9626_v29 = vld [vmem:[%s17539_s0 + $0xd8] sm:$0xff]  }
  0xcf   :  { %8201 = vmatprep.mubr.msk.bf16.mxu0 %vm17735_vm1, %v17547_v0 }
  0xd6   :  { %8202 = vmatmul.mubr.msk.bf16.gmra.mrb[104].mxu0 %vm443_vm2, %v9588_v30 }
  0xd7   :  { %8205 = vmatprep.mubr.msk.bf16.mxu0 %vm17735_vm1, %v17547_v0 }
  0xde   :  { %8206 = vmatmul.mubr.msk.bf16.gmra.mrb[108].mxu0 %vm443_vm2, %v9589_v31 }
  0xdf   :  { %8209 = vmatprep.mubr.msk.bf16.mxu0 %vm17735_vm1, %v17547_v0 }
  0xe6   :  { %8210 = vmatmul.mubr.msk.bf16.gmra.mrb[112].mxu0 %vm443_vm2, %v9590_v32 }
  0xe7   :  { %8213 = vmatprep.mubr.msk.bf16.mxu0 %vm17735_vm1, %v17547_v0 }
  0xee   :  { %8214 = vmatmul.mubr.msk.bf16.gmra.mrb[116].mxu0 %vm443_vm2, %v9591_v33 }
  0xef   :  { %8217 = vmatprep.mubr.msk.bf16.mxu0 %vm17735_vm1, %v17547_v0 }
  0xf6   :  { %8218 = vmatmul.mubr.msk.bf16.gmra.mrb[120].mxu0 %vm443_vm2, %v9592_v34 }
  0xf7   :  { %8221 = vmatprep.mubr.msk.bf16.mxu0 %vm17735_vm1, %v17547_v0 }
  0xfe   :  { %8222 = vmatmul.mubr.msk.bf16.gmra.mrb[124].mxu0 %vm443_vm2, %v9593_v35  ;;  %v203_v35 = vld [vmem:[%s17540_s2 + $0xa8] sm:$0xff] }
  0xff   :  { %8225 = vmatprep.mubr.msk.bf16.mxu0 %vm17735_vm1, %v17547_v0  ;;  %2684 = vperm.xlu1 %9560, %v203_v35   ;;  %v220_v35 = vld [vmem:[%s17540_s2 + $0x130] sm:$0xff] }
 0x106   :  { %8226 = vmatmul.mubr.msk.bf16.gmra.mrb[128].mxu0 %vm443_vm2, %v9594_v36  ;;  %v204_v36 = vld [vmem:[%s17540_s2 + $0xb0] sm:$0xff] }
 0x107   :  { %8229 = vmatprep.mubr.msk.bf16.mxu0 %vm17735_vm1, %v17547_v0  ;;  %2689 = vperm.xlu0 %9559, %v204_v36  }
 0x10e   :  { %8230 = vmatmul.mubr.msk.bf16.gmra.mrb[132].mxu0 %vm443_vm2, %v9595_v37 }
 0x10f   :  { %8233 = vmatprep.mubr.msk.bf16.mxu0 %vm17735_vm1, %v17547_v0 }
 0x116   :  { %8234 = vmatmul.mubr.msk.bf16.gmra.mrb[136].mxu0 %vm443_vm2, %v9596_v38  ;;  %v205_v38 = vld [vmem:[%s17540_s2 + $0xb8] sm:$0xff] }
 0x117   :  { %8237 = vmatprep.mubr.msk.bf16.mxu0 %vm17735_vm1, %v17547_v0  ;;  %2694 = vperm.xlu1 %9560, %v205_v38   ;;  %v222_v38 = vld [vmem:[%s17540_s2 + $0x140] sm:$0xff] }
 0x11e   :  { %8238 = vmatmul.mubr.msk.bf16.gmra.mrb[140].mxu0 %vm443_vm2, %v9597_v39  ;;  %v206_v39 = vld [vmem:[%s17540_s2 + $0xc0] sm:$0xff] }
 0x11f   :  { %8241 = vmatprep.mubr.msk.bf16.mxu0 %vm17735_vm1, %v17547_v0  ;;  %2699 = vperm.xlu0 %9559, %v206_v39  }
 0x126   :  { %8242 = vmatmul.mubr.msk.bf16.gmra.mrb[144].mxu0 %vm443_vm2, %v9598_v40 }
 0x127   :  { %8247 = vmatprep.mubr.msk.bf16.mxu0 %vm17735_vm1, %v17547_v0 }
 0x12e   :  { %8248 = vmatmul.mubr.msk.bf16.vlgmr.msra.gmra.mrb[0].mxu0 %vm1076_vm3, %v9599_v41 }
 0x12f   :  { %8251 = vmatprep.mubr.msk.bf16.mxu0 %vm17735_vm1, %v17547_v0 }
 0x136   :  { %8252 = vmatmul.mubr.msk.bf16.gmra.mrb[4].mxu0 %vm1076_vm3, %v9600_v42 }
 0x137   :  { %8255 = vmatprep.mubr.msk.bf16.mxu0 %vm17735_vm1, %v17547_v0 }
 0x13e   :  { %8256 = vmatmul.mubr.msk.bf16.gmra.mrb[8].mxu0 %vm1076_vm3, %v9601_v43 }
 0x13f   :  { %8259 = vmatprep.mubr.msk.bf16.mxu0 %vm17735_vm1, %v17547_v0 }
 0x146   :  { %8260 = vmatmul.mubr.msk.bf16.gmra.mrb[12].mxu0 %vm1076_vm3, %v9602_v44  ;;  %v9627_v44 = vld [vmem:[%s17539_s0 + $0xe0] sm:$0xff]  }
 0x147   :  { %8263 = vmatprep.mubr.msk.bf16.mxu0 %vm17735_vm1, %v17547_v0 }
 0x14e   :  { %8264 = vmatmul.mubr.msk.bf16.gmra.mrb[16].mxu0 %vm1076_vm3, %v9603_v45 }
 0x14f   :  { %8267 = vmatprep.mubr.msk.bf16.mxu0 %vm17735_vm1, %v17547_v0 }
 0x156   :  { %8268 = vmatmul.mubr.msk.bf16.gmra.mrb[20].mxu0 %vm1076_vm3, %v9604_v46 }
 0x157   :  { %8271 = vmatprep.mubr.msk.bf16.mxu0 %vm17735_vm1, %v17547_v0 }
 0x15e   :  { %8272 = vmatmul.mubr.msk.bf16.gmra.mrb[24].mxu0 %vm1076_vm3, %v9605_v47 }
 0x15f   :  { %8275 = vmatprep.mubr.msk.bf16.mxu0 %vm17735_vm1, %v17547_v0 }
 0x166   :  { %8276 = vmatmul.mubr.msk.bf16.gmra.mrb[28].mxu0 %vm1076_vm3, %v9606_v48 }
 0x167   :  { %8279 = vmatprep.mubr.msk.bf16.mxu0 %vm17735_vm1, %v17547_v0 }
 0x16e   :  { %8280 = vmatmul.mubr.msk.bf16.gmra.mrb[32].mxu0 %vm1076_vm3, %v9607_v49 }
 0x16f   :  { %8283 = vmatprep.mubr.msk.bf16.mxu0 %vm17735_vm1, %v17547_v0 }
 0x176   :  { %8284 = vmatmul.mubr.msk.bf16.gmra.mrb[36].mxu0 %vm1076_vm3, %v9608_v50  ;;  %v207_v50 = vld [vmem:[%s17540_s2 + $0xc8] sm:$0xff] }
 0x177   :  { %8287 = vmatprep.mubr.msk.bf16.mxu0 %vm17735_vm1, %v17547_v0  ;;  %2704 = vperm.xlu1 %9560, %v207_v50  }
 0x17e   :  { %8288 = vmatmul.mubr.msk.bf16.gmra.mrb[40].mxu0 %vm1076_vm3, %v9609_v51  ;;  %v208_v51 = vld [vmem:[%s17540_s2 + $0xd0] sm:$0xff] }
 0x17f   :  { %8291 = vmatprep.mubr.msk.bf16.mxu0 %vm17735_vm1, %v17547_v0  ;;  %2709 = vperm.xlu0 %9559, %v208_v51   ;;  %v223_v51 = vld [vmem:[%s17540_s2 + $0x148] sm:$0xff] }
 0x186   :  { %8292 = vmatmul.mubr.msk.bf16.gmra.mrb[44].mxu0 %vm1076_vm3, %v9610_v52 }
 0x187   :  { %8295 = vmatprep.mubr.msk.bf16.mxu0 %vm17735_vm1, %v17547_v0 }
 0x18e   :  { %8296 = vmatmul.mubr.msk.bf16.gmra.mrb[48].mxu0 %vm1076_vm3, %v9611_v53  ;;  %v209_v53 = vld [vmem:[%s17540_s2 + $0xd8] sm:$0xff] }
 0x18f   :  { %8299 = vmatprep.mubr.msk.bf16.mxu0 %vm17735_vm1, %v17547_v0  ;;  %2714 = vperm.xlu1 %9560, %v209_v53  }
 0x196   :  { %8300 = vmatmul.mubr.msk.bf16.gmra.mrb[52].mxu0 %vm1076_vm3, %v9612_v54  ;;  %v210_v54 = vld [vmem:[%s17540_s2 + $0xe0] sm:$0xff] }
 0x197   :  { %8303 = vmatprep.mubr.msk.bf16.mxu0 %vm17735_vm1, %v17547_v0  ;;  %2719 = vperm.xlu0 %9559, %v210_v54   ;;  %v225_v54 = vld [vmem:[%s17540_s2 + $0x158] sm:$0xff] }
 0x19b   :  { %2729 = vperm.xlu0 %9559, %v212_v3  }
 0x19e   :  { %8304 = vmatmul.mubr.msk.bf16.gmra.mrb[56].mxu0 %vm1076_vm3, %v9613_v55 }
 0x19f   :  { %8307 = vmatprep.mubr.msk.bf16.mxu0 %vm17735_vm1, %v17547_v0  ;;  %2739 = vperm.xlu0 %9559, %v214_v6   ;;  %v228_v6 = vld [vmem:[%s17540_s2 + $0x170] sm:$0xff] }
 0x1a3   :  { %2749 = vperm.xlu0 %9559, %v216_v18  }
 0x1a6   :  { %8308 = vmatmul.mubr.msk.bf16.gmra.mrb[60].mxu0 %vm1076_vm3, %v9614_v56 }
 0x1a7   :  { %8311 = vmatprep.mubr.msk.bf16.mxu0 %vm17735_vm1, %v17547_v0  ;;  %2759 = vperm.xlu0 %9559, %v218_v21  }
 0x1ab   :  { %2769 = vperm.xlu0 %9559, %v220_v35   ;;  %v9634_v35 = vld [vmem:[%s17539_s0 + $0x118] sm:$0xff]  }
 0x1ae   :  { %8312 = vmatmul.mubr.msk.bf16.gmra.mrb[64].mxu0 %vm1076_vm3, %v9615_v57 }
 0x1af   :  { %8315 = vmatprep.mubr.msk.bf16.mxu0 %vm17735_vm1, %v17547_v0  ;;  %2779 = vperm.xlu0 %9559, %v222_v38  }
 0x1b6   :  { %8316 = vmatmul.mubr.msk.bf16.gmra.mrb[68].mxu0 %vm1076_vm3, %v9616_v58 }
 0x1b7   :  { %8319 = vmatprep.mubr.msk.bf16.mxu0 %vm17735_vm1, %v17547_v0 }
 0x1be   :  { %8320 = vmatmul.mubr.msk.bf16.gmra.mrb[72].mxu0 %vm1076_vm3, %v9617_v59  ;;  %v9628_v59 = vld [vmem:[%s17539_s0 + $0xe8] sm:$0xff]  }
 0x1bf   :  { %8323 = vmatprep.mubr.msk.bf16.mxu0 %vm17735_vm1, %v17547_v0 }
 0x1c6   :  { %8324 = vmatmul.mubr.msk.bf16.gmra.mrb[76].mxu0 %vm1076_vm3, %v9618_v60 }
 0x1c7   :  { %8327 = vmatprep.mubr.msk.bf16.mxu0 %vm17735_vm1, %v17547_v0 }
 0x1ce   :  { %8328 = vmatmul.mubr.msk.bf16.gmra.mrb[80].mxu0 %vm1076_vm3, %v9619_v61 }
 0x1cf   :  { %8331 = vmatprep.mubr.msk.bf16.mxu0 %vm17735_vm1, %v17547_v0 }
 0x1d6   :  { %8332 = vmatmul.mubr.msk.bf16.gmra.mrb[84].mxu0 %vm1076_vm3, %v9620_v62 }
 0x1d7   :  { %8335 = vmatprep.mubr.msk.bf16.mxu0 %vm17735_vm1, %v17547_v0 }
 0x1de   :  { %8336 = vmatmul.mubr.msk.bf16.gmra.mrb[88].mxu0 %vm1076_vm3, %v9621_v2  ;;  %v211_v2 = vld [vmem:[%s17540_s2 + $0xe8] sm:$0xff] }
 0x1df   :  { %8339 = vmatprep.mubr.msk.bf16.mxu0 %vm17735_vm1, %v17547_v0  ;;  %2724 = vperm.xlu1 %9560, %v211_v2  }
 0x1e3   :  { %2734 = vperm.xlu1 %9560, %v213_v5   ;;  %v227_v5 = vld [vmem:[%s17540_s2 + $0x168] sm:$0xff] }
 0x1e6   :  { %8340 = vmatmul.mubr.msk.bf16.gmra.mrb[92].mxu0 %vm1076_vm3, %v9622_v7 }
 0x1e7   :  { %8343 = vmatprep.mubr.msk.bf16.mxu0 %vm17735_vm1, %v17547_v0 }
 0x1ee   :  { %8344 = vmatmul.mubr.msk.bf16.gmra.mrb[96].mxu0 %vm1076_vm3, %v9623_v12 }
 0x1ef   :  { %8347 = vmatprep.mubr.msk.bf16.mxu0 %vm17735_vm1, %v17547_v0 }
 0x1f6   :  { %8348 = vmatmul.mubr.msk.bf16.gmra.mrb[100].mxu0 %vm1076_vm3, %v9624_v17  ;;  %v215_v17 = vld [vmem:[%s17540_s2 + $0x108] sm:$0xff] }
 0x1f7   :  { %8351 = vmatprep.mubr.msk.bf16.mxu0 %vm17735_vm1, %v17547_v0  ;;  %2744 = vperm.xlu1 %9560, %v215_v17  }
 0x1fb   :  { %2754 = vperm.xlu1 %9560, %v217_v20  }
 0x1fe   :  { %8352 = vmatmul.mubr.msk.bf16.gmra.mrb[104].mxu0 %vm1076_vm3, %v9625_v22 }
 0x1ff   :  { %8355 = vmatprep.mubr.msk.bf16.mxu0 %vm17735_vm1, %v17547_v0 }
 0x201   :  { %v10504_v27 = vpop.f32.mrb[0].mxu0 }
 0x202   :  { %v8249_v28 = vpop.f32.mrb[1].mxu0  ;;  %v1599_v31 = vmul.f32 %v10504_v27, %v10504_v27 }
 0x203   :  { %v10509_v30 = vpop.f32.mrb[2].mxu0 }
 0x204   :  { %v1518_v32 = vadd.f32 %v10509_v30, %v10504_v27  ;;  %v1600_v33 = vmul.f32 %v10509_v30, %v10509_v30  ;;  %v8250_v34 = vpop.f32.mrb[3].mxu0 }
 0x205   :  { %v219_v34 = vld [vmem:[%s17540_s2 + $0x128] sm:$0xff] }
 0x206   :  { %v1672_v37 = vadd.f32 %v1600_v33, %v1599_v31  ;;  %8356 = vmatmul.mubr.msk.bf16.gmra.mrb[108].mxu0 %vm1076_vm3, %v9626_v29  ;;  %2764 = vperm.xlu1 %9560, %v219_v34  }
 0x207   :  { %8359 = vmatprep.mubr.msk.bf16.mxu0 %vm17735_vm1, %v17547_v0 }
 0x209   :  { %v10532_v40 = vpop.f32.mrb[4].mxu0 }
 0x20a   :  { %v1519_v41 = vadd.f32 %v1518_v32, %v10532_v40  ;;  %v1601_v42 = vmul.f32 %v10532_v40, %v10532_v40  ;;  %v8253_v43 = vpop.f32.mrb[5].mxu0 }
 0x20b   :  { %v10540_v45 = vpop.f32.mrb[6].mxu0 }
 0x20c   :  { %v1673_v46 = vadd.f32 %v1672_v37, %v1601_v42  ;;  %v1520_v47 = vadd.f32 %v1519_v41, %v10540_v45  ;;  %v1602_v48 = vmul.f32 %v10540_v45, %v10540_v45  ;;  %v8254_v49 = vpop.f32.mrb[7].mxu0  ;;  %v221_v37 = vld [vmem:[%s17540_s2 + $0x138] sm:$0xff] }
 0x20d   :  { %2774 = vperm.xlu1 %9560, %v221_v37  }
 0x20e   :  { %v1674_v52 = vadd.f32 %v1673_v46, %v1602_v48  ;;  %8360 = vmatmul.mubr.msk.bf16.gmra.mrb[112].mxu0 %vm1076_vm3, %v9627_v44  ;;  %v9631_v44 = vld [vmem:[%s17539_s0 + $0x100] sm:$0xff]  }
 0x20f   :  { %8363 = vmatprep.mubr.msk.bf16.mxu0 %vm17735_vm1, %v17547_v0 }
 0x211   :  { %v10560_v55 = vpop.f32.mrb[8].mxu0  ;;  %2784 = vperm.xlu1 %9560, %v223_v51  }
 0x212   :  { %v1521_v56 = vadd.f32 %v1520_v47, %v10560_v55  ;;  %v1603_v57 = vmul.f32 %v10560_v55, %v10560_v55  ;;  %v8257_v58 = vpop.f32.mrb[9].mxu0 }
 0x213   :  { %v10568_v60 = vpop.f32.mrb[10].mxu0 }
 0x214   :  { %v1675_v61 = vadd.f32 %v1674_v52, %v1603_v57  ;;  %v1522_v62 = vadd.f32 %v1521_v56, %v10568_v60  ;;  %v1604_v63 = vmul.f32 %v10568_v60, %v10568_v60  ;;  %v8258_v1 = vpop.f32.mrb[11].mxu0  ;;  %v224_v52 = vld [vmem:[%s17540_s2 + $0x150] sm:$0xff]  ;;  %v226_v56 = vld [vmem:[%s17540_s2 + $0x160] sm:$0xff] }
 0x215   :  { %2789 = vperm.xlu0 %9559, %v224_v52   ;;  %2794 = vperm.xlu1 %9560, %v225_v54   ;;  %v9635_v54 = vld [vmem:[%s17539_s0 + $0x120] ss:$0 sps:$4 sm:$0x11]  }
 0x216   :  { %v1676_v4 = vadd.f32 %v1675_v61, %v1604_v63  ;;  %8364 = vmatmul.mubr.msk.bf16.gmra.mrb[116].mxu0 %vm1076_vm3, %v9628_v59 }
 0x217   :  { %8367 = vmatprep.mubr.msk.bf16.mxu0 %vm17735_vm1, %v17547_v0 }
 0x219   :  { %v10588_v7 = vpop.f32.mrb[12].mxu0  ;;  %2799 = vperm.xlu0 %9559, %v226_v56   ;;  %2804 = vperm.xlu1 %9560, %v227_v5   ;;  %v242_v5 = vld [vmem:[%s17540_s2 + $0x1e0] sm:$0xff] }
 0x21a   :  { %v1523_v8 = vadd.f32 %v1522_v62, %v10588_v7  ;;  %v1605_v9 = vmul.f32 %v10588_v7, %v10588_v7  ;;  %v8261_v10 = vpop.f32.mrb[13].mxu0  ;;  %v9632_v62 = vld [vmem:[%s17539_s0 + $0x108] sm:$0xff]  }
 0x21b   :  { %v10596_v12 = vpop.f32.mrb[14].mxu0  ;;  %v230_v10 = vld [vmem:[%s17540_s2 + $0x180] sm:$0xff] }
 0x21c   :  { %v1677_v13 = vadd.f32 %v1676_v4, %v1605_v9  ;;  %v1524_v14 = vadd.f32 %v1523_v8, %v10596_v12  ;;  %v1606_v15 = vmul.f32 %v10596_v12, %v10596_v12  ;;  %v8262_v16 = vpop.f32.mrb[15].mxu0  ;;  %v229_v9 = vld [vmem:[%s17540_s2 + $0x178] sm:$0xff] }
 0x21d   :  { %2809 = vperm.xlu0 %9559, %v228_v6   ;;  %2814 = vperm.xlu1 %9560, %v229_v9   ;;  %v9633_v16 = vld [vmem:[%s17539_s0 + $0x110] sm:$0xff]  }
 0x21e   :  { %v1678_v19 = vadd.f32 %v1677_v13, %v1606_v15  ;;  %8368 = vmatmul.mubr.msk.bf16.gmra.mrb[120].mxu0 %vm1076_vm3, %v9629_v11 }
 0x21f   :  { %8371 = vmatprep.mubr.msk.bf16.mxu0 %vm17735_vm1, %v17547_v0 }
 0x221   :  { %v10616_v22 = vpop.f32.mrb[16].mxu0  ;;  %2819 = vperm.xlu0 %9559, %v230_v10  }
 0x222   :  { %v1525_v23 = vadd.f32 %v1524_v14, %v10616_v22  ;;  %v1607_v24 = vmul.f32 %v10616_v22, %v10616_v22  ;;  %v8265_v25 = vpop.f32.mrb[17].mxu0 }
 0x223   :  { %v10624_v28 = vpop.f32.mrb[18].mxu0 }
 0x224   :  { %v1679_v29 = vadd.f32 %v1678_v19, %v1607_v24  ;;  %v1526_v31 = vadd.f32 %v1525_v23, %v10624_v28  ;;  %v1608_v32 = vmul.f32 %v10624_v28, %v10624_v28  ;;  %v8266_v33 = vpop.f32.mrb[19].mxu0  ;;  %v231_v23 = vld [vmem:[%s17540_s2 + $0x188] sm:$0xff]  ;;  %v232_v24 = vld [vmem:[%s17540_s2 + $0x190] sm:$0xff] }
 0x225   :  { %2824 = vperm.xlu1 %9560, %v231_v23   ;;  %2829 = vperm.xlu0 %9559, %v232_v24   ;;  %v245_v23 = vld [vmem:[%s17540_s2 + $0x1f8] sm:$0xff]  ;;  %v246_v24 = vld [vmem:[%s17540_s2 + $0x200] sm:$0xff] }
 0x226   :  { %v1680_v36 = vadd.f32 %v1679_v29, %v1608_v32  ;;  %8372 = vmatmul.mubr.msk.bf16.gmra.mrb[124].mxu0 %vm1076_vm3, %v9630_v26  ;;  %v233_v26 = vld [vmem:[%s17540_s2 + $0x198] sm:$0xff]  ;;  %v234_v29 = vld [vmem:[%s17540_s2 + $0x1a0] sm:$0xff] }
 0x227   :  { %8375 = vmatprep.mubr.msk.bf16.mxu0 %vm17735_vm1, %v17547_v0 }
 0x229   :  { %v10644_v39 = vpop.f32.mrb[20].mxu0  ;;  %2834 = vperm.xlu1 %9560, %v233_v26   ;;  %2839 = vperm.xlu0 %9559, %v234_v29  }
 0x22a   :  { %v1527_v41 = vadd.f32 %v1526_v31, %v10644_v39  ;;  %v1609_v42 = vmul.f32 %v10644_v39, %v10644_v39  ;;  %v8269_v43 = vpop.f32.mrb[21].mxu0 }
 0x22b   :  { %v10652_v46 = vpop.f32.mrb[22].mxu0  ;;  %v235_v43 = vld [vmem:[%s17540_s2 + $0x1a8] sm:$0xff] }
 0x22c   :  { %v1681_v47 = vadd.f32 %v1680_v36, %v1609_v42  ;;  %v1528_v48 = vadd.f32 %v1527_v41, %v10652_v46  ;;  %v1610_v49 = vmul.f32 %v10652_v46, %v10652_v46  ;;  %v8270_v50 = vpop.f32.mrb[23].mxu0 }
 0x22d   :  { %2844 = vperm.xlu1 %9560, %v235_v43  }
 0x22e   :  { %v1682_v53 = vadd.f32 %v1681_v47, %v1610_v49  ;;  %8376 = vmatmul.mubr.msk.bf16.gmra.mrb[128].mxu0 %vm1076_vm3, %v9631_v44  ;;  %v236_v44 = vld [vmem:[%s17540_s2 + $0x1b0] sm:$0xff]  ;;  %v238_v49 = vld [vmem:[%s17540_s2 + $0x1c0] sm:$0xff] }
 0x22f   :  { %8379 = vmatprep.mubr.msk.bf16.mxu0 %vm17735_vm1, %v17547_v0  ;;  %2849 = vperm.xlu0 %9559, %v236_v44   ;;  %v249_v44 = vld [vmem:[%s17540_s2 + $0x218] sm:$0xff] }
 0x231   :  { %v10672_v57 = vpop.f32.mrb[24].mxu0 }
 0x232   :  { %v1529_v58 = vadd.f32 %v1528_v48, %v10672_v57  ;;  %v1611_v59 = vmul.f32 %v10672_v57, %v10672_v57  ;;  %v8273_v61 = vpop.f32.mrb[25].mxu0  ;;  %v237_v48 = vld [vmem:[%s17540_s2 + $0x1b8] sm:$0xff] }
 0x233   :  { %v10680_v63 = vpop.f32.mrb[26].mxu0  ;;  %2854 = vperm.xlu1 %9560, %v237_v48   ;;  %2859 = vperm.xlu0 %9559, %v238_v49  }
 0x234   :  { %v1683_v1 = vadd.f32 %v1682_v53, %v1611_v59  ;;  %v1530_v2 = vadd.f32 %v1529_v58, %v10680_v63  ;;  %v1612_v3 = vmul.f32 %v10680_v63, %v10680_v63  ;;  %v8274_v4 = vpop.f32.mrb[27].mxu0 }
 0x235   :  { %v241_v4 = vld [vmem:[%s17540_s2 + $0x1d8] sm:$0xff] }
 0x236   :  { %v1684_v8 = vadd.f32 %v1683_v1, %v1612_v3  ;;  %8380 = vmatmul.mubr.msk.bf16.gmra.mrb[132].mxu0 %vm1076_vm3, %v9632_v62  ;;  %v239_v1 = vld [vmem:[%s17540_s2 + $0x1c8] sm:$0xff] }
 0x237   :  { %8383 = vmatprep.mubr.msk.bf16.mxu0 %vm17735_vm1, %v17547_v0  ;;  %2864 = vperm.xlu1 %9560, %v239_v1   ;;  %v252_v1 = vld [vmem:[%s17540_s2 + $0x230] sm:$0xff] }
 0x239   :  { %v10700_v11 = vpop.f32.mrb[28].mxu0 }
 0x23a   :  { %v1531_v13 = vadd.f32 %v1530_v2, %v10700_v11  ;;  %v1613_v14 = vmul.f32 %v10700_v11, %v10700_v11  ;;  %v8277_v15 = vpop.f32.mrb[29].mxu0  ;;  %v240_v2 = vld [vmem:[%s17540_s2 + $0x1d0] sm:$0xff] }
 0x23b   :  { %v10708_v17 = vpop.f32.mrb[30].mxu0  ;;  %2869 = vperm.xlu0 %9559, %v240_v2   ;;  %2874 = vperm.xlu1 %9560, %v241_v4   ;;  %v254_v4 = vld [vmem:[%s17540_s2 + $0x240] sm:$0x3] }
 0x23c   :  { %v1685_v18 = vadd.f32 %v1684_v8, %v1613_v14  ;;  %v1532_v19 = vadd.f32 %v1531_v13, %v10708_v17  ;;  %v1614_v20 = vmul.f32 %v10708_v17, %v10708_v17  ;;  %v8278_v21 = vpop.f32.mrb[31].mxu0 }
 0x23e   :  { %v1686_v25 = vadd.f32 %v1685_v18, %v1614_v20  ;;  %8384 = vmatmul.mubr.msk.bf16.gmra.mrb[136].mxu0 %vm1076_vm3, %v9633_v16  ;;  %v244_v20 = vld [vmem:[%s17540_s2 + $0x1f0] sm:$0xff] }
 0x23f   :  { %8387 = vmatprep.mubr.msk.bf16.mxu0 %vm17735_vm1, %v17547_v0  ;;  %2879 = vperm.xlu0 %9559, %v242_v5  }
 0x241   :  { %v10728_v31 = vpop.f32.mrb[32].mxu0 }
 0x242   :  { %v1533_v32 = vadd.f32 %v1532_v19, %v10728_v31  ;;  %v1615_v33 = vmul.f32 %v10728_v31, %v10728_v31  ;;  %v8281_v34 = vpop.f32.mrb[33].mxu0  ;;  %v243_v19 = vld [vmem:[%s17540_s2 + $0x1e8] sm:$0xff] }
 0x243   :  { %v10736_v36 = vpop.f32.mrb[34].mxu0  ;;  %2884 = vperm.xlu1 %9560, %v243_v19   ;;  %2889 = vperm.xlu0 %9559, %v244_v20  }
 0x244   :  { %v1687_v37 = vadd.f32 %v1686_v25, %v1615_v33  ;;  %v1534_v38 = vadd.f32 %v1533_v32, %v10736_v36  ;;  %v1616_v41 = vmul.f32 %v10736_v36, %v10736_v36  ;;  %v8282_v42 = vpop.f32.mrb[35].mxu0 }
 0x245   :  { %v248_v42 = vld [vmem:[%s17540_s2 + $0x210] sm:$0xff] }
 0x246   :  { %v1688_v47 = vadd.f32 %v1687_v37, %v1616_v41  ;;  %8388 = vmatmul.mubr.msk.bf16.gmra.mrb[140].mxu0 %vm1076_vm3, %v9634_v35  ;;  %v247_v41 = vld [vmem:[%s17540_s2 + $0x208] sm:$0xff] }
 0x247   :  { %8391 = vmatprep.mubr.msk.bf16.mxu0 %vm17735_vm1, %v17547_v0  ;;  %2894 = vperm.xlu1 %9560, %v245_v23  }
 0x248   :  { %2899 = vperm.xlu0 %9559, %v246_v24  }
 0x249   :  { %v10756_v50 = vpop.f32.mrb[36].mxu0 }
 0x24a   :  { %v1535_v51 = vadd.f32 %v1534_v38, %v10756_v50  ;;  %v1617_v52 = vmul.f32 %v10756_v50, %v10756_v50  ;;  %v8285_v53 = vpop.f32.mrb[37].mxu0 }
 0x24b   :  { %v10764_v56 = vpop.f32.mrb[38].mxu0  ;;  %2904 = vperm.xlu1 %9560, %v247_v41  }
 0x24c   :  { %v1689_v58 = vadd.f32 %v1688_v47, %v1617_v52  ;;  %v1536_v59 = vadd.f32 %v1535_v51, %v10764_v56  ;;  %v1618_v61 = vmul.f32 %v10764_v56, %v10764_v56  ;;  %v8286_v62 = vpop.f32.mrb[39].mxu0  ;;  %2909 = vperm.xlu0 %9559, %v248_v42   ;;  %v250_v47 = vld [vmem:[%s17540_s2 + $0x220] sm:$0xff] }
 0x24d   :  { %v251_v62 = vld [vmem:[%s17540_s2 + $0x228] sm:$0xff] }
 0x24e   :  { %v1690_v3 = vadd.f32 %v1689_v58, %v1618_v61  ;;  %8392 = vmatmul.mubr.msk.bf16.gmra.mrb[144].mxu0 %vm1076_vm3, %v9635_v54 }
 0x24f   :  { %8992 = vmatprep.mubr.msk.f32.mxu0 %vm17735_vm1, %v17547_v0  ;;  %2914 = vperm.xlu1 %9560, %v249_v44  }
 0x250   :  { %2919 = vperm.xlu0 %9559, %v250_v47  }
 0x251   :  { %v10784_v6 = vpop.f32.mrb[40].mxu0 }
 0x252   :  { %v1537_v8 = vadd.f32 %v1536_v59, %v10784_v6  ;;  %v1619_v9 = vmul.f32 %v10784_v6, %v10784_v6  ;;  %v8289_v10 = vpop.f32.mrb[41].mxu0 }
 0x253   :  { %v10789_v13 = vpop.f32.mrb[42].mxu0  ;;  %2924 = vperm.xlu1 %9560, %v251_v62  }
 0x254   :  { %v1691_v14 = vadd.f32 %v1690_v3, %v1619_v9  ;;  %v1538_v15 = vadd.f32 %v1537_v8, %v10789_v13  ;;  %v1620_v16 = vmul.f32 %v10789_v13, %v10789_v13  ;;  %v8290_v18 = vpop.f32.mrb[43].mxu0  ;;  %2929 = vperm.xlu0 %9559, %v252_v1   ;;  %v253_v3 = vld [vmem:[%s17540_s2 + $0x238] sm:$0xff] }
 0x256   :  { %v1692_v21 = vadd.f32 %v1691_v14, %v1620_v16 }
 0x257   :  { %2934 = vperm.xlu1 %9560, %v253_v3  }
 0x258   :  { %2939 = vperm.xlu0 %9559, %v254_v4  }
 0x259   :  { %v10806_v25 = vpop.f32.mrb[44].mxu0 }
 0x25a   :  { %v1539_v26 = vadd.f32 %v1538_v15, %v10806_v25  ;;  %v1621_v29 = vmul.f32 %v10806_v25, %v10806_v25  ;;  %v8293_v32 = vpop.f32.mrb[45].mxu0 }
 0x25b   :  { %v10811_v33 = vpop.f32.mrb[46].mxu0 }
 0x25c   :  { %v1693_v34 = vadd.f32 %v1692_v21, %v1621_v29  ;;  %v1540_v35 = vadd.f32 %v1539_v26, %v10811_v33  ;;  %v1622_v37 = vmul.f32 %v10811_v33, %v10811_v33  ;;  %v8294_v38 = vpop.f32.mrb[47].mxu0 }
 0x25e   :  { %v1694_v43 = vadd.f32 %v1693_v34, %v1622_v37 }
 0x261   :  { %v10828_v48 = vpop.f32.mrb[48].mxu0 }
 0x262   :  { %v1541_v49 = vadd.f32 %v1540_v35, %v10828_v48  ;;  %v1623_v51 = vmul.f32 %v10828_v48, %v10828_v48  ;;  %v8297_v52 = vpop.f32.mrb[49].mxu0 }
 0x263   :  { %v10833_v53 = vpop.f32.mrb[50].mxu0 }
 0x264   :  { %v1695_v54 = vadd.f32 %v1694_v43, %v1623_v51  ;;  %v1542_v58 = vadd.f32 %v1541_v49, %v10833_v53  ;;  %v1624_v59 = vmul.f32 %v10833_v53, %v10833_v53  ;;  %v8298_v61 = vpop.f32.mrb[51].mxu0 }
 0x266   :  { %v1696_v2 = vadd.f32 %v1695_v54, %v1624_v59 }
 0x269   :  { %v10850_v5 = vpop.f32.mrb[52].mxu0 }
 0x26a   :  { %v1543_v8 = vadd.f32 %v1542_v58, %v10850_v5  ;;  %v1625_v9 = vmul.f32 %v10850_v5, %v10850_v5  ;;  %v8301_v10 = vpop.f32.mrb[53].mxu0 }
 0x26b   :  { %v10855_v14 = vpop.f32.mrb[54].mxu0 }
 0x26c   :  { %v1697_v15 = vadd.f32 %v1696_v2, %v1625_v9  ;;  %v1544_v16 = vadd.f32 %v1543_v8, %v10855_v14  ;;  %v1626_v18 = vmul.f32 %v10855_v14, %v10855_v14  ;;  %v8302_v19 = vpop.f32.mrb[55].mxu0 }
 0x26e   :  { %v1698_v20 = vadd.f32 %v1697_v15, %v1626_v18 }
 0x271   :  { %v10860_v21 = vpop.f32.mrb[56].mxu0 }
 0x272   :  { %v1545_v23 = vadd.f32 %v1544_v16, %v10860_v21  ;;  %v1627_v24 = vmul.f32 %v10860_v21, %v10860_v21  ;;  %v8305_v26 = vpop.f32.mrb[57].mxu0 }
 0x273   :  { %v10865_v29 = vpop.f32.mrb[58].mxu0 }
 0x274   :  { %v1699_v32 = vadd.f32 %v1698_v20, %v1627_v24  ;;  %v1546_v34 = vadd.f32 %v1545_v23, %v10865_v29  ;;  %v1628_v35 = vmul.f32 %v10865_v29, %v10865_v29  ;;  %v8306_v37 = vpop.f32.mrb[59].mxu0 }
 0x276   :  { %v1700_v38 = vadd.f32 %v1699_v32, %v1628_v35 }
 0x279   :  { %v10870_v41 = vpop.f32.mrb[60].mxu0 }
 0x27a   :  { %v1547_v42 = vadd.f32 %v1546_v34, %v10870_v41  ;;  %v1629_v43 = vmul.f32 %v10870_v41, %v10870_v41  ;;  %v8309_v44 = vpop.f32.mrb[61].mxu0 }
 0x27b   :  { %v10875_v47 = vpop.f32.mrb[62].mxu0 }
 0x27c   :  { %v1701_v49 = vadd.f32 %v1700_v38, %v1629_v43  ;;  %v1548_v51 = vadd.f32 %v1547_v42, %v10875_v47  ;;  %v1630_v52 = vmul.f32 %v10875_v47, %v10875_v47  ;;  %v8310_v54 = vpop.f32.mrb[63].mxu0 }
 0x27e   :  { %v1702_v58 = vadd.f32 %v1701_v49, %v1630_v52 }
 0x281   :  { %v10880_v59 = vpop.f32.mrb[64].mxu0 }
 0x282   :  { %v1549_v61 = vadd.f32 %v1548_v51, %v10880_v59  ;;  %v1631_v62 = vmul.f32 %v10880_v59, %v10880_v59  ;;  %v8313_v1 = vpop.f32.mrb[65].mxu0 }
 0x283   :  { %v10885_v2 = vpop.f32.mrb[66].mxu0 }
 0x284   :  { %v1703_v3 = vadd.f32 %v1702_v58, %v1631_v62  ;;  %v1550_v4 = vadd.f32 %v1549_v61, %v10885_v2  ;;  %v1632_v8 = vmul.f32 %v10885_v2, %v10885_v2  ;;  %v8314_v9 = vpop.f32.mrb[67].mxu0 }
 0x286   :  { %v1704_v10 = vadd.f32 %v1703_v3, %v1632_v8 }
 0x289   :  { %v10890_v15 = vpop.f32.mrb[68].mxu0 }
 0x28a   :  { %v1551_v16 = vadd.f32 %v1550_v4, %v10890_v15  ;;  %v1633_v18 = vmul.f32 %v10890_v15, %v10890_v15  ;;  %v8317_v19 = vpop.f32.mrb[69].mxu0 }
 0x28b   :  { %v10895_v20 = vpop.f32.mrb[70].mxu0 }
 0x28c   :  { %v1705_v23 = vadd.f32 %v1704_v10, %v1633_v18  ;;  %v1552_v24 = vadd.f32 %v1551_v16, %v10895_v20  ;;  %v1634_v26 = vmul.f32 %v10895_v20, %v10895_v20  ;;  %v8318_v32 = vpop.f32.mrb[71].mxu0 }
 0x28e   :  { %v1706_v34 = vadd.f32 %v1705_v23, %v1634_v26 }
 0x291   :  { %v10900_v35 = vpop.f32.mrb[72].mxu0 }
 0x292   :  { %v1553_v37 = vadd.f32 %v1552_v24, %v10900_v35  ;;  %v1635_v38 = vmul.f32 %v10900_v35, %v10900_v35  ;;  %v8321_v42 = vpop.f32.mrb[73].mxu0 }
 0x293   :  { %v10905_v43 = vpop.f32.mrb[74].mxu0 }
 0x294   :  { %v1707_v44 = vadd.f32 %v1706_v34, %v1635_v38  ;;  %v1554_v49 = vadd.f32 %v1553_v37, %v10905_v43  ;;  %v1636_v51 = vmul.f32 %v10905_v43, %v10905_v43  ;;  %v8322_v52 = vpop.f32.mrb[75].mxu0 }
 0x296   :  { %v1708_v54 = vadd.f32 %v1707_v44, %v1636_v51 }
 0x299   :  { %v10910_v58 = vpop.f32.mrb[76].mxu0 }
 0x29a   :  { %v1555_v61 = vadd.f32 %v1554_v49, %v10910_v58  ;;  %v1637_v62 = vmul.f32 %v10910_v58, %v10910_v58  ;;  %v8325_v1 = vpop.f32.mrb[77].mxu0 }
 0x29b   :  { %v10915_v3 = vpop.f32.mrb[78].mxu0 }
 0x29c   :  { %v1709_v4 = vadd.f32 %v1708_v54, %v1637_v62  ;;  %v1556_v8 = vadd.f32 %v1555_v61, %v10915_v3  ;;  %v1638_v9 = vmul.f32 %v10915_v3, %v10915_v3  ;;  %v8326_v10 = vpop.f32.mrb[79].mxu0 }
 0x29e   :  { %v1710_v16 = vadd.f32 %v1709_v4, %v1638_v9 }
 0x2a1   :  { %v10920_v18 = vpop.f32.mrb[80].mxu0 }
 0x2a2   :  { %v1557_v19 = vadd.f32 %v1556_v8, %v10920_v18  ;;  %v1639_v23 = vmul.f32 %v10920_v18, %v10920_v18  ;;  %v8329_v24 = vpop.f32.mrb[81].mxu0 }
 0x2a3   :  { %v10925_v26 = vpop.f32.mrb[82].mxu0 }
 0x2a4   :  { %v1711_v32 = vadd.f32 %v1710_v16, %v1639_v23  ;;  %v1558_v34 = vadd.f32 %v1557_v19, %v10925_v26  ;;  %v1640_v37 = vmul.f32 %v10925_v26, %v10925_v26  ;;  %v8330_v38 = vpop.f32.mrb[83].mxu0 }
 0x2a6   :  { %v1712_v42 = vadd.f32 %v1711_v32, %v1640_v37 }
 0x2a9   :  { %v10930_v44 = vpop.f32.mrb[84].mxu0 }
 0x2aa   :  { %17864 = vst [vmem:[#allocation2_spill] sm:$0xff] %v10930_v44  ;;  %v1559_v49 = vadd.f32 %v1558_v34, %v10930_v44  ;;  %v1641_v51 = vmul.f32 %v10930_v44, %v10930_v44  ;;  %v8333_v52 = vpop.f32.mrb[85].mxu0 }
 0x2ab   :  { %v10935_v54 = vpop.f32.mrb[86].mxu0 }
 0x2ac   :  { %17865 = vst [vmem:[#allocation3_spill] sm:$0xff] %v10935_v54  ;;  %v1713_v61 = vadd.f32 %v1712_v42, %v1641_v51  ;;  %v1560_v62 = vadd.f32 %v1559_v49, %v10935_v54  ;;  %v1642_v1 = vmul.f32 %v10935_v54, %v10935_v54  ;;  %v8334_v4 = vpop.f32.mrb[87].mxu0 }
 0x2ae   :  { %v1714_v8 = vadd.f32 %v1713_v61, %v1642_v1 }
 0x2b1   :  { %v10940_v9 = vpop.f32.mrb[88].mxu0 }
 0x2b2   :  { %17866 = vst [vmem:[#allocation4_spill] sm:$0xff] %v10940_v9  ;;  %v1561_v10 = vadd.f32 %v1560_v62, %v10940_v9  ;;  %v1643_v16 = vmul.f32 %v10940_v9, %v10940_v9  ;;  %v8337_v19 = vpop.f32.mrb[89].mxu0 }
 0x2b3   :  { %v10945_v23 = vpop.f32.mrb[90].mxu0 }
 0x2b4   :  { %17867 = vst [vmem:[#allocation5_spill] sm:$0xff] %v10945_v23  ;;  %v1715_v24 = vadd.f32 %v1714_v8, %v1643_v16  ;;  %v1562_v32 = vadd.f32 %v1561_v10, %v10945_v23  ;;  %v1644_v34 = vmul.f32 %v10945_v23, %v10945_v23  ;;  %v8338_v37 = vpop.f32.mrb[91].mxu0 }
 0x2b6   :  { %v1716_v38 = vadd.f32 %v1715_v24, %v1644_v34 }
 0x2b9   :  { %v10950_v42 = vpop.f32.mrb[92].mxu0 }
 0x2ba   :  { %17868 = vst [vmem:[#allocation6_spill] sm:$0xff] %v10950_v42  ;;  %v1563_v49 = vadd.f32 %v1562_v32, %v10950_v42  ;;  %v1645_v51 = vmul.f32 %v10950_v42, %v10950_v42  ;;  %v8341_v52 = vpop.f32.mrb[93].mxu0  ;;  %v11142_v42 = vld [vmem:[%s17542_s9 + $0x8] sm:$0xff] }
 0x2bb   :  { %v10955_v61 = vpop.f32.mrb[94].mxu0  ;;  %17895 = vst [vmem:[#allocation32_spill] sm:$0xff] %v11142_v42 }
 0x2bc   :  { %17869 = vst [vmem:[#allocation7_spill] sm:$0xff] %v10955_v61  ;;  %v1717_v62 = vadd.f32 %v1716_v38, %v1645_v51  ;;  %v1564_v1 = vadd.f32 %v1563_v49, %v10955_v61  ;;  %v1646_v4 = vmul.f32 %v10955_v61, %v10955_v61  ;;  %v8342_v8 = vpop.f32.mrb[95].mxu0 }
 0x2be   :  { %v1718_v10 = vadd.f32 %v1717_v62, %v1646_v4 }
 0x2c1   :  { %v10960_v16 = vpop.f32.mrb[96].mxu0 }
 0x2c2   :  { %17870 = vst [vmem:[#allocation8_spill] sm:$0xff] %v10960_v16  ;;  %v1565_v19 = vadd.f32 %v1564_v1, %v10960_v16  ;;  %v1647_v24 = vmul.f32 %v10960_v16, %v10960_v16  ;;  %v8345_v32 = vpop.f32.mrb[97].mxu0 }
 0x2c3   :  { %v10965_v34 = vpop.f32.mrb[98].mxu0 }
 0x2c4   :  { %17871 = vst [vmem:[#allocation9_spill] sm:$0xff] %v10965_v34  ;;  %v1719_v37 = vadd.f32 %v1718_v10, %v1647_v24  ;;  %v1566_v38 = vadd.f32 %v1565_v19, %v10965_v34  ;;  %v1648_v49 = vmul.f32 %v10965_v34, %v10965_v34  ;;  %v8346_v51 = vpop.f32.mrb[99].mxu0 }
 0x2c6   :  { %v1720_v52 = vadd.f32 %v1719_v37, %v1648_v49 }
 0x2c9   :  { %v10970_v8 = vpop.f32.mrb[100].mxu0 }
 0x2ca   :  { %17872 = vst [vmem:[#allocation10_spill] sm:$0xff] %v10970_v8  ;;  %v1567_v62 = vadd.f32 %v1566_v38, %v10970_v8  ;;  %v1649_v1 = vmul.f32 %v10970_v8, %v10970_v8  ;;  %v8349_v4 = vpop.f32.mrb[101].mxu0 }
 0x2cb   :  { %v10975_v0 = vpop.f32.mrb[102].mxu0 }
 0x2cc   :  { %17873 = vst [vmem:[#allocation11_spill] sm:$0xff] %v10975_v0  ;;  %v1721_v32 = vadd.f32 %v1720_v52, %v1649_v1  ;;  %v1568_v10 = vadd.f32 %v1567_v62, %v10975_v0  ;;  %v1650_v19 = vmul.f32 %v10975_v0, %v10975_v0  ;;  %v8350_v24 = vpop.f32.mrb[103].mxu0 }
 0x2ce   :  { %v1722_v34 = vadd.f32 %v1721_v32, %v1650_v19 }
 0x2d1   :  { %v10980_v51 = vpop.f32.mrb[104].mxu0 }
 0x2d2   :  { %17874 = vst [vmem:[#allocation12_spill] sm:$0xff] %v10980_v51  ;;  %v1569_v37 = vadd.f32 %v1568_v10, %v10980_v51  ;;  %v1651_v38 = vmul.f32 %v10980_v51, %v10980_v51  ;;  %v8353_v49 = vpop.f32.mrb[105].mxu0 }
 0x2d3   :  { %v10985_v8 = vpop.f32.mrb[106].mxu0 }
 0x2d4   :  { %17875 = vst [vmem:[#allocation13_spill] sm:$0xff] %v10985_v8  ;;  %v1723_v4 = vadd.f32 %v1722_v34, %v1651_v38  ;;  %v1570_v52 = vadd.f32 %v1569_v37, %v10985_v8  ;;  %v1652_v62 = vmul.f32 %v10985_v8, %v10985_v8  ;;  %v8354_v1 = vpop.f32.mrb[107].mxu0 }
 0x2d6   :  { %v1724_v0 = vadd.f32 %v1723_v4, %v1652_v62 }
 0x2d9   :  { %v10990_v24 = vpop.f32.mrb[108].mxu0 }
 0x2da   :  { %17876 = vst [vmem:[#allocation14_spill] sm:$0xff] %v10990_v24  ;;  %v1571_v32 = vadd.f32 %v1570_v52, %v10990_v24  ;;  %v1653_v10 = vmul.f32 %v10990_v24, %v10990_v24  ;;  %v8357_v19 = vpop.f32.mrb[109].mxu0 }
 0x2db   :  { %v10995_v51 = vpop.f32.mrb[110].mxu0 }
 0x2dc   :  { %17877 = vst [vmem:[#allocation15_spill] sm:$0xff] %v10995_v51  ;;  %v1725_v49 = vadd.f32 %v1724_v0, %v1653_v10  ;;  %v1572_v34 = vadd.f32 %v1571_v32, %v10995_v51  ;;  %v1654_v37 = vmul.f32 %v10995_v51, %v10995_v51  ;;  %v8358_v38 = vpop.f32.mrb[111].mxu0 }
 0x2de   :  { %v1726_v8 = vadd.f32 %v1725_v49, %v1654_v37 }
 0x2e1   :  { %v11000_v1 = vpop.f32.mrb[112].mxu0 }
 0x2e2   :  { %17878 = vst [vmem:[#allocation16_spill] sm:$0xff] %v11000_v1  ;;  %v1573_v4 = vadd.f32 %v1572_v34, %v11000_v1  ;;  %v1655_v52 = vmul.f32 %v11000_v1, %v11000_v1  ;;  %v8361_v62 = vpop.f32.mrb[113].mxu0 }
 0x2e3   :  { %v11005_v24 = vpop.f32.mrb[114].mxu0 }
 0x2e4   :  { %17879 = vst [vmem:[#allocation17_spill] sm:$0xff] %v11005_v24  ;;  %v1727_v19 = vadd.f32 %v1726_v8, %v1655_v52  ;;  %v1574_v0 = vadd.f32 %v1573_v4, %v11005_v24  ;;  %v1656_v32 = vmul.f32 %v11005_v24, %v11005_v24  ;;  %v8362_v10 = vpop.f32.mrb[115].mxu0 }
 0x2e6   :  { %v1728_v51 = vadd.f32 %v1727_v19, %v1656_v32  ;;  %v3169_v19 = vld [vmem:[%s17541_s5] sm:$0xff] }
 0x2e9   :  { %v11010_v38 = vpop.f32.mrb[116].mxu0 }
 0x2ea   :  { %17880 = vst [vmem:[#allocation18_spill] sm:$0xff] %v11010_v38  ;;  %v1575_v49 = vadd.f32 %v1574_v0, %v11010_v38  ;;  %v1657_v34 = vmul.f32 %v11010_v38, %v11010_v38  ;;  %v8365_v37 = vpop.f32.mrb[117].mxu0  ;;  %v3170_v0 = vld [vmem:[%s17541_s5 + $0x8] sm:$0xff] }
 0x2eb   :  { %v11015_v1 = vpop.f32.mrb[118].mxu0  ;;  %v9212_v32 = vpack.c.bf16 %v3170_v0, %v3169_v19  ;;  %v17559_v37 = vmov 0.0|0.0  }
 0x2ec   :  { %17881 = vst [vmem:[#allocation19_spill] sm:$0xff] %v11015_v1  ;;  %v1729_v62 = vadd.f32 %v1728_v51, %v1657_v34  ;;  %v1576_v8 = vadd.f32 %v1575_v49, %v11015_v1  ;;  %v1658_v4 = vmul.f32 %v11015_v1, %v11015_v1  ;;  %v8366_v52 = vpop.f32.mrb[119].mxu0  ;;  %9211 = vmatprep.subr.bf16.mxu1 %v17559_v37 }
 0x2ed   :  { %9235 = vmatprep.subr.bf16.mxu0 %v17559_v37  ;;  %9213 = vmatpush3.bf16.msra.mxu1 %v9212_v32 }
 0x2ee   :  { %v1730_v10 = vadd.f32 %v1729_v62, %v1658_v4  ;;  %9214 = vmatprep.subr.bf16.mxu1 %v17559_v37 }
 0x2f1   :  { %v11029_v51 = vpop.f32.mrb[120].mxu0 }
 0x2f2   :  { %17882 = vst [vmem:[#allocation20_spill] sm:$0xff] %v11029_v51  ;;  %v1577_v49 = vadd.f32 %v1576_v8, %v11029_v51  ;;  %v1659_v34 = vmul.f32 %v11029_v51, %v11029_v51  ;;  %v8369_v52 = vpop.f32.mrb[121].mxu0 }
 0x2f3   :  { %v11034_v1 = vpop.f32.mrb[122].mxu0 }
 0x2f4   :  { %17883 = vst [vmem:[#allocation21_spill] sm:$0xff] %v11034_v1  ;;  %v1731_v19 = vadd.f32 %v1730_v10, %v1659_v34  ;;  %v1578_v62 = vadd.f32 %v1577_v49, %v11034_v1  ;;  %v1660_v4 = vmul.f32 %v11034_v1, %v11034_v1  ;;  %v8370_v0 = vpop.f32.mrb[123].mxu0 }
 0x2f6   :  { %v1732_v32 = vadd.f32 %v1731_v19, %v1660_v4 }
 0x2f9   :  { %v11039_v38 = vpop.f32.mrb[124].mxu0 }
 0x2fa   :  { %17884 = vst [vmem:[#allocation22_spill] sm:$0xff] %v11039_v38  ;;  %v1579_v37 = vadd.f32 %v1578_v62, %v11039_v38  ;;  %v1661_v8 = vmul.f32 %v11039_v38, %v11039_v38  ;;  %v8373_v24 = vpop.f32.mrb[125].mxu0 }
 0x2fb   :  { %v11044_v51 = vpop.f32.mrb[126].mxu0 }
 0x2fc   :  { %17885 = vst [vmem:[#allocation23_spill] sm:$0xff] %v11044_v51  ;;  %v1733_v52 = vadd.f32 %v1732_v32, %v1661_v8  ;;  %v1580_v10 = vadd.f32 %v1579_v37, %v11044_v51  ;;  %v1662_v49 = vmul.f32 %v11044_v51, %v11044_v51  ;;  %v8374_v34 = vpop.f32.mrb[127].mxu0 }
 0x2fe   :  { %v1734_v1 = vadd.f32 %v1733_v52, %v1662_v49 }
 0x301   :  { %v11049_v0 = vpop.f32.mrb[128].mxu0 }
 0x302   :  { %17886 = vst [vmem:[#allocation24_spill] sm:$0xff] %v11049_v0  ;;  %v1581_v19 = vadd.f32 %v1580_v10, %v11049_v0  ;;  %v1663_v62 = vmul.f32 %v11049_v0, %v11049_v0  ;;  %v8377_v4 = vpop.f32.mrb[129].mxu0 }
 0x303   :  { %v11054_v38 = vpop.f32.mrb[130].mxu0 }
 0x304   :  { %17887 = vst [vmem:[#allocation25_spill] sm:$0xff] %v11054_v38  ;;  %v1735_v24 = vadd.f32 %v1734_v1, %v1663_v62  ;;  %v1582_v32 = vadd.f32 %v1581_v19, %v11054_v38  ;;  %v1664_v37 = vmul.f32 %v11054_v38, %v11054_v38  ;;  %v8378_v8 = vpop.f32.mrb[131].mxu0  ;;  %v3171_v1 = vld [vmem:[%s17541_s5 + $0x10] sm:$0xff]  ;;  %v3172_v19 = vld [vmem:[%s17541_s5 + $0x18] sm:$0xff] }
 0x305   :  { %v3174_v8 = vld [vmem:[%s17541_s5 + $0x28] sm:$0xff] }
 0x306   :  { %v1736_v51 = vadd.f32 %v1735_v24, %v1664_v37  ;;  %v3173_v37 = vld [vmem:[%s17541_s5 + $0x20] sm:$0xff] }
 0x307   :  { %v9218_v38 = vpack.c.bf16 %v3174_v8, %v3173_v37 }
 0x309   :  { %v11059_v34 = vpop.f32.mrb[132].mxu0 }
 0x30a   :  { %17888 = vst [vmem:[#allocation26_spill] sm:$0xff] %v11059_v34  ;;  %v1583_v52 = vadd.f32 %v1582_v32, %v11059_v34  ;;  %v1665_v10 = vmul.f32 %v11059_v34, %v11059_v34  ;;  %v8381_v49 = vpop.f32.mrb[133].mxu0  ;;  %v9215_v34 = vpack.c.bf16 %v3172_v19, %v3171_v1 }
 0x30b   :  { %v11064_v0 = vpop.f32.mrb[134].mxu0 }
 0x30c   :  { %17889 = vst [vmem:[#allocation27_spill] sm:$0xff] %v11064_v0  ;;  %v1737_v62 = vadd.f32 %v1736_v51, %v1665_v10  ;;  %v1584_v4 = vadd.f32 %v1583_v52, %v11064_v0  ;;  %v1666_v24 = vmul.f32 %v11064_v0, %v11064_v0  ;;  %v8382_v32 = vpop.f32.mrb[135].mxu0  ;;  %9216 = vmatpush3.bf16.msra.mxu1 %v9215_v34  ;;  %v17891_v51 = vmov 0.0|0.0   ;;  %v3175_v52 = vld [vmem:[%s17541_s5 + $0x30] sm:$0xff]  ;;  %v3176_v10 = vld [vmem:[%s17541_s5 + $0x38] sm:$0xff] }
 0x30d   :  { %9217 = vmatprep.subr.bf16.mxu1 %v17891_v51  ;;  %v9221_v0 = vpack.c.bf16 %v3176_v10, %v3175_v52  ;;  %v3180_v52 = vld [vmem:[%s17541_s5 + $0x58] sm:$0xff] }
 0x30e   :  { %v1738_v49 = vadd.f32 %v1737_v62, %v1666_v24 }
 0x310   :  { %9219 = vmatpush3.bf16.msra.mxu1 %v9218_v38  ;;  %v3179_v38 = vld [vmem:[%s17541_s5 + $0x50] sm:$0xff] }
 0x311   :  { %v11081_v16 = vpop.f32.mrb[136].mxu0  ;;  %9220 = vmatprep.subr.bf16.mxu1 %v17891_v51 }
 0x312   :  { %17890 = vst [vmem:[#allocation28_spill] sm:$0xff] %v11081_v16  ;;  %v1585_v32 = vadd.f32 %v1584_v4, %v11081_v16  ;;  %v1667_v62 = vmul.f32 %v11081_v16, %v11081_v16  ;;  %v8385_v1 = vpop.f32.mrb[137].mxu0  ;;  %v3177_v4 = vld [vmem:[%s17541_s5 + $0x40] sm:$0xff] }
 0x313   :  { %v11093_v34 = vpop.f32.mrb[138].mxu0  ;;  %v3178_v1 = vld [vmem:[%s17541_s5 + $0x48] sm:$0xff] }
 0x314   :  { %17892 = vst [vmem:[#allocation29_spill] sm:$0xff] %v11093_v34  ;;  %v1739_v19 = vadd.f32 %v1738_v49, %v1667_v62  ;;  %v1586_v24 = vadd.f32 %v1585_v32, %v11093_v34  ;;  %v1668_v37 = vmul.f32 %v11093_v34, %v11093_v34  ;;  %v8386_v8 = vpop.f32.mrb[139].mxu0  ;;  %9222 = vmatpush3.bf16.msra.mxu1 %v9221_v0 }
 0x315   :  { %v9224_v49 = vpack.c.bf16 %v3178_v1, %v3177_v4  ;;  %9223 = vmatprep.subr.bf16.mxu1 %v17891_v51  ;;  %v9227_v34 = vpack.c.bf16 %v3180_v52, %v3179_v38  ;;  %v3184_v38 = vld [vmem:[%s17541_s5 + $0x78] sm:$0xff] }
 0x316   :  { %v1740_v16 = vadd.f32 %v1739_v19, %v1668_v37 }
 0x318   :  { %9225 = vmatpush3.bf16.msra.mxu1 %v9224_v49  ;;  %v3183_v49 = vld [vmem:[%s17541_s5 + $0x70] sm:$0xff] }
 0x319   :  { %v11105_v32 = vpop.f32.mrb[140].mxu0  ;;  %9226 = vmatprep.subr.bf16.mxu1 %v17891_v51 }
 0x31a   :  { %17893 = vst [vmem:[#allocation30_spill] sm:$0xff] %v11105_v32  ;;  %v1587_v10 = vadd.f32 %v1586_v24, %v11105_v32  ;;  %v1669_v62 = vmul.f32 %v11105_v32, %v11105_v32  ;;  %v8389_v19 = vpop.f32.mrb[141].mxu0  ;;  %v3181_v24 = vld [vmem:[%s17541_s5 + $0x60] sm:$0xff] }
 0x31b   :  { %v11117_v0 = vpop.f32.mrb[142].mxu0  ;;  %v3182_v19 = vld [vmem:[%s17541_s5 + $0x68] sm:$0xff] }
 0x31c   :  { %17894 = vst [vmem:[#allocation31_spill] sm:$0xff] %v11117_v0  ;;  %v1741_v37 = vadd.f32 %v1740_v16, %v1669_v62  ;;  %v1588_v8 = vadd.f32 %v1587_v10, %v11117_v0  ;;  %v1670_v4 = vmul.f32 %v11117_v0, %v11117_v0  ;;  %v8390_v1 = vpop.f32.mrb[143].mxu0  ;;  %9228 = vmatpush3.bf16.msra.mxu1 %v9227_v34 }
 0x31d   :  { %v9230_v16 = vpack.c.bf16 %v3182_v19, %v3181_v24  ;;  %9229 = vmatprep.subr.bf16.mxu1 %v17891_v51  ;;  %v9233_v24 = vpack.c.bf16 %v3184_v38, %v3183_v49 }
 0x31e   :  { %v1742_v32 = vadd.f32 %v1741_v37, %v1670_v4 }
 0x320   :  { %9231 = vmatpush3.bf16.msra.mxu1 %v9230_v16 }
 0x321   :  { %v1510_v10 = vpop.f32.mrb[144].mxu0  ;;  %9232 = vmatprep.subr.bf16.mxu1 %v17891_v51 }
 0x322   :  { %v1590_v52 = vsel %vm17734_vm4, %v1510_v10, 0.0  ;;  %v1671_v62 = vmul.f32 %v1510_v10, %v1510_v10  ;;  %v8393_v1 = vpop.f32.mrb[145].mxu0 }
 0x323   :  { %v1591_v0 = vadd.f32 %v1590_v52, %v1588_v8  ;;  %v1513_v37 = vpop.f32.mrb[146].mxu0  ;;  %v1516_v8 = vmul.f32 0.0002230212, %v11142_v42 }
 0x324   :  { %v1743_v34 = vsel %vm17734_vm4, %v1671_v62, 0.0  ;;  %v8394_v4 = vpop.f32.mrb[147].mxu0  ;;  %9234 = vmatpush3.bf16.msra.mxu1 %v9233_v24  ;;  %v17896_v62 = vmov 0.0  }
 0x325   :  { %v1592_v19 = vrot.slane %v1591_v0, 4  ;;  %v1744_v61 = vadd.f32 %v1743_v34, %v1742_v32  ;;  %8646 = vmatprep.subr.bf16.mxu1 %v17896_v62  ;;  %v11146_v38 = vadd.f32 0.0017301039, %v1516_v8  ;;  %v255_v8 = vld [vmem:[%s17542_s9] sm:$0xff]  ;;  %v17917_v62 = vld [vmem:[#allocation15_spill] sm:$0xff] }
 0x327   :  { %v1593_v23 = vadd.f32 %v1592_v19, %v1591_v0  ;;  %v1745_v9 = vrot.slane %v1744_v61, 4  ;;  %17897 = vst [vmem:[#allocation33_spill] sm:$0xff] %v11146_v38 }
 0x329   :  { %v1594_v52 = vrot.slane %v1593_v23, 2  ;;  %v1746_v1 = vadd.f32 %v1745_v9, %v1744_v61  ;;  %v1761_v9 = vlaneseq }
 0x32b   :  { %v1595_v16 = vadd.f32 %v1594_v52, %v1593_v23  ;;  %v1747_v49 = vrot.slane %v1746_v1, 2  ;;  %v11150_v61 = vshrl.u32 %v1761_v9, 7  ;;  %v17900_v9 = vld [vmem:[#allocation2_spill] sm:$0xff] }
 0x32d   :  { %v1596_v32 = vrot.slane %v1595_v16, 1  ;;  %v1748_v37 = vadd.f32 %v1747_v49, %v1746_v1  ;;  %17898 = vst [vmem:[#allocation34_spill] sm:$0xff] %v11150_v61  ;;  %v17584_v52 = vsub.s32 0, %v11150_v61 }
 0x32f   :  { %v1597_v34 = vadd.f32 %v1596_v32, %v1595_v16  ;;  %v1749_v4 = vrot.slane %v1748_v37, 1 }
 0x331   :  { %v1598_v51 = vmul.f32 %v1597_v34, %v11146_v38  ;;  %v1750_v54 = vadd.f32 %v1749_v4, %v1748_v37 }
 0x333   :  { %v1751_v0 = vmul.f32 %v1750_v54, %v11146_v38  ;;  %v1752_v24 = vmul.f32 %v1598_v51, %v1598_v51  ;;  %v17913_v38 = vld [vmem:[#allocation13_spill] sm:$0xff] }
 0x335   :  { %v1753_v19 = vsub.f32 %v1751_v0, %v1752_v24 }
 0x337   :  { %v1754_v42 = vmax.f32 %v1753_v19, 0.0 }
 0x339   :  { %v1755_v44 = vadd.f32 1e-05, %v1754_v42  ;;  %v17585_v42 = vsub.s32 1, %v11150_v61  ;;  %v17919_v61 = vld [vmem:[#allocation16_spill] sm:$0xff] }
 0x33b   :  { %9644 = vrsqrt.f32 %v1755_v44 }
 0x345   :  { %v9645_v23 = vpop.eup %9644 }
 0x346   :  { %v1758_v1 = vrot.slane %v9645_v23, 1  ;;  %v17901_v23 = vld [vmem:[#allocation3_spill] sm:$0xff] }
 0x348   :  { %v1760_v16 = vmul.f32 %v1758_v1, %v255_v8  ;;  %v17903_v1 = vld [vmem:[#allocation5_spill] sm:$0xff] }
 0x34a   :  { %v11158_v54 = vrot.slane %v1760_v16, %v17584_v52  ;;  %v1839_v49 = vrot.slane %v1760_v16, 7  ;;  %v17904_v16 = vld [vmem:[#allocation6_spill] sm:$0xff]  ;;  %v17909_v52 = vld [vmem:[#allocation11_spill] sm:$0xff] }
 0x34c   :  { %v1837_v44 = vmul.f32 %v11158_v54, %v1510_v10  ;;  %v1841_v32 = vmul.f32 %v1839_v49, %v1598_v51  ;;  %v11164_v37 = vmul.f32 %v11158_v54, %v10504_v27  ;;  %v11168_v34 = vmul.f32 %v11158_v54, %v10509_v30  ;;  %v17905_v49 = vld [vmem:[#allocation7_spill] sm:$0xff] }
 0x34d   :  { %v11172_v4 = vmul.f32 %v11158_v54, %v10532_v40  ;;  %v11176_v0 = vmul.f32 %v11158_v54, %v10540_v45  ;;  %v11180_v10 = vmul.f32 %v11158_v54, %v10560_v55  ;;  %v11184_v27 = vmul.f32 %v11158_v54, %v10568_v60 }
 0x34e   :  { %v1842_v51 = vsub.f32 %v255_v8, %v1841_v32  ;;  %v11188_v30 = vmul.f32 %v11158_v54, %v10588_v7  ;;  %v11192_v40 = vmul.f32 %v11158_v54, %v10596_v12  ;;  %v11196_v45 = vmul.f32 %v11158_v54, %v10616_v22  ;;  %v17902_v8 = vld [vmem:[#allocation4_spill] sm:$0xff] }
 0x34f   :  { %v11200_v55 = vmul.f32 %v11158_v54, %v10624_v28  ;;  %v11204_v60 = vmul.f32 %v11158_v54, %v10644_v39  ;;  %v11208_v7 = vmul.f32 %v11158_v54, %v10652_v46  ;;  %v11212_v12 = vmul.f32 %v11158_v54, %v10672_v57  ;;  %v17906_v32 = vld [vmem:[#allocation8_spill] sm:$0xff] }
 0x350   :  { %v11216_v22 = vrot.slane %v1842_v51, %v17585_v42  ;;  %v11220_v28 = vmul.f32 %v11158_v54, %v10680_v63  ;;  %v11224_v39 = vmul.f32 %v11158_v54, %v10700_v11  ;;  %v11228_v46 = vmul.f32 %v11158_v54, %v10708_v17  ;;  %v17911_v42 = vld [vmem:[#allocation12_spill] sm:$0xff] }
 0x351   :  { %v11232_v57 = vmul.f32 %v11158_v54, %v10728_v31  ;;  %v11236_v24 = vmul.f32 %v11158_v54, %v10736_v36  ;;  %v11240_v63 = vmul.f32 %v11158_v54, %v10756_v50  ;;  %v11244_v11 = vmul.f32 %v11158_v54, %v10764_v56 }
 0x352   :  { %v11247_v19 = vadd.f32 %v11216_v22, %v1837_v44  ;;  %v11251_v17 = vmul.f32 %v11158_v54, %v10784_v6  ;;  %v11255_v31 = vmul.f32 %v11158_v54, %v10789_v13  ;;  %v11259_v36 = vmul.f32 %v11158_v54, %v10806_v25 }
 0x353   :  { %v11263_v50 = vmul.f32 %v11158_v54, %v10811_v33  ;;  %v11267_v56 = vmul.f32 %v11158_v54, %v10828_v48  ;;  %v11271_v6 = vmul.f32 %v11158_v54, %v10833_v53  ;;  %v11275_v13 = vmul.f32 %v11158_v54, %v10850_v5 }
 0x354   :  { %17899 = vst [vmem:[#allocation35_spill] sm:$0xff] %v11247_v19  ;;  %v11279_v25 = vmul.f32 %v11158_v54, %v10855_v14  ;;  %v11283_v33 = vmul.f32 %v11158_v54, %v10860_v21  ;;  %v11287_v48 = vmul.f32 %v11158_v54, %v10865_v29  ;;  %v11291_v53 = vmul.f32 %v11158_v54, %v10870_v41  ;;  %v17915_v19 = vld [vmem:[#allocation14_spill] sm:$0xff] }
 0x355   :  { %v11295_v5 = vmul.f32 %v11158_v54, %v10875_v47  ;;  %v11299_v14 = vmul.f32 %v11158_v54, %v10880_v59  ;;  %v11303_v21 = vmul.f32 %v11158_v54, %v10885_v2  ;;  %v11307_v29 = vmul.f32 %v11158_v54, %v10890_v15 }
 0x356   :  { %v11311_v41 = vmul.f32 %v11158_v54, %v10895_v20  ;;  %v11315_v47 = vmul.f32 %v11158_v54, %v10900_v35  ;;  %v11319_v59 = vmul.f32 %v11158_v54, %v10905_v43  ;;  %v11323_v2 = vmul.f32 %v11158_v54, %v10910_v58 }
 0x357   :  { %v11327_v15 = vmul.f32 %v11158_v54, %v10915_v3  ;;  %v11331_v20 = vmul.f32 %v11158_v54, %v10920_v18  ;;  %v11335_v35 = vmul.f32 %v11158_v54, %v10925_v26  ;;  %v11339_v43 = vmul.f32 %v11158_v54, %v17900_v9  ;;  %v17907_v9 = vld [vmem:[#allocation9_spill] sm:$0xff] }
 0x358   :  { %v11343_v58 = vmul.f32 %v11158_v54, %v17901_v23  ;;  %v11347_v3 = vmul.f32 %v11158_v54, %v17902_v8  ;;  %v11351_v18 = vmul.f32 %v11158_v54, %v17903_v1  ;;  %v11355_v26 = vmul.f32 %v11158_v54, %v17904_v16  ;;  %v17908_v8 = vld [vmem:[#allocation10_spill] sm:$0xff] }
 0x359   :  { %v11359_v44 = vmul.f32 %v11158_v54, %v17905_v49  ;;  %v11363_v51 = vmul.f32 %v11158_v54, %v17906_v32  ;;  %v11367_v23 = vmul.f32 %v11158_v54, %v17907_v9  ;;  %v11371_v1 = vmul.f32 %v11158_v54, %v17908_v8 }
 0x35a   :  { %v11375_v16 = vmul.f32 %v11158_v54, %v17909_v52  ;;  %v11379_v49 = vmul.f32 %v11158_v54, %v17911_v42  ;;  %v11383_v32 = vmul.f32 %v11158_v54, %v17913_v38  ;;  %v11387_v9 = vmul.f32 %v11158_v54, %v17915_v19 }
 0x35b   :  { %v11391_v8 = vmul.f32 %v11158_v54, %v17917_v62  ;;  %v11395_v52 = vmul.f32 %v11158_v54, %v17919_v61 }
 0x35c   :  { %17910 = vst [vmem:[#allocation2_spill] sm:$0xff] %v11375_v16  ;;  %17912 = vst [vmem:[#allocation3_spill] sm:$0xff] %v11379_v49  ;;  %v17921_v16 = vld [vmem:[#allocation17_spill] sm:$0xff]  ;;  %v17923_v49 = vld [vmem:[#allocation18_spill] sm:$0xff] }
 0x35d   :  { %17914 = vst [vmem:[#allocation4_spill] sm:$0xff] %v11383_v32  ;;  %17916 = vst [vmem:[#allocation5_spill] sm:$0xff] %v11387_v9  ;;  %v11399_v42 = vmul.f32 %v11158_v54, %v17921_v16  ;;  %v11403_v38 = vmul.f32 %v11158_v54, %v17923_v49  ;;  %v17925_v32 = vld [vmem:[#allocation19_spill] sm:$0xff]  ;;  %v17927_v9 = vld [vmem:[#allocation20_spill] sm:$0xff] }
 0x35e   :  { %17918 = vst [vmem:[#allocation6_spill] sm:$0xff] %v11391_v8  ;;  %17920 = vst [vmem:[#allocation7_spill] sm:$0xff] %v11395_v52  ;;  %v11407_v19 = vmul.f32 %v11158_v54, %v17925_v32  ;;  %v11411_v62 = vmul.f32 %v11158_v54, %v17927_v9  ;;  %v17929_v8 = vld [vmem:[#allocation21_spill] sm:$0xff]  ;;  %v17931_v52 = vld [vmem:[#allocation22_spill] sm:$0xff] }
 0x35f   :  { %17922 = vst [vmem:[#allocation8_spill] sm:$0xff] %v11399_v42  ;;  %17924 = vst [vmem:[#allocation9_spill] sm:$0xff] %v11403_v38  ;;  %v11415_v61 = vmul.f32 %v11158_v54, %v17929_v8  ;;  %v11419_v16 = vmul.f32 %v11158_v54, %v17931_v52  ;;  %v17933_v42 = vld [vmem:[#allocation23_spill] sm:$0xff]  ;;  %v17935_v38 = vld [vmem:[#allocation24_spill] sm:$0xff] }
 0x360   :  { %17926 = vst [vmem:[#allocation10_spill] sm:$0xff] %v11407_v19  ;;  %17928 = vst [vmem:[#allocation11_spill] sm:$0xff] %v11411_v62  ;;  %v11423_v49 = vmul.f32 %v11158_v54, %v17933_v42  ;;  %v11427_v32 = vmul.f32 %v11158_v54, %v17935_v38  ;;  %v17937_v19 = vld [vmem:[#allocation25_spill] sm:$0xff]  ;;  %v17939_v62 = vld [vmem:[#allocation26_spill] sm:$0xff] }
 0x361   :  { %17930 = vst [vmem:[#allocation12_spill] sm:$0xff] %v11415_v61  ;;  %17932 = vst [vmem:[#allocation13_spill] sm:$0xff] %v11419_v16  ;;  %v11431_v9 = vmul.f32 %v11158_v54, %v17937_v19  ;;  %v11435_v8 = vmul.f32 %v11158_v54, %v17939_v62  ;;  %v17940_v61 = vld [vmem:[#allocation27_spill] sm:$0xff]  ;;  %v17941_v16 = vld [vmem:[#allocation28_spill] sm:$0xff] }
 0x362   :  { %17934 = vst [vmem:[#allocation14_spill] sm:$0xff] %v11423_v49  ;;  %17936 = vst [vmem:[#allocation15_spill] sm:$0xff] %v11427_v32  ;;  %v11439_v52 = vmul.f32 %v11158_v54, %v17940_v61  ;;  %v11443_v42 = vmul.f32 %v11158_v54, %v17941_v16  ;;  %v17942_v49 = vld [vmem:[#allocation29_spill] sm:$0xff]  ;;  %v17943_v32 = vld [vmem:[#allocation30_spill] sm:$0xff]  ;;  %v11459_v61 = vadd.f32 %v11216_v22, %v11164_v37 }
 0x363   :  { %17938 = vst [vmem:[#allocation16_spill] sm:$0xff] %v11431_v9  ;;  %v11447_v38 = vmul.f32 %v11158_v54, %v17942_v49  ;;  %v11451_v19 = vmul.f32 %v11158_v54, %v17943_v32  ;;  %v17944_v9 = vld [vmem:[#allocation31_spill] sm:$0xff]  ;;  %v11463_v16 = vadd.f32 %v11216_v22, %v11168_v34  ;;  %v11467_v49 = vadd.f32 %v11216_v22, %v11172_v4 }
 0x364   :  { %v11455_v62 = vmul.f32 %v11158_v54, %v17944_v9  ;;  %v11471_v32 = vadd.f32 %v11216_v22, %v11176_v0  ;;  %v11475_v54 = vadd.f32 %v11216_v22, %v11180_v10  ;;  %v11479_v37 = vadd.f32 %v11216_v22, %v11184_v27  ;;  %v17959_v9 = vld [vmem:[#allocation2_spill] sm:$0xff] }
 0x365   :  { %v11483_v34 = vadd.f32 %v11216_v22, %v11188_v30  ;;  %v11487_v4 = vadd.f32 %v11216_v22, %v11192_v40  ;;  %v11491_v0 = vadd.f32 %v11216_v22, %v11196_v45  ;;  %v11495_v10 = vadd.f32 %v11216_v22, %v11200_v55 }
 0x366   :  { %v11499_v27 = vadd.f32 %v11216_v22, %v11204_v60  ;;  %v11503_v30 = vadd.f32 %v11216_v22, %v11208_v7  ;;  %v11507_v40 = vadd.f32 %v11216_v22, %v11212_v12  ;;  %v11511_v45 = vadd.f32 %v11216_v22, %v11220_v28 }
 0x367   :  { %v11515_v55 = vadd.f32 %v11216_v22, %v11224_v39  ;;  %v11519_v60 = vadd.f32 %v11216_v22, %v11228_v46  ;;  %v11523_v7 = vadd.f32 %v11216_v22, %v11232_v57  ;;  %v11527_v12 = vadd.f32 %v11216_v22, %v11236_v24 }
 0x368   :  { %v11531_v28 = vadd.f32 %v11216_v22, %v11240_v63  ;;  %v11535_v39 = vadd.f32 %v11216_v22, %v11244_v11  ;;  %v11539_v46 = vadd.f32 %v11216_v22, %v11251_v17  ;;  %v11543_v57 = vadd.f32 %v11216_v22, %v11255_v31 }
 0x369   :  { %v11547_v24 = vadd.f32 %v11216_v22, %v11259_v36  ;;  %v11551_v63 = vadd.f32 %v11216_v22, %v11263_v50  ;;  %v11555_v11 = vadd.f32 %v11216_v22, %v11267_v56  ;;  %v11559_v17 = vadd.f32 %v11216_v22, %v11271_v6 }
 0x36a   :  { %v11563_v31 = vadd.f32 %v11216_v22, %v11275_v13  ;;  %v11567_v36 = vadd.f32 %v11216_v22, %v11279_v25  ;;  %v11571_v50 = vadd.f32 %v11216_v22, %v11283_v33  ;;  %v11575_v56 = vadd.f32 %v11216_v22, %v11287_v48 }
 0x36b   :  { %v11579_v6 = vadd.f32 %v11216_v22, %v11291_v53  ;;  %v11583_v13 = vadd.f32 %v11216_v22, %v11295_v5  ;;  %v11587_v25 = vadd.f32 %v11216_v22, %v11299_v14  ;;  %v11591_v33 = vadd.f32 %v11216_v22, %v11303_v21 }
 0x36c   :  { %v11595_v48 = vadd.f32 %v11216_v22, %v11307_v29  ;;  %v11599_v53 = vadd.f32 %v11216_v22, %v11311_v41  ;;  %v11603_v5 = vadd.f32 %v11216_v22, %v11315_v47  ;;  %v11607_v14 = vadd.f32 %v11216_v22, %v11319_v59 }
 0x36d   :  { %v11611_v21 = vadd.f32 %v11216_v22, %v11323_v2  ;;  %v11615_v29 = vadd.f32 %v11216_v22, %v11327_v15  ;;  %v11619_v41 = vadd.f32 %v11216_v22, %v11331_v20  ;;  %v11623_v47 = vadd.f32 %v11216_v22, %v11335_v35 }
 0x36e   :  { %17945 = vst [vmem:[#allocation17_spill] sm:$0xff] %v11607_v14  ;;  %v11627_v59 = vadd.f32 %v11216_v22, %v11339_v43  ;;  %v11631_v2 = vadd.f32 %v11216_v22, %v11343_v58  ;;  %v11635_v15 = vadd.f32 %v11216_v22, %v11347_v3  ;;  %v11639_v20 = vadd.f32 %v11216_v22, %v11351_v18 }
 0x36f   :  { %17946 = vst [vmem:[#allocation18_spill] sm:$0xff] %v11611_v21  ;;  %17947 = vst [vmem:[#allocation19_spill] sm:$0xff] %v11615_v29  ;;  %v11643_v35 = vadd.f32 %v11216_v22, %v11355_v26  ;;  %v11647_v43 = vadd.f32 %v11216_v22, %v11359_v44  ;;  %v11651_v58 = vadd.f32 %v11216_v22, %v11363_v51 }
 0x370   :  { %17948 = vst [vmem:[#allocation20_spill] sm:$0xff] %v11619_v41  ;;  %17949 = vst [vmem:[#allocation21_spill] sm:$0xff] %v11623_v47  ;;  %v11655_v3 = vadd.f32 %v11216_v22, %v11367_v23  ;;  %v11659_v18 = vadd.f32 %v11216_v22, %v11371_v1  ;;  %v11663_v26 = vadd.f32 %v11216_v22, %v17959_v9  ;;  %v1921_v47 = vmul.f32 0.5, %v11463_v16 }
 0x371   :  { %17950 = vst [vmem:[#allocation22_spill] sm:$0xff] %v11627_v59  ;;  %17951 = vst [vmem:[#allocation23_spill] sm:$0xff] %v11631_v2 }
 0x372   :  { %17952 = vst [vmem:[#allocation24_spill] sm:$0xff] %v11635_v15  ;;  %17953 = vst [vmem:[#allocation25_spill] sm:$0xff] %v11639_v20  ;;  %v17997_v20 = vld [vmem:[#allocation32_spill] sm:$0xff] }
 0x373   :  { %17954 = vst [vmem:[#allocation26_spill] sm:$0xff] %v11643_v35  ;;  %17955 = vst [vmem:[#allocation27_spill] sm:$0xff] %v11647_v43  ;;  %v17961_v35 = vld [vmem:[#allocation3_spill] sm:$0xff]  ;;  %v17963_v43 = vld [vmem:[#allocation4_spill] sm:$0xff] }
 0x374   :  { %17956 = vst [vmem:[#allocation28_spill] sm:$0xff] %v11651_v58  ;;  %17957 = vst [vmem:[#allocation29_spill] sm:$0xff] %v11655_v3  ;;  %v11667_v44 = vadd.f32 %v11216_v22, %v17961_v35  ;;  %v11671_v51 = vadd.f32 %v11216_v22, %v17963_v43  ;;  %v17965_v58 = vld [vmem:[#allocation5_spill] sm:$0xff]  ;;  %v17967_v3 = vld [vmem:[#allocation6_spill] sm:$0xff] }
 0x375   :  { %17958 = vst [vmem:[#allocation30_spill] sm:$0xff] %v11659_v18  ;;  %17960 = vst [vmem:[#allocation31_spill] sm:$0xff] %v11663_v26  ;;  %v11675_v23 = vadd.f32 %v11216_v22, %v17965_v58  ;;  %v11679_v1 = vadd.f32 %v11216_v22, %v17967_v3  ;;  %v17969_v18 = vld [vmem:[#allocation7_spill] sm:$0xff]  ;;  %v17971_v26 = vld [vmem:[#allocation8_spill] sm:$0xff] }
 0x376   :  { %17962 = vst [vmem:[#allocation2_spill] sm:$0xff] %v11667_v44  ;;  %17964 = vst [vmem:[#allocation3_spill] sm:$0xff] %v11671_v51  ;;  %v11683_v9 = vadd.f32 %v11216_v22, %v17969_v18  ;;  %v11687_v35 = vadd.f32 %v11216_v22, %v17971_v26  ;;  %v17973_v44 = vld [vmem:[#allocation9_spill] sm:$0xff]  ;;  %v17975_v51 = vld [vmem:[#allocation10_spill] sm:$0xff] }
 0x377   :  { %17966 = vst [vmem:[#allocation4_spill] sm:$0xff] %v11675_v23  ;;  %17968 = vst [vmem:[#allocation5_spill] sm:$0xff] %v11679_v1  ;;  %v11691_v43 = vadd.f32 %v11216_v22, %v17973_v44  ;;  %v11695_v58 = vadd.f32 %v11216_v22, %v17975_v51  ;;  %v17977_v23 = vld [vmem:[#allocation11_spill] sm:$0xff]  ;;  %v17979_v1 = vld [vmem:[#allocation12_spill] sm:$0xff] }
 0x378   :  { %17970 = vst [vmem:[#allocation6_spill] sm:$0xff] %v11683_v9  ;;  %17972 = vst [vmem:[#allocation7_spill] sm:$0xff] %v11687_v35  ;;  %v11699_v3 = vadd.f32 %v11216_v22, %v17977_v23  ;;  %v11703_v18 = vadd.f32 %v11216_v22, %v17979_v1  ;;  %v17981_v9 = vld [vmem:[#allocation13_spill] sm:$0xff]  ;;  %v17983_v35 = vld [vmem:[#allocation14_spill] sm:$0xff]  ;;  %v11723_v1 = vadd.f32 %v11216_v22, %v11435_v8 }
 0x379   :  { %17974 = vst [vmem:[#allocation8_spill] sm:$0xff] %v11691_v43  ;;  %17976 = vst [vmem:[#allocation9_spill] sm:$0xff] %v11695_v58  ;;  %v11707_v26 = vadd.f32 %v11216_v22, %v17981_v9  ;;  %v11711_v44 = vadd.f32 %v11216_v22, %v17983_v35  ;;  %v17985_v43 = vld [vmem:[#allocation15_spill] sm:$0xff]  ;;  %v17987_v58 = vld [vmem:[#allocation16_spill] sm:$0xff]  ;;  %v11727_v9 = vadd.f32 %v11216_v22, %v11439_v52  ;;  %v1994_v52 = vmul.f32 0.044715, %v11463_v16 }
 0x37a   :  { %17978 = vst [vmem:[#allocation10_spill] sm:$0xff] %v11699_v3  ;;  %17980 = vst [vmem:[#allocation11_spill] sm:$0xff] %v11703_v18  ;;  %v11715_v51 = vadd.f32 %v11216_v22, %v17985_v43  ;;  %v11719_v23 = vadd.f32 %v11216_v22, %v17987_v58  ;;  %v11731_v35 = vadd.f32 %v11216_v22, %v11443_v42 }
 0x37b   :  { %17982 = vst [vmem:[#allocation12_spill] sm:$0xff] %v11707_v26  ;;  %17984 = vst [vmem:[#allocation13_spill] sm:$0xff] %v11711_v44  ;;  %v11735_v43 = vadd.f32 %v11216_v22, %v11447_v38  ;;  %v11739_v58 = vadd.f32 %v11216_v22, %v11451_v19  ;;  %v11743_v8 = vadd.f32 %v11216_v22, %v11455_v62  ;;  %v1997_v38 = vmul.f32 0.044715, %v11475_v54 }
 0x37c   :  { %17986 = vst [vmem:[#allocation14_spill] sm:$0xff] %v11715_v51  ;;  %17988 = vst [vmem:[#allocation15_spill] sm:$0xff] %v11719_v23 }
 0x37d   :  { %17989 = vst [vmem:[#allocation16_spill] sm:$0xff] %v11723_v1  ;;  %17990 = vst [vmem:[#allocation36_spill] sm:$0xff] %v11727_v9  ;;  %v1993_v1 = vmul.f32 0.044715, %v11459_v61  ;;  %v1995_v9 = vmul.f32 0.044715, %v11467_v49  ;;  %v2070_v62 = vmul.f32 %v1997_v38, %v11475_v54 }
 0x37e   :  { %17991 = vst [vmem:[#allocation37_spill] sm:$0xff] %v11731_v35  ;;  %17992 = vst [vmem:[#allocation38_spill] sm:$0xff] %v11735_v43  ;;  %v1996_v35 = vmul.f32 0.044715, %v11471_v32  ;;  %v2067_v43 = vmul.f32 %v1994_v52, %v11463_v16 }
 0x37f   :  { %17993 = vst [vmem:[#allocation39_spill] sm:$0xff] %v11739_v58  ;;  %17994 = vst [vmem:[#allocation40_spill] sm:$0xff] %v11743_v8  ;;  %v2066_v42 = vmul.f32 %v1993_v1, %v11459_v61  ;;  %v2068_v19 = vmul.f32 %v1995_v9, %v11467_v49  ;;  %v1998_v8 = vmul.f32 0.044715, %v11479_v37  ;;  %v2143_v38 = vmul.f32 %v2070_v62, %v11475_v54 }
 0x380   :  { %v2069_v22 = vmul.f32 %v1996_v35, %v11471_v32  ;;  %v2140_v23 = vmul.f32 %v2067_v43, %v11463_v16 }
 0x381   :  { %v2139_v58 = vmul.f32 %v2066_v42, %v11459_v61  ;;  %v2141_v1 = vmul.f32 %v2068_v19, %v11467_v49  ;;  %v1999_v42 = vmul.f32 0.044715, %v11483_v34  ;;  %v2071_v18 = vmul.f32 %v1998_v8, %v11479_v37  ;;  %v11776_v8 = vpop.permute.xlu0 %2579 }
 0x382   :  { %v2142_v44 = vmul.f32 %v2069_v22, %v11471_v32  ;;  %v2213_v52 = vadd.f32 %v2140_v23, %v11463_v16  ;;  %v2000_v19 = vmul.f32 0.044715, %v11487_v4  ;;  %v2216_v22 = vadd.f32 %v2143_v38, %v11475_v54  ;;  %17998 = vst [vmem:[#allocation32_spill] sm:$0xff] %v11776_v8 }
 0x383   :  { %v2212_v51 = vadd.f32 %v2139_v58, %v11459_v61  ;;  %v2214_v9 = vadd.f32 %v2141_v1, %v11467_v49  ;;  %v2072_v58 = vmul.f32 %v1999_v42, %v11483_v34  ;;  %v17995_v1 = vld [vmem:[#allocation34_spill] sm:$0xff]  ;;  %v2001_v42 = vmul.f32 0.044715, %v11491_v0 }
 0x384   :  { %v2215_v35 = vadd.f32 %v2142_v44, %v11471_v32  ;;  %v2286_v43 = vmul.f32 0.7978846, %v2213_v52  ;;  %v17996_v44 = vsub.s32 1, %v17995_v1  ;;  %v2073_v52 = vmul.f32 %v2000_v19, %v11487_v4 }
 0x385   :  { %v2285_v26 = vmul.f32 0.7978846, %v2212_v51  ;;  %v2287_v3 = vmul.f32 0.7978846, %v2214_v9  ;;  %v2144_v51 = vmul.f32 %v2071_v18, %v11479_v37  ;;  %v2289_v9 = vmul.f32 0.7978846, %v2216_v22  ;;  %v11794_v22 = vpop.permute.xlu0 %2584 }
 0x386   :  { %v2288_v23 = vmul.f32 0.7978846, %v2215_v35  ;;  %v11774_v62 = vrot.slane %v17997_v20, %v17996_v44  ;;  %v17999_v35 = vsub.s32 0, %v17995_v1  ;;  %v2146_v19 = vmul.f32 %v2073_v52, %v11487_v4  ;;  %18000 = vst [vmem:[#allocation41_spill] sm:$0xff] %v11794_v22  ;;  %v11799_v1 = vpop.permute.xlu1 %2589 }
 0x387   :  { %9646 = vtanh.f32 %v2285_v26  ;;  %v2145_v26 = vmul.f32 %v2072_v58, %v11483_v34  ;;  %v2074_v44 = vmul.f32 %v2001_v42, %v11491_v0  ;;  %18001 = vst [vmem:[#allocation42_spill] sm:$0xff] %v11799_v1  ;;  %v1922_v16 = vmul.f32 0.5, %v11467_v49 }
 0x388   :  { %9648 = vtanh.f32 %v2286_v43  ;;  %v11785_v18 = vrot.slane %v17997_v20, %v17999_v35  ;;  %v2946_v38 = vmul.f32 %v11774_v62, %v11776_v8  ;;  %v4515_v43 = vld [vmem:[%s17543_s7] sm:$0xf]  ;;  %v2002_v20 = vmul.f32 0.044715, %v11495_v10 }
 0x389   :  { %9650 = vtanh.f32 %v2287_v3  ;;  %v2217_v3 = vadd.f32 %v2144_v51, %v11479_v37  ;;  %v2218_v58 = vadd.f32 %v2145_v26, %v11483_v34  ;;  %v2947_v15 = vmul.f32 %v11774_v62, %v11794_v22 }
 0x38a   :  { %9652 = vtanh.f32 %v2288_v23  ;;  %v3023_v8 = vadd.f32 %v11785_v18, %v2946_v38  ;;  %v1920_v26 = vmul.f32 0.5, %v11459_v61  ;;  %v4517_v59 = vsel %vm555_vm0, %v4515_v43, 0 }
 0x38b   :  { %9654 = vtanh.f32 %v2289_v9  ;;  %v2290_v51 = vmul.f32 0.7978846, %v2217_v3  ;;  %v2948_v9 = vmul.f32 %v11774_v62, %v11799_v1  ;;  %v2291_v41 = vmul.f32 0.7978846, %v2218_v58 }
 0x38c   :  { %v2219_v38 = vadd.f32 %v2146_v19, %v11487_v4  ;;  %v2147_v29 = vmul.f32 %v2074_v44, %v11491_v0  ;;  %v2075_v22 = vmul.f32 %v2002_v20, %v11495_v10  ;;  %v2003_v61 = vmul.f32 0.044715, %v11499_v27  ;;  %v11816_v19 = vpop.permute.xlu1 %2594 }
 0x38d   :  { %9656 = vtanh.f32 %v2290_v51  ;;  %v2004_v58 = vmul.f32 0.044715, %v11503_v30  ;;  %v18002_v51 = vmov 0.0  }
 0x38e   :  { %9658 = vtanh.f32 %v2291_v41  ;;  %v2292_v44 = vmul.f32 0.7978846, %v2219_v38 }
 0x390   :  { %9660 = vtanh.f32 %v2292_v44  ;;  %v11842_v44 = vpop.permute.xlu1 %2604 }
 0x391   :  { %v9647_v23 = vpop.eup %9646 }
 0x392   :  { %v9649_v35 = vpop.eup %9648  ;;  %v2431_v52 = vadd.f32 1.0, %v9647_v23  ;;  %v3024_v23 = vadd.f32 %v11785_v18, %v2947_v15  ;;  %v2220_v15 = vadd.f32 %v2147_v29, %v11491_v0  ;;  %v1923_v29 = vmul.f32 0.5, %v11471_v32 }
 0x393   :  { %v9651_v2 = vpop.eup %9650  ;;  %v2432_v3 = vadd.f32 1.0, %v9649_v35  ;;  %v3025_v35 = vadd.f32 %v11785_v18, %v2948_v9  ;;  %v2005_v9 = vmul.f32 0.044715, %v11507_v40 }
 0x394   :  { %v2504_v42 = vmul.f32 %v2431_v52, %v1920_v26  ;;  %v2433_v14 = vadd.f32 1.0, %v9651_v2  ;;  %v9653_v1 = vpop.eup %9652  ;;  %v2076_v2 = vmul.f32 %v2003_v61, %v11499_v27 }
 0x395   :  { %v2505_v21 = vmul.f32 %v2432_v3, %v1921_v47  ;;  %v2148_v47 = vmul.f32 %v2075_v22, %v11495_v10  ;;  %v2434_v20 = vadd.f32 1.0, %v9653_v1  ;;  %v9655_v26 = vpop.eup %9654  ;;  %v2077_v22 = vmul.f32 %v2004_v58, %v11503_v30 }
 0x396   :  { %v3096_v43 = vmul.f32 %v3023_v8, %v2504_v42  ;;  %v2949_v8 = vmul.f32 %v11774_v62, %v11816_v19  ;;  %v2506_v41 = vmul.f32 %v2433_v14, %v1922_v16  ;;  %v2293_v14 = vmul.f32 0.7978846, %v2220_v15 }
 0x397   :  { %v3097_v49 = vmul.f32 %v3024_v23, %v2505_v21  ;;  %v2221_v21 = vadd.f32 %v2148_v47, %v11495_v10  ;;  %v2149_v1 = vmul.f32 %v2076_v2, %v11499_v27  ;;  %v2507_v38 = vmul.f32 %v2434_v20, %v1923_v29  ;;  %v9657_v23 = vpop.eup %9656 }
 0x398   :  { %8428 = vmatmul.mubr.f32.vlgmr.msra.gmra.mrb[0].mxu1 %v3096_v43  ;;  %v3026_v3 = vadd.f32 %v11785_v18, %v2949_v8  ;;  %v3098_v42 = vmul.f32 %v3025_v35, %v2506_v41  ;;  %v2435_v61 = vadd.f32 1.0, %v9655_v26  ;;  %v1924_v43 = vmul.f32 0.5, %v11475_v54  ;;  %v9659_v2 = vpop.eup %9658 }
 0x399   :  { %8647 = vmatpush3.bf16.msra.mxu1 %v4517_v59  ;;  %8430 = vmatprep.mubr.msk.f32.mxu1 %vm17735_vm1, %v18002_v51  ;;  %v11826_v59 = vpop.permute.xlu0 %2599  ;;  %v2150_v16 = vmul.f32 %v2077_v22, %v11503_v30  ;;  %v2078_v58 = vmul.f32 %v2005_v9, %v11507_v40  ;;  %9662 = vtanh.f32 %v2293_v14  ;;  %v2294_v15 = vmul.f32 0.7978846, %v2221_v21 }
 0x39a   :  { %8796 = vmatprep.subr.bf16.mxu1 %v18002_v51  ;;  %v2950_v52 = vmul.f32 %v11774_v62, %v11826_v59  ;;  %v2222_v35 = vadd.f32 %v2149_v1, %v11499_v27  ;;  %v2006_v47 = vmul.f32 0.044715, %v11511_v45  ;;  %v2951_v8 = vmul.f32 %v11774_v62, %v11842_v44 }
 0x39b   :  { %v3099_v54 = vmul.f32 %v3026_v3, %v2507_v38  ;;  %v2436_v41 = vadd.f32 1.0, %v9657_v23  ;;  %v2223_v29 = vadd.f32 %v2150_v16, %v11503_v30  ;;  %v2007_v22 = vmul.f32 0.044715, %v11515_v55 }
 0x39c   :  { %8431 = vmatmul.mubr.f32.gmra.mrb[2].mxu1 %v3097_v49  ;;  %v3027_v32 = vadd.f32 %v11785_v18, %v2950_v52  ;;  %v2508_v49 = vmul.f32 %v2435_v61, %v1924_v43  ;;  %v1925_v52 = vmul.f32 0.5, %v11479_v37  ;;  %9664 = vtanh.f32 %v2294_v15  ;;  %v9661_v61 = vpop.eup %9660  ;;  %v11865_v15 = vpop.permute.xlu1 %2614 }
 0x39d   :  { %8433 = vmatprep.mubr.msk.f32.mxu1 %vm17735_vm1, %v18002_v51  ;;  %v11850_v20 = vpop.permute.xlu0 %2609  ;;  %v2295_v9 = vmul.f32 0.7978846, %v2222_v35  ;;  %v2151_v14 = vmul.f32 %v2078_v58, %v11507_v40  ;;  %v2079_v21 = vmul.f32 %v2006_v47, %v11511_v45  ;;  %v3028_v1 = vadd.f32 %v11785_v18, %v2951_v8 }
 0x39e   :  { %v2952_v26 = vmul.f32 %v11774_v62, %v11850_v20  ;;  %v3100_v3 = vmul.f32 %v3027_v32, %v2508_v49  ;;  %v2437_v38 = vadd.f32 1.0, %v9659_v2  ;;  %v1926_v23 = vmul.f32 0.5, %v11483_v34 }
 0x39f   :  { %v2296_v43 = vmul.f32 0.7978846, %v2223_v29  ;;  %v2008_v16 = vmul.f32 0.044715, %v11519_v60  ;;  %9666 = vtanh.f32 %v2295_v9  ;;  %v2224_v58 = vadd.f32 %v2151_v14, %v11507_v40 }
 0x3a0   :  { %8434 = vmatmul.mubr.f32.gmra.mrb[4].mxu1 %v3098_v42  ;;  %v2509_v42 = vmul.f32 %v2436_v41, %v1925_v52  ;;  %v3029_v37 = vadd.f32 %v11785_v18, %v2952_v26  ;;  %v2152_v32 = vmul.f32 %v2079_v21, %v11511_v45  ;;  %v2080_v35 = vmul.f32 %v2007_v22, %v11515_v55 }
 0x3a1   :  { %8436 = vmatprep.mubr.msk.f32.mxu1 %vm17735_vm1, %v18002_v51  ;;  %v2953_v47 = vmul.f32 %v11774_v62, %v11865_v15  ;;  %v2510_v34 = vmul.f32 %v2437_v38, %v1926_v23  ;;  %v2438_v8 = vadd.f32 1.0, %v9661_v61  ;;  %v11874_v49 = vpop.permute.xlu0 %2619  ;;  %v1927_v26 = vmul.f32 0.5, %v11487_v4 }
 0x3a2   :  { %v3101_v2 = vmul.f32 %v3028_v1, %v2509_v42  ;;  %v2954_v41 = vmul.f32 %v11774_v62, %v11874_v49  ;;  %9668 = vtanh.f32 %v2296_v43  ;;  %v2081_v52 = vmul.f32 %v2008_v16, %v11519_v60  ;;  %v11890_v16 = vpop.permute.xlu1 %2624 }
 0x3a3   :  { %v2297_v29 = vmul.f32 0.7978846, %v2224_v58  ;;  %v2225_v22 = vadd.f32 %v2152_v32, %v11511_v45  ;;  %v2153_v9 = vmul.f32 %v2080_v35, %v11515_v55  ;;  %v2009_v14 = vmul.f32 0.044715, %v11523_v7 }
 0x3a4   :  { %8437 = vmatmul.mubr.f32.gmra.mrb[6].mxu1 %v3099_v54  ;;  %v9663_v54 = vpop.eup %9662  ;;  %v3030_v21 = vadd.f32 %v11785_v18, %v2953_v47  ;;  %v3102_v1 = vmul.f32 %v3029_v37, %v2510_v34  ;;  %v3031_v4 = vadd.f32 %v11785_v18, %v2954_v41  ;;  %v1928_v61 = vmul.f32 0.5, %v11491_v0 }
 0x3a5   :  { %8439 = vmatprep.mubr.msk.f32.mxu1 %vm17735_vm1, %v18002_v51  ;;  %v2439_v42 = vadd.f32 1.0, %v9663_v54  ;;  %v2154_v23 = vmul.f32 %v2081_v52, %v11519_v60  ;;  %v2010_v43 = vmul.f32 0.044715, %v11527_v12  ;;  %9670 = vtanh.f32 %v2297_v29 }
 0x3a6   :  { %v9665_v38 = vpop.eup %9664  ;;  %v2298_v58 = vmul.f32 0.7978846, %v2225_v22  ;;  %v2226_v37 = vadd.f32 %v2153_v9, %v11515_v55  ;;  %v2082_v32 = vmul.f32 %v2009_v14, %v11523_v7  ;;  %v2955_v35 = vmul.f32 %v11774_v62, %v11890_v16 }
 0x3a7   :  { %v2512_v0 = vmul.f32 %v2439_v42, %v1928_v61  ;;  %v1929_v41 = vmul.f32 0.5, %v11495_v10  ;;  %v2083_v52 = vmul.f32 %v2010_v43, %v11527_v12  ;;  %v2011_v9 = vmul.f32 0.044715, %v11531_v28  ;;  %v11913_v43 = vpop.permute.xlu1 %2634 }
 0x3a8   :  { %8440 = vmatmul.mubr.f32.gmra.mrb[8].mxu1 %v3100_v3  ;;  %v2511_v3 = vmul.f32 %v2438_v8, %v1927_v26  ;;  %v11898_v8 = vpop.permute.xlu0 %2629  ;;  %v2227_v26 = vadd.f32 %v2154_v23, %v11519_v60  ;;  %9672 = vtanh.f32 %v2298_v58  ;;  %v2299_v29 = vmul.f32 0.7978846, %v2226_v37 }
 0x3a9   :  { %8442 = vmatprep.mubr.msk.f32.mxu1 %vm17735_vm1, %v18002_v51  ;;  %v9667_v34 = vpop.eup %9666  ;;  %v2956_v54 = vmul.f32 %v11774_v62, %v11898_v8  ;;  %v2155_v22 = vmul.f32 %v2082_v32, %v11523_v7  ;;  %v2156_v23 = vmul.f32 %v2083_v52, %v11527_v12  ;;  %v2012_v37 = vmul.f32 0.044715, %v11535_v39 }
 0x3aa   :  { %v3103_v47 = vmul.f32 %v3030_v21, %v2511_v3  ;;  %v3032_v21 = vadd.f32 %v11785_v18, %v2955_v35  ;;  %v2441_v42 = vadd.f32 1.0, %v9667_v34  ;;  %v2300_v61 = vmul.f32 0.7978846, %v2227_v26 }
 0x3ab   :  { %v3033_v10 = vadd.f32 %v11785_v18, %v2956_v54  ;;  %9674 = vtanh.f32 %v2299_v29  ;;  %v2228_v58 = vadd.f32 %v2155_v22, %v11523_v7  ;;  %v2957_v32 = vmul.f32 %v11774_v62, %v11913_v43 }
 0x3ac   :  { %8443 = vmatmul.mubr.f32.gmra.mrb[10].mxu1 %v3101_v2  ;;  %v2440_v2 = vadd.f32 1.0, %v9665_v38  ;;  %v9669_v14 = vpop.eup %9668  ;;  %v1930_v38 = vmul.f32 0.5, %v11499_v27  ;;  %v1931_v54 = vmul.f32 0.5, %v11503_v30  ;;  %9676 = vtanh.f32 %v2300_v61 }
 0x3ad   :  { %8445 = vmatprep.mubr.msk.f32.mxu1 %vm17735_vm1, %v18002_v51  ;;  %v2301_v26 = vmul.f32 0.7978846, %v2228_v58  ;;  %v2085_v29 = vmul.f32 %v2012_v37, %v11535_v39  ;;  %v2013_v22 = vmul.f32 0.044715, %v11539_v46  ;;  %v2014_v61 = vmul.f32 0.044715, %v11543_v57 }
 0x3ae   :  { %v2513_v3 = vmul.f32 %v2440_v2, %v1929_v41  ;;  %v2514_v27 = vmul.f32 %v2441_v42, %v1930_v38  ;;  %v11922_v2 = vpop.permute.xlu0 %2639  ;;  %v2229_v41 = vadd.f32 %v2156_v23, %v11527_v12  ;;  %v1932_v42 = vmul.f32 0.5, %v11507_v40  ;;  %v11937_v23 = vpop.permute.xlu1 %2644 }
 0x3af   :  { %v2958_v34 = vmul.f32 %v11774_v62, %v11922_v2  ;;  %9678 = vtanh.f32 %v2301_v26  ;;  %v2959_v37 = vmul.f32 %v11774_v62, %v11937_v23 }
 0x3b0   :  { %8446 = vmatmul.mubr.f32.gmra.mrb[12].mxu1 %v3102_v1  ;;  %v3104_v1 = vmul.f32 %v3031_v4, %v2512_v0  ;;  %v2084_v4 = vmul.f32 %v2011_v9, %v11531_v28  ;;  %v3105_v35 = vmul.f32 %v3032_v21, %v2513_v3  ;;  %v9671_v0 = vpop.eup %9670  ;;  %v3034_v9 = vadd.f32 %v11785_v18, %v2957_v32 }
 0x3b1   :  { %8448 = vmatprep.mubr.msk.f32.mxu1 %vm17735_vm1, %v18002_v51  ;;  %v3035_v30 = vadd.f32 %v11785_v18, %v2958_v34  ;;  %v2302_v38 = vmul.f32 0.7978846, %v2229_v41  ;;  %v1933_v34 = vmul.f32 0.5, %v11511_v45 }
 0x3b2   :  { %v2157_v52 = vmul.f32 %v2084_v4, %v11531_v28  ;;  %v9673_v3 = vpop.eup %9672  ;;  %v2086_v4 = vmul.f32 %v2013_v22, %v11539_v46 }
 0x3b3   :  { %9680 = vtanh.f32 %v2302_v38  ;;  %v2016_v38 = vmul.f32 0.044715, %v11551_v63 }
 0x3b4   :  { %8449 = vmatmul.mubr.f32.gmra.mrb[14].mxu1 %v3103_v47  ;;  %v2442_v47 = vadd.f32 1.0, %v9669_v14  ;;  %v3106_v14 = vmul.f32 %v3033_v10, %v2514_v27  ;;  %v2230_v58 = vadd.f32 %v2157_v52, %v11531_v28  ;;  %v2158_v10 = vmul.f32 %v2085_v29, %v11535_v39 }
 0x3b5   :  { %8451 = vmatprep.mubr.msk.f32.mxu1 %vm17735_vm1, %v18002_v51  ;;  %v9675_v27 = vpop.eup %9674  ;;  %v2159_v52 = vmul.f32 %v2086_v4, %v11539_v46  ;;  %v2015_v29 = vmul.f32 0.044715, %v11547_v24 }
 0x3b6   :  { %v2515_v21 = vmul.f32 %v2442_v47, %v1931_v54  ;;  %v11946_v47 = vpop.permute.xlu0 %2649  ;;  %v2087_v54 = vmul.f32 %v2014_v61, %v11543_v57  ;;  %v2303_v41 = vmul.f32 0.7978846, %v2230_v58  ;;  %v2231_v26 = vadd.f32 %v2158_v10, %v11535_v39  ;;  %v9677_v22 = vpop.eup %9676 }
 0x3b7   :  { %v11962_v61 = vpop.permute.xlu1 %2654  ;;  %v2088_v10 = vmul.f32 %v2015_v29, %v11547_v24 }
 0x3b8   :  { %8452 = vmatmul.mubr.f32.gmra.mrb[16].mxu1 %v3104_v1  ;;  %v2443_v1 = vadd.f32 1.0, %v9671_v0  ;;  %v3107_v32 = vmul.f32 %v3034_v9, %v2515_v21  ;;  %v2960_v0 = vmul.f32 %v11774_v62, %v11946_v47  ;;  %v3036_v9 = vadd.f32 %v11785_v18, %v2959_v37 }
 0x3b9   :  { %8454 = vmatprep.mubr.msk.f32.mxu1 %vm17735_vm1, %v18002_v51  ;;  %9682 = vtanh.f32 %v2303_v41  ;;  %v2304_v58 = vmul.f32 0.7978846, %v2231_v26  ;;  %v2961_v4 = vmul.f32 %v11774_v62, %v11962_v61  ;;  %v2161_v26 = vmul.f32 %v2088_v10, %v11547_v24 }
 0x3ba   :  { %v2516_v40 = vmul.f32 %v2443_v1, %v1932_v42  ;;  %v2445_v1 = vadd.f32 1.0, %v9675_v27  ;;  %v3037_v45 = vadd.f32 %v11785_v18, %v2960_v0  ;;  %v2160_v42 = vmul.f32 %v2087_v54, %v11543_v57 }
 0x3bb   :  { %v1935_v0 = vmul.f32 0.5, %v11519_v60  ;;  %v2089_v54 = vmul.f32 %v2016_v38, %v11551_v63  ;;  %9684 = vtanh.f32 %v2304_v58  ;;  %v11985_v38 = vpop.permute.xlu1 %2664  ;;  %v2234_v58 = vadd.f32 %v2161_v26, %v11547_v24 }
 0x3bc   :  { %8455 = vmatmul.mubr.f32.gmra.mrb[18].mxu1 %v3105_v35  ;;  %v2444_v35 = vadd.f32 1.0, %v9673_v3  ;;  %v1934_v3 = vmul.f32 0.5, %v11515_v55  ;;  %v2963_v10 = vmul.f32 %v11774_v62, %v11985_v38  ;;  %v2019_v26 = vmul.f32 0.044715, %v11563_v31 }
 0x3bd   :  { %8457 = vmatprep.mubr.msk.f32.mxu1 %vm17735_vm1, %v18002_v51 }
 0x3be   :  { %v2517_v21 = vmul.f32 %v2444_v35, %v1933_v34  ;;  %v2518_v55 = vmul.f32 %v2445_v1, %v1934_v3  ;;  %v11970_v35 = vpop.permute.xlu0 %2659  ;;  %v2233_v34 = vadd.f32 %v2160_v42, %v11543_v57  ;;  %v1936_v1 = vmul.f32 0.5, %v11523_v7 }
 0x3bf   :  { %v2962_v27 = vmul.f32 %v11774_v62, %v11970_v35  ;;  %v2162_v42 = vmul.f32 %v2089_v54, %v11551_v63 }
 0x3c0   :  { %8458 = vmatmul.mubr.f32.gmra.mrb[20].mxu1 %v3106_v14  ;;  %v3108_v14 = vmul.f32 %v3035_v30, %v2516_v40  ;;  %v2232_v30 = vadd.f32 %v2159_v52, %v11539_v46  ;;  %v3109_v37 = vmul.f32 %v3036_v9, %v2517_v21  ;;  %v9679_v40 = vpop.eup %9678  ;;  %v2017_v52 = vmul.f32 0.044715, %v11555_v11 }
 0x3c1   :  { %8460 = vmatprep.mubr.msk.f32.mxu1 %vm17735_vm1, %v18002_v51  ;;  %v9681_v29 = vpop.eup %9680  ;;  %v3110_v9 = vmul.f32 %v3037_v45, %v2518_v55  ;;  %v2447_v21 = vadd.f32 1.0, %v9679_v40  ;;  %v3039_v60 = vadd.f32 %v11785_v18, %v2962_v27  ;;  %v2306_v3 = vmul.f32 0.7978846, %v2233_v34 }
 0x3c2   :  { %v2305_v41 = vmul.f32 0.7978846, %v2232_v30  ;;  %v2090_v45 = vmul.f32 %v2017_v52, %v11555_v11  ;;  %v2018_v30 = vmul.f32 0.044715, %v11559_v17  ;;  %v1937_v27 = vmul.f32 0.5, %v11527_v12 }
 0x3c3   :  { %v2520_v7 = vmul.f32 %v2447_v21, %v1936_v1  ;;  %v9683_v55 = vpop.eup %9682  ;;  %v2307_v34 = vmul.f32 0.7978846, %v2234_v58  ;;  %v3040_v52 = vadd.f32 %v11785_v18, %v2963_v10  ;;  %v1938_v21 = vmul.f32 0.5, %v11531_v28 }
 0x3c4   :  { %8461 = vmatmul.mubr.f32.gmra.mrb[22].mxu1 %v3107_v32  ;;  %v2446_v32 = vadd.f32 1.0, %v9677_v22  ;;  %v3038_v22 = vadd.f32 %v11785_v18, %v2961_v4  ;;  %9686 = vtanh.f32 %v2305_v41  ;;  %v2163_v54 = vmul.f32 %v2090_v45, %v11555_v11 }
 0x3c5   :  { %8463 = vmatprep.mubr.msk.f32.mxu1 %vm17735_vm1, %v18002_v51  ;;  %9688 = vtanh.f32 %v2306_v3  ;;  %v2091_v41 = vmul.f32 %v2018_v30, %v11559_v17  ;;  %v2020_v3 = vmul.f32 0.044715, %v11567_v36  ;;  %v2092_v45 = vmul.f32 %v2019_v26, %v11563_v31 }
 0x3c6   :  { %9690 = vtanh.f32 %v2307_v34  ;;  %v2236_v58 = vadd.f32 %v2163_v54, %v11555_v11 }
 0x3c7   :  { %v2165_v54 = vmul.f32 %v2092_v45, %v11563_v31 }
 0x3c8   :  { %8464 = vmatmul.mubr.f32.gmra.mrb[24].mxu1 %v3108_v14  ;;  %v2519_v14 = vmul.f32 %v2446_v32, %v1935_v0  ;;  %v11994_v32 = vpop.permute.xlu0 %2669  ;;  %v2235_v0 = vadd.f32 %v2162_v42, %v11551_v63  ;;  %v12009_v42 = vpop.permute.xlu1 %2674 }
 0x3c9   :  { %8466 = vmatprep.mubr.msk.f32.mxu1 %vm17735_vm1, %v18002_v51  ;;  %v2964_v40 = vmul.f32 %v11774_v62, %v11994_v32  ;;  %v2965_v30 = vmul.f32 %v11774_v62, %v12009_v42 }
 0x3ca   :  { %v3111_v4 = vmul.f32 %v3038_v22, %v2519_v14  ;;  %v9685_v14 = vpop.eup %9684  ;;  %v2308_v1 = vmul.f32 0.7978846, %v2235_v0  ;;  %v2309_v0 = vmul.f32 0.7978846, %v2236_v58 }
 0x3cb   :  { %v3041_v12 = vadd.f32 %v11785_v18, %v2964_v40  ;;  %v1939_v40 = vmul.f32 0.5, %v11535_v39 }
 0x3cc   :  { %8467 = vmatmul.mubr.f32.gmra.mrb[26].mxu1 %v3109_v37  ;;  %v2448_v37 = vadd.f32 1.0, %v9681_v29  ;;  %v3112_v29 = vmul.f32 %v3039_v60, %v2520_v7  ;;  %v2164_v60 = vmul.f32 %v2091_v41, %v11559_v17  ;;  %9692 = vtanh.f32 %v2308_v1 }
 0x3cd   :  { %8469 = vmatprep.mubr.msk.f32.mxu1 %vm17735_vm1, %v18002_v51  ;;  %v2021_v41 = vmul.f32 0.044715, %v11571_v50  ;;  %v2022_v1 = vmul.f32 0.044715, %v11575_v56  ;;  %9694 = vtanh.f32 %v2309_v0 }
 0x3ce   :  { %v2521_v22 = vmul.f32 %v2448_v37, %v1937_v27  ;;  %v9687_v7 = vpop.eup %9686  ;;  %v12018_v37 = vpop.permute.xlu0 %2679  ;;  %v2093_v27 = vmul.f32 %v2020_v3, %v11567_v36  ;;  %v2237_v34 = vadd.f32 %v2164_v60, %v11559_v17 }
 0x3cf   :  { %v9689_v26 = vpop.eup %9688  ;;  %v12034_v3 = vpop.permute.xlu1 %2684  ;;  %v2094_v60 = vmul.f32 %v2021_v41, %v11571_v50 }
 0x3d0   :  { %8470 = vmatmul.mubr.f32.gmra.mrb[28].mxu1 %v3110_v9  ;;  %v2449_v9 = vadd.f32 1.0, %v9683_v55  ;;  %v3113_v10 = vmul.f32 %v3040_v52, %v2521_v22  ;;  %v2966_v55 = vmul.f32 %v11774_v62, %v12018_v37  ;;  %v3042_v52 = vadd.f32 %v11785_v18, %v2965_v30 }
 0x3d1   :  { %8472 = vmatprep.mubr.msk.f32.mxu1 %vm17735_vm1, %v18002_v51  ;;  %v2310_v58 = vmul.f32 0.7978846, %v2237_v34  ;;  %v2967_v45 = vmul.f32 %v11774_v62, %v12034_v3  ;;  %v2167_v34 = vmul.f32 %v2094_v60, %v11571_v50 }
 0x3d2   :  { %v2522_v28 = vmul.f32 %v2449_v9, %v1938_v21  ;;  %v2451_v9 = vadd.f32 1.0, %v9687_v7  ;;  %v3043_v39 = vadd.f32 %v11785_v18, %v2966_v55  ;;  %v2166_v21 = vmul.f32 %v2093_v27, %v11567_v36 }
 0x3d3   :  { %v1941_v55 = vmul.f32 0.5, %v11543_v57  ;;  %v2095_v27 = vmul.f32 %v2022_v1, %v11575_v56  ;;  %9696 = vtanh.f32 %v2310_v58  ;;  %v12057_v1 = vpop.permute.xlu1 %2694  ;;  %v2240_v58 = vadd.f32 %v2167_v34, %v11571_v50 }
 0x3d4   :  { %8473 = vmatmul.mubr.f32.gmra.mrb[30].mxu1 %v3111_v4  ;;  %v2450_v4 = vadd.f32 1.0, %v9685_v14  ;;  %v1940_v14 = vmul.f32 0.5, %v11539_v46  ;;  %v2969_v60 = vmul.f32 %v11774_v62, %v12057_v1  ;;  %v2025_v34 = vmul.f32 0.044715, %v11587_v25 }
 0x3d5   :  { %8475 = vmatprep.mubr.msk.f32.mxu1 %vm17735_vm1, %v18002_v51 }
 0x3d6   :  { %v2523_v22 = vmul.f32 %v2450_v4, %v1939_v40  ;;  %v2524_v46 = vmul.f32 %v2451_v9, %v1940_v14  ;;  %v12042_v4 = vpop.permute.xlu0 %2689  ;;  %v2239_v40 = vadd.f32 %v2166_v21, %v11567_v36  ;;  %v1942_v9 = vmul.f32 0.5, %v11547_v24 }
 0x3d7   :  { %v2968_v7 = vmul.f32 %v11774_v62, %v12042_v4  ;;  %v2168_v21 = vmul.f32 %v2095_v27, %v11575_v56 }
 0x3d8   :  { %8476 = vmatmul.mubr.f32.gmra.mrb[32].mxu1 %v3112_v29  ;;  %v3114_v29 = vmul.f32 %v3041_v12, %v2522_v28  ;;  %v2238_v12 = vadd.f32 %v2165_v54, %v11563_v31  ;;  %v3115_v30 = vmul.f32 %v3042_v52, %v2523_v22  ;;  %v9691_v28 = vpop.eup %9690  ;;  %v2023_v54 = vmul.f32 0.044715, %v11579_v6 }
 0x3d9   :  { %8478 = vmatprep.mubr.msk.f32.mxu1 %vm17735_vm1, %v18002_v51  ;;  %v9693_v41 = vpop.eup %9692  ;;  %v3116_v52 = vmul.f32 %v3043_v39, %v2524_v46  ;;  %v2453_v22 = vadd.f32 1.0, %v9691_v28  ;;  %v3045_v57 = vadd.f32 %v11785_v18, %v2968_v7  ;;  %v2312_v14 = vmul.f32 0.7978846, %v2239_v40 }
 0x3da   :  { %v2311_v0 = vmul.f32 0.7978846, %v2238_v12  ;;  %v2096_v39 = vmul.f32 %v2023_v54, %v11579_v6  ;;  %v2024_v12 = vmul.f32 0.044715, %v11583_v13  ;;  %v9695_v46 = vpop.eup %9694  ;;  %v1943_v7 = vmul.f32 0.5, %v11551_v63 }
 0x3db   :  { %v2526_v24 = vmul.f32 %v2453_v22, %v1942_v9  ;;  %v2313_v40 = vmul.f32 0.7978846, %v2240_v58  ;;  %v3046_v54 = vadd.f32 %v11785_v18, %v2969_v60  ;;  %v1944_v22 = vmul.f32 0.5, %v11555_v11 }
 0x3dc   :  { %8479 = vmatmul.mubr.f32.gmra.mrb[34].mxu1 %v3113_v10  ;;  %v2452_v10 = vadd.f32 1.0, %v9689_v26  ;;  %v3044_v26 = vadd.f32 %v11785_v18, %v2967_v45  ;;  %9698 = vtanh.f32 %v2311_v0  ;;  %v2169_v27 = vmul.f32 %v2096_v39, %v11579_v6 }
 0x3dd   :  { %8481 = vmatprep.mubr.msk.f32.mxu1 %vm17735_vm1, %v18002_v51  ;;  %9700 = vtanh.f32 %v2312_v14  ;;  %v2097_v0 = vmul.f32 %v2024_v12, %v11583_v13  ;;  %v2026_v14 = vmul.f32 0.044715, %v11591_v33  ;;  %v2098_v39 = vmul.f32 %v2025_v34, %v11587_v25 }
 0x3de   :  { %9702 = vtanh.f32 %v2313_v40  ;;  %v2242_v58 = vadd.f32 %v2169_v27, %v11579_v6 }
 0x3df   :  { %v2171_v27 = vmul.f32 %v2098_v39, %v11587_v25 }
 0x3e0   :  { %8482 = vmatmul.mubr.f32.gmra.mrb[36].mxu1 %v3114_v29  ;;  %v2525_v29 = vmul.f32 %v2452_v10, %v1941_v55  ;;  %v12066_v10 = vpop.permute.xlu0 %2699  ;;  %v2241_v55 = vadd.f32 %v2168_v21, %v11575_v56  ;;  %v12081_v21 = vpop.permute.xlu1 %2704 }
 0x3e1   :  { %8484 = vmatprep.mubr.msk.f32.mxu1 %vm17735_vm1, %v18002_v51  ;;  %v2970_v28 = vmul.f32 %v11774_v62, %v12066_v10  ;;  %v2971_v12 = vmul.f32 %v11774_v62, %v12081_v21 }
 0x3e2   :  { %v3117_v45 = vmul.f32 %v3044_v26, %v2525_v29  ;;  %v9697_v29 = vpop.eup %9696  ;;  %v2314_v9 = vmul.f32 0.7978846, %v2241_v55  ;;  %v2315_v55 = vmul.f32 0.7978846, %v2242_v58 }
 0x3e3   :  { %v3047_v63 = vadd.f32 %v11785_v18, %v2970_v28  ;;  %v1945_v28 = vmul.f32 0.5, %v11559_v17 }
 0x3e4   :  { %8485 = vmatmul.mubr.f32.gmra.mrb[38].mxu1 %v3115_v30  ;;  %v2454_v30 = vadd.f32 1.0, %v9693_v41  ;;  %v3118_v41 = vmul.f32 %v3045_v57, %v2526_v24  ;;  %v2170_v57 = vmul.f32 %v2097_v0, %v11583_v13  ;;  %9704 = vtanh.f32 %v2314_v9 }
 0x3e5   :  { %8487 = vmatprep.mubr.msk.f32.mxu1 %vm17735_vm1, %v18002_v51  ;;  %v2027_v0 = vmul.f32 0.044715, %v11595_v48  ;;  %v2028_v9 = vmul.f32 0.044715, %v11599_v53  ;;  %9706 = vtanh.f32 %v2315_v55 }
 0x3e6   :  { %v2527_v26 = vmul.f32 %v2454_v30, %v1943_v7  ;;  %v9699_v24 = vpop.eup %9698  ;;  %v12090_v30 = vpop.permute.xlu0 %2709  ;;  %v2099_v7 = vmul.f32 %v2026_v14, %v11591_v33  ;;  %v2243_v40 = vadd.f32 %v2170_v57, %v11583_v13 }
 0x3e7   :  { %v9701_v34 = vpop.eup %9700  ;;  %v12106_v14 = vpop.permute.xlu1 %2714  ;;  %v2100_v57 = vmul.f32 %v2027_v0, %v11595_v48 }
 0x3e8   :  { %8488 = vmatmul.mubr.f32.gmra.mrb[40].mxu1 %v3116_v52  ;;  %v2455_v52 = vadd.f32 1.0, %v9695_v46  ;;  %v3119_v60 = vmul.f32 %v3046_v54, %v2527_v26  ;;  %v2972_v46 = vmul.f32 %v11774_v62, %v12090_v30  ;;  %v3048_v54 = vadd.f32 %v11785_v18, %v2971_v12  ;;  %18003 = vst [vmem:[#allocation43_spill] sm:$0xff] %v12106_v14 }
 0x3e9   :  { %8490 = vmatprep.mubr.msk.f32.mxu1 %vm17735_vm1, %v18002_v51  ;;  %v2316_v58 = vmul.f32 0.7978846, %v2243_v40  ;;  %v2973_v39 = vmul.f32 %v11774_v62, %v12106_v14  ;;  %v2173_v40 = vmul.f32 %v2100_v57, %v11595_v48 }
 0x3ea   :  { %v2528_v11 = vmul.f32 %v2455_v52, %v1944_v22  ;;  %v2457_v52 = vadd.f32 1.0, %v9699_v24  ;;  %v3049_v17 = vadd.f32 %v11785_v18, %v2972_v46  ;;  %v2172_v22 = vmul.f32 %v2099_v7, %v11591_v33 }
 0x3eb   :  { %v1947_v46 = vmul.f32 0.5, %v11567_v36  ;;  %v2101_v7 = vmul.f32 %v2028_v9, %v11599_v53  ;;  %9708 = vtanh.f32 %v2316_v58  ;;  %v12129_v9 = vpop.permute.xlu1 %2724  ;;  %v2246_v58 = vadd.f32 %v2173_v40, %v11595_v48 }
 0x3ec   :  { %8491 = vmatmul.mubr.f32.gmra.mrb[42].mxu1 %v3117_v45  ;;  %v2456_v45 = vadd.f32 1.0, %v9697_v29  ;;  %v1946_v29 = vmul.f32 0.5, %v11563_v31  ;;  %18005 = vst [vmem:[#allocation45_spill] sm:$0xff] %v12129_v9 }
 0x3ed   :  { %8493 = vmatprep.mubr.msk.f32.mxu1 %vm17735_vm1, %v18002_v51  ;;  %v2319_v40 = vmul.f32 0.7978846, %v2246_v58 }
 0x3ee   :  { %v2529_v26 = vmul.f32 %v2456_v45, %v1945_v28  ;;  %v2530_v31 = vmul.f32 %v2457_v52, %v1946_v29  ;;  %v12114_v45 = vpop.permute.xlu0 %2719  ;;  %v2245_v28 = vadd.f32 %v2172_v22, %v11591_v33  ;;  %v1948_v52 = vmul.f32 0.5, %v11571_v50 }
 0x3ef   :  { %18004 = vst [vmem:[#allocation44_spill] sm:$0xff] %v12114_v45  ;;  %v2974_v24 = vmul.f32 %v11774_v62, %v12114_v45  ;;  %v2174_v22 = vmul.f32 %v2101_v7, %v11599_v53  ;;  %v18008_v7 = vld [vmem:[#allocation18_spill] sm:$0xff] }
 0x3f0   :  { %8494 = vmatmul.mubr.f32.gmra.mrb[44].mxu1 %v3118_v41  ;;  %v3120_v41 = vmul.f32 %v3047_v63, %v2528_v11  ;;  %v2244_v63 = vadd.f32 %v2171_v27, %v11587_v25  ;;  %v3121_v12 = vmul.f32 %v3048_v54, %v2529_v26  ;;  %v9703_v11 = vpop.eup %9702  ;;  %v2029_v27 = vmul.f32 0.044715, %v11603_v5 }
 0x3f1   :  { %8496 = vmatprep.mubr.msk.f32.mxu1 %vm17735_vm1, %v18002_v51  ;;  %v9705_v0 = vpop.eup %9704  ;;  %v3122_v54 = vmul.f32 %v3049_v17, %v2530_v31  ;;  %v2459_v26 = vadd.f32 1.0, %v9703_v11  ;;  %v3051_v36 = vadd.f32 %v11785_v18, %v2974_v24  ;;  %v2318_v29 = vmul.f32 0.7978846, %v2245_v28 }
 0x3f2   :  { %v2317_v55 = vmul.f32 0.7978846, %v2244_v63  ;;  %v2102_v17 = vmul.f32 %v2029_v27, %v11603_v5  ;;  %v18006_v63 = vld [vmem:[#allocation17_spill] sm:$0xff]  ;;  %v2460_v31 = vadd.f32 1.0, %v9705_v0  ;;  %v12138_v11 = vpop.permute.xlu0 %2729  ;;  %v2247_v28 = vadd.f32 %v2174_v22, %v11599_v53 }
 0x3f3   :  { %v2030_v57 = vmul.f32 0.044715, %v18006_v63  ;;  %v2532_v50 = vmul.f32 %v2459_v26, %v1948_v52  ;;  %18007 = vst [vmem:[#allocation17_spill] sm:$0xff] %v12138_v11  ;;  %v2976_v24 = vmul.f32 %v11774_v62, %v12138_v11  ;;  %v1950_v22 = vmul.f32 0.5, %v11579_v6 }
 0x3f4   :  { %8497 = vmatmul.mubr.f32.gmra.mrb[46].mxu1 %v3119_v60  ;;  %v2458_v60 = vadd.f32 1.0, %v9701_v34  ;;  %v3050_v34 = vadd.f32 %v11785_v18, %v2973_v39  ;;  %9710 = vtanh.f32 %v2317_v55  ;;  %v2975_v39 = vmul.f32 %v11774_v62, %v12129_v9 }
 0x3f5   :  { %8499 = vmatprep.mubr.msk.f32.mxu1 %vm17735_vm1, %v18002_v51  ;;  %v2031_v55 = vmul.f32 0.044715, %v18008_v7  ;;  %9712 = vtanh.f32 %v2318_v29  ;;  %v2175_v27 = vmul.f32 %v2102_v17, %v11603_v5  ;;  %v2103_v0 = vmul.f32 %v2030_v57, %v18006_v63  ;;  %v12153_v29 = vpop.permute.xlu1 %2734  ;;  %v18010_v17 = vld [vmem:[#allocation19_spill] sm:$0xff] }
 0x3f6   :  { %18009 = vst [vmem:[#allocation18_spill] sm:$0xff] %v12153_v29  ;;  %9714 = vtanh.f32 %v2319_v40  ;;  %v2032_v57 = vmul.f32 0.044715, %v18010_v17 }
 0x3f7   :  { %v2104_v11 = vmul.f32 %v2031_v55, %v18008_v7  ;;  %v2248_v58 = vadd.f32 %v2175_v27, %v11603_v5 }
 0x3f8   :  { %8500 = vmatmul.mubr.f32.gmra.mrb[48].mxu1 %v3120_v41  ;;  %v2531_v41 = vmul.f32 %v2458_v60, %v1947_v46  ;;  %v9707_v60 = vpop.eup %9706  ;;  %v1949_v46 = vmul.f32 0.5, %v11575_v56  ;;  %v3053_v56 = vadd.f32 %v11785_v18, %v2976_v24  ;;  %v12162_v24 = vpop.permute.xlu0 %2739 }
 0x3f9   :  { %8502 = vmatprep.mubr.msk.f32.mxu1 %vm17735_vm1, %v18002_v51  ;;  %v2461_v26 = vadd.f32 1.0, %v9707_v60  ;;  %v9709_v52 = vpop.eup %9708  ;;  %18011 = vst [vmem:[#allocation19_spill] sm:$0xff] %v12162_v24  ;;  %v2177_v55 = vmul.f32 %v2104_v11, %v18008_v7  ;;  %v2321_v40 = vmul.f32 0.7978846, %v2248_v58  ;;  %v1952_v11 = vmul.f32 0.5, %v11587_v25 }
 0x3fb   :  { %v2534_v6 = vmul.f32 %v2461_v26, %v1950_v22  ;;  %v2250_v58 = vadd.f32 %v2177_v55, %v18008_v7 }
 0x3fc   :  { %8503 = vmatmul.mubr.f32.gmra.mrb[50].mxu1 %v3121_v12  ;;  %v3123_v12 = vmul.f32 %v3050_v34, %v2531_v41  ;;  %v3052_v34 = vadd.f32 %v11785_v18, %v2975_v39  ;;  %v2533_v41 = vmul.f32 %v2460_v31, %v1949_v46  ;;  %v2977_v39 = vmul.f32 %v11774_v62, %v12153_v29 }
 0x3fd   :  { %8505 = vmatprep.mubr.msk.f32.mxu1 %vm17735_vm1, %v18002_v51  ;;  %v2462_v31 = vadd.f32 1.0, %v9709_v52  ;;  %v2978_v46 = vmul.f32 %v11774_v62, %v12162_v24  ;;  %v3126_v26 = vmul.f32 %v3053_v56, %v2534_v6 }
 0x3fe   :  { %v9711_v60 = vpop.eup %9710 }
 0x3ff   :  { %v2463_v22 = vadd.f32 1.0, %v9711_v60 }
 0x400   :  { %8506 = vmatmul.mubr.f32.gmra.mrb[52].mxu1 %v3122_v54  ;;  %v3124_v54 = vmul.f32 %v3051_v36, %v2532_v50  ;;  %v2176_v36 = vmul.f32 %v2103_v0, %v18006_v63  ;;  %v3125_v50 = vmul.f32 %v3052_v34, %v2533_v41  ;;  %v2105_v0 = vmul.f32 %v2032_v57, %v18010_v17  ;;  %v18012_v34 = vld [vmem:[#allocation20_spill] sm:$0xff] }
 0x401   :  { %8508 = vmatprep.mubr.msk.f32.mxu1 %vm17735_vm1, %v18002_v51  ;;  %v3054_v41 = vadd.f32 %v11785_v18, %v2977_v39  ;;  %v2536_v60 = vmul.f32 %v2463_v22, %v1952_v11 }
 0x402   :  { %v2249_v27 = vadd.f32 %v2176_v36, %v18006_v63  ;;  %v18014_v36 = vld [vmem:[#allocation21_spill] sm:$0xff]  ;;  %v2178_v56 = vmul.f32 %v2105_v0, %v18010_v17 }
 0x403   :  { %v2034_v24 = vmul.f32 0.044715, %v18014_v36 }
 0x404   :  { %8509 = vmatmul.mubr.f32.gmra.mrb[54].mxu1 %v3123_v12  ;;  %v2320_v12 = vmul.f32 0.7978846, %v2247_v28  ;;  %v1951_v28 = vmul.f32 0.5, %v11583_v13  ;;  %v3055_v13 = vadd.f32 %v11785_v18, %v2978_v46  ;;  %v2322_v57 = vmul.f32 0.7978846, %v2249_v27 }
 0x405   :  { %8511 = vmatprep.mubr.msk.f32.mxu1 %vm17735_vm1, %v18002_v51  ;;  %v2323_v27 = vmul.f32 0.7978846, %v2250_v58  ;;  %v2107_v0 = vmul.f32 %v2034_v24, %v18014_v36 }
 0x406   :  { %9716 = vtanh.f32 %v2320_v12  ;;  %v2535_v52 = vmul.f32 %v2462_v31, %v1951_v28  ;;  %v12175_v12 = vpop.permute.xlu1 %2744  ;;  %v12186_v28 = vpop.permute.xlu0 %2749 }
 0x407   :  { %18013 = vst [vmem:[#allocation20_spill] sm:$0xff] %v12175_v12  ;;  %9718 = vtanh.f32 %v2321_v40  ;;  %v2979_v6 = vmul.f32 %v11774_v62, %v12175_v12  ;;  %18015 = vst [vmem:[#allocation21_spill] sm:$0xff] %v12186_v28  ;;  %v2980_v55 = vmul.f32 %v11774_v62, %v12186_v28  ;;  %v1953_v40 = vmul.f32 0.5, %v11591_v33 }
 0x408   :  { %8512 = vmatmul.mubr.f32.gmra.mrb[56].mxu1 %v3124_v54  ;;  %v2033_v54 = vmul.f32 0.044715, %v18012_v34  ;;  %v3127_v31 = vmul.f32 %v3054_v41, %v2535_v52  ;;  %9720 = vtanh.f32 %v2322_v57  ;;  %v1954_v57 = vmul.f32 0.5, %v11595_v48 }
 0x409   :  { %8514 = vmatprep.mubr.msk.f32.mxu1 %vm17735_vm1, %v18002_v51  ;;  %9722 = vtanh.f32 %v2323_v27 }
 0x40a   :  { %v2106_v39 = vmul.f32 %v2033_v54, %v18012_v34  ;;  %v2251_v54 = vadd.f32 %v2178_v56, %v18010_v17  ;;  %v12198_v11 = vpop.permute.xlu1 %2754  ;;  %v2180_v56 = vmul.f32 %v2107_v0, %v18014_v36 }
 0x40b   :  { %v2981_v24 = vmul.f32 %v11774_v62, %v12198_v11 }
 0x40c   :  { %8515 = vmatmul.mubr.f32.gmra.mrb[58].mxu1 %v3125_v50  ;;  %v9713_v50 = vpop.eup %9712  ;;  %v2179_v41 = vmul.f32 %v2106_v39, %v18012_v34  ;;  %v18018_v39 = vld [vmem:[#allocation23_spill] sm:$0xff] }
 0x40d   :  { %8517 = vmatprep.mubr.msk.f32.mxu1 %vm17735_vm1, %v18002_v51  ;;  %v2464_v46 = vadd.f32 1.0, %v9713_v50  ;;  %v9715_v25 = vpop.eup %9714  ;;  %v3056_v50 = vadd.f32 %v11785_v18, %v2979_v6  ;;  %v2036_v28 = vmul.f32 0.044715, %v18018_v39  ;;  %v2324_v6 = vmul.f32 0.7978846, %v2251_v54 }
 0x40e   :  { %v2465_v58 = vadd.f32 1.0, %v9715_v25  ;;  %v2252_v12 = vadd.f32 %v2179_v41, %v18012_v34  ;;  %v1955_v54 = vmul.f32 0.5, %v11599_v53  ;;  %v2253_v41 = vadd.f32 %v2180_v56, %v18014_v36  ;;  %v12224_v56 = vpop.permute.xlu1 %2764 }
 0x40f   :  { %v2537_v33 = vmul.f32 %v2464_v46, %v1953_v40  ;;  %v12210_v46 = vpop.permute.xlu0 %2759  ;;  %9724 = vtanh.f32 %v2324_v6  ;;  %v2983_v6 = vmul.f32 %v11774_v62, %v12224_v56 }
 0x410   :  { %8518 = vmatmul.mubr.f32.gmra.mrb[60].mxu1 %v3126_v26  ;;  %v18016_v26 = vld [vmem:[#allocation22_spill] sm:$0xff]  ;;  %v9717_v22 = vpop.eup %9716  ;;  %18019 = vst [vmem:[#allocation23_spill] sm:$0xff] %v12210_v46  ;;  %v2538_v40 = vmul.f32 %v2465_v58, %v1954_v57  ;;  %v2982_v0 = vmul.f32 %v11774_v62, %v12210_v46  ;;  %v2326_v29 = vmul.f32 0.7978846, %v2253_v41 }
 0x411   :  { %8520 = vmatprep.mubr.msk.f32.mxu1 %vm17735_vm1, %v18002_v51  ;;  %v2035_v52 = vmul.f32 0.044715, %v18016_v26  ;;  %18017 = vst [vmem:[#allocation22_spill] sm:$0xff] %v12198_v11  ;;  %v3129_v25 = vmul.f32 %v3056_v50, %v2537_v33  ;;  %v2466_v48 = vadd.f32 1.0, %v9717_v22  ;;  %v9719_v27 = vpop.eup %9718  ;;  %v18020_v50 = vld [vmem:[#allocation24_spill] sm:$0xff] }
 0x412   :  { %v2037_v33 = vmul.f32 0.044715, %v18020_v50  ;;  %v2467_v46 = vadd.f32 1.0, %v9719_v27  ;;  %v9721_v11 = vpop.eup %9720  ;;  %v3059_v53 = vadd.f32 %v11785_v18, %v2982_v0  ;;  %18022 = vst [vmem:[#allocation24_spill] sm:$0xff] %v12224_v56 }
 0x413   :  { %v2539_v57 = vmul.f32 %v2466_v48, %v1955_v54  ;;  %v12234_v48 = vpop.permute.xlu0 %2769 }
 0x414   :  { %8521 = vmatmul.mubr.f32.gmra.mrb[62].mxu1 %v3127_v31  ;;  %v3128_v31 = vmul.f32 %v3055_v13, %v2536_v60  ;;  %v2108_v13 = vmul.f32 %v2035_v52, %v18016_v26  ;;  %v3057_v60 = vadd.f32 %v11785_v18, %v2980_v55  ;;  %v2109_v52 = vmul.f32 %v2036_v28, %v18018_v39 }
 0x415   :  { %8523 = vmatprep.mubr.msk.f32.mxu1 %vm17735_vm1, %v18002_v51  ;;  %v2325_v55 = vmul.f32 0.7978846, %v2252_v12  ;;  %v1956_v28 = vmul.f32 0.5, %v11603_v5  ;;  %v2468_v5 = vadd.f32 1.0, %v9721_v11  ;;  %v2984_v41 = vmul.f32 %v11774_v62, %v12234_v48 }
 0x416   :  { %v2181_v22 = vmul.f32 %v2108_v13, %v18016_v26  ;;  %v3130_v58 = vmul.f32 %v3057_v60, %v2538_v40  ;;  %v2182_v12 = vmul.f32 %v2109_v52, %v18018_v39  ;;  %v2110_v60 = vmul.f32 %v2037_v33, %v18020_v50  ;;  %v9723_v40 = vpop.eup %9722 }
 0x417   :  { %9726 = vtanh.f32 %v2325_v55  ;;  %v2540_v0 = vmul.f32 %v2467_v46, %v1956_v28  ;;  %v1957_v52 = vmul.f32 0.5, %v18006_v63  ;;  %v2469_v33 = vadd.f32 1.0, %v9723_v40  ;;  %v18026_v40 = vld [vmem:[#allocation27_spill] sm:$0xff] }
 0x418   :  { %8524 = vmatmul.mubr.f32.gmra.mrb[64].mxu1 %v3128_v31  ;;  %v3058_v31 = vadd.f32 %v11785_v18, %v2981_v24  ;;  %v18021_v24 = vld [vmem:[#allocation25_spill] sm:$0xff]  ;;  %v2254_v13 = vadd.f32 %v2181_v22, %v18016_v26  ;;  %9728 = vtanh.f32 %v2326_v29  ;;  %v2255_v55 = vadd.f32 %v2182_v12, %v18018_v39  ;;  %v18024_v22 = vld [vmem:[#allocation26_spill] sm:$0xff] }
 0x419   :  { %8526 = vmatprep.mubr.msk.f32.mxu1 %vm17735_vm1, %v18002_v51  ;;  %18023 = vst [vmem:[#allocation25_spill] sm:$0xff] %v12234_v48  ;;  %v2183_v11 = vmul.f32 %v2110_v60, %v18020_v50  ;;  %v3060_v46 = vadd.f32 %v11785_v18, %v2983_v6  ;;  %v2541_v28 = vmul.f32 %v2468_v5, %v1957_v52  ;;  %v9725_v29 = vpop.eup %9724 }
 0x41a   :  { %v3131_v27 = vmul.f32 %v3058_v31, %v2539_v57  ;;  %v2327_v31 = vmul.f32 0.7978846, %v2254_v13  ;;  %v12246_v57 = vpop.permute.xlu1 %2774  ;;  %v3061_v48 = vadd.f32 %v11785_v18, %v2984_v41  ;;  %v2328_v13 = vmul.f32 0.7978846, %v2255_v55 }
 0x41b   :  { %18025 = vst [vmem:[#allocation26_spill] sm:$0xff] %v12246_v57  ;;  %v2985_v12 = vmul.f32 %v11774_v62, %v12246_v57  ;;  %v3133_v5 = vmul.f32 %v3060_v46, %v2541_v28  ;;  %v18028_v28 = vld [vmem:[#allocation28_spill] sm:$0xff] }
 0x41c   :  { %8527 = vmatmul.mubr.f32.gmra.mrb[66].mxu1 %v3129_v25  ;;  %v2038_v25 = vmul.f32 0.044715, %v18021_v24  ;;  %9730 = vtanh.f32 %v2327_v31 }
 0x41d   :  { %8529 = vmatprep.mubr.msk.f32.mxu1 %vm17735_vm1, %v18002_v51  ;;  %v3062_v41 = vadd.f32 %v11785_v18, %v2985_v12  ;;  %9732 = vtanh.f32 %v2328_v13 }
 0x41e   :  { %v2111_v54 = vmul.f32 %v2038_v25, %v18021_v24  ;;  %v3132_v25 = vmul.f32 %v3059_v53, %v2540_v0  ;;  %v2256_v53 = vadd.f32 %v2183_v11, %v18020_v50  ;;  %v2040_v0 = vmul.f32 0.044715, %v18026_v40  ;;  %v12271_v56 = vpop.permute.xlu1 %2784 }
 0x41f   :  { %18030 = vst [vmem:[#allocation28_spill] sm:$0xff] %v12271_v56  ;;  %v2987_v13 = vmul.f32 %v11774_v62, %v12271_v56 }
 0x420   :  { %8530 = vmatmul.mubr.f32.gmra.mrb[68].mxu1 %v3130_v58  ;;  %v2039_v58 = vmul.f32 0.044715, %v18024_v22  ;;  %v2184_v63 = vmul.f32 %v2111_v54, %v18021_v24  ;;  %v2470_v54 = vadd.f32 1.0, %v9725_v29  ;;  %v2329_v11 = vmul.f32 0.7978846, %v2256_v53 }
 0x421   :  { %8532 = vmatprep.mubr.msk.f32.mxu1 %vm17735_vm1, %v18002_v51  ;;  %v2113_v46 = vmul.f32 %v2040_v0, %v18026_v40 }
 0x422   :  { %v2112_v60 = vmul.f32 %v2039_v58, %v18024_v22  ;;  %v2257_v52 = vadd.f32 %v2184_v63, %v18021_v24  ;;  %v1959_v58 = vmul.f32 0.5, %v18010_v17  ;;  %v2041_v63 = vmul.f32 0.044715, %v18028_v28 }
 0x423   :  { %9734 = vtanh.f32 %v2329_v11  ;;  %v2186_v53 = vmul.f32 %v2113_v46, %v18026_v40  ;;  %v18032_v46 = vld [vmem:[#allocation30_spill] sm:$0xff] }
 0x424   :  { %8533 = vmatmul.mubr.f32.gmra.mrb[70].mxu1 %v3131_v27  ;;  %v1958_v27 = vmul.f32 0.5, %v18008_v7  ;;  %v9727_v7 = vpop.eup %9726  ;;  %v2543_v12 = vmul.f32 %v2470_v54, %v1959_v58  ;;  %v2330_v57 = vmul.f32 0.7978846, %v2257_v52  ;;  %v2114_v0 = vmul.f32 %v2041_v63, %v18028_v28 }
 0x425   :  { %8535 = vmatprep.mubr.msk.f32.mxu1 %vm17735_vm1, %v18002_v51  ;;  %v9729_v29 = vpop.eup %9728  ;;  %v2043_v63 = vmul.f32 0.044715, %v18032_v46 }
 0x426   :  { %v2542_v6 = vmul.f32 %v2469_v33, %v1958_v27  ;;  %v2185_v33 = vmul.f32 %v2112_v60, %v18024_v22  ;;  %v2471_v27 = vadd.f32 1.0, %v9727_v7  ;;  %v3135_v54 = vmul.f32 %v3062_v41, %v2543_v12  ;;  %v12294_v12 = vpop.permute.xlu1 %2794 }
 0x427   :  { %9736 = vtanh.f32 %v2330_v57  ;;  %v2259_v41 = vadd.f32 %v2186_v53, %v18026_v40  ;;  %v2187_v57 = vmul.f32 %v2114_v0, %v18028_v28  ;;  %18033 = vst [vmem:[#allocation30_spill] sm:$0xff] %v12294_v12  ;;  %v18034_v53 = vld [vmem:[#allocation31_spill] sm:$0xff] }
 0x428   :  { %8536 = vmatmul.mubr.f32.gmra.mrb[72].mxu1 %v3132_v25  ;;  %v12260_v25 = vpop.permute.xlu0 %2779  ;;  %v3134_v31 = vmul.f32 %v3061_v48, %v2542_v6  ;;  %v1960_v48 = vmul.f32 0.5, %v18012_v34  ;;  %v2258_v60 = vadd.f32 %v2185_v33, %v18024_v22  ;;  %v2472_v6 = vadd.f32 1.0, %v9729_v29 }
 0x429   :  { %8538 = vmatprep.mubr.msk.f32.mxu1 %vm17735_vm1, %v18002_v51  ;;  %18027 = vst [vmem:[#allocation27_spill] sm:$0xff] %v12260_v25  ;;  %v2986_v55 = vmul.f32 %v11774_v62, %v12260_v25  ;;  %v18029_v25 = vld [vmem:[#allocation29_spill] sm:$0xff]  ;;  %v3064_v34 = vadd.f32 %v11785_v18, %v2987_v13  ;;  %v2044_v0 = vmul.f32 0.044715, %v18034_v53 }
 0x42a   :  { %v2544_v52 = vmul.f32 %v2471_v27, %v1960_v48  ;;  %v2331_v11 = vmul.f32 0.7978846, %v2258_v60  ;;  %v1962_v60 = vmul.f32 0.5, %v18016_v26  ;;  %v12322_v45 = vpop.permute.xlu1 %2804 }
 0x42b   :  { %v3063_v17 = vadd.f32 %v11785_v18, %v2986_v55  ;;  %v9731_v55 = vpop.eup %9730 }
 0x42c   :  { %8539 = vmatmul.mubr.f32.gmra.mrb[74].mxu1 %v3133_v5  ;;  %v2042_v5 = vmul.f32 0.044715, %v18029_v25  ;;  %v12283_v58 = vpop.permute.xlu0 %2789  ;;  %v9733_v29 = vpop.eup %9732  ;;  %v2473_v13 = vadd.f32 1.0, %v9731_v55  ;;  %9738 = vtanh.f32 %v2331_v11  ;;  %v1963_v11 = vmul.f32 0.5, %v18018_v39 }
 0x42d   :  { %8541 = vmatprep.mubr.msk.f32.mxu1 %vm17735_vm1, %v18002_v51  ;;  %18031 = vst [vmem:[#allocation29_spill] sm:$0xff] %v12283_v58  ;;  %v2988_v33 = vmul.f32 %v11774_v62, %v12283_v58  ;;  %v3136_v27 = vmul.f32 %v3063_v17, %v2544_v52  ;;  %v2332_v58 = vmul.f32 0.7978846, %v2259_v41  ;;  %v2260_v17 = vadd.f32 %v2187_v57, %v18028_v28  ;;  %v18036_v57 = vld [vmem:[#allocation2_spill] sm:$0xff] }
 0x42e   :  { %v2115_v7 = vmul.f32 %v2042_v5, %v18029_v25  ;;  %v2474_v55 = vadd.f32 1.0, %v9733_v29  ;;  %v2117_v41 = vmul.f32 %v2044_v0, %v18034_v53  ;;  %18038 = vst [vmem:[#allocation2_spill] sm:$0xff] %v12322_v45 }
 0x42f   :  { %9740 = vtanh.f32 %v2332_v58 }
 0x430   :  { %8542 = vmatmul.mubr.f32.gmra.mrb[76].mxu1 %v3134_v31  ;;  %v1961_v31 = vmul.f32 0.5, %v18014_v36  ;;  %v2188_v48 = vmul.f32 %v2115_v7, %v18029_v25  ;;  %v2989_v36 = vmul.f32 %v11774_v62, %v12294_v12  ;;  %v2546_v7 = vmul.f32 %v2473_v13, %v1962_v60  ;;  %v12308_v26 = vpop.permute.xlu0 %2799 }
 0x431   :  { %8544 = vmatprep.mubr.msk.f32.mxu1 %vm17735_vm1, %v18002_v51  ;;  %18035 = vst [vmem:[#allocation31_spill] sm:$0xff] %v12308_v26  ;;  %v2990_v56 = vmul.f32 %v11774_v62, %v12308_v26  ;;  %v2190_v0 = vmul.f32 %v2117_v41, %v18034_v53  ;;  %v18040_v41 = vld [vmem:[#allocation4_spill] sm:$0xff] }
 0x432   :  { %v2545_v5 = vmul.f32 %v2472_v6, %v1961_v31  ;;  %v2116_v6 = vmul.f32 %v2043_v63, %v18032_v46  ;;  %v2261_v31 = vadd.f32 %v2188_v48, %v18029_v25  ;;  %v2333_v63 = vmul.f32 0.7978846, %v2260_v17 }
 0x433   :  { %v2991_v17 = vmul.f32 %v11774_v62, %v12322_v45 }
 0x434   :  { %8545 = vmatmul.mubr.f32.gmra.mrb[78].mxu1 %v3135_v54  ;;  %v3065_v54 = vadd.f32 %v11785_v18, %v2988_v33  ;;  %v3137_v52 = vmul.f32 %v3064_v34, %v2545_v5  ;;  %v9735_v33 = vpop.eup %9734  ;;  %v2045_v34 = vmul.f32 0.044715, %v18036_v57  ;;  %v2189_v29 = vmul.f32 %v2116_v6, %v18032_v46  ;;  %v18037_v5 = vld [vmem:[#allocation3_spill] sm:$0xff] }
 0x435   :  { %8547 = vmatprep.mubr.msk.f32.mxu1 %vm17735_vm1, %v18002_v51  ;;  %v9737_v12 = vpop.eup %9736  ;;  %v2046_v13 = vmul.f32 0.044715, %v18037_v5  ;;  %v2475_v60 = vadd.f32 1.0, %v9735_v33  ;;  %v2334_v26 = vmul.f32 0.7978846, %v2261_v31  ;;  %9742 = vtanh.f32 %v2333_v63 }
 0x436   :  { %v3138_v48 = vmul.f32 %v3065_v54, %v2546_v7  ;;  %v2476_v39 = vadd.f32 1.0, %v9737_v12  ;;  %v2118_v9 = vmul.f32 %v2045_v34, %v18036_v57  ;;  %v2262_v58 = vadd.f32 %v2189_v29, %v18032_v46  ;;  %v9739_v6 = vpop.eup %9738  ;;  %v12330_v7 = vpop.permute.xlu0 %2809 }
 0x437   :  { %v3067_v54 = vadd.f32 %v11785_v18, %v2990_v56  ;;  %18039 = vst [vmem:[#allocation3_spill] sm:$0xff] %v12330_v7  ;;  %v1965_v31 = vmul.f32 0.5, %v18021_v24  ;;  %v2263_v33 = vadd.f32 %v2190_v0, %v18034_v53  ;;  %9744 = vtanh.f32 %v2334_v26  ;;  %v12345_v26 = vpop.permute.xlu1 %2814 }
 0x438   :  { %8548 = vmatmul.mubr.f32.gmra.mrb[80].mxu1 %v3136_v27  ;;  %v3066_v27 = vadd.f32 %v11785_v18, %v2989_v36  ;;  %v2547_v36 = vmul.f32 %v2474_v55, %v1963_v11  ;;  %v2992_v55 = vmul.f32 %v11774_v62, %v12330_v7  ;;  %v2191_v11 = vmul.f32 %v2118_v9, %v18036_v57 }
 0x439   :  { %8550 = vmatprep.mubr.msk.f32.mxu1 %vm17735_vm1, %v18002_v51  ;;  %v2335_v56 = vmul.f32 0.7978846, %v2262_v58  ;;  %v2047_v34 = vmul.f32 0.044715, %v18040_v41  ;;  %v3068_v63 = vadd.f32 %v11785_v18, %v2991_v17  ;;  %v1966_v9 = vmul.f32 0.5, %v18024_v22  ;;  %18041 = vst [vmem:[#allocation4_spill] sm:$0xff] %v12345_v26 }
 0x43a   :  { %v3069_v24 = vadd.f32 %v11785_v18, %v2992_v55  ;;  %v2264_v0 = vadd.f32 %v2191_v11, %v18036_v57  ;;  %v18042_v58 = vld [vmem:[#allocation5_spill] sm:$0xff]  ;;  %v2993_v17 = vmul.f32 %v11774_v62, %v12345_v26  ;;  %v12354_v55 = vpop.permute.xlu0 %2819 }
 0x43b   :  { %9746 = vtanh.f32 %v2335_v56  ;;  %18043 = vst [vmem:[#allocation5_spill] sm:$0xff] %v12354_v55  ;;  %v18044_v56 = vld [vmem:[#allocation6_spill] sm:$0xff] }
 0x43c   :  { %8551 = vmatmul.mubr.f32.gmra.mrb[82].mxu1 %v3137_v52  ;;  %v1964_v52 = vmul.f32 0.5, %v18020_v50  ;;  %v3139_v50 = vmul.f32 %v3066_v27, %v2547_v36  ;;  %v2119_v27 = vmul.f32 %v2046_v13, %v18037_v5  ;;  %v2477_v36 = vadd.f32 1.0, %v9739_v6 }
 0x43d   :  { %8553 = vmatprep.mubr.msk.f32.mxu1 %vm17735_vm1, %v18002_v51  ;;  %v2337_v11 = vmul.f32 0.7978846, %v2264_v0 }
 0x43e   :  { %v2548_v12 = vmul.f32 %v2475_v60, %v1964_v52  ;;  %v9741_v60 = vpop.eup %9740  ;;  %v2336_v52 = vmul.f32 0.7978846, %v2263_v33  ;;  %v2192_v13 = vmul.f32 %v2119_v27, %v18037_v5  ;;  %v2550_v22 = vmul.f32 %v2477_v36, %v1966_v9 }
 0x43f   :  { %v9743_v6 = vpop.eup %9742  ;;  %v1967_v33 = vmul.f32 0.5, %v18026_v40  ;;  %v2049_v27 = vmul.f32 0.044715, %v18044_v56  ;;  %v12366_v40 = vpop.permute.xlu1 %2824 }
 0x440   :  { %8554 = vmatmul.mubr.f32.gmra.mrb[84].mxu1 %v3138_v48  ;;  %v3140_v29 = vmul.f32 %v3067_v54, %v2548_v12  ;;  %v2549_v48 = vmul.f32 %v2476_v39, %v1965_v31  ;;  %v2120_v39 = vmul.f32 %v2047_v34, %v18040_v41  ;;  %v2048_v54 = vmul.f32 0.044715, %v18042_v58  ;;  %18045 = vst [vmem:[#allocation6_spill] sm:$0xff] %v12366_v40 }
 0x441   :  { %8556 = vmatprep.mubr.msk.f32.mxu1 %vm17735_vm1, %v18002_v51  ;;  %v2478_v12 = vadd.f32 1.0, %v9741_v60  ;;  %v2994_v31 = vmul.f32 %v11774_v62, %v12354_v55  ;;  %9748 = vtanh.f32 %v2336_v52  ;;  %v2265_v34 = vadd.f32 %v2192_v13, %v18037_v5  ;;  %v18046_v55 = vld [vmem:[#allocation7_spill] sm:$0xff] }
 0x442   :  { %v3142_v36 = vmul.f32 %v3069_v24, %v2550_v22  ;;  %v2479_v9 = vadd.f32 1.0, %v9743_v6  ;;  %v2995_v0 = vmul.f32 %v11774_v62, %v12366_v40  ;;  %v1968_v52 = vmul.f32 0.5, %v18028_v28 }
 0x443   :  { %v2551_v60 = vmul.f32 %v2478_v12, %v1967_v33  ;;  %v2122_v13 = vmul.f32 %v2049_v27, %v18044_v56  ;;  %9750 = vtanh.f32 %v2337_v11  ;;  %v2338_v24 = vmul.f32 0.7978846, %v2265_v34  ;;  %v12382_v34 = vpop.permute.xlu0 %2829 }
 0x444   :  { %8557 = vmatmul.mubr.f32.gmra.mrb[86].mxu1 %v3139_v50  ;;  %v3141_v50 = vmul.f32 %v3068_v63, %v2549_v48  ;;  %v2193_v63 = vmul.f32 %v2120_v39, %v18040_v41  ;;  %v3070_v48 = vadd.f32 %v11785_v18, %v2993_v17  ;;  %v2050_v39 = vmul.f32 0.044715, %v18046_v55  ;;  %18047 = vst [vmem:[#allocation7_spill] sm:$0xff] %v12382_v34 }
 0x445   :  { %8559 = vmatprep.mubr.msk.f32.mxu1 %vm17735_vm1, %v18002_v51  ;;  %v3071_v22 = vadd.f32 %v11785_v18, %v2994_v31  ;;  %v2552_v6 = vmul.f32 %v2479_v9, %v1968_v52  ;;  %v3072_v28 = vadd.f32 %v11785_v18, %v2995_v0  ;;  %v1969_v27 = vmul.f32 0.5, %v18029_v25  ;;  %v12390_v52 = vpop.permute.xlu1 %2834 }
 0x446   :  { %v3143_v12 = vmul.f32 %v3070_v48, %v2551_v60  ;;  %v2195_v40 = vmul.f32 %v2122_v13, %v18044_v56  ;;  %v2123_v11 = vmul.f32 %v2050_v39, %v18046_v55  ;;  %9752 = vtanh.f32 %v2338_v24 }
 0x447   :  { %v2996_v60 = vmul.f32 %v11774_v62, %v12382_v34  ;;  %v3144_v9 = vmul.f32 %v3071_v22, %v2552_v6  ;;  %v2997_v13 = vmul.f32 %v11774_v62, %v12390_v52  ;;  %v1970_v39 = vmul.f32 0.5, %v18032_v46  ;;  %v12402_v46 = vpop.permute.xlu0 %2839 }
 0x448   :  { %8560 = vmatmul.mubr.f32.gmra.mrb[88].mxu1 %v3140_v29  ;;  %v2121_v29 = vmul.f32 %v2048_v54, %v18042_v58  ;;  %v2266_v54 = vadd.f32 %v2193_v63, %v18040_v41  ;;  %v2268_v24 = vadd.f32 %v2195_v40, %v18044_v56  ;;  %v2998_v40 = vmul.f32 %v11774_v62, %v12402_v46 }
 0x449   :  { %8562 = vmatprep.mubr.msk.f32.mxu1 %vm17735_vm1, %v18002_v51 }
 0x44a   :  { %v2194_v17 = vmul.f32 %v2121_v29, %v18042_v58  ;;  %v2339_v31 = vmul.f32 0.7978846, %v2266_v54  ;;  %v18048_v29 = vld [vmem:[#allocation8_spill] sm:$0xff]  ;;  %v2196_v54 = vmul.f32 %v2123_v11, %v18046_v55  ;;  %v1971_v11 = vmul.f32 0.5, %v18034_v53 }
 0x44b   :  { %v2051_v48 = vmul.f32 0.044715, %v18048_v29  ;;  %18049 = vst [vmem:[#allocation8_spill] sm:$0xff] %v12390_v52  ;;  %v3075_v53 = vadd.f32 %v11785_v18, %v2998_v40 }
 0x44c   :  { %8563 = vmatmul.mubr.f32.gmra.mrb[90].mxu1 %v3141_v50  ;;  %v9745_v50 = vpop.eup %9744  ;;  %v2267_v63 = vadd.f32 %v2194_v17, %v18042_v58  ;;  %9754 = vtanh.f32 %v2339_v31  ;;  %v2341_v31 = vmul.f32 0.7978846, %v2268_v24  ;;  %v1972_v24 = vmul.f32 0.5, %v18036_v57 }
 0x44d   :  { %8565 = vmatprep.mubr.msk.f32.mxu1 %vm17735_vm1, %v18002_v51  ;;  %v2480_v33 = vadd.f32 1.0, %v9745_v50  ;;  %v2124_v22 = vmul.f32 %v2051_v48, %v18048_v29 }
 0x44e   :  { %v2340_v17 = vmul.f32 0.7978846, %v2267_v63  ;;  %v2269_v63 = vadd.f32 %v2196_v54, %v18046_v55 }
 0x44f   :  { %v2553_v25 = vmul.f32 %v2480_v33, %v1969_v27  ;;  %v3073_v33 = vadd.f32 %v11785_v18, %v2996_v60  ;;  %v18052_v60 = vld [vmem:[#allocation10_spill] sm:$0xff] }
 0x450   :  { %8566 = vmatmul.mubr.f32.gmra.mrb[92].mxu1 %v3142_v36  ;;  %v9747_v36 = vpop.eup %9746  ;;  %9756 = vtanh.f32 %v2340_v17  ;;  %v2342_v54 = vmul.f32 0.7978846, %v2269_v63  ;;  %v12416_v17 = vpop.permute.xlu1 %2844  ;;  %v18056_v63 = vld [vmem:[#allocation12_spill] sm:$0xff] }
 0x451   :  { %8568 = vmatprep.mubr.msk.f32.mxu1 %vm17735_vm1, %v18002_v51  ;;  %v2481_v50 = vadd.f32 1.0, %v9747_v36  ;;  %v9749_v0 = vpop.eup %9748  ;;  %v3145_v36 = vmul.f32 %v3072_v28, %v2553_v25  ;;  %v2197_v28 = vmul.f32 %v2124_v22, %v18048_v29  ;;  %v2053_v25 = vmul.f32 0.044715, %v18052_v60  ;;  %18053 = vst [vmem:[#allocation10_spill] sm:$0xff] %v12416_v17 }
 0x452   :  { %v9751_v52 = vpop.eup %9750  ;;  %9758 = vtanh.f32 %v2341_v31  ;;  %v12426_v31 = vpop.permute.xlu0 %2849 }
 0x453   :  { %v2554_v27 = vmul.f32 %v2481_v50, %v1970_v39  ;;  %v3074_v50 = vadd.f32 %v11785_v18, %v2997_v13  ;;  %v2270_v22 = vadd.f32 %v2197_v28, %v18048_v29  ;;  %v3000_v28 = vmul.f32 %v11774_v62, %v12426_v31 }
 0x454   :  { %8569 = vmatmul.mubr.f32.gmra.mrb[94].mxu1 %v3143_v12  ;;  %v18050_v12 = vld [vmem:[#allocation9_spill] sm:$0xff]  ;;  %9760 = vtanh.f32 %v2342_v54 }
 0x455   :  { %8571 = vmatprep.mubr.msk.f32.mxu1 %vm17735_vm1, %v18002_v51  ;;  %v2052_v6 = vmul.f32 0.044715, %v18050_v12  ;;  %18051 = vst [vmem:[#allocation9_spill] sm:$0xff] %v12402_v46  ;;  %v9753_v46 = vpop.eup %9752 }
 0x456   :  { %v2484_v40 = vadd.f32 1.0, %v9753_v46 }
 0x457   :  { %v2125_v48 = vmul.f32 %v2052_v6, %v18050_v12  ;;  %v2126_v6 = vmul.f32 %v2053_v25, %v18052_v60  ;;  %v2343_v25 = vmul.f32 0.7978846, %v2270_v22  ;;  %v1974_v22 = vmul.f32 0.5, %v18040_v41 }
 0x458   :  { %8572 = vmatmul.mubr.f32.gmra.mrb[96].mxu1 %v3144_v9  ;;  %v2482_v9 = vadd.f32 1.0, %v9749_v0  ;;  %v3146_v0 = vmul.f32 %v3073_v33, %v2554_v27  ;;  %v2999_v27 = vmul.f32 %v11774_v62, %v12416_v17 }
 0x459   :  { %8574 = vmatprep.mubr.msk.f32.mxu1 %vm17735_vm1, %v18002_v51  ;;  %v2198_v13 = vmul.f32 %v2125_v48, %v18050_v12  ;;  %v1973_v48 = vmul.f32 0.5, %v18037_v5  ;;  %v2199_v46 = vmul.f32 %v2126_v6, %v18052_v60  ;;  %9762 = vtanh.f32 %v2343_v25 }
 0x45a   :  { %v2555_v39 = vmul.f32 %v2482_v9, %v1971_v11  ;;  %v9755_v11 = vpop.eup %9754 }
 0x45b   :  { %v2557_v17 = vmul.f32 %v2484_v40, %v1973_v48  ;;  %v2485_v34 = vadd.f32 1.0, %v9755_v11  ;;  %v3077_v40 = vadd.f32 %v11785_v18, %v3000_v28  ;;  %v12450_v11 = vpop.permute.xlu0 %2859 }
 0x45c   :  { %8575 = vmatmul.mubr.f32.gmra.mrb[98].mxu1 %v3145_v36  ;;  %v2483_v36 = vadd.f32 1.0, %v9751_v52  ;;  %v18054_v52 = vld [vmem:[#allocation11_spill] sm:$0xff]  ;;  %v3147_v9 = vmul.f32 %v3074_v50, %v2555_v39  ;;  %v2271_v50 = vadd.f32 %v2198_v13, %v18050_v12  ;;  %v18058_v13 = vld [vmem:[#allocation13_spill] sm:$0xff]  ;;  %v3002_v41 = vmul.f32 %v11774_v62, %v12450_v11 }
 0x45d   :  { %8577 = vmatprep.mubr.msk.f32.mxu1 %vm17735_vm1, %v18002_v51  ;;  %v2054_v33 = vmul.f32 0.044715, %v18054_v52  ;;  %18055 = vst [vmem:[#allocation11_spill] sm:$0xff] %v12426_v31  ;;  %v9757_v31 = vpop.eup %9756  ;;  %v2056_v6 = vmul.f32 0.044715, %v18058_v13  ;;  %18059 = vst [vmem:[#allocation13_spill] sm:$0xff] %v12450_v11  ;;  %v2558_v48 = vmul.f32 %v2485_v34, %v1974_v22 }
 0x45e   :  { %v2556_v57 = vmul.f32 %v2483_v36, %v1972_v24  ;;  %v3076_v36 = vadd.f32 %v11785_v18, %v2999_v27 }
 0x45f   :  { %v2127_v39 = vmul.f32 %v2054_v33, %v18054_v52  ;;  %v2272_v33 = vadd.f32 %v2199_v46, %v18052_v60  ;;  %v1975_v46 = vmul.f32 0.5, %v18042_v58  ;;  %v3079_v58 = vadd.f32 %v11785_v18, %v3002_v41  ;;  %v18064_v41 = vld [vmem:[#allocation15_spill] sm:$0xff] }
 0x460   :  { %8578 = vmatmul.mubr.f32.gmra.mrb[100].mxu1 %v3146_v0  ;;  %v2055_v0 = vmul.f32 0.044715, %v18056_v63  ;;  %v3148_v24 = vmul.f32 %v3075_v53, %v2556_v57  ;;  %v2344_v53 = vmul.f32 0.7978846, %v2271_v50  ;;  %v9759_v57 = vpop.eup %9758 }
 0x461   :  { %8580 = vmatprep.mubr.msk.f32.mxu1 %vm17735_vm1, %v18002_v51  ;;  %v2200_v27 = vmul.f32 %v2127_v39, %v18054_v52  ;;  %v2129_v39 = vmul.f32 %v2056_v6, %v18058_v13 }
 0x462   :  { %v2128_v5 = vmul.f32 %v2055_v0, %v18056_v63  ;;  %v3149_v0 = vmul.f32 %v3076_v36, %v2557_v17  ;;  %9764 = vtanh.f32 %v2344_v53  ;;  %v2345_v17 = vmul.f32 0.7978846, %v2272_v33  ;;  %v9761_v36 = vpop.eup %9760 }
 0x463   :  { %v2273_v34 = vadd.f32 %v2200_v27, %v18054_v52  ;;  %v1976_v53 = vmul.f32 0.5, %v18044_v56  ;;  %v2488_v45 = vadd.f32 1.0, %v9761_v36 }
 0x464   :  { %8581 = vmatmul.mubr.f32.gmra.mrb[102].mxu1 %v3147_v9  ;;  %v12438_v9 = vpop.permute.xlu1 %2854  ;;  %v2201_v25 = vmul.f32 %v2128_v5, %v18056_v63  ;;  %v3150_v5 = vmul.f32 %v3077_v40, %v2558_v48  ;;  %v2202_v48 = vmul.f32 %v2129_v39, %v18058_v13  ;;  %9766 = vtanh.f32 %v2345_v17 }
 0x465   :  { %8583 = vmatprep.mubr.msk.f32.mxu1 %vm17735_vm1, %v18002_v51  ;;  %18057 = vst [vmem:[#allocation12_spill] sm:$0xff] %v12438_v9  ;;  %v3001_v54 = vmul.f32 %v11774_v62, %v12438_v9  ;;  %v2346_v56 = vmul.f32 0.7978846, %v2273_v34  ;;  %v1977_v17 = vmul.f32 0.5, %v18046_v55 }
 0x466   :  { %v2274_v33 = vadd.f32 %v2201_v25, %v18056_v63  ;;  %v2058_v25 = vmul.f32 0.044715, %v18064_v41  ;;  %v2275_v36 = vadd.f32 %v2202_v48, %v18058_v13 }
 0x467   :  { %v3078_v22 = vadd.f32 %v11785_v18, %v3001_v54  ;;  %9768 = vtanh.f32 %v2346_v56  ;;  %v1978_v56 = vmul.f32 0.5, %v18048_v29 }
 0x468   :  { %8584 = vmatmul.mubr.f32.gmra.mrb[104].mxu1 %v3148_v24  ;;  %v2486_v24 = vadd.f32 1.0, %v9757_v31  ;;  %v18061_v31 = vld [vmem:[#allocation14_spill] sm:$0xff]  ;;  %v12464_v11 = vpop.permute.xlu1 %2864 }
 0x469   :  { %8586 = vmatprep.mubr.msk.f32.mxu1 %vm17735_vm1, %v18002_v51  ;;  %v2057_v28 = vmul.f32 0.044715, %v18061_v31  ;;  %18062 = vst [vmem:[#allocation14_spill] sm:$0xff] %v12464_v11  ;;  %v3003_v6 = vmul.f32 %v11774_v62, %v12464_v11 }
 0x46b   :  { %v12454_v9 = vpop.f32.mrb[0].mxu1 }
 0x46c   :  { %18060 = vst [vmem:[#allocation46_spill] sm:$0xff] %v12454_v9  ;;  %v8429_v50 = vpop.f32.mrb[1].mxu1  ;;  %8587 = vmatmul.mubr.f32.gmra.mrb[106].mxu1 %v3149_v0  ;;  %v2559_v0 = vmul.f32 %v2486_v24, %v1975_v46  ;;  %v3695_v27 = vmul.f32 %v12454_v9, %v12454_v9  ;;  %v2130_v24 = vmul.f32 %v2057_v28, %v18061_v31  ;;  %v12484_v46 = vpop.permute.xlu0 %2869 }
 0x46d   :  { %8589 = vmatprep.mubr.msk.f32.mxu1 %vm17735_vm1, %v18002_v51  ;;  %v2487_v50 = vadd.f32 1.0, %v9759_v57  ;;  %18065 = vst [vmem:[#allocation15_spill] sm:$0xff] %v12484_v46  ;;  %v3004_v39 = vmul.f32 %v11774_v62, %v12484_v46 }
 0x46f   :  { %v12469_v26 = vpop.f32.mrb[2].mxu1  ;;  %v2560_v7 = vmul.f32 %v2487_v50, %v1976_v53  ;;  %v2131_v50 = vmul.f32 %v2058_v25, %v18064_v41  ;;  %v12501_v53 = vpop.permute.xlu1 %2874 }
 0x470   :  { %18063 = vst [vmem:[#allocation47_spill] sm:$0xff] %v12469_v26  ;;  %v3615_v54 = vadd.f32 %v12469_v26, %v12454_v9  ;;  %v3696_v57 = vmul.f32 %v12469_v26, %v12469_v26  ;;  %v8432_v40 = vpop.f32.mrb[3].mxu1  ;;  %8590 = vmatmul.mubr.f32.gmra.mrb[108].mxu1 %v3150_v5  ;;  %v3151_v9 = vmul.f32 %v3078_v22, %v2559_v0  ;;  %v9763_v26 = vpop.eup %9762  ;;  %v2347_v22 = vmul.f32 0.7978846, %v2274_v33 }
 0x471   :  { %8592 = vmatprep.mubr.msk.f32.mxu1 %vm17735_vm1, %v18002_v51  ;;  %v3080_v5 = vadd.f32 %v11785_v18, %v3003_v6  ;;  %v2203_v0 = vmul.f32 %v2130_v24, %v18061_v31  ;;  %v18067_v6 = vld [vmem:[#allocation16_spill] sm:$0xff]  ;;  %v3081_v33 = vadd.f32 %v11785_v18, %v3004_v39  ;;  %v3005_v48 = vmul.f32 %v11774_v62, %v12501_v53  ;;  %v12518_v39 = vpop.permute.xlu0 %2879 }
 0x472   :  { %v3768_v11 = vadd.f32 %v3696_v57, %v3695_v27  ;;  %v2059_v55 = vmul.f32 0.044715, %v18067_v6  ;;  %18068 = vst [vmem:[#allocation16_spill] sm:$0xff] %v12501_v53  ;;  %v2561_v57 = vmul.f32 %v2488_v45, %v1977_v17  ;;  %9770 = vtanh.f32 %v2347_v22 }
 0x473   :  { %v12489_v40 = vpop.f32.mrb[4].mxu1  ;;  %v2348_v45 = vmul.f32 0.7978846, %v2275_v36  ;;  %v3082_v22 = vadd.f32 %v11785_v18, %v3005_v48  ;;  %v3006_v36 = vmul.f32 %v11774_v62, %v12518_v39  ;;  %v12535_v48 = vpop.permute.xlu1 %2884 }
 0x474   :  { %18066 = vst [vmem:[#allocation48_spill] sm:$0xff] %v12489_v40  ;;  %v3616_v34 = vadd.f32 %v3615_v54, %v12489_v40  ;;  %v3697_v28 = vmul.f32 %v12489_v40, %v12489_v40  ;;  %v8435_v14 = vpop.f32.mrb[5].mxu1  ;;  %8593 = vmatmul.mubr.f32.gmra.mrb[110].mxu1 %v3151_v9  ;;  %v3152_v54 = vmul.f32 %v3079_v58, %v2560_v7  ;;  %v9765_v9 = vpop.eup %9764  ;;  %v18070_v58 = vld [vmem:[#allocation36_spill] sm:$0xff] }
 0x475   :  { %8595 = vmatprep.mubr.msk.f32.mxu1 %vm17735_vm1, %v18002_v51  ;;  %v2489_v14 = vadd.f32 1.0, %v9763_v26  ;;  %v2276_v7 = vadd.f32 %v2203_v0, %v18061_v31  ;;  %v2204_v26 = vmul.f32 %v2131_v50, %v18064_v41  ;;  %v2060_v29 = vmul.f32 0.044715, %v18070_v58  ;;  %18071 = vst [vmem:[#allocation36_spill] sm:$0xff] %v12518_v39 }
 0x476   :  { %v3769_v27 = vadd.f32 %v3768_v11, %v3697_v28  ;;  %v2132_v11 = vmul.f32 %v2059_v55, %v18067_v6  ;;  %v1979_v0 = vmul.f32 0.5, %v18050_v12  ;;  %9772 = vtanh.f32 %v2348_v45 }
 0x477   :  { %v12506_v40 = vpop.f32.mrb[6].mxu1  ;;  %v2562_v28 = vmul.f32 %v2489_v14, %v1978_v56  ;;  %v2277_v14 = vadd.f32 %v2204_v26, %v18064_v41  ;;  %v2133_v12 = vmul.f32 %v2060_v29, %v18070_v58  ;;  %v3083_v45 = vadd.f32 %v11785_v18, %v3006_v36 }
 0x478   :  { %18069 = vst [vmem:[#allocation49_spill] sm:$0xff] %v12506_v40  ;;  %v3617_v24 = vadd.f32 %v3616_v34, %v12506_v40  ;;  %v3698_v25 = vmul.f32 %v12506_v40, %v12506_v40  ;;  %v8438_v46 = vpop.f32.mrb[7].mxu1  ;;  %8596 = vmatmul.mubr.f32.gmra.mrb[112].mxu1 %v3152_v54  ;;  %v3153_v34 = vmul.f32 %v3080_v5, %v2561_v57  ;;  %v9767_v54 = vpop.eup %9766  ;;  %v18073_v5 = vld [vmem:[#allocation37_spill] sm:$0xff]  ;;  %v2349_v57 = vmul.f32 0.7978846, %v2276_v7 }
 0x479   :  { %8598 = vmatprep.mubr.msk.f32.mxu1 %vm17735_vm1, %v18002_v51  ;;  %v2490_v46 = vadd.f32 1.0, %v9765_v9  ;;  %v2205_v9 = vmul.f32 %v2132_v11, %v18067_v6  ;;  %18074 = vst [vmem:[#allocation37_spill] sm:$0xff] %v12535_v48  ;;  %v1980_v7 = vmul.f32 0.5, %v18052_v60  ;;  %v2206_v60 = vmul.f32 %v2133_v12, %v18070_v58 }
 0x47a   :  { %v3770_v17 = vadd.f32 %v3769_v27, %v3698_v25  ;;  %v2061_v27 = vmul.f32 0.044715, %v18073_v5  ;;  %9774 = vtanh.f32 %v2349_v57  ;;  %v1981_v57 = vmul.f32 0.5, %v18054_v52 }
 0x47b   :  { %v12523_v40 = vpop.f32.mrb[8].mxu1  ;;  %v2563_v25 = vmul.f32 %v2490_v46, %v1979_v0  ;;  %v2350_v46 = vmul.f32 0.7978846, %v2277_v14  ;;  %v12552_v0 = vpop.permute.xlu0 %2889 }
 0x47c   :  { %18072 = vst [vmem:[#allocation50_spill] sm:$0xff] %v12523_v40  ;;  %v3618_v50 = vadd.f32 %v3617_v24, %v12523_v40  ;;  %v3699_v55 = vmul.f32 %v12523_v40, %v12523_v40  ;;  %v8441_v53 = vpop.f32.mrb[9].mxu1  ;;  %8599 = vmatmul.mubr.f32.gmra.mrb[114].mxu1 %v3153_v34  ;;  %v3154_v24 = vmul.f32 %v3081_v33, %v2562_v28  ;;  %v9769_v34 = vpop.eup %9768 }
 0x47d   :  { %8601 = vmatprep.mubr.msk.f32.mxu1 %vm17735_vm1, %v18002_v51  ;;  %v2491_v53 = vadd.f32 1.0, %v9767_v54  ;;  %v3007_v40 = vmul.f32 %v11774_v62, %v12535_v48  ;;  %v2134_v33 = vmul.f32 %v2061_v27, %v18073_v5  ;;  %v2278_v54 = vadd.f32 %v2205_v9, %v18067_v6  ;;  %v9771_v36 = vpop.eup %9770 }
 0x47e   :  { %v3771_v56 = vadd.f32 %v3770_v17, %v3699_v55  ;;  %v18076_v17 = vld [vmem:[#allocation38_spill] sm:$0xff]  ;;  %v3155_v55 = vmul.f32 %v3082_v22, %v2563_v25  ;;  %9776 = vtanh.f32 %v2350_v46  ;;  %v2279_v25 = vadd.f32 %v2206_v60, %v18070_v58 }
 0x47f   :  { %v12540_v39 = vpop.f32.mrb[10].mxu1  ;;  %v2062_v28 = vmul.f32 0.044715, %v18076_v17  ;;  %18077 = vst [vmem:[#allocation38_spill] sm:$0xff] %v12552_v0  ;;  %v3084_v27 = vadd.f32 %v11785_v18, %v3007_v40  ;;  %v2207_v22 = vmul.f32 %v2134_v33, %v18073_v5  ;;  %v2351_v40 = vmul.f32 0.7978846, %v2278_v54 }
 0x480   :  { %18075 = vst [vmem:[#allocation51_spill] sm:$0xff] %v12540_v39  ;;  %v3619_v26 = vadd.f32 %v3618_v50, %v12540_v39  ;;  %v3700_v11 = vmul.f32 %v12540_v39, %v12540_v39  ;;  %v8444_v29 = vpop.f32.mrb[11].mxu1  ;;  %8602 = vmatmul.mubr.f32.gmra.mrb[116].mxu1 %v3154_v24  ;;  %v2492_v24 = vadd.f32 1.0, %v9769_v34  ;;  %v3008_v39 = vmul.f32 %v11774_v62, %v12552_v0  ;;  %v9773_v34 = vpop.eup %9772 }
 0x481   :  { %8604 = vmatprep.mubr.msk.f32.mxu1 %vm17735_vm1, %v18002_v51  ;;  %v2564_v29 = vmul.f32 %v2491_v53, %v1980_v7  ;;  %v18079_v53 = vld [vmem:[#allocation39_spill] sm:$0xff]  ;;  %v12569_v7 = vpop.permute.xlu1 %2894  ;;  %v1982_v46 = vmul.f32 0.5, %v18056_v63  ;;  %9778 = vtanh.f32 %v2351_v40  ;;  %v1983_v40 = vmul.f32 0.5, %v18058_v13 }
 0x482   :  { %v3772_v50 = vadd.f32 %v3771_v56, %v3700_v11  ;;  %v2135_v56 = vmul.f32 %v2062_v28, %v18076_v17  ;;  %v2063_v52 = vmul.f32 0.044715, %v18079_v53  ;;  %18080 = vst [vmem:[#allocation39_spill] sm:$0xff] %v12569_v7  ;;  %v3085_v33 = vadd.f32 %v11785_v18, %v3008_v39 }
 0x483   :  { %v12557_v48 = vpop.f32.mrb[12].mxu1  ;;  %v3156_v11 = vmul.f32 %v3083_v45, %v2564_v29  ;;  %v3009_v28 = vmul.f32 %v11774_v62, %v12569_v7  ;;  %v2280_v45 = vadd.f32 %v2207_v22, %v18073_v5  ;;  %v2352_v39 = vmul.f32 0.7978846, %v2279_v25  ;;  %v18082_v29 = vld [vmem:[#allocation40_spill] sm:$0xff] }
 0x484   :  { %18078 = vst [vmem:[#allocation52_spill] sm:$0xff] %v12557_v48  ;;  %v3620_v14 = vadd.f32 %v3619_v26, %v12557_v48  ;;  %v3701_v9 = vmul.f32 %v12557_v48, %v12557_v48  ;;  %v8447_v12 = vpop.f32.mrb[13].mxu1  ;;  %8605 = vmatmul.mubr.f32.gmra.mrb[118].mxu1 %v3155_v55  ;;  %v2493_v55 = vadd.f32 1.0, %v9771_v36  ;;  %v2208_v36 = vmul.f32 %v2135_v56, %v18076_v17 }
 0x485   :  { %8607 = vmatprep.mubr.msk.f32.mxu1 %vm17735_vm1, %v18002_v51  ;;  %v2565_v12 = vmul.f32 %v2492_v24, %v1981_v57  ;;  %v2064_v63 = vmul.f32 0.044715, %v18082_v29  ;;  %v12586_v24 = vpop.permute.xlu0 %2899  ;;  %v3086_v22 = vadd.f32 %v11785_v18, %v3009_v28  ;;  %9780 = vtanh.f32 %v2352_v39  ;;  %v12603_v28 = vpop.permute.xlu1 %2904 }
 0x486   :  { %v3773_v26 = vadd.f32 %v3772_v50, %v3701_v9  ;;  %v2136_v50 = vmul.f32 %v2063_v52, %v18079_v53  ;;  %v2566_v9 = vmul.f32 %v2493_v55, %v1982_v46  ;;  %v3010_v56 = vmul.f32 %v11774_v62, %v12586_v24  ;;  %v18084_v55 = vld [vmem:[#allocation35_spill] sm:$0xff] }
 0x487   :  { %v12574_v48 = vpop.f32.mrb[14].mxu1  ;;  %v2065_v13 = vmul.f32 0.044715, %v18084_v55 }
 0x488   :  { %18081 = vst [vmem:[#allocation53_spill] sm:$0xff] %v12574_v48  ;;  %v3621_v54 = vadd.f32 %v3620_v14, %v12574_v48  ;;  %v3702_v60 = vmul.f32 %v12574_v48, %v12574_v48  ;;  %v8450_v0 = vpop.f32.mrb[15].mxu1  ;;  %8608 = vmatmul.mubr.f32.gmra.mrb[120].mxu1 %v3156_v11  ;;  %v3157_v14 = vmul.f32 %v3084_v27, %v2565_v12  ;;  %v9775_v11 = vpop.eup %9774  ;;  %v2353_v27 = vmul.f32 0.7978846, %v2280_v45 }
 0x489   :  { %8610 = vmatprep.mubr.msk.f32.mxu1 %vm17735_vm1, %v18002_v51  ;;  %v2494_v0 = vadd.f32 1.0, %v9773_v34  ;;  %v2281_v34 = vadd.f32 %v2208_v36, %v18076_v17  ;;  %v2137_v12 = vmul.f32 %v2064_v63, %v18082_v29  ;;  %v3087_v45 = vadd.f32 %v11785_v18, %v3010_v56  ;;  %v12619_v56 = vpop.permute.xlu0 %2909 }
 0x48a   :  { %v3774_v57 = vadd.f32 %v3773_v26, %v3702_v60  ;;  %v2209_v26 = vmul.f32 %v2136_v50, %v18079_v53  ;;  %v3011_v36 = vmul.f32 %v11774_v62, %v12603_v28  ;;  %9782 = vtanh.f32 %v2353_v27 }
 0x48b   :  { %v12591_v48 = vpop.f32.mrb[16].mxu1  ;;  %v2567_v60 = vmul.f32 %v2494_v0, %v1983_v40  ;;  %v2210_v0 = vmul.f32 %v2137_v12, %v18082_v29 }
 0x48c   :  { %18083 = vst [vmem:[#allocation40_spill] sm:$0xff] %v12591_v48  ;;  %v3622_v25 = vadd.f32 %v3621_v54, %v12591_v48  ;;  %v3703_v52 = vmul.f32 %v12591_v48, %v12591_v48  ;;  %v8453_v7 = vpop.f32.mrb[17].mxu1  ;;  %8611 = vmatmul.mubr.f32.gmra.mrb[122].mxu1 %v3157_v14  ;;  %v3158_v54 = vmul.f32 %v3085_v33, %v2566_v9  ;;  %v9777_v14 = vpop.eup %9776  ;;  %v2354_v33 = vmul.f32 0.7978846, %v2281_v34 }
 0x48d   :  { %8613 = vmatprep.mubr.msk.f32.mxu1 %vm17735_vm1, %v18002_v51  ;;  %v2495_v7 = vadd.f32 1.0, %v9775_v11  ;;  %v2282_v9 = vadd.f32 %v2209_v26, %v18079_v53  ;;  %v2138_v11 = vmul.f32 %v2065_v13, %v18084_v55  ;;  %v3088_v34 = vadd.f32 %v11785_v18, %v3011_v36 }
 0x48e   :  { %v3775_v46 = vadd.f32 %v3774_v57, %v3703_v52  ;;  %v1984_v57 = vmul.f32 0.5, %v18061_v31  ;;  %v3012_v31 = vmul.f32 %v11774_v62, %v12619_v56  ;;  %9784 = vtanh.f32 %v2354_v33 }
 0x48f   :  { %v12608_v48 = vpop.f32.mrb[18].mxu1 }
 0x490   :  { %18085 = vst [vmem:[#allocation35_spill] sm:$0xff] %v12608_v48  ;;  %v3623_v39 = vadd.f32 %v3622_v25, %v12608_v48  ;;  %v3704_v50 = vmul.f32 %v12608_v48, %v12608_v48  ;;  %v8456_v63 = vpop.f32.mrb[19].mxu1  ;;  %8614 = vmatmul.mubr.f32.gmra.mrb[124].mxu1 %v3158_v54  ;;  %v3159_v25 = vmul.f32 %v3086_v22, %v2567_v60  ;;  %v9779_v54 = vpop.eup %9778  ;;  %v2355_v22 = vmul.f32 0.7978846, %v2282_v9 }
 0x491   :  { %8616 = vmatprep.mubr.msk.f32.mxu1 %vm17735_vm1, %v18002_v51  ;;  %v2568_v52 = vmul.f32 %v2495_v7, %v1984_v57  ;;  %v2496_v63 = vadd.f32 1.0, %v9777_v14  ;;  %v2283_v60 = vadd.f32 %v2210_v0, %v18082_v29  ;;  %v2211_v7 = vmul.f32 %v2138_v11, %v18084_v55  ;;  %v9781_v57 = vpop.eup %9780  ;;  %v12634_v48 = vpop.permute.xlu1 %2914 }
 0x492   :  { %v3776_v40 = vadd.f32 %v3775_v46, %v3704_v50  ;;  %v1985_v46 = vmul.f32 0.5, %v18064_v41  ;;  %v3013_v41 = vmul.f32 %v11774_v62, %v12634_v48  ;;  %v1986_v0 = vmul.f32 0.5, %v18067_v6 }
 0x493   :  { %v12623_v27 = vpop.f32.mrb[20].mxu1  ;;  %v3160_v36 = vmul.f32 %v3087_v45, %v2568_v52  ;;  %v3089_v45 = vadd.f32 %v11785_v18, %v3012_v31  ;;  %9786 = vtanh.f32 %v2355_v22  ;;  %v2356_v11 = vmul.f32 0.7978846, %v2283_v60 }
 0x494   :  { %18086 = vst [vmem:[#allocation54_spill] sm:$0xff] %v12623_v27  ;;  %v3624_v26 = vadd.f32 %v3623_v39, %v12623_v27  ;;  %v3705_v12 = vmul.f32 %v12623_v27, %v12623_v27  ;;  %v8459_v13 = vpop.f32.mrb[21].mxu1  ;;  %8617 = vmatmul.mubr.f32.gmra.mrb[126].mxu1 %v3159_v25  ;;  %v2569_v50 = vmul.f32 %v2496_v63, %v1985_v46  ;;  %v2497_v39 = vadd.f32 1.0, %v9779_v54  ;;  %v9783_v52 = vpop.eup %9782 }
 0x495   :  { %8619 = vmatprep.mubr.msk.f32.mxu1 %vm17735_vm1, %v18002_v51  ;;  %v1987_v22 = vmul.f32 0.5, %v18070_v58  ;;  %v3090_v60 = vadd.f32 %v11785_v18, %v3013_v41  ;;  %9788 = vtanh.f32 %v2356_v11 }
 0x496   :  { %v3777_v14 = vadd.f32 %v3776_v40, %v3705_v12  ;;  %v2284_v40 = vadd.f32 %v2211_v7, %v18084_v55  ;;  %v3161_v54 = vmul.f32 %v3088_v34, %v2569_v50  ;;  %v2498_v12 = vadd.f32 1.0, %v9781_v57 }
 0x497   :  { %v12636_v13 = vpop.f32.mrb[22].mxu1  ;;  %v2499_v57 = vadd.f32 1.0, %v9783_v52 }
 0x498   :  { %18087 = vst [vmem:[#allocation55_spill] sm:$0xff] %v12636_v13  ;;  %v3625_v25 = vadd.f32 %v3624_v26, %v12636_v13  ;;  %v3706_v33 = vmul.f32 %v12636_v13, %v12636_v13  ;;  %v8462_v9 = vpop.f32.mrb[23].mxu1  ;;  %8620 = vmatmul.mubr.f32.gmra.mrb[128].mxu1 %v3160_v36  ;;  %v2570_v26 = vmul.f32 %v2497_v39, %v1986_v0  ;;  %v2357_v7 = vmul.f32 0.7978846, %v2284_v40  ;;  %v12663_v0 = vpop.permute.xlu1 %2924 }
 0x499   :  { %8622 = vmatprep.mubr.msk.f32.mxu1 %vm17735_vm1, %v18002_v51  ;;  %v12650_v9 = vpop.permute.xlu0 %2919  ;;  %v2571_v39 = vmul.f32 %v2498_v12, %v1987_v22 }
 0x49a   :  { %v3778_v63 = vadd.f32 %v3777_v14, %v3706_v33  ;;  %v3014_v34 = vmul.f32 %v11774_v62, %v12650_v9  ;;  %v3162_v50 = vmul.f32 %v3089_v45, %v2570_v26  ;;  %v3015_v45 = vmul.f32 %v11774_v62, %v12663_v0 }
 0x49b   :  { %v12648_v46 = vpop.f32.mrb[24].mxu1  ;;  %9790 = vtanh.f32 %v2357_v7  ;;  %v3163_v52 = vmul.f32 %v3090_v60, %v2571_v39 }
 0x49c   :  { %18088 = vst [vmem:[#allocation56_spill] sm:$0xff] %v12648_v46  ;;  %v3626_v6 = vadd.f32 %v3625_v25, %v12648_v46  ;;  %v3707_v31 = vmul.f32 %v12648_v46, %v12648_v46  ;;  %v8465_v36 = vpop.f32.mrb[25].mxu1  ;;  %8623 = vmatmul.mubr.f32.gmra.mrb[130].mxu1 %v3161_v54  ;;  %v9785_v25 = vpop.eup %9784  ;;  %v3091_v11 = vadd.f32 %v11785_v18, %v3014_v34 }
 0x49d   :  { %8625 = vmatprep.mubr.msk.f32.mxu1 %vm17735_vm1, %v18002_v51  ;;  %v1988_v36 = vmul.f32 0.5, %v18073_v5  ;;  %v2500_v26 = vadd.f32 1.0, %v9785_v25  ;;  %v9787_v12 = vpop.eup %9786  ;;  %v3092_v7 = vadd.f32 %v11785_v18, %v3015_v45 }
 0x49e   :  { %v3779_v14 = vadd.f32 %v3778_v63, %v3707_v31  ;;  %v12676_v31 = vpop.permute.xlu0 %2929 }
 0x49f   :  { %v12661_v33 = vpop.f32.mrb[26].mxu1  ;;  %v2572_v63 = vmul.f32 %v2499_v57, %v1988_v36  ;;  %v3016_v60 = vmul.f32 %v11774_v62, %v12676_v31 }
 0x4a0   :  { %18089 = vst [vmem:[#allocation57_spill] sm:$0xff] %v12661_v33  ;;  %v3627_v58 = vadd.f32 %v3626_v6, %v12661_v33  ;;  %v3708_v41 = vmul.f32 %v12661_v33, %v12661_v33  ;;  %v8468_v54 = vpop.f32.mrb[27].mxu1  ;;  %8626 = vmatmul.mubr.f32.gmra.mrb[132].mxu1 %v3162_v50  ;;  %v1989_v50 = vmul.f32 0.5, %v18076_v17 }
 0x4a1   :  { %8628 = vmatprep.mubr.msk.f32.mxu1 %vm17735_vm1, %v18002_v51  ;;  %v3164_v57 = vmul.f32 %v3091_v11, %v2572_v63 }
 0x4a2   :  { %v3780_v40 = vadd.f32 %v3779_v14, %v3708_v41  ;;  %v12687_v14 = vpop.permute.xlu1 %2934  ;;  %v2573_v25 = vmul.f32 %v2500_v26, %v1989_v50  ;;  %v9789_v41 = vpop.eup %9788 }
 0x4a3   :  { %v12674_v6 = vpop.f32.mrb[28].mxu1  ;;  %v12700_v11 = vpop.permute.xlu0 %2939 }
 0x4a4   :  { %18090 = vst [vmem:[#allocation58_spill] sm:$0xff] %v12674_v6  ;;  %v3628_v5 = vadd.f32 %v3627_v58, %v12674_v6  ;;  %v3709_v22 = vmul.f32 %v12674_v6, %v12674_v6  ;;  %v8471_v34 = vpop.f32.mrb[29].mxu1  ;;  %8629 = vmatmul.mubr.f32.gmra.mrb[134].mxu1 %v3163_v52  ;;  %v2501_v58 = vadd.f32 1.0, %v9787_v12  ;;  %v1990_v52 = vmul.f32 0.5, %v18079_v53 }
 0x4a5   :  { %8631 = vmatprep.mubr.msk.f32.mxu1 %vm17735_vm1, %v18002_v51  ;;  %v3093_v34 = vadd.f32 %v11785_v18, %v3016_v60  ;;  %v3165_v26 = vmul.f32 %v3092_v7, %v2573_v25 }
 0x4a6   :  { %v3781_v39 = vadd.f32 %v3780_v40, %v3709_v22  ;;  %v3017_v40 = vmul.f32 %v11774_v62, %v12687_v14  ;;  %v2574_v12 = vmul.f32 %v2501_v58, %v1990_v52  ;;  %v9791_v22 = vpop.eup %9790 }
 0x4a7   :  { %v12689_v54 = vpop.f32.mrb[30].mxu1 }
 0x4a8   :  { %18091 = vst [vmem:[#allocation59_spill] sm:$0xff] %v12689_v54  ;;  %v3629_v36 = vadd.f32 %v3628_v5, %v12689_v54  ;;  %v3710_v17 = vmul.f32 %v12689_v54, %v12689_v54  ;;  %v8474_v45 = vpop.f32.mrb[31].mxu1  ;;  %8632 = vmatmul.mubr.f32.gmra.mrb[136].mxu1 %v3164_v57  ;;  %v2502_v5 = vadd.f32 1.0, %v9789_v41  ;;  %v3094_v54 = vadd.f32 %v11785_v18, %v3017_v40 }
 0x4a9   :  { %8634 = vmatprep.mubr.msk.f32.mxu1 %vm17735_vm1, %v18002_v51  ;;  %v1991_v45 = vmul.f32 0.5, %v18082_v29  ;;  %v3166_v25 = vmul.f32 %v3093_v34, %v2574_v12  ;;  %v2503_v41 = vadd.f32 1.0, %v9791_v22  ;;  %v1992_v40 = vmul.f32 0.5, %v18084_v55 }
 0x4aa   :  { %v3782_v63 = vadd.f32 %v3781_v39, %v3710_v17  ;;  %v3018_v39 = vmul.f32 %v11774_v62, %v12700_v11 }
 0x4ab   :  { %v12702_v50 = vpop.f32.mrb[32].mxu1  ;;  %v2575_v58 = vmul.f32 %v2502_v5, %v1991_v45 }
 0x4ac   :  { %18092 = vst [vmem:[#allocation60_spill] sm:$0xff] %v12702_v50  ;;  %v3630_v57 = vadd.f32 %v3629_v36, %v12702_v50  ;;  %v3711_v53 = vmul.f32 %v12702_v50, %v12702_v50  ;;  %v8477_v60 = vpop.f32.mrb[33].mxu1  ;;  %8635 = vmatmul.mubr.f32.gmra.mrb[138].mxu1 %v3165_v26  ;;  %v3095_v62 = vadd.f32 %v11785_v18, %v3018_v39  ;;  %v9636_v39 = vld [vmem:[%s17544_s6] sm:$0xff]  }
 0x4ad   :  { %8637 = vmatprep.mubr.msk.f32.mxu1 %vm17735_vm1, %v18002_v51  ;;  %v3167_v34 = vmul.f32 %v3094_v54, %v2575_v58  ;;  %v2576_v26 = vmul.f32 %v2503_v41, %v1992_v40 }
 0x4ae   :  { %v3783_v7 = vadd.f32 %v3782_v63, %v3711_v53 }
 0x4af   :  { %v12713_v36 = vpop.f32.mrb[34].mxu1  ;;  %v3168_v53 = vmul.f32 %v3095_v62, %v2576_v26 }
 0x4b0   :  { %18093 = vst [vmem:[#allocation61_spill] sm:$0xff] %v12713_v36  ;;  %v3631_v17 = vadd.f32 %v3630_v57, %v12713_v36  ;;  %v3712_v52 = vmul.f32 %v12713_v36, %v12713_v36  ;;  %v8480_v29 = vpop.f32.mrb[35].mxu1  ;;  %8638 = vmatmul.mubr.f32.gmra.mrb[140].mxu1 %v3166_v25 }
 0x4b1   :  { %8640 = vmatprep.mubr.msk.f32.mxu1 %vm17735_vm1, %v18002_v51  ;;  %v9637_v29 = vld [vmem:[%s17544_s6 + $0x8] sm:$0xff]  }
 0x4b2   :  { %v3784_v63 = vadd.f32 %v3783_v7, %v3712_v52  ;;  %v9944_v52 = vld [vmem:[%s17537_s1] sm:$0xff]  }
 0x4b3   :  { %v12722_v12 = vpop.f32.mrb[36].mxu1 }
 0x4b4   :  { %18094 = vst [vmem:[#allocation62_spill] sm:$0xff] %v12722_v12  ;;  %v3632_v5 = vadd.f32 %v3631_v17, %v12722_v12  ;;  %v3713_v22 = vmul.f32 %v12722_v12, %v12722_v12  ;;  %v8483_v57 = vpop.f32.mrb[37].mxu1  ;;  %8641 = vmatmul.mubr.f32.gmra.mrb[142].mxu1 %v3167_v34 }
 0x4b5   :  { %8643 = vmatprep.mubr.msk.f32.mxu1 %vm17735_vm1, %v18002_v51 }
 0x4b6   :  { %v3785_v55 = vadd.f32 %v3784_v63, %v3713_v22 }
 0x4b7   :  { %v12729_v60 = vpop.f32.mrb[38].mxu1 }
 0x4b8   :  { %18095 = vst [vmem:[#allocation63_spill] sm:$0xff] %v12729_v60  ;;  %v3633_v18 = vadd.f32 %v3632_v5, %v12729_v60  ;;  %v3714_v54 = vmul.f32 %v12729_v60, %v12729_v60  ;;  %v8486_v45 = vpop.f32.mrb[39].mxu1  ;;  %8644 = vmatmul.mubr.f32.gmra.mrb[144].mxu1 %v3168_v53  ;;  %v9638_v5 = vld [vmem:[%s17544_s6 + $0x10] sm:$0xff]  }
 0x4b9   :  { %8648 = vmatprep.mubr.msk.bf16.mxu1 %vm17735_vm1, %v18002_v51  ;;  %v9639_v45 = vld [vmem:[%s17544_s6 + $0x18] sm:$0xff]  }
 0x4ba   :  { %v3786_v7 = vadd.f32 %v3785_v55, %v3714_v54  ;;  %v9945_v54 = vld [vmem:[%s17537_s1 + $0x8] sm:$0xff]  }
 0x4bb   :  { %v12739_v25 = vpop.f32.mrb[40].mxu1 }
 0x4bc   :  { %v3634_v58 = vadd.f32 %v3633_v18, %v12739_v25  ;;  %v3715_v41 = vmul.f32 %v12739_v25, %v12739_v25  ;;  %v8489_v17 = vpop.f32.mrb[41].mxu1  ;;  %8649 = vmatmul.mubr.msk.bf16.vlgmr.msra.gmra.mrb[148].mxu1 %vm443_vm2, %v9944_v52 }
 0x4bd   :  { %8797 = vmatpush3.bf16.msra.mxu1 %v9636_v39  ;;  %8652 = vmatprep.mubr.msk.bf16.mxu1 %vm17735_vm1, %v18002_v51 }
 0x4be   :  { %v3787_v40 = vadd.f32 %v3786_v7, %v3715_v41  ;;  %8798 = vmatprep.subr.bf16.mxu1 %v18002_v51 }
 0x4bf   :  { %v12754_v62 = vpop.f32.mrb[42].mxu1 }
 0x4c0   :  { %v3635_v63 = vadd.f32 %v3634_v58, %v12754_v62  ;;  %v3716_v34 = vmul.f32 %v12754_v62, %v12754_v62  ;;  %v8492_v26 = vpop.f32.mrb[43].mxu1 }
 0x4c1   :  { %8799 = vmatpush3.bf16.msra.mxu1 %v9637_v29  ;;  %v9946_v26 = vld [vmem:[%s17537_s1 + $0x10] sm:$0xff]  }
 0x4c2   :  { %v3788_v22 = vadd.f32 %v3787_v40, %v3716_v34  ;;  %8800 = vmatprep.subr.bf16.mxu1 %v18002_v51 }
 0x4c3   :  { %v12763_v57 = vpop.f32.mrb[44].mxu1 }
 0x4c4   :  { %v3636_v55 = vadd.f32 %v3635_v63, %v12763_v57  ;;  %v3717_v53 = vmul.f32 %v12763_v57, %v12763_v57  ;;  %v8495_v18 = vpop.f32.mrb[45].mxu1  ;;  %8653 = vmatmul.mubr.msk.bf16.gmra.mrb[152].mxu1 %vm443_vm2, %v9945_v54 }
 0x4c5   :  { %8656 = vmatprep.mubr.msk.bf16.mxu1 %vm17735_vm1, %v18002_v51  ;;  %8801 = vmatpush3.bf16.msra.mxu1 %v9638_v5 }
 0x4c6   :  { %v3789_v39 = vadd.f32 %v3788_v22, %v3717_v53  ;;  %8802 = vmatprep.subr.bf16.mxu1 %v18002_v51 }
 0x4c7   :  { %v12778_v7 = vpop.f32.mrb[46].mxu1 }
 0x4c8   :  { %v3637_v58 = vadd.f32 %v3636_v55, %v12778_v7  ;;  %v3718_v41 = vmul.f32 %v12778_v7, %v12778_v7  ;;  %v8498_v17 = vpop.f32.mrb[47].mxu1 }
 0x4c9   :  { %8803 = vmatpush3.bf16.msra.mxu1 %v9639_v45  ;;  %v9640_v45 = vld [vmem:[%s17544_s6 + $0x20] sm:$0xff]  }
 0x4ca   :  { %v3790_v52 = vadd.f32 %v3789_v39, %v3718_v41  ;;  %8804 = vmatprep.subr.bf16.mxu1 %v18002_v51 }
 0x4cb   :  { %v12784_v29 = vpop.f32.mrb[48].mxu1 }
 0x4cc   :  { %v3638_v40 = vadd.f32 %v3637_v58, %v12784_v29  ;;  %v3719_v63 = vmul.f32 %v12784_v29, %v12784_v29  ;;  %v8501_v34 = vpop.f32.mrb[49].mxu1  ;;  %8657 = vmatmul.mubr.msk.bf16.gmra.mrb[156].mxu1 %vm443_vm2, %v9946_v26 }
 0x4cd   :  { %8660 = vmatprep.mubr.msk.bf16.mxu1 %vm17735_vm1, %v18002_v51  ;;  %8805 = vmatpush3.bf16.msra.mxu1 %v9640_v45 }
 0x4ce   :  { %v3791_v5 = vadd.f32 %v3790_v52, %v3719_v63  ;;  %v9947_v52 = vld [vmem:[%s17537_s1 + $0x18] sm:$0xff]   ;;  %8806 = vmatprep.subr.bf16.mxu1 %v18002_v51 }
 0x4cf   :  { %v12795_v22 = vpop.f32.mrb[50].mxu1 }
 0x4d0   :  { %v3639_v55 = vadd.f32 %v3638_v40, %v12795_v22  ;;  %v3720_v53 = vmul.f32 %v12795_v22, %v12795_v22  ;;  %v8504_v18 = vpop.f32.mrb[51].mxu1 }
 0x4d2   :  { %v3792_v54 = vadd.f32 %v3791_v5, %v3720_v53 }
 0x4d3   :  { %v12803_v39 = vpop.f32.mrb[52].mxu1 }
 0x4d4   :  { %v3640_v58 = vadd.f32 %v3639_v55, %v12803_v39  ;;  %v3721_v41 = vmul.f32 %v12803_v39, %v12803_v39  ;;  %v8507_v17 = vpop.f32.mrb[53].mxu1  ;;  %8661 = vmatmul.mubr.msk.bf16.gmra.mrb[160].mxu1 %vm443_vm2, %v9947_v52 }
 0x4d5   :  { %8664 = vmatprep.mubr.msk.bf16.mxu1 %vm17735_vm1, %v18002_v51 }
 0x4d6   :  { %v3793_v40 = vadd.f32 %v3792_v54, %v3721_v41  ;;  %v9948_v54 = vld [vmem:[%s17537_s1 + $0x20] sm:$0xff]  }
 0x4d7   :  { %v12815_v63 = vpop.f32.mrb[54].mxu1 }
 0x4d8   :  { %v3641_v34 = vadd.f32 %v3640_v58, %v12815_v63  ;;  %v3722_v26 = vmul.f32 %v12815_v63, %v12815_v63  ;;  %v8510_v5 = vpop.f32.mrb[55].mxu1 }
 0x4da   :  { %v3794_v55 = vadd.f32 %v3793_v40, %v3722_v26 }
 0x4db   :  { %v12820_v53 = vpop.f32.mrb[56].mxu1 }
 0x4dc   :  { %v3642_v18 = vadd.f32 %v3641_v34, %v12820_v53  ;;  %v3723_v17 = vmul.f32 %v12820_v53, %v12820_v53  ;;  %v8513_v45 = vpop.f32.mrb[57].mxu1  ;;  %8665 = vmatmul.mubr.msk.bf16.gmra.mrb[164].mxu1 %vm443_vm2, %v9948_v54 }
 0x4dd   :  { %8668 = vmatprep.mubr.msk.bf16.mxu1 %vm17735_vm1, %v18002_v51 }
 0x4de   :  { %v3795_v58 = vadd.f32 %v3794_v55, %v3723_v17  ;;  %v9949_v55 = vld [vmem:[%s17537_s1 + $0x28] sm:$0xff]  }
 0x4df   :  { %v12831_v41 = vpop.f32.mrb[58].mxu1 }
 0x4e0   :  { %v3643_v52 = vadd.f32 %v3642_v18, %v12831_v41  ;;  %v3724_v40 = vmul.f32 %v12831_v41, %v12831_v41  ;;  %v8516_v34 = vpop.f32.mrb[59].mxu1 }
 0x4e2   :  { %v3796_v26 = vadd.f32 %v3795_v58, %v3724_v40 }
 0x4e3   :  { %v12836_v5 = vpop.f32.mrb[60].mxu1 }
 0x4e4   :  { %18096 = vst [vmem:[#allocation64_spill] sm:$0xff] %v12836_v5  ;;  %v3644_v45 = vadd.f32 %v3643_v52, %v12836_v5  ;;  %v3725_v54 = vmul.f32 %v12836_v5, %v12836_v5  ;;  %v8519_v60 = vpop.f32.mrb[61].mxu1  ;;  %8669 = vmatmul.mubr.msk.bf16.gmra.mrb[168].mxu1 %vm443_vm2, %v9949_v55 }
 0x4e5   :  { %8672 = vmatprep.mubr.msk.bf16.mxu1 %vm17735_vm1, %v18002_v51 }
 0x4e6   :  { %v3797_v18 = vadd.f32 %v3796_v26, %v3725_v54  ;;  %v9950_v26 = vld [vmem:[%s17537_s1 + $0x30] sm:$0xff]  }
 0x4e7   :  { %v12847_v17 = vpop.f32.mrb[62].mxu1 }
 0x4e8   :  { %18097 = vst [vmem:[#allocation65_spill] sm:$0xff] %v12847_v17  ;;  %v3645_v58 = vadd.f32 %v3644_v45, %v12847_v17  ;;  %v3726_v52 = vmul.f32 %v12847_v17, %v12847_v17  ;;  %v8522_v40 = vpop.f32.mrb[63].mxu1  ;;  %v18142_v17 = vld [vmem:[#allocation41_spill] sm:$0xff] }
 0x4ea   :  { %v3798_v34 = vadd.f32 %v3797_v18, %v3726_v52 }
 0x4eb   :  { %v12852_v60 = vpop.f32.mrb[64].mxu1 }
 0x4ec   :  { %18098 = vst [vmem:[#allocation66_spill] sm:$0xff] %v12852_v60  ;;  %v3646_v12 = vadd.f32 %v3645_v58, %v12852_v60  ;;  %v3727_v55 = vmul.f32 %v12852_v60, %v12852_v60  ;;  %v8525_v36 = vpop.f32.mrb[65].mxu1  ;;  %8673 = vmatmul.mubr.msk.bf16.gmra.mrb[172].mxu1 %vm443_vm2, %v9950_v26 }
 0x4ed   :  { %8676 = vmatprep.mubr.msk.bf16.mxu1 %vm17735_vm1, %v18002_v51 }
 0x4ee   :  { %v3799_v45 = vadd.f32 %v3798_v34, %v3727_v55  ;;  %v9951_v34 = vld [vmem:[%s17537_s1 + $0x38] sm:$0xff]   ;;  %v9641_v55 = vld [vmem:[%s17544_s6 + $0x28] sm:$0xff]  }
 0x4ef   :  { %v12863_v54 = vpop.f32.mrb[66].mxu1  ;;  %8807 = vmatpush3.bf16.msra.mxu1 %v9641_v55 }
 0x4f0   :  { %18099 = vst [vmem:[#allocation67_spill] sm:$0xff] %v12863_v54  ;;  %v3647_v18 = vadd.f32 %v3646_v12, %v12863_v54  ;;  %v3728_v58 = vmul.f32 %v12863_v54, %v12863_v54  ;;  %v8528_v52 = vpop.f32.mrb[67].mxu1  ;;  %8808 = vmatprep.subr.bf16.mxu1 %v18002_v51 }
 0x4f2   :  { %v3800_v40 = vadd.f32 %v3799_v45, %v3728_v58 }
 0x4f3   :  { %v12868_v36 = vpop.f32.mrb[68].mxu1 }
 0x4f4   :  { %18100 = vst [vmem:[#allocation68_spill] sm:$0xff] %v12868_v36  ;;  %v3648_v50 = vadd.f32 %v3647_v18, %v12868_v36  ;;  %v3729_v26 = vmul.f32 %v12868_v36, %v12868_v36  ;;  %v8531_v6 = vpop.f32.mrb[69].mxu1  ;;  %8677 = vmatmul.mubr.msk.bf16.gmra.mrb[176].mxu1 %vm443_vm2, %v9951_v34 }
 0x4f5   :  { %8680 = vmatprep.mubr.msk.bf16.mxu1 %vm17735_vm1, %v18002_v51 }
 0x4f6   :  { %v3801_v12 = vadd.f32 %v3800_v40, %v3729_v26 }
 0x4f7   :  { %v12882_v45 = vpop.f32.mrb[70].mxu1 }
 0x4f8   :  { %18101 = vst [vmem:[#allocation69_spill] sm:$0xff] %v12882_v45  ;;  %v3649_v18 = vadd.f32 %v3648_v50, %v12882_v45  ;;  %v3730_v6 = vmul.f32 %v12882_v45, %v12882_v45  ;;  %v8534_v58 = vpop.f32.mrb[71].mxu1  ;;  %v9952_v50 = vld [vmem:[%s17537_s1 + $0x40] sm:$0xff]  }
 0x4fa   :  { %v3802_v52 = vadd.f32 %v3801_v12, %v3730_v6 }
 0x4fb   :  { %v12888_v34 = vpop.f32.mrb[72].mxu1 }
 0x4fc   :  { %18102 = vst [vmem:[#allocation70_spill] sm:$0xff] %v12888_v34  ;;  %v3650_v40 = vadd.f32 %v3649_v18, %v12888_v34  ;;  %v3731_v26 = vmul.f32 %v12888_v34, %v12888_v34  ;;  %v8537_v33 = vpop.f32.mrb[73].mxu1  ;;  %8681 = vmatmul.mubr.msk.bf16.gmra.mrb[180].mxu1 %vm443_vm2, %v9952_v50 }
 0x4fd   :  { %8684 = vmatprep.mubr.msk.bf16.mxu1 %vm17735_vm1, %v18002_v51 }
 0x4fe   :  { %v3803_v55 = vadd.f32 %v3802_v52, %v3731_v26  ;;  %v9953_v52 = vld [vmem:[%s17537_s1 + $0x48] sm:$0xff]  }
 0x4ff   :  { %v12899_v58 = vpop.f32.mrb[74].mxu1 }
 0x500   :  { %18103 = vst [vmem:[#allocation71_spill] sm:$0xff] %v12899_v58  ;;  %v3651_v12 = vadd.f32 %v3650_v40, %v12899_v58  ;;  %v3732_v18 = vmul.f32 %v12899_v58, %v12899_v58  ;;  %v8540_v6 = vpop.f32.mrb[75].mxu1 }
 0x502   :  { %v3804_v46 = vadd.f32 %v3803_v55, %v3732_v18 }
 0x503   :  { %v12904_v33 = vpop.f32.mrb[76].mxu1 }
 0x504   :  { %18104 = vst [vmem:[#allocation72_spill] sm:$0xff] %v12904_v33  ;;  %v3652_v13 = vadd.f32 %v3651_v12, %v12904_v33  ;;  %v3733_v50 = vmul.f32 %v12904_v33, %v12904_v33  ;;  %v8543_v27 = vpop.f32.mrb[77].mxu1  ;;  %8685 = vmatmul.mubr.msk.bf16.gmra.mrb[184].mxu1 %vm443_vm2, %v9953_v52 }
 0x505   :  { %8688 = vmatprep.mubr.msk.bf16.mxu1 %vm17735_vm1, %v18002_v51 }
 0x506   :  { %v3805_v40 = vadd.f32 %v3804_v46, %v3733_v50  ;;  %v9954_v46 = vld [vmem:[%s17537_s1 + $0x50] sm:$0xff]  }
 0x507   :  { %v12915_v26 = vpop.f32.mrb[78].mxu1 }
 0x508   :  { %18105 = vst [vmem:[#allocation73_spill] sm:$0xff] %v12915_v26  ;;  %v3653_v55 = vadd.f32 %v3652_v13, %v12915_v26  ;;  %v3734_v12 = vmul.f32 %v12915_v26, %v12915_v26  ;;  %v8546_v18 = vpop.f32.mrb[79].mxu1 }
 0x50a   :  { %v3806_v6 = vadd.f32 %v3805_v40, %v3734_v12 }
 0x50b   :  { %v12920_v27 = vpop.f32.mrb[80].mxu1 }
 0x50c   :  { %18106 = vst [vmem:[#allocation74_spill] sm:$0xff] %v12920_v27  ;;  %v3654_v33 = vadd.f32 %v3653_v55, %v12920_v27  ;;  %v3735_v52 = vmul.f32 %v12920_v27, %v12920_v27  ;;  %v8549_v58 = vpop.f32.mrb[81].mxu1  ;;  %8689 = vmatmul.mubr.msk.bf16.gmra.mrb[188].mxu1 %vm443_vm2, %v9954_v46 }
 0x50d   :  { %8692 = vmatprep.mubr.msk.bf16.mxu1 %vm17735_vm1, %v18002_v51 }
 0x50e   :  { %v3807_v13 = vadd.f32 %v3806_v6, %v3735_v52  ;;  %v9955_v6 = vld [vmem:[%s17537_s1 + $0x58] sm:$0xff]  }
 0x50f   :  { %v12931_v50 = vpop.f32.mrb[82].mxu1 }
 0x510   :  { %18107 = vst [vmem:[#allocation75_spill] sm:$0xff] %v12931_v50  ;;  %v3655_v40 = vadd.f32 %v3654_v33, %v12931_v50  ;;  %v3736_v55 = vmul.f32 %v12931_v50, %v12931_v50  ;;  %v8552_v12 = vpop.f32.mrb[83].mxu1 }
 0x512   :  { %v3808_v18 = vadd.f32 %v3807_v13, %v3736_v55 }
 0x513   :  { %v12936_v58 = vpop.f32.mrb[84].mxu1 }
 0x514   :  { %18108 = vst [vmem:[#allocation76_spill] sm:$0xff] %v12936_v58  ;;  %v3656_v27 = vadd.f32 %v3655_v40, %v12936_v58  ;;  %v3737_v46 = vmul.f32 %v12936_v58, %v12936_v58  ;;  %v8555_v26 = vpop.f32.mrb[85].mxu1  ;;  %8693 = vmatmul.mubr.msk.bf16.gmra.mrb[192].mxu1 %vm443_vm2, %v9955_v6 }
 0x515   :  { %8696 = vmatprep.mubr.msk.bf16.mxu1 %vm17735_vm1, %v18002_v51 }
 0x516   :  { %v3809_v33 = vadd.f32 %v3808_v18, %v3737_v46  ;;  %v9956_v18 = vld [vmem:[%s17537_s1 + $0x60] sm:$0xff]  }
 0x517   :  { %v12947_v52 = vpop.f32.mrb[86].mxu1 }
 0x518   :  { %18109 = vst [vmem:[#allocation77_spill] sm:$0xff] %v12947_v52  ;;  %v3657_v13 = vadd.f32 %v3656_v27, %v12947_v52  ;;  %v3738_v40 = vmul.f32 %v12947_v52, %v12947_v52  ;;  %v8558_v55 = vpop.f32.mrb[87].mxu1 }
 0x51a   :  { %v3810_v12 = vadd.f32 %v3809_v33, %v3738_v40 }
 0x51b   :  { %v12952_v26 = vpop.f32.mrb[88].mxu1 }
 0x51c   :  { %18110 = vst [vmem:[#allocation78_spill] sm:$0xff] %v12952_v26  ;;  %v3658_v58 = vadd.f32 %v3657_v13, %v12952_v26  ;;  %v3739_v6 = vmul.f32 %v12952_v26, %v12952_v26  ;;  %v8561_v50 = vpop.f32.mrb[89].mxu1  ;;  %8697 = vmatmul.mubr.msk.bf16.gmra.mrb[196].mxu1 %vm443_vm2, %v9956_v18 }
 0x51d   :  { %8700 = vmatprep.mubr.msk.bf16.mxu1 %vm17735_vm1, %v18002_v51 }
 0x51e   :  { %v3811_v27 = vadd.f32 %v3810_v12, %v3739_v6  ;;  %v9957_v12 = vld [vmem:[%s17537_s1 + $0x68] sm:$0xff]  }
 0x51f   :  { %v12963_v46 = vpop.f32.mrb[90].mxu1 }
 0x520   :  { %18111 = vst [vmem:[#allocation79_spill] sm:$0xff] %v12963_v46  ;;  %v3659_v33 = vadd.f32 %v3658_v58, %v12963_v46  ;;  %v3740_v13 = vmul.f32 %v12963_v46, %v12963_v46  ;;  %v8564_v40 = vpop.f32.mrb[91].mxu1 }
 0x522   :  { %v3812_v55 = vadd.f32 %v3811_v27, %v3740_v13 }
 0x523   :  { %v12968_v50 = vpop.f32.mrb[92].mxu1 }
 0x524   :  { %18112 = vst [vmem:[#allocation80_spill] sm:$0xff] %v12968_v50  ;;  %v3660_v26 = vadd.f32 %v3659_v33, %v12968_v50  ;;  %v3741_v18 = vmul.f32 %v12968_v50, %v12968_v50  ;;  %v8567_v52 = vpop.f32.mrb[93].mxu1  ;;  %8701 = vmatmul.mubr.msk.bf16.gmra.mrb[200].mxu1 %vm443_vm2, %v9957_v12 }
 0x525   :  { %8704 = vmatprep.mubr.msk.bf16.mxu1 %vm17735_vm1, %v18002_v51 }
 0x526   :  { %v3813_v58 = vadd.f32 %v3812_v55, %v3741_v18  ;;  %v9958_v55 = vld [vmem:[%s17537_s1 + $0x70] sm:$0xff]  }
 0x527   :  { %v12979_v6 = vpop.f32.mrb[94].mxu1 }
 0x528   :  { %18113 = vst [vmem:[#allocation81_spill] sm:$0xff] %v12979_v6  ;;  %v3661_v27 = vadd.f32 %v3660_v26, %v12979_v6  ;;  %v3742_v33 = vmul.f32 %v12979_v6, %v12979_v6  ;;  %v8570_v13 = vpop.f32.mrb[95].mxu1 }
 0x52a   :  { %v3814_v40 = vadd.f32 %v3813_v58, %v3742_v33 }
 0x52b   :  { %v12984_v52 = vpop.f32.mrb[96].mxu1 }
 0x52c   :  { %18114 = vst [vmem:[#allocation82_spill] sm:$0xff] %v12984_v52  ;;  %v3662_v50 = vadd.f32 %v3661_v27, %v12984_v52  ;;  %v3743_v12 = vmul.f32 %v12984_v52, %v12984_v52  ;;  %v8573_v46 = vpop.f32.mrb[97].mxu1  ;;  %8705 = vmatmul.mubr.msk.bf16.gmra.mrb[204].mxu1 %vm443_vm2, %v9958_v55 }
 0x52d   :  { %8708 = vmatprep.mubr.msk.bf16.mxu1 %vm17735_vm1, %v18002_v51 }
 0x52e   :  { %v3815_v26 = vadd.f32 %v3814_v40, %v3743_v12  ;;  %v9959_v40 = vld [vmem:[%s17537_s1 + $0x78] sm:$0xff]  }
 0x52f   :  { %v12995_v18 = vpop.f32.mrb[98].mxu1 }
 0x530   :  { %18115 = vst [vmem:[#allocation83_spill] sm:$0xff] %v12995_v18  ;;  %v3663_v58 = vadd.f32 %v3662_v50, %v12995_v18  ;;  %v3744_v27 = vmul.f32 %v12995_v18, %v12995_v18  ;;  %v8576_v33 = vpop.f32.mrb[99].mxu1 }
 0x532   :  { %v3816_v13 = vadd.f32 %v3815_v26, %v3744_v27 }
 0x533   :  { %v13000_v46 = vpop.f32.mrb[100].mxu1 }
 0x534   :  { %18116 = vst [vmem:[#allocation84_spill] sm:$0xff] %v13000_v46  ;;  %v3664_v52 = vadd.f32 %v3663_v58, %v13000_v46  ;;  %v3745_v55 = vmul.f32 %v13000_v46, %v13000_v46  ;;  %v8579_v6 = vpop.f32.mrb[101].mxu1  ;;  %8709 = vmatmul.mubr.msk.bf16.gmra.mrb[208].mxu1 %vm443_vm2, %v9959_v40 }
 0x535   :  { %8712 = vmatprep.mubr.msk.bf16.mxu1 %vm17735_vm1, %v18002_v51 }
 0x536   :  { %v3817_v50 = vadd.f32 %v3816_v13, %v3745_v55  ;;  %v9960_v13 = vld [vmem:[%s17537_s1 + $0x80] sm:$0xff]  }
 0x537   :  { %v13011_v12 = vpop.f32.mrb[102].mxu1 }
 0x538   :  { %18117 = vst [vmem:[#allocation85_spill] sm:$0xff] %v13011_v12  ;;  %v3665_v26 = vadd.f32 %v3664_v52, %v13011_v12  ;;  %v3746_v58 = vmul.f32 %v13011_v12, %v13011_v12  ;;  %v8582_v27 = vpop.f32.mrb[103].mxu1 }
 0x53a   :  { %v3818_v33 = vadd.f32 %v3817_v50, %v3746_v58 }
 0x53b   :  { %v13016_v6 = vpop.f32.mrb[104].mxu1 }
 0x53c   :  { %18118 = vst [vmem:[#allocation86_spill] sm:$0xff] %v13016_v6  ;;  %v3666_v46 = vadd.f32 %v3665_v26, %v13016_v6  ;;  %v3747_v40 = vmul.f32 %v13016_v6, %v13016_v6  ;;  %v8585_v18 = vpop.f32.mrb[105].mxu1  ;;  %8713 = vmatmul.mubr.msk.bf16.gmra.mrb[212].mxu1 %vm443_vm2, %v9960_v13 }
 0x53d   :  { %8716 = vmatprep.mubr.msk.bf16.mxu1 %vm17735_vm1, %v18002_v51 }
 0x53e   :  { %v3819_v52 = vadd.f32 %v3818_v33, %v3747_v40  ;;  %v9961_v33 = vld [vmem:[%s17537_s1 + $0x88] sm:$0xff]  }
 0x53f   :  { %v13027_v55 = vpop.f32.mrb[106].mxu1 }
 0x540   :  { %18119 = vst [vmem:[#allocation87_spill] sm:$0xff] %v13027_v55  ;;  %v3667_v50 = vadd.f32 %v3666_v46, %v13027_v55  ;;  %v3748_v26 = vmul.f32 %v13027_v55, %v13027_v55  ;;  %v8588_v58 = vpop.f32.mrb[107].mxu1 }
 0x542   :  { %v3820_v27 = vadd.f32 %v3819_v52, %v3748_v26 }
 0x543   :  { %v13032_v18 = vpop.f32.mrb[108].mxu1 }
 0x544   :  { %18120 = vst [vmem:[#allocation88_spill] sm:$0xff] %v13032_v18  ;;  %v3668_v6 = vadd.f32 %v3667_v50, %v13032_v18  ;;  %v3749_v13 = vmul.f32 %v13032_v18, %v13032_v18  ;;  %v8591_v12 = vpop.f32.mrb[109].mxu1  ;;  %8717 = vmatmul.mubr.msk.bf16.gmra.mrb[216].mxu1 %vm443_vm2, %v9961_v33 }
 0x545   :  { %8720 = vmatprep.mubr.msk.bf16.mxu1 %vm17735_vm1, %v18002_v51 }
 0x546   :  { %v3821_v46 = vadd.f32 %v3820_v27, %v3749_v13  ;;  %v9962_v27 = vld [vmem:[%s17537_s1 + $0x90] sm:$0xff]  }
 0x547   :  { %v13043_v40 = vpop.f32.mrb[110].mxu1 }
 0x548   :  { %18121 = vst [vmem:[#allocation89_spill] sm:$0xff] %v13043_v40  ;;  %v3669_v52 = vadd.f32 %v3668_v6, %v13043_v40  ;;  %v3750_v50 = vmul.f32 %v13043_v40, %v13043_v40  ;;  %v8594_v26 = vpop.f32.mrb[111].mxu1 }
 0x54a   :  { %v3822_v58 = vadd.f32 %v3821_v46, %v3750_v50 }
 0x54b   :  { %v13048_v12 = vpop.f32.mrb[112].mxu1 }
 0x54c   :  { %18122 = vst [vmem:[#allocation90_spill] sm:$0xff] %v13048_v12  ;;  %v3670_v18 = vadd.f32 %v3669_v52, %v13048_v12  ;;  %v3751_v33 = vmul.f32 %v13048_v12, %v13048_v12  ;;  %v8597_v55 = vpop.f32.mrb[113].mxu1  ;;  %8721 = vmatmul.mubr.msk.bf16.gmra.mrb[220].mxu1 %vm443_vm2, %v9962_v27 }
 0x54d   :  { %8724 = vmatprep.mubr.msk.bf16.mxu1 %vm17735_vm1, %v18002_v51 }
 0x54e   :  { %v3823_v6 = vadd.f32 %v3822_v58, %v3751_v33  ;;  %v9963_v58 = vld [vmem:[%s17537_s1 + $0x98] sm:$0xff]  }
 0x54f   :  { %v13059_v13 = vpop.f32.mrb[114].mxu1 }
 0x550   :  { %18123 = vst [vmem:[#allocation91_spill] sm:$0xff] %v13059_v13  ;;  %v3671_v46 = vadd.f32 %v3670_v18, %v13059_v13  ;;  %v3752_v52 = vmul.f32 %v13059_v13, %v13059_v13  ;;  %v8600_v50 = vpop.f32.mrb[115].mxu1 }
 0x552   :  { %v3824_v26 = vadd.f32 %v3823_v6, %v3752_v52 }
 0x553   :  { %v13064_v55 = vpop.f32.mrb[116].mxu1 }
 0x554   :  { %18124 = vst [vmem:[#allocation92_spill] sm:$0xff] %v13064_v55  ;;  %v3672_v12 = vadd.f32 %v3671_v46, %v13064_v55  ;;  %v3753_v27 = vmul.f32 %v13064_v55, %v13064_v55  ;;  %v8603_v40 = vpop.f32.mrb[117].mxu1  ;;  %8725 = vmatmul.mubr.msk.bf16.gmra.mrb[224].mxu1 %vm443_vm2, %v9963_v58 }
 0x555   :  { %8728 = vmatprep.mubr.msk.bf16.mxu1 %vm17735_vm1, %v18002_v51 }
 0x556   :  { %v3825_v18 = vadd.f32 %v3824_v26, %v3753_v27  ;;  %v9964_v26 = vld [vmem:[%s17537_s1 + $0xa0] sm:$0xff]  }
 0x557   :  { %v13075_v33 = vpop.f32.mrb[118].mxu1 }
 0x558   :  { %18125 = vst [vmem:[#allocation93_spill] sm:$0xff] %v13075_v33  ;;  %v3673_v6 = vadd.f32 %v3672_v12, %v13075_v33  ;;  %v3754_v46 = vmul.f32 %v13075_v33, %v13075_v33  ;;  %v8606_v52 = vpop.f32.mrb[119].mxu1 }
 0x55a   :  { %v3826_v50 = vadd.f32 %v3825_v18, %v3754_v46 }
 0x55b   :  { %v13080_v40 = vpop.f32.mrb[120].mxu1 }
 0x55c   :  { %18126 = vst [vmem:[#allocation94_spill] sm:$0xff] %v13080_v40  ;;  %v3674_v55 = vadd.f32 %v3673_v6, %v13080_v40  ;;  %v3755_v58 = vmul.f32 %v13080_v40, %v13080_v40  ;;  %v8609_v13 = vpop.f32.mrb[121].mxu1  ;;  %8729 = vmatmul.mubr.msk.bf16.gmra.mrb[228].mxu1 %vm443_vm2, %v9964_v26 }
 0x55d   :  { %8732 = vmatprep.mubr.msk.bf16.mxu1 %vm17735_vm1, %v18002_v51 }
 0x55e   :  { %v3827_v12 = vadd.f32 %v3826_v50, %v3755_v58  ;;  %v9965_v50 = vld [vmem:[%s17537_s1 + $0xa8] sm:$0xff]  }
 0x55f   :  { %v13091_v27 = vpop.f32.mrb[122].mxu1 }
 0x560   :  { %18127 = vst [vmem:[#allocation95_spill] sm:$0xff] %v13091_v27  ;;  %v3675_v18 = vadd.f32 %v3674_v55, %v13091_v27  ;;  %v3756_v6 = vmul.f32 %v13091_v27, %v13091_v27  ;;  %v8612_v46 = vpop.f32.mrb[123].mxu1 }
 0x562   :  { %v3828_v52 = vadd.f32 %v3827_v12, %v3756_v6 }
 0x563   :  { %v13096_v13 = vpop.f32.mrb[124].mxu1 }
 0x564   :  { %18128 = vst [vmem:[#allocation96_spill] sm:$0xff] %v13096_v13  ;;  %v3676_v40 = vadd.f32 %v3675_v18, %v13096_v13  ;;  %v3757_v26 = vmul.f32 %v13096_v13, %v13096_v13  ;;  %v8615_v33 = vpop.f32.mrb[125].mxu1  ;;  %8733 = vmatmul.mubr.msk.bf16.gmra.mrb[232].mxu1 %vm443_vm2, %v9965_v50  ;;  %v9642_v13 = vld [vmem:[%s17544_s6 + $0x30] sm:$0xff]  }
 0x565   :  { %8736 = vmatprep.mubr.msk.bf16.mxu1 %vm17735_vm1, %v18002_v51  ;;  %8809 = vmatpush3.bf16.msra.mxu1 %v9642_v13 }
 0x566   :  { %v3829_v55 = vadd.f32 %v3828_v52, %v3757_v26  ;;  %8810 = vmatprep.subr.bf16.mxu1 %v18002_v51 }
 0x567   :  { %v13107_v58 = vpop.f32.mrb[126].mxu1 }
 0x568   :  { %18129 = vst [vmem:[#allocation97_spill] sm:$0xff] %v13107_v58  ;;  %v3677_v12 = vadd.f32 %v3676_v40, %v13107_v58  ;;  %v3758_v18 = vmul.f32 %v13107_v58, %v13107_v58  ;;  %v8618_v6 = vpop.f32.mrb[127].mxu1  ;;  %v9966_v40 = vld [vmem:[%s17537_s1 + $0xb0] sm:$0xff]  }
 0x56a   :  { %v3830_v46 = vadd.f32 %v3829_v55, %v3758_v18  ;;  %v9643_v55 = vld [vmem:[%s17544_s6 + $0x38] sm:$0xff]  }
 0x56b   :  { %v13112_v33 = vpop.f32.mrb[128].mxu1  ;;  %8811 = vmatpush3.bf16.msra.mxu1 %v9643_v55 }
 0x56c   :  { %18130 = vst [vmem:[#allocation98_spill] sm:$0xff] %v13112_v33  ;;  %v3678_v50 = vadd.f32 %v3677_v12, %v13112_v33  ;;  %v3759_v52 = vmul.f32 %v13112_v33, %v13112_v33  ;;  %v8621_v26 = vpop.f32.mrb[129].mxu1  ;;  %8737 = vmatmul.mubr.msk.bf16.gmra.mrb[236].mxu1 %vm443_vm2, %v9966_v40 }
 0x56d   :  { %8740 = vmatprep.mubr.msk.bf16.mxu1 %vm17735_vm1, %v18002_v51 }
 0x56e   :  { %v3831_v18 = vadd.f32 %v3830_v46, %v3759_v52  ;;  %v9967_v52 = vld [vmem:[%s17537_s1 + $0xb8] sm:$0xff]  }
 0x56f   :  { %v13130_v12 = vpop.f32.mrb[130].mxu1 }
 0x570   :  { %18131 = vst [vmem:[#allocation99_spill] sm:$0xff] %v13130_v12  ;;  %v3679_v6 = vadd.f32 %v3678_v50, %v13130_v12  ;;  %v3760_v26 = vmul.f32 %v13130_v12, %v13130_v12  ;;  %v8624_v33 = vpop.f32.mrb[131].mxu1 }
 0x572   :  { %v3832_v40 = vadd.f32 %v3831_v18, %v3760_v26 }
 0x573   :  { %v13135_v58 = vpop.f32.mrb[132].mxu1 }
 0x574   :  { %18132 = vst [vmem:[#allocation100_spill] sm:$0xff] %v13135_v58  ;;  %v3680_v13 = vadd.f32 %v3679_v6, %v13135_v58  ;;  %v3761_v27 = vmul.f32 %v13135_v58, %v13135_v58  ;;  %v8627_v46 = vpop.f32.mrb[133].mxu1  ;;  %8741 = vmatmul.mubr.msk.bf16.gmra.mrb[240].mxu1 %vm443_vm2, %v9967_v52 }
 0x575   :  { %8744 = vmatprep.mubr.msk.bf16.mxu1 %vm17735_vm1, %v18002_v51 }
 0x576   :  { %v3833_v33 = vadd.f32 %v3832_v40, %v3761_v27  ;;  %v9968_v27 = vld [vmem:[%s17537_s1 + $0xc0] sm:$0xff]  }
 0x577   :  { %v13146_v50 = vpop.f32.mrb[134].mxu1 }
 0x578   :  { %18133 = vst [vmem:[#allocation101_spill] sm:$0xff] %v13146_v50  ;;  %v3681_v55 = vadd.f32 %v3680_v13, %v13146_v50  ;;  %v3762_v18 = vmul.f32 %v13146_v50, %v13146_v50  ;;  %v8630_v6 = vpop.f32.mrb[135].mxu1 }
 0x57a   :  { %v3834_v26 = vadd.f32 %v3833_v33, %v3762_v18 }
 0x57b   :  { %v13151_v46 = vpop.f32.mrb[136].mxu1 }
 0x57c   :  { %18134 = vst [vmem:[#allocation102_spill] sm:$0xff] %v13151_v46  ;;  %v3682_v58 = vadd.f32 %v3681_v55, %v13151_v46  ;;  %v3763_v52 = vmul.f32 %v13151_v46, %v13151_v46  ;;  %v8633_v12 = vpop.f32.mrb[137].mxu1  ;;  %8745 = vmatmul.mubr.msk.bf16.gmra.mrb[244].mxu1 %vm443_vm2, %v9968_v27 }
 0x57d   :  { %8748 = vmatprep.mubr.msk.bf16.mxu1 %vm17735_vm1, %v18002_v51 }
 0x57e   :  { %v3835_v40 = vadd.f32 %v3834_v26, %v3763_v52  ;;  %v9969_v26 = vld [vmem:[%s17537_s1 + $0xc8] sm:$0xff]  }
 0x57f   :  { %v13162_v13 = vpop.f32.mrb[138].mxu1 }
 0x580   :  { %18135 = vst [vmem:[#allocation103_spill] sm:$0xff] %v13162_v13  ;;  %v3683_v33 = vadd.f32 %v3682_v58, %v13162_v13  ;;  %v3764_v55 = vmul.f32 %v13162_v13, %v13162_v13  ;;  %v8636_v18 = vpop.f32.mrb[139].mxu1 }
 0x582   :  { %v3836_v6 = vadd.f32 %v3835_v40, %v3764_v55 }
 0x583   :  { %v13167_v12 = vpop.f32.mrb[140].mxu1 }
 0x584   :  { %18136 = vst [vmem:[#allocation104_spill] sm:$0xff] %v13167_v12  ;;  %v3684_v46 = vadd.f32 %v3683_v33, %v13167_v12  ;;  %v3765_v27 = vmul.f32 %v13167_v12, %v13167_v12  ;;  %v8639_v50 = vpop.f32.mrb[141].mxu1  ;;  %8749 = vmatmul.mubr.msk.bf16.gmra.mrb[248].mxu1 %vm443_vm2, %v9969_v26  ;;  %v18138_v12 = vld [vmem:[#allocation34_spill] sm:$0xff] }
 0x585   :  { %8752 = vmatprep.mubr.msk.bf16.mxu1 %vm17735_vm1, %v18002_v51  ;;  %v17729_v13 = vsub.s32 2, %v18138_v12 }
 0x586   :  { %v3837_v58 = vadd.f32 %v3836_v6, %v3765_v27 }
 0x587   :  { %v13178_v52 = vpop.f32.mrb[142].mxu1 }
 0x588   :  { %18137 = vst [vmem:[#allocation105_spill] sm:$0xff] %v13178_v52  ;;  %v3685_v40 = vadd.f32 %v3684_v46, %v13178_v52  ;;  %v3766_v33 = vmul.f32 %v13178_v52, %v13178_v52  ;;  %v8642_v55 = vpop.f32.mrb[143].mxu1  ;;  %v9970_v46 = vld [vmem:[%s17537_s1 + $0xd0] sm:$0xff]   ;;  %v18139_v52 = vsub.s32 3, %v18138_v12 }
 0x58a   :  { %v3838_v18 = vadd.f32 %v3837_v58, %v3766_v33 }
 0x58b   :  { %v13183_v50 = vpop.f32.mrb[144].mxu1 }
 0x58c   :  { %v3686_v26 = vsel %vm17734_vm4, %v13183_v50, 0.0  ;;  %v3767_v34 = vmul.f32 %v13183_v50, %v13183_v50  ;;  %v8645_v6 = vpop.f32.mrb[145].mxu1  ;;  %8753 = vmatmul.mubr.msk.bf16.gmra.mrb[252].mxu1 %vm443_vm2, %v9970_v46 }
 0x58d   :  { %v3687_v27 = vadd.f32 %v3686_v26, %v3685_v40  ;;  %8756 = vmatprep.mubr.msk.bf16.mxu1 %vm17735_vm1, %v18002_v51  ;;  %v9971_v6 = vld [vmem:[%s17542_s9 + $0x8] sm:$0xff] }
 0x58e   :  { %v3839_v58 = vsel %vm17734_vm4, %v3767_v34, 0.0  ;;  %v13203_v45 = vrot.slane %v9971_v6, %v18139_v52  ;;  %v13207_v54 = vrot.slane %v9971_v6, %v17729_v13  ;;  %v18140_v34 = vld [vmem:[#allocation32_spill] sm:$0xff]  ;;  %v9972_v52 = vld [vmem:[%s17537_s1 + $0xd8] sm:$0xff]  }
 0x58f   :  { %v3688_v33 = vrot.slane %v3687_v27, 4  ;;  %v3840_v55 = vadd.f32 %v3839_v58, %v3838_v18  ;;  %v18141_v58 = vld [vmem:[#allocation42_spill] sm:$0xff] }
 0x590   :  { %v4239_v18 = vmul.f32 %v13203_v45, %v18140_v34  ;;  %v4241_v60 = vmul.f32 %v13203_v45, %v18141_v58  ;;  %v4240_v5 = vmul.f32 %v13203_v45, %v18142_v17  ;;  %v4242_v58 = vmul.f32 %v13203_v45, %v11816_v19 }
 0x591   :  { %v3689_v36 = vadd.f32 %v3688_v33, %v3687_v27  ;;  %v3841_v46 = vrot.slane %v3840_v55, 4  ;;  %v4248_v19 = vmul.f32 %v13203_v45, %v11890_v16  ;;  %v4253_v16 = vmul.f32 %v13203_v45, %v11946_v47 }
 0x592   :  { %v13225_v34 = vadd.f32 %v13207_v54, %v4241_v60  ;;  %v13228_v17 = vadd.f32 %v13207_v54, %v4240_v5  ;;  %v4246_v60 = vmul.f32 %v13203_v45, %v11865_v15  ;;  %v4247_v5 = vmul.f32 %v13203_v45, %v11874_v49 }
 0x593   :  { %v3690_v40 = vrot.slane %v3689_v36, 2  ;;  %v3842_v26 = vadd.f32 %v3841_v46, %v3840_v55  ;;  %v13222_v46 = vadd.f32 %v13207_v54, %v4239_v18  ;;  %v4245_v18 = vmul.f32 %v13203_v45, %v11850_v20 }
 0x594   :  { %8757 = vmatmul.mubr.msk.bf16.gmra.mrb[0].mxu1 %vm443_vm2, %v9972_v52  ;;  %18144 = vst [vmem:[#allocation42_spill] sm:$0xff] %v13225_v34  ;;  %18145 = vst [vmem:[#allocation41_spill] sm:$0xff] %v13228_v17  ;;  %v13252_v20 = vadd.f32 %v13207_v54, %v4242_v58  ;;  %v4251_v15 = vmul.f32 %v13203_v45, %v11922_v2  ;;  %v4252_v49 = vmul.f32 %v13203_v45, %v11937_v23  ;;  %v18279_v34 = vld [vmem:[#allocation85_spill] sm:$0xff]  ;;  %v18280_v17 = vld [vmem:[#allocation86_spill] sm:$0xff] }
 0x595   :  { %v3691_v27 = vadd.f32 %v3690_v40, %v3689_v36  ;;  %v3843_v33 = vrot.slane %v3842_v26, 2  ;;  %8760 = vmatprep.mubr.msk.bf16.mxu1 %vm17735_vm1, %v18002_v51  ;;  %18143 = vst [vmem:[#allocation32_spill] sm:$0xff] %v13222_v46  ;;  %v4243_v36 = vmul.f32 %v13203_v45, %v11826_v59  ;;  %v4244_v40 = vmul.f32 %v13203_v45, %v11842_v44  ;;  %v18281_v46 = vld [vmem:[#allocation87_spill] sm:$0xff] }
 0x596   :  { %v4249_v59 = vmul.f32 %v13203_v45, %v11898_v8  ;;  %v4250_v44 = vmul.f32 %v13203_v45, %v11913_v43  ;;  %v9973_v8 = vld [vmem:[%s17537_s1 + $0xe0] sm:$0xff]   ;;  %v13276_v47 = vadd.f32 %v13207_v54, %v4245_v18  ;;  %v13279_v58 = vadd.f32 %v13207_v54, %v4246_v60 }
 0x597   :  { %v3692_v55 = vrot.slane %v3691_v27, 1  ;;  %v3844_v6 = vadd.f32 %v3843_v33, %v3842_v26  ;;  %v13265_v43 = vadd.f32 %v13207_v54, %v4243_v36  ;;  %v13282_v36 = vadd.f32 %v13207_v54, %v4247_v5 }
 0x598   :  { %18150 = vst [vmem:[#allocation108_spill] sm:$0xff] %v13276_v47  ;;  %18151 = vst [vmem:[#allocation109_spill] sm:$0xff] %v13279_v58  ;;  %v13299_v60 = vadd.f32 %v13207_v54, %v4252_v49  ;;  %v13302_v5 = vadd.f32 %v13207_v54, %v4253_v16  ;;  %v4259_v49 = vmul.f32 %v13203_v45, %v12018_v37  ;;  %v18274_v58 = vld [vmem:[#allocation80_spill] sm:$0xff]  ;;  %v18275_v47 = vld [vmem:[#allocation81_spill] sm:$0xff] }
 0x599   :  { %v3693_v52 = vadd.f32 %v3692_v55, %v3691_v27  ;;  %v3845_v26 = vrot.slane %v3844_v6, 1  ;;  %v18146_v27 = vld [vmem:[#allocation33_spill] sm:$0xff]  ;;  %18148 = vst [vmem:[#allocation106_spill] sm:$0xff] %v13265_v43  ;;  %18152 = vst [vmem:[#allocation110_spill] sm:$0xff] %v13282_v36  ;;  %v4260_v16 = vmul.f32 %v13203_v45, %v12034_v3  ;;  %v4265_v37 = vmul.f32 %v13203_v45, %v12090_v30  ;;  %v18161_v3 = vld [vmem:[#allocation43_spill] sm:$0xff] }
 0x59a   :  { %18147 = vst [vmem:[#allocation33_spill] sm:$0xff] %v13252_v20  ;;  %18157 = vst [vmem:[#allocation115_spill] sm:$0xff] %v13299_v60  ;;  %v18269_v60 = vld [vmem:[#allocation75_spill] sm:$0xff]  ;;  %v18278_v20 = vld [vmem:[#allocation84_spill] sm:$0xff] }
 0x59b   :  { %v13249_v33 = vmul.f32 %v3693_v52, %v18146_v27  ;;  %v3846_v55 = vadd.f32 %v3845_v26, %v3844_v6  ;;  %v13268_v6 = vadd.f32 %v13207_v54, %v4244_v40  ;;  %v4254_v40 = vmul.f32 %v13203_v45, %v11962_v61  ;;  %18158 = vst [vmem:[#allocation116_spill] sm:$0xff] %v13302_v5  ;;  %v18268_v5 = vld [vmem:[#allocation74_spill] sm:$0xff]  ;;  %v18273_v36 = vld [vmem:[#allocation79_spill] sm:$0xff] }
 0x59c   :  { %8761 = vmatmul.mubr.msk.bf16.gmra.mrb[4].mxu1 %vm443_vm2, %v9973_v8  ;;  %v13287_v52 = vadd.f32 %v13207_v54, %v4248_v19  ;;  %v13290_v26 = vadd.f32 %v13207_v54, %v4249_v59  ;;  %v4255_v61 = vmul.f32 %v13203_v45, %v11970_v35  ;;  %v4256_v19 = vmul.f32 %v13203_v45, %v11985_v38  ;;  %v18277_v43 = vld [vmem:[#allocation83_spill] sm:$0xff] }
 0x59d   :  { %18149 = vst [vmem:[#allocation107_spill] sm:$0xff] %v13268_v6  ;;  %v3847_v2 = vmul.f32 %v3846_v55, %v18146_v27  ;;  %v3848_v23 = vmul.f32 %v13249_v33, %v13249_v33  ;;  %8764 = vmatprep.mubr.msk.bf16.mxu1 %vm17735_vm1, %v18002_v51  ;;  %v13293_v27 = vadd.f32 %v13207_v54, %v4250_v44  ;;  %v18276_v6 = vld [vmem:[#allocation82_spill] sm:$0xff] }
 0x59e   :  { %18153 = vst [vmem:[#allocation111_spill] sm:$0xff] %v13287_v52  ;;  %18154 = vst [vmem:[#allocation112_spill] sm:$0xff] %v13290_v26  ;;  %v13296_v55 = vadd.f32 %v13207_v54, %v4251_v15  ;;  %v4257_v59 = vmul.f32 %v13203_v45, %v11994_v32  ;;  %v4258_v44 = vmul.f32 %v13203_v45, %v12009_v42  ;;  %v18272_v52 = vld [vmem:[#allocation78_spill] sm:$0xff] }
 0x59f   :  { %18155 = vst [vmem:[#allocation113_spill] sm:$0xff] %v13293_v27  ;;  %v3849_v18 = vsub.f32 %v3847_v2, %v3848_v23  ;;  %v13313_v8 = vadd.f32 %v13207_v54, %v4254_v40  ;;  %v4261_v35 = vmul.f32 %v13203_v45, %v12042_v4  ;;  %v4262_v38 = vmul.f32 %v13203_v45, %v12057_v1  ;;  %v18162_v4 = vld [vmem:[#allocation44_spill] sm:$0xff]  ;;  %v9974_v1 = vld [vmem:[%s17537_s1 + $0xe8] sm:$0xff]   ;;  %v18271_v27 = vld [vmem:[#allocation77_spill] sm:$0xff] }
 0x5a0   :  { %18156 = vst [vmem:[#allocation114_spill] sm:$0xff] %v13296_v55  ;;  %v4263_v32 = vmul.f32 %v13203_v45, %v12066_v10  ;;  %v4264_v42 = vmul.f32 %v13203_v45, %v12081_v21  ;;  %v13328_v23 = vadd.f32 %v13207_v54, %v4255_v61  ;;  %v4266_v40 = vmul.f32 %v13203_v45, %v18161_v3  ;;  %v18270_v55 = vld [vmem:[#allocation76_spill] sm:$0xff] }
 0x5a1   :  { %v3850_v15 = vmax.f32 %v3849_v18, 0.0  ;;  %18159 = vst [vmem:[#allocation117_spill] sm:$0xff] %v13313_v8  ;;  %v4267_v18 = vmul.f32 %v13203_v45, %v18162_v4  ;;  %v13341_v10 = vadd.f32 %v13207_v54, %v4256_v19  ;;  %v13344_v21 = vadd.f32 %v13207_v54, %v4257_v59  ;;  %v18169_v19 = vld [vmem:[#allocation45_spill] sm:$0xff] }
 0x5a2   :  { %18160 = vst [vmem:[#allocation118_spill] sm:$0xff] %v13328_v23  ;;  %v13347_v30 = vadd.f32 %v13207_v54, %v4258_v44  ;;  %v13352_v61 = vadd.f32 %v13207_v54, %v4259_v49  ;;  %v13358_v3 = vadd.f32 %v13207_v54, %v4261_v35  ;;  %v4268_v59 = vmul.f32 %v13203_v45, %v18169_v19  ;;  %v18173_v49 = vld [vmem:[#allocation17_spill] sm:$0xff]  ;;  %v18266_v23 = vld [vmem:[#allocation72_spill] sm:$0xff] }
 0x5a3   :  { %v3851_v2 = vadd.f32 1e-05, %v3850_v15  ;;  %18163 = vst [vmem:[#allocation43_spill] sm:$0xff] %v13341_v10  ;;  %18164 = vst [vmem:[#allocation44_spill] sm:$0xff] %v13344_v21  ;;  %v13355_v15 = vadd.f32 %v13207_v54, %v4260_v16  ;;  %v13363_v4 = vadd.f32 %v13207_v54, %v4262_v38  ;;  %v13366_v44 = vadd.f32 %v13207_v54, %v4263_v32  ;;  %v18177_v38 = vld [vmem:[#allocation18_spill] sm:$0xff]  ;;  %v18178_v32 = vld [vmem:[#allocation19_spill] sm:$0xff] }
 0x5a4   :  { %8765 = vmatmul.mubr.msk.bf16.gmra.mrb[8].mxu1 %vm443_vm2, %v9974_v1  ;;  %18165 = vst [vmem:[#allocation119_spill] sm:$0xff] %v13347_v30  ;;  %18166 = vst [vmem:[#allocation120_spill] sm:$0xff] %v13352_v61  ;;  %v4269_v1 = vmul.f32 %v13203_v45, %v18173_v49  ;;  %v13374_v16 = vadd.f32 %v13207_v54, %v4265_v37  ;;  %v13377_v35 = vadd.f32 %v13207_v54, %v4266_v40  ;;  %v18181_v37 = vld [vmem:[#allocation22_spill] sm:$0xff]  ;;  %v18188_v30 = vld [vmem:[#allocation27_spill] sm:$0xff] }
 0x5a5   :  { %9792 = vrsqrt.f32 %v3851_v2  ;;  %8768 = vmatprep.mubr.msk.bf16.mxu1 %vm17735_vm1, %v18002_v51  ;;  %18167 = vst [vmem:[#allocation121_spill] sm:$0xff] %v13355_v15  ;;  %18168 = vst [vmem:[#allocation122_spill] sm:$0xff] %v13358_v3  ;;  %v13369_v2 = vadd.f32 %v13207_v54, %v4264_v42  ;;  %v13380_v19 = vadd.f32 %v13207_v54, %v4267_v18  ;;  %v18179_v42 = vld [vmem:[#allocation20_spill] sm:$0xff]  ;;  %v18183_v18 = vld [vmem:[#allocation23_spill] sm:$0xff] }
 0x5a6   :  { %18170 = vst [vmem:[#allocation45_spill] sm:$0xff] %v13363_v4  ;;  %18171 = vst [vmem:[#allocation123_spill] sm:$0xff] %v13366_v44  ;;  %v4270_v13 = vmul.f32 %v13203_v45, %v18177_v38  ;;  %v4271_v44 = vmul.f32 %v13203_v45, %v18178_v32  ;;  %v18180_v4 = vld [vmem:[#allocation21_spill] sm:$0xff]  ;;  %v13393_v40 = vadd.f32 %v13207_v54, %v4268_v59  ;;  %v18187_v15 = vld [vmem:[#allocation26_spill] sm:$0xff] }
 0x5a7   :  { %18172 = vst [vmem:[#allocation124_spill] sm:$0xff] %v13369_v2  ;;  %18174 = vst [vmem:[#allocation17_spill] sm:$0xff] %v13374_v16  ;;  %v4272_v2 = vmul.f32 %v13203_v45, %v18179_v42  ;;  %v4273_v49 = vmul.f32 %v13203_v45, %v18180_v4  ;;  %v4274_v16 = vmul.f32 %v13203_v45, %v18181_v37  ;;  %v18185_v3 = vld [vmem:[#allocation25_spill] sm:$0xff]  ;;  %v18189_v59 = vld [vmem:[#allocation28_spill] sm:$0xff] }
 0x5a8   :  { %18175 = vst [vmem:[#allocation125_spill] sm:$0xff] %v13377_v35  ;;  %18176 = vst [vmem:[#allocation126_spill] sm:$0xff] %v13380_v19  ;;  %v4275_v19 = vmul.f32 %v13203_v45, %v18183_v18  ;;  %v18184_v35 = vld [vmem:[#allocation24_spill] sm:$0xff]  ;;  %v4277_v32 = vmul.f32 %v13203_v45, %v18185_v3  ;;  %v13402_v42 = vadd.f32 %v13207_v54, %v4269_v1  ;;  %v18191_v61 = vld [vmem:[#allocation29_spill] sm:$0xff] }
 0x5a9   :  { %18182 = vst [vmem:[#allocation18_spill] sm:$0xff] %v13393_v40  ;;  %v4276_v38 = vmul.f32 %v13203_v45, %v18184_v35  ;;  %v4278_v4 = vmul.f32 %v13203_v45, %v18187_v15  ;;  %v4279_v37 = vmul.f32 %v13203_v45, %v18188_v30  ;;  %v4280_v40 = vmul.f32 %v13203_v45, %v18189_v59  ;;  %v18192_v21 = vld [vmem:[#allocation30_spill] sm:$0xff]  ;;  %v18193_v1 = vld [vmem:[#allocation31_spill] sm:$0xff]  ;;  %v9975_v15 = vld [vmem:[%s17537_s1 + $0xf0] sm:$0xff]  }
 0x5aa   :  { %18186 = vst [vmem:[#allocation19_spill] sm:$0xff] %v13402_v42  ;;  %v13411_v18 = vadd.f32 %v13207_v54, %v4270_v13  ;;  %v4281_v35 = vmul.f32 %v13203_v45, %v18191_v61  ;;  %v4282_v3 = vmul.f32 %v13203_v45, %v18192_v21  ;;  %v4283_v42 = vmul.f32 %v13203_v45, %v18193_v1  ;;  %v18222_v10 = vld [vmem:[#allocation15_spill] sm:$0xff]  ;;  %v18267_v8 = vld [vmem:[#allocation73_spill] sm:$0xff] }
 0x5ab   :  { %v13424_v30 = vadd.f32 %v13207_v54, %v4271_v44  ;;  %v13427_v13 = vadd.f32 %v13207_v54, %v4272_v2  ;;  %v13430_v61 = vadd.f32 %v13207_v54, %v4273_v49  ;;  %v13433_v21 = vadd.f32 %v13207_v54, %v4274_v16  ;;  %v18201_v2 = vld [vmem:[#allocation2_spill] sm:$0xff] }
 0x5ac   :  { %18190 = vst [vmem:[#allocation20_spill] sm:$0xff] %v13411_v18  ;;  %8769 = vmatmul.mubr.msk.bf16.gmra.mrb[12].mxu1 %vm443_vm2, %v9975_v15  ;;  %v13438_v59 = vadd.f32 %v13207_v54, %v4275_v19  ;;  %v13441_v1 = vadd.f32 %v13207_v54, %v4276_v38  ;;  %v13444_v44 = vadd.f32 %v13207_v54, %v4277_v32  ;;  %v18205_v19 = vld [vmem:[#allocation3_spill] sm:$0xff] }
 0x5ad   :  { %18194 = vst [vmem:[#allocation21_spill] sm:$0xff] %v13424_v30  ;;  %18195 = vst [vmem:[#allocation22_spill] sm:$0xff] %v13427_v13  ;;  %8772 = vmatprep.mubr.msk.bf16.mxu1 %vm17735_vm1, %v18002_v51  ;;  %v4284_v15 = vmul.f32 %v13203_v45, %v18201_v2  ;;  %v13452_v16 = vadd.f32 %v13207_v54, %v4279_v37  ;;  %v4285_v38 = vmul.f32 %v13203_v45, %v18205_v19  ;;  %v18212_v19 = vld [vmem:[#allocation7_spill] sm:$0xff]  ;;  %v18220_v13 = vld [vmem:[#allocation13_spill] sm:$0xff] }
 0x5ae   :  { %18196 = vst [vmem:[#allocation23_spill] sm:$0xff] %v13430_v61  ;;  %18197 = vst [vmem:[#allocation24_spill] sm:$0xff] %v13433_v21  ;;  %v13449_v61 = vadd.f32 %v13207_v54, %v4278_v4  ;;  %v13455_v21 = vadd.f32 %v13207_v54, %v4280_v40  ;;  %v13463_v32 = vadd.f32 %v13207_v54, %v4282_v3  ;;  %v18214_v3 = vld [vmem:[#allocation8_spill] sm:$0xff]  ;;  %v18221_v30 = vld [vmem:[#allocation14_spill] sm:$0xff] }
 0x5af   :  { %18198 = vst [vmem:[#allocation25_spill] sm:$0xff] %v13438_v59  ;;  %18199 = vst [vmem:[#allocation26_spill] sm:$0xff] %v13441_v1  ;;  %v9793_v49 = vpop.eup %9792  ;;  %v13460_v1 = vadd.f32 %v13207_v54, %v4281_v35  ;;  %v13466_v2 = vadd.f32 %v13207_v54, %v4283_v42  ;;  %v4289_v35 = vmul.f32 %v13203_v45, %v18212_v19  ;;  %v18218_v59 = vld [vmem:[#allocation11_spill] sm:$0xff] }
 0x5b0   :  { %18200 = vst [vmem:[#allocation27_spill] sm:$0xff] %v13444_v44  ;;  %18202 = vst [vmem:[#allocation28_spill] sm:$0xff] %v13449_v61  ;;  %v3854_v4 = vrot.slane %v9793_v49, 1  ;;  %v18209_v61 = vld [vmem:[#allocation4_spill] sm:$0xff]  ;;  %v4290_v42 = vmul.f32 %v13203_v45, %v18214_v3  ;;  %v4296_v18 = vmul.f32 %v13203_v45, %v18221_v30 }
 0x5b1   :  { %18203 = vst [vmem:[#allocation29_spill] sm:$0xff] %v13452_v16  ;;  %18204 = vst [vmem:[#allocation30_spill] sm:$0xff] %v13455_v21  ;;  %v4286_v37 = vmul.f32 %v13203_v45, %v18209_v61  ;;  %v18210_v16 = vld [vmem:[#allocation5_spill] sm:$0xff]  ;;  %v18211_v21 = vld [vmem:[#allocation6_spill] sm:$0xff]  ;;  %v13515_v30 = vadd.f32 %v13207_v54, %v4289_v35 }
 0x5b2   :  { %18206 = vst [vmem:[#allocation31_spill] sm:$0xff] %v13460_v1  ;;  %18207 = vst [vmem:[#allocation2_spill] sm:$0xff] %v13463_v32  ;;  %v4287_v40 = vmul.f32 %v13203_v45, %v18210_v16  ;;  %v4288_v44 = vmul.f32 %v13203_v45, %v18211_v21  ;;  %v13477_v1 = vadd.f32 %v13207_v54, %v4284_v15  ;;  %v9976_v61 = vld [vmem:[%s17542_s9] sm:$0xff] }
 0x5b3   :  { %18208 = vst [vmem:[#allocation3_spill] sm:$0xff] %v13466_v2  ;;  %v18215_v2 = vld [vmem:[#allocation9_spill] sm:$0xff]  ;;  %v3856_v16 = vmul.f32 %v9976_v61, %v3854_v4  ;;  %v13487_v32 = vadd.f32 %v13207_v54, %v4285_v38  ;;  %v18217_v21 = vld [vmem:[#allocation10_spill] sm:$0xff]  ;;  %v4293_v15 = vmul.f32 %v13203_v45, %v18218_v59  ;;  %v4297_v4 = vmul.f32 %v13203_v45, %v18222_v10 }
 0x5b4   :  { %18213 = vst [vmem:[#allocation4_spill] sm:$0xff] %v13477_v1  ;;  %v4291_v49 = vmul.f32 %v13203_v45, %v18215_v2  ;;  %v4292_v19 = vmul.f32 %v13203_v45, %v18217_v21  ;;  %v18219_v1 = vld [vmem:[#allocation12_spill] sm:$0xff]  ;;  %v4295_v2 = vmul.f32 %v13203_v45, %v18220_v13  ;;  %v9977_v21 = vld [vmem:[%s17537_s1 + $0xf8] sm:$0xff]   ;;  %v13506_v59 = vadd.f32 %v13207_v54, %v4286_v37 }
 0x5b5   :  { %18216 = vst [vmem:[#allocation5_spill] sm:$0xff] %v13487_v32  ;;  %v4294_v3 = vmul.f32 %v13203_v45, %v18219_v1  ;;  %v3935_v38 = vrot.slane %v3856_v16, 7  ;;  %8773 = vmatmul.mubr.msk.bf16.gmra.mrb[16].mxu1 %vm443_vm2, %v9977_v21  ;;  %v13509_v1 = vadd.f32 %v13207_v54, %v4287_v40  ;;  %v13512_v13 = vadd.f32 %v13207_v54, %v4288_v44 }
 0x5b6   :  { %18223 = vst [vmem:[#allocation6_spill] sm:$0xff] %v13506_v59  ;;  %18226 = vst [vmem:[#allocation9_spill] sm:$0xff] %v13515_v30  ;;  %8776 = vmatprep.mubr.msk.bf16.mxu1 %vm17735_vm1, %v18002_v51  ;;  %v13520_v10 = vadd.f32 %v13207_v54, %v4290_v42  ;;  %v13523_v21 = vadd.f32 %v13207_v54, %v4291_v49  ;;  %v18229_v37 = vsub.s32 2, %v18138_v12  ;;  %v18233_v42 = vld [vmem:[#allocation16_spill] sm:$0xff] }
 0x5b7   :  { %18224 = vst [vmem:[#allocation7_spill] sm:$0xff] %v13509_v1  ;;  %18225 = vst [vmem:[#allocation8_spill] sm:$0xff] %v13512_v13  ;;  %v3937_v40 = vmul.f32 %v3935_v38, %v13249_v33  ;;  %v13531_v44 = vadd.f32 %v13207_v54, %v4292_v19  ;;  %v13534_v35 = vadd.f32 %v13207_v54, %v4293_v15  ;;  %v18237_v38 = vld [vmem:[#allocation36_spill] sm:$0xff]  ;;  %v18263_v13 = vld [vmem:[#allocation69_spill] sm:$0xff] }
 0x5b8   :  { %18227 = vst [vmem:[#allocation10_spill] sm:$0xff] %v13520_v10  ;;  %18228 = vst [vmem:[#allocation11_spill] sm:$0xff] %v13523_v21  ;;  %v13527_v59 = vrot.slane %v3856_v16, %v18229_v37  ;;  %v13537_v30 = vadd.f32 %v13207_v54, %v4294_v3  ;;  %v4298_v10 = vmul.f32 %v13203_v45, %v18233_v42  ;;  %v18238_v37 = vld [vmem:[#allocation37_spill] sm:$0xff]  ;;  %v18240_v42 = vld [vmem:[#allocation39_spill] sm:$0xff] }
 0x5b9   :  { %18230 = vst [vmem:[#allocation12_spill] sm:$0xff] %v13531_v44  ;;  %18231 = vst [vmem:[#allocation13_spill] sm:$0xff] %v13534_v35  ;;  %v13542_v49 = vadd.f32 %v13207_v54, %v4295_v2  ;;  %v13545_v16 = vadd.f32 %v13207_v54, %v4296_v18  ;;  %v13548_v33 = vadd.f32 %v13207_v54, %v4297_v4  ;;  %v18239_v44 = vld [vmem:[#allocation38_spill] sm:$0xff] }
 0x5ba   :  { %18232 = vst [vmem:[#allocation14_spill] sm:$0xff] %v13537_v30  ;;  %v3938_v19 = vsub.f32 %v9976_v61, %v3937_v40  ;;  %v4299_v15 = vmul.f32 %v13203_v45, %v18237_v38  ;;  %v4300_v3 = vmul.f32 %v13203_v45, %v18238_v37  ;;  %v4301_v21 = vmul.f32 %v13203_v45, %v18239_v44  ;;  %v18264_v1 = vld [vmem:[#allocation70_spill] sm:$0xff]  ;;  %v18299_v30 = vld [vmem:[#allocation105_spill] sm:$0xff] }
 0x5bb   :  { %18234 = vst [vmem:[#allocation15_spill] sm:$0xff] %v13542_v49  ;;  %18235 = vst [vmem:[#allocation16_spill] sm:$0xff] %v13545_v16  ;;  %v4302_v2 = vmul.f32 %v13203_v45, %v18240_v42  ;;  %v4303_v18 = vmul.f32 %v13203_v45, %v12586_v24  ;;  %v4311_v4 = vmul.f32 %v13203_v45, %v12700_v11  ;;  %v18241_v40 = vsub.s32 3, %v18138_v12  ;;  %v18260_v12 = vld [vmem:[#allocation66_spill] sm:$0xff]  ;;  %v18298_v49 = vld [vmem:[#allocation104_spill] sm:$0xff] }
 0x5bc   :  { %18236 = vst [vmem:[#allocation127_spill] sm:$0xff] %v13548_v33  ;;  %v3933_v61 = vmul.f32 %v13527_v59, %v13183_v50  ;;  %v13569_v37 = vadd.f32 %v13207_v54, %v4298_v10  ;;  %v4304_v44 = vmul.f32 %v13203_v45, %v12603_v28  ;;  %v4305_v42 = vmul.f32 %v13203_v45, %v12619_v56  ;;  %v9978_v28 = vld [vmem:[%s17537_s1 + $0x100] sm:$0xff]  }
 0x5bd   :  { %v13566_v38 = vrot.slane %v3938_v19, %v18241_v40  ;;  %v4306_v24 = vmul.f32 %v13203_v45, %v12634_v48  ;;  %v4307_v11 = vmul.f32 %v13203_v45, %v12650_v9  ;;  %v4308_v50 = vmul.f32 %v13203_v45, %v12663_v0  ;;  %8777 = vmatmul.mubr.msk.bf16.gmra.mrb[20].mxu1 %vm443_vm2, %v9978_v28  ;;  %v18296_v33 = vld [vmem:[#allocation102_spill] sm:$0xff] }
 0x5be   :  { %18242 = vst [vmem:[#allocation36_spill] sm:$0xff] %v13569_v37  ;;  %v4309_v19 = vmul.f32 %v13203_v45, %v12676_v31  ;;  %v13589_v56 = vadd.f32 %v13207_v54, %v4299_v15  ;;  %v13592_v48 = vadd.f32 %v13207_v54, %v4300_v3  ;;  %v13595_v9 = vadd.f32 %v13207_v54, %v4301_v21  ;;  %v18295_v37 = vld [vmem:[#allocation101_spill] sm:$0xff] }
 0x5bf   :  { %v4015_v10 = vadd.f32 %v13566_v38, %v3933_v61  ;;  %v4310_v0 = vmul.f32 %v13203_v45, %v12687_v14  ;;  %8780 = vmatprep.mubr.msk.bf16.mxu1 %vm17735_vm1, %v18002_v51  ;;  %v13602_v31 = vadd.f32 %v13207_v54, %v4302_v2  ;;  %v13605_v61 = vadd.f32 %v13207_v54, %v4303_v18 }
 0x5c0   :  { %18243 = vst [vmem:[#allocation37_spill] sm:$0xff] %v13589_v56  ;;  %18244 = vst [vmem:[#allocation38_spill] sm:$0xff] %v13592_v48  ;;  %v4388_v15 = vadd.f32 %v13207_v54, %v4311_v4  ;;  %v13609_v3 = vadd.f32 %v13207_v54, %v4304_v44  ;;  %v13612_v21 = vadd.f32 %v13207_v54, %v4305_v42  ;;  %v18256_v42 = vld [vmem:[#allocation46_spill] sm:$0xff]  ;;  %v18294_v56 = vld [vmem:[#allocation100_spill] sm:$0xff] }
 0x5c1   :  { %18245 = vst [vmem:[#allocation39_spill] sm:$0xff] %v13595_v9  ;;  %18246 = vst [vmem:[#allocation128_spill] sm:$0xff] %v13602_v31  ;;  %vm4088_vm5 = vcmp.ge.f32.partialorder %v4015_v10, 0.0  ;;  %v13615_v14 = vadd.f32 %v13207_v54, %v4306_v24  ;;  %v13619_v2 = vadd.f32 %v13207_v54, %v4307_v11  ;;  %v13622_v18 = vadd.f32 %v13207_v54, %v4308_v50  ;;  %v18257_v10 = vld [vmem:[#allocation47_spill] sm:$0xff]  ;;  %v18290_v31 = vld [vmem:[#allocation96_spill] sm:$0xff] }
 0x5c2   :  { %18247 = vst [vmem:[#allocation129_spill] sm:$0xff] %v13605_v61  ;;  %18248 = vst [vmem:[#allocation130_spill] sm:$0xff] %v13609_v3  ;;  %v7639_v45 = vsel %vm4088_vm5, 1.0, %v18002_v51  ;;  %v13625_v4 = vadd.f32 %v13207_v54, %v4309_v19  ;;  %v13630_v44 = vadd.f32 %v13207_v54, %v4310_v0  ;;  %v3861_v24 = vmul.f32 %v13527_v59, %v18256_v42  ;;  %v18258_v42 = vld [vmem:[#allocation64_spill] sm:$0xff]  ;;  %v18288_v3 = vld [vmem:[#allocation94_spill] sm:$0xff] }
 0x5c3   :  { %18249 = vst [vmem:[#allocation131_spill] sm:$0xff] %v13612_v21  ;;  %18250 = vst [vmem:[#allocation132_spill] sm:$0xff] %v13615_v14  ;;  %v13627_v40 = vmul.f32 %v7639_v45, %v4388_v15  ;;  %v3862_v28 = vmul.f32 %v13527_v59, %v18257_v10  ;;  %v3881_v11 = vmul.f32 %v13527_v59, %v12739_v25  ;;  %v18259_v10 = vld [vmem:[#allocation65_spill] sm:$0xff]  ;;  %v18286_v14 = vld [vmem:[#allocation92_spill] sm:$0xff] }
 0x5c4   :  { %18251 = vst [vmem:[#allocation133_spill] sm:$0xff] %v13619_v2  ;;  %18252 = vst [vmem:[#allocation134_spill] sm:$0xff] %v13622_v18  ;;  %v3882_v50 = vmul.f32 %v13527_v59, %v12754_v62  ;;  %v3883_v19 = vmul.f32 %v13527_v59, %v12763_v57  ;;  %v3884_v15 = vmul.f32 %v13527_v59, %v12778_v7  ;;  %v18284_v18 = vld [vmem:[#allocation90_spill] sm:$0xff]  ;;  %v18285_v2 = vld [vmem:[#allocation91_spill] sm:$0xff] }
 0x5c5   :  { %18253 = vst [vmem:[#allocation135_spill] sm:$0xff] %v13625_v4  ;;  %18254 = vst [vmem:[#allocation136_spill] sm:$0xff] %v13627_v40  ;;  %v3885_v54 = vmul.f32 %v13527_v59, %v12784_v29  ;;  %v3886_v0 = vmul.f32 %v13527_v59, %v12795_v22  ;;  %v3887_v45 = vmul.f32 %v13527_v59, %v12803_v39  ;;  %v9979_v39 = vld [vmem:[%s17537_s1 + $0x108] sm:$0xff]   ;;  %v18262_v40 = vld [vmem:[#allocation68_spill] sm:$0xff] }
 0x5c6   :  { %18255 = vst [vmem:[#allocation137_spill] sm:$0xff] %v13630_v44  ;;  %v3888_v25 = vmul.f32 %v13527_v59, %v12815_v63  ;;  %v3889_v62 = vmul.f32 %v13527_v59, %v12820_v53  ;;  %v3890_v57 = vmul.f32 %v13527_v59, %v12831_v41  ;;  %v3891_v7 = vmul.f32 %v13527_v59, %v18258_v42  ;;  %v18261_v63 = vld [vmem:[#allocation67_spill] sm:$0xff]  ;;  %v18282_v44 = vld [vmem:[#allocation88_spill] sm:$0xff]  ;;  %v18283_v4 = vld [vmem:[#allocation89_spill] sm:$0xff] }
 0x5c7   :  { %v3892_v29 = vmul.f32 %v13527_v59, %v18259_v10  ;;  %v3893_v22 = vmul.f32 %v13527_v59, %v18260_v12  ;;  %8781 = vmatmul.mubr.msk.bf16.gmra.mrb[24].mxu1 %vm443_vm2, %v9979_v39  ;;  %v3894_v53 = vmul.f32 %v13527_v59, %v18261_v63  ;;  %v3895_v41 = vmul.f32 %v13527_v59, %v18262_v40  ;;  %v18265_v12 = vld [vmem:[#allocation71_spill] sm:$0xff]  ;;  %v18287_v21 = vld [vmem:[#allocation93_spill] sm:$0xff]  ;;  %v18292_v48 = vld [vmem:[#allocation98_spill] sm:$0xff] }
 0x5c8   :  { %v3896_v42 = vmul.f32 %v13527_v59, %v18263_v13  ;;  %v3897_v10 = vmul.f32 %v13527_v59, %v18264_v1  ;;  %8784 = vmatprep.mubr.msk.bf16.mxu1 %vm17735_vm1, %v18002_v51  ;;  %v3898_v32 = vmul.f32 %v13527_v59, %v18265_v12  ;;  %v3899_v39 = vmul.f32 %v13527_v59, %v18266_v23  ;;  %v18289_v61 = vld [vmem:[#allocation95_spill] sm:$0xff]  ;;  %v18291_v9 = vld [vmem:[#allocation97_spill] sm:$0xff] }
 0x5c9   :  { %v3900_v63 = vmul.f32 %v13527_v59, %v18267_v8  ;;  %v3901_v40 = vmul.f32 %v13527_v59, %v18268_v5  ;;  %v3902_v13 = vmul.f32 %v13527_v59, %v18269_v60  ;;  %v3903_v1 = vmul.f32 %v13527_v59, %v18270_v55 }
 0x5ca   :  { %v3904_v26 = vmul.f32 %v13527_v59, %v18271_v27  ;;  %v3905_v12 = vmul.f32 %v13527_v59, %v18272_v52  ;;  %v3906_v23 = vmul.f32 %v13527_v59, %v18273_v36  ;;  %v3907_v8 = vmul.f32 %v13527_v59, %v18274_v58 }
 0x5cb   :  { %v3908_v5 = vmul.f32 %v13527_v59, %v18275_v47  ;;  %v3909_v60 = vmul.f32 %v13527_v59, %v18276_v6  ;;  %v3910_v55 = vmul.f32 %v13527_v59, %v18277_v43  ;;  %v3911_v27 = vmul.f32 %v13527_v59, %v18278_v20 }
 0x5cc   :  { %v3912_v52 = vmul.f32 %v13527_v59, %v18279_v34  ;;  %v3913_v36 = vmul.f32 %v13527_v59, %v18280_v17  ;;  %v3914_v58 = vmul.f32 %v13527_v59, %v18281_v46  ;;  %v3915_v47 = vmul.f32 %v13527_v59, %v18282_v44 }
 0x5cd   :  { %v3916_v6 = vmul.f32 %v13527_v59, %v18283_v4  ;;  %v3917_v43 = vmul.f32 %v13527_v59, %v18284_v18  ;;  %v3918_v20 = vmul.f32 %v13527_v59, %v18285_v2  ;;  %v3919_v34 = vmul.f32 %v13527_v59, %v18286_v14  ;;  %v9980_v14 = vld [vmem:[%s17537_s1 + $0x110] sm:$0xff]  }
 0x5ce   :  { %v3920_v17 = vmul.f32 %v13527_v59, %v18287_v21  ;;  %v3921_v46 = vmul.f32 %v13527_v59, %v18288_v3  ;;  %v3922_v44 = vmul.f32 %v13527_v59, %v18289_v61  ;;  %v3923_v4 = vmul.f32 %v13527_v59, %v18290_v31  ;;  %v18293_v21 = vld [vmem:[#allocation99_spill] sm:$0xff] }
 0x5cf   :  { %v3924_v18 = vmul.f32 %v13527_v59, %v18291_v9  ;;  %v3925_v2 = vmul.f32 %v13527_v59, %v18292_v48  ;;  %8785 = vmatmul.mubr.msk.bf16.gmra.mrb[28].mxu1 %vm443_vm2, %v9980_v14  ;;  %v3926_v3 = vmul.f32 %v13527_v59, %v18293_v21  ;;  %v3927_v61 = vmul.f32 %v13527_v59, %v18294_v56  ;;  %v18297_v48 = vld [vmem:[#allocation103_spill] sm:$0xff] }
 0x5d0   :  { %v3928_v31 = vmul.f32 %v13527_v59, %v18295_v37  ;;  %v3929_v9 = vmul.f32 %v13527_v59, %v18296_v33  ;;  %8788 = vmatprep.mubr.msk.bf16.mxu1 %vm17735_vm1, %v18002_v51  ;;  %v3930_v16 = vmul.f32 %v13527_v59, %v18297_v48  ;;  %v3931_v14 = vmul.f32 %v13527_v59, %v18298_v49 }
 0x5d1   :  { %v3932_v21 = vmul.f32 %v13527_v59, %v18299_v30  ;;  %v13753_v56 = vadd.f32 %v13566_v38, %v3861_v24  ;;  %v13756_v37 = vadd.f32 %v13566_v38, %v3862_v28  ;;  %v13759_v33 = vadd.f32 %v13566_v38, %v3881_v11 }
 0x5d2   :  { %v13762_v35 = vadd.f32 %v13566_v38, %v3882_v50  ;;  %v13765_v48 = vadd.f32 %v13566_v38, %v3883_v19  ;;  %v13768_v49 = vadd.f32 %v13566_v38, %v3884_v15  ;;  %v13771_v30 = vadd.f32 %v13566_v38, %v3885_v54 }
 0x5d3   :  { %v13774_v24 = vadd.f32 %v13566_v38, %v3886_v0  ;;  %v13777_v28 = vadd.f32 %v13566_v38, %v3887_v45  ;;  %v13780_v11 = vadd.f32 %v13566_v38, %v3888_v25  ;;  %v13783_v50 = vadd.f32 %v13566_v38, %v3889_v62 }
 0x5d4   :  { %v13786_v19 = vadd.f32 %v13566_v38, %v3890_v57  ;;  %v13789_v15 = vadd.f32 %v13566_v38, %v3891_v7  ;;  %v13792_v54 = vadd.f32 %v13566_v38, %v3892_v29  ;;  %v13795_v0 = vadd.f32 %v13566_v38, %v3893_v22 }
 0x5d5   :  { %v13798_v45 = vadd.f32 %v13566_v38, %v3894_v53  ;;  %v13801_v25 = vadd.f32 %v13566_v38, %v3895_v41  ;;  %v13804_v62 = vadd.f32 %v13566_v38, %v3896_v42  ;;  %v13807_v57 = vadd.f32 %v13566_v38, %v3897_v10 }
 0x5d6   :  { %v13810_v7 = vadd.f32 %v13566_v38, %v3898_v32  ;;  %v13813_v29 = vadd.f32 %v13566_v38, %v3899_v39  ;;  %v13816_v22 = vadd.f32 %v13566_v38, %v3900_v63  ;;  %v13819_v53 = vadd.f32 %v13566_v38, %v3901_v40  ;;  %v9981_v32 = vld [vmem:[%s17537_s1 + $0x118] sm:$0xff]  }
 0x5d7   :  { %v13822_v41 = vadd.f32 %v13566_v38, %v3902_v13  ;;  %v13825_v42 = vadd.f32 %v13566_v38, %v3903_v1  ;;  %8789 = vmatmul.mubr.msk.bf16.gmra.mrb[32].mxu1 %vm443_vm2, %v9981_v32  ;;  %v13832_v10 = vadd.f32 %v13566_v38, %v3904_v26  ;;  %v13835_v39 = vadd.f32 %v13566_v38, %v3905_v12 }
 0x5d8   :  { %v13838_v63 = vadd.f32 %v13566_v38, %v3906_v23  ;;  %v13841_v40 = vadd.f32 %v13566_v38, %v3907_v8  ;;  %8792 = vmatprep.mubr.msk.bf16.mxu1 %vm17735_vm1, %v18002_v51  ;;  %v13846_v13 = vadd.f32 %v13566_v38, %v3908_v5  ;;  %v13849_v1 = vadd.f32 %v13566_v38, %v3909_v60 }
 0x5d9   :  { %v13852_v26 = vadd.f32 %v13566_v38, %v3910_v55  ;;  %v13855_v12 = vadd.f32 %v13566_v38, %v3911_v27  ;;  %v13858_v23 = vadd.f32 %v13566_v38, %v3912_v52  ;;  %v13861_v8 = vadd.f32 %v13566_v38, %v3913_v36 }
 0x5da   :  { %18300 = vst [vmem:[#allocation46_spill] sm:$0xff] %v13846_v13  ;;  %18301 = vst [vmem:[#allocation47_spill] sm:$0xff] %v13849_v1  ;;  %v13864_v32 = vadd.f32 %v13566_v38, %v3914_v58  ;;  %v3997_v5 = vadd.f32 %v13566_v38, %v3915_v47  ;;  %v3998_v60 = vadd.f32 %v13566_v38, %v3916_v6  ;;  %vm4016_vm11 = vcmp.ge.f32.partialorder %v13753_v56, 0.0 }
 0x5db   :  { %18302 = vst [vmem:[#allocation64_spill] sm:$0xff] %v13852_v26  ;;  %18303 = vst [vmem:[#allocation65_spill] sm:$0xff] %v13855_v12  ;;  %v3999_v1 = vadd.f32 %v13566_v38, %v3917_v43  ;;  %v4000_v55 = vadd.f32 %v13566_v38, %v3918_v20  ;;  %v4001_v27 = vadd.f32 %v13566_v38, %v3919_v34  ;;  %vm4017_vm12 = vcmp.ge.f32.partialorder %v13756_v37, 0.0 }
 0x5dc   :  { %18304 = vst [vmem:[#allocation66_spill] sm:$0xff] %v13858_v23  ;;  %18305 = vst [vmem:[#allocation67_spill] sm:$0xff] %v13861_v8  ;;  %v4002_v12 = vadd.f32 %v13566_v38, %v3920_v17  ;;  %v4003_v52 = vadd.f32 %v13566_v38, %v3921_v46  ;;  %v4004_v36 = vadd.f32 %v13566_v38, %v3922_v44  ;;  %vm18307_vm9 = vcmp.ge.f32.partialorder %v3997_v5, 0.0 }
 0x5dd   :  { %18306 = vst [vmem:[#allocation68_spill] sm:$0xff] %v13864_v32  ;;  %v4005_v8 = vadd.f32 %v13566_v38, %v3923_v4  ;;  %v4006_v58 = vadd.f32 %v13566_v38, %v3924_v18  ;;  %v4007_v47 = vadd.f32 %v13566_v38, %v3925_v2  ;;  %v4008_v6 = vadd.f32 %v13566_v38, %v3926_v3  ;;  %v9982_v4 = vld [vmem:[%s17537_s1 + $0x120] ss:$0 sps:$4 sm:$0x11]  }
 0x5de   :  { %v4009_v43 = vadd.f32 %v13566_v38, %v3927_v61  ;;  %v4010_v20 = vadd.f32 %v13566_v38, %v3928_v31  ;;  %v4011_v34 = vadd.f32 %v13566_v38, %v3929_v9  ;;  %v4012_v17 = vadd.f32 %v13566_v38, %v3930_v16 }
 0x5df   :  { %v4013_v46 = vadd.f32 %v13566_v38, %v3931_v14  ;;  %v4014_v44 = vadd.f32 %v13566_v38, %v3932_v21  ;;  %8793 = vmatmul.mubr.msk.bf16.gmra.mrb[36].mxu1 %vm443_vm2, %v9982_v4  ;;  %vm4074_vm10 = vcmp.ge.f32.partialorder %v4001_v27, 0.0  ;;  %vm4077_vm13 = vcmp.ge.f32.partialorder %v4004_v36, 0.0 }
 0x5e0   :  { %8812 = vmatprep.mubr.msk.bf16.mxu1 %vm17735_vm1, %v18002_v51  ;;  %vm4078_vm14 = vcmp.ge.f32.partialorder %v4005_v8, 0.0  ;;  %vm4080_vm0 = vcmp.ge.f32.partialorder %v4007_v47, 0.0  ;;  %vm4081_vm3 = vcmp.ge.f32.partialorder %v4008_v6, 0.0  ;;  %vm4083_vm4 = vcmp.ge.f32.partialorder %v4010_v20, 0.0  ;;  %v18317_v6 = vld [vmem:[#allocation14_spill] sm:$0xff]  ;;  %v18318_v20 = vld [vmem:[#allocation15_spill] sm:$0xff] }
 0x5e1   :  { %vm4084_vm8 = vcmp.ge.f32.partialorder %v4011_v34, 0.0  ;;  %vm4085_vm7 = vcmp.ge.f32.partialorder %v4012_v17, 0.0  ;;  %vm4086_vm6 = vcmp.ge.f32.partialorder %v4013_v46, 0.0  ;;  %v7621_v16 = vsel %vm18307_vm9, 1.0, %v18002_v51  ;;  %v18319_v34 = vld [vmem:[#allocation16_spill] sm:$0xff]  ;;  %v18320_v17 = vld [vmem:[#allocation127_spill] sm:$0xff] }
 0x5e2   :  { %vm18308_vm1 = vcmp.ge.f32.partialorder %v3998_v60, 0.0  ;;  %vm18309_vm15 = vcmp.ge.f32.partialorder %v3999_v1, 0.0  ;;  %vm18310_vm5 = vcmp.ge.f32.partialorder %v4000_v55, 0.0  ;;  %v7625_v61 = vsel %vm4074_vm10, 1.0, %v18002_v51  ;;  %v18321_v46 = vld [vmem:[#allocation36_spill] sm:$0xff] }
 0x5e3   :  { %v7622_v18 = vsel %vm18308_vm1, 1.0, %v18002_v51  ;;  %v7623_v2 = vsel %vm18309_vm15, 1.0, %v18002_v51  ;;  %v7624_v3 = vsel %vm18310_vm5, 1.0, %v18002_v51  ;;  %vm18311_vm2 = vcmp.ge.f32.partialorder %v4002_v12, 0.0 }
 0x5e4   :  { %v7626_v31 = vsel %vm18311_vm2, 1.0, %v18002_v51  ;;  %vm18312_vm9 = vcmp.ge.f32.partialorder %v4003_v52, 0.0  ;;  %v7628_v14 = vsel %vm4077_vm13, 1.0, %v18002_v51  ;;  %v7629_v21 = vsel %vm4078_vm14, 1.0, %v18002_v51 }
 0x5e5   :  { %v7627_v9 = vsel %vm18312_vm9, 1.0, %v18002_v51  ;;  %vm18313_vm1 = vcmp.ge.f32.partialorder %v4006_v58, 0.0  ;;  %v7631_v5 = vsel %vm4080_vm0, 1.0, %v18002_v51  ;;  %v7632_v60 = vsel %vm4081_vm3, 1.0, %v18002_v51  ;;  %v18316_v58 = vld [vmem:[#allocation13_spill] sm:$0xff] }
 0x5e6   :  { %v7630_v1 = vsel %vm18313_vm1, 1.0, %v18002_v51  ;;  %vm18314_vm10 = vcmp.ge.f32.partialorder %v4009_v43, 0.0  ;;  %v7634_v55 = vsel %vm4083_vm4, 1.0, %v18002_v51  ;;  %v7635_v27 = vsel %vm4084_vm8, 1.0, %v18002_v51 }
 0x5e7   :  { %v7633_v12 = vsel %vm18314_vm10, 1.0, %v18002_v51  ;;  %v7636_v8 = vsel %vm4085_vm7, 1.0, %v18002_v51  ;;  %v7637_v52 = vsel %vm4086_vm6, 1.0, %v18002_v51  ;;  %vm18315_vm13 = vcmp.ge.f32.partialorder %v4014_v44, 0.0  ;;  %v18322_v44 = vld [vmem:[#allocation37_spill] sm:$0xff] }
 0x5e8   :  { %v7638_v36 = vsel %vm18315_vm13, 1.0, %v18002_v51  ;;  %v13929_v47 = vmul.f32 %v7621_v16, %v18316_v58  ;;  %v13932_v43 = vmul.f32 %v7622_v18, %v18317_v6  ;;  %v13935_v4 = vmul.f32 %v7623_v2, %v18318_v20  ;;  %v18324_v16 = vld [vmem:[#allocation38_spill] sm:$0xff]  ;;  %v18326_v18 = vld [vmem:[#allocation39_spill] sm:$0xff]  ;;  %v18328_v2 = vld [vmem:[#allocation128_spill] sm:$0xff] }
 0x5e9   :  { %v13938_v32 = vmul.f32 %v7624_v3, %v18319_v34  ;;  %v13941_v23 = vmul.f32 %v7625_v61, %v18320_v17  ;;  %v13944_v26 = vmul.f32 %v7626_v31, %v18321_v46  ;;  %v13947_v13 = vmul.f32 %v7627_v9, %v18322_v44  ;;  %v18330_v3 = vld [vmem:[#allocation129_spill] sm:$0xff]  ;;  %v18332_v61 = vld [vmem:[#allocation130_spill] sm:$0xff]  ;;  %v18334_v31 = vld [vmem:[#allocation131_spill] sm:$0xff] }
 0x5ea   :  { %v13950_v58 = vmul.f32 %v7628_v14, %v18324_v16  ;;  %v13953_v6 = vmul.f32 %v7629_v21, %v18326_v18  ;;  %v13956_v20 = vmul.f32 %v7630_v1, %v18328_v2  ;;  %v13959_v34 = vmul.f32 %v7631_v5, %v18330_v3  ;;  %v18336_v9 = vld [vmem:[#allocation132_spill] sm:$0xff]  ;;  %v18338_v14 = vld [vmem:[#allocation133_spill] sm:$0xff]  ;;  %v18340_v21 = vld [vmem:[#allocation134_spill] sm:$0xff] }
 0x5eb   :  { %18323 = vst [vmem:[#allocation69_spill] sm:$0xff] %v13947_v13  ;;  %v13962_v17 = vmul.f32 %v7632_v60, %v18332_v61  ;;  %v13965_v46 = vmul.f32 %v7633_v12, %v18334_v31  ;;  %v13968_v44 = vmul.f32 %v7634_v55, %v18336_v9  ;;  %v13971_v16 = vmul.f32 %v7635_v27, %v18338_v14  ;;  %v18342_v1 = vld [vmem:[#allocation135_spill] sm:$0xff]  ;;  %v18344_v5 = vld [vmem:[#allocation137_spill] sm:$0xff]  ;;  %v18350_v55 = vld [vmem:[#allocation50_spill] sm:$0xff] }
 0x5ec   :  { %18325 = vst [vmem:[#allocation70_spill] sm:$0xff] %v13950_v58  ;;  %18327 = vst [vmem:[#allocation71_spill] sm:$0xff] %v13953_v6  ;;  %v13974_v18 = vmul.f32 %v7636_v8, %v18340_v21  ;;  %v13977_v2 = vmul.f32 %v7637_v52, %v18342_v1  ;;  %v13980_v3 = vmul.f32 %v7638_v36, %v18344_v5  ;;  %v7567_v9 = vsel %vm4016_vm11, 1.0, %v18002_v51  ;;  %v18346_v21 = vld [vmem:[#allocation48_spill] sm:$0xff]  ;;  %v18347_v5 = vld [vmem:[#allocation49_spill] sm:$0xff] }
 0x5ed   :  { %18329 = vst [vmem:[#allocation72_spill] sm:$0xff] %v13956_v20  ;;  %18331 = vst [vmem:[#allocation73_spill] sm:$0xff] %v13959_v34  ;;  %v7568_v14 = vsel %vm4017_vm12, 1.0, %v18002_v51  ;;  %v3863_v1 = vmul.f32 %v13527_v59, %v18346_v21  ;;  %v3864_v36 = vmul.f32 %v13527_v59, %v18347_v5  ;;  %v18348_v52 = vld [vmem:[#allocation32_spill] sm:$0xff]  ;;  %v18349_v61 = vld [vmem:[#allocation41_spill] sm:$0xff]  ;;  %v3865_v31 = vmul.f32 %v13527_v59, %v18350_v55 }
 0x5ee   :  { %18333 = vst [vmem:[#allocation74_spill] sm:$0xff] %v13962_v17  ;;  %18335 = vst [vmem:[#allocation75_spill] sm:$0xff] %v13965_v46  ;;  %v4389_v8 = vmul.f32 %v7567_v9, %v18348_v52  ;;  %v4390_v27 = vmul.f32 %v7568_v14, %v18349_v61  ;;  %v18351_v12 = vld [vmem:[#allocation51_spill] sm:$0xff]  ;;  %v18354_v9 = vld [vmem:[#allocation40_spill] sm:$0xff]  ;;  %vm18355_vm11 = vmmov 0   ;;  %vm4036_vm15 = vcmp.ge.f32.partialorder %v13759_v33, 0.0 }
 0x5ef   :  { %18337 = vst [vmem:[#allocation76_spill] sm:$0xff] %v13968_v44  ;;  %18339 = vst [vmem:[#allocation77_spill] sm:$0xff] %v13971_v16  ;;  %v3866_v56 = vmul.f32 %v13527_v59, %v18351_v12  ;;  %v3945_v60 = vadd.f32 %v13566_v38, %v3863_v1  ;;  %v3946_v37 = vadd.f32 %v13566_v38, %v3864_v36  ;;  %vm4037_vm0 = vcmp.ge.f32.partialorder %v13762_v35, 0.0  ;;  %v18376_v46 = vld [vmem:[#allocation61_spill] sm:$0xff]  ;;  %v18412_v17 = vld [vmem:[#allocation22_spill] sm:$0xff] }
 0x5f0   :  { %18341 = vst [vmem:[#allocation78_spill] sm:$0xff] %v13974_v18  ;;  %18343 = vst [vmem:[#allocation79_spill] sm:$0xff] %v13977_v2  ;;  %v18352_v2 = vld [vmem:[#allocation52_spill] sm:$0xff]  ;;  %v4462_v16 = vpack.c.bf16 %v4390_v27, %v4389_v8  ;;  %v3947_v52 = vadd.f32 %v13566_v38, %v3865_v31  ;;  %v3869_v55 = vmul.f32 %v13527_v59, %v18354_v9  ;;  %v18357_v8 = vld [vmem:[#allocation33_spill] sm:$0xff]  ;;  %vm4038_vm1 = vcmp.ge.f32.partialorder %v13765_v48, 0.0 }
 0x5f1   :  { %18345 = vst [vmem:[#allocation80_spill] sm:$0xff] %v13980_v3  ;;  %v3867_v21 = vmul.f32 %v13527_v59, %v18352_v2  ;;  %v18353_v3 = vld [vmem:[#allocation53_spill] sm:$0xff]  ;;  %v3948_v61 = vadd.f32 %v13566_v38, %v3866_v56  ;;  %vm4018_vm4 = vcmp.ge.f32.partialorder %v3945_v60, 0.0  ;;  %vm4019_vm6 = vcmp.ge.f32.partialorder %v3946_v37, 0.0  ;;  %v18358_v56 = vld [vmem:[#allocation106_spill] sm:$0xff]  ;;  %v18360_v9 = vld [vmem:[#allocation35_spill] sm:$0xff] }
 0x5f2   :  { %v3868_v5 = vmul.f32 %v13527_v59, %v18353_v3  ;;  %8813 = vmatmul.mubr.bf16.vlgmr.msra.gmra.mrb[148].mxu1 %v4462_v16  ;;  %v7569_v2 = vsel %vm4018_vm4, 1.0, %v18002_v51  ;;  %v7570_v14 = vsel %vm4019_vm6, 1.0, %v18002_v51  ;;  %vm4020_vm7 = vcmp.ge.f32.partialorder %v3947_v52, 0.0  ;;  %v18356_v3 = vld [vmem:[#allocation42_spill] sm:$0xff]  ;;  %v18359_v16 = vld [vmem:[#allocation107_spill] sm:$0xff] }
 0x5f3   :  { %v3949_v12 = vadd.f32 %v13566_v38, %v3867_v21  ;;  %vm4021_vm8 = vcmp.ge.f32.partialorder %v3948_v61, 0.0  ;;  %8816 = vmatprep.mubr.msk.bf16.mxu1 %vm18355_vm11, %v18002_v51  ;;  %v4391_v27 = vmul.f32 %v7569_v2, %v18356_v3  ;;  %v4392_v31 = vmul.f32 %v7570_v14, %v18357_v8  ;;  %v18361_v3 = vld [vmem:[#allocation108_spill] sm:$0xff] }
 0x5f4   :  { %v3950_v36 = vadd.f32 %v13566_v38, %v3868_v5  ;;  %v7571_v60 = vsel %vm4020_vm7, 1.0, %v18002_v51  ;;  %v7572_v1 = vsel %vm4021_vm8, 1.0, %v18002_v51  ;;  %v3870_v2 = vmul.f32 %v13527_v59, %v18360_v9  ;;  %v18365_v9 = vld [vmem:[#allocation56_spill] sm:$0xff] }
 0x5f5   :  { %v14037_v37 = vmul.f32 %v7571_v60, %v18358_v56  ;;  %v14040_v21 = vmul.f32 %v7572_v1, %v18359_v16  ;;  %vm4022_vm12 = vcmp.ge.f32.partialorder %v3949_v12, 0.0  ;;  %v4463_v5 = vpack.c.bf16 %v4392_v31, %v4391_v27  ;;  %v18362_v60 = vld [vmem:[#allocation109_spill] sm:$0xff]  ;;  %v18363_v27 = vld [vmem:[#allocation54_spill] sm:$0xff]  ;;  %v18364_v1 = vld [vmem:[#allocation55_spill] sm:$0xff] }
 0x5f6   :  { %vm4023_vm14 = vcmp.ge.f32.partialorder %v3950_v36, 0.0  ;;  %v7573_v52 = vsel %vm4022_vm12, 1.0, %v18002_v51  ;;  %v3951_v12 = vadd.f32 %v13566_v38, %v3869_v55  ;;  %v3952_v36 = vadd.f32 %v13566_v38, %v3870_v2  ;;  %v18366_v55 = vld [vmem:[#allocation57_spill] sm:$0xff] }
 0x5f7   :  { %v7574_v61 = vsel %vm4023_vm14, 1.0, %v18002_v51  ;;  %v4464_v14 = vpack.c.bf16 %v14040_v21, %v14037_v37  ;;  %v14049_v8 = vmul.f32 %v7573_v52, %v18361_v3  ;;  %v3871_v31 = vmul.f32 %v13527_v59, %v18363_v27  ;;  %v18367_v52 = vld [vmem:[#allocation58_spill] sm:$0xff] }
 0x5f8   :  { %v14052_v56 = vmul.f32 %v7574_v61, %v18362_v60  ;;  %v3872_v16 = vmul.f32 %v13527_v59, %v18364_v1  ;;  %v3873_v18 = vmul.f32 %v13527_v59, %v18365_v9  ;;  %vm4024_vm3 = vcmp.ge.f32.partialorder %v3951_v12, 0.0  ;;  %v18368_v1 = vld [vmem:[#allocation110_spill] sm:$0xff] }
 0x5f9   :  { %v3874_v21 = vmul.f32 %v13527_v59, %v18366_v55  ;;  %v3875_v61 = vmul.f32 %v13527_v59, %v18367_v52  ;;  %vm4025_vm5 = vcmp.ge.f32.partialorder %v3952_v36, 0.0  ;;  %v7575_v2 = vsel %vm4024_vm3, 1.0, %v18002_v51  ;;  %v18369_v36 = vld [vmem:[#allocation111_spill] sm:$0xff] }
 0x5fa   :  { %v3953_v3 = vadd.f32 %v13566_v38, %v3871_v31  ;;  %v3954_v60 = vadd.f32 %v13566_v38, %v3872_v16  ;;  %8817 = vmatmul.mubr.bf16.gmra.mrb[152].mxu1 %v4463_v5  ;;  %v7576_v27 = vsel %vm4025_vm5, 1.0, %v18002_v51  ;;  %v14075_v9 = vmul.f32 %v7575_v2, %v18368_v1  ;;  %v18370_v31 = vld [vmem:[#allocation59_spill] sm:$0xff]  ;;  %v18371_v2 = vld [vmem:[#allocation112_spill] sm:$0xff] }
 0x5fb   :  { %v3955_v12 = vadd.f32 %v13566_v38, %v3873_v18  ;;  %v3956_v55 = vadd.f32 %v13566_v38, %v3874_v21  ;;  %8820 = vmatprep.mubr.msk.bf16.mxu1 %vm18355_vm11, %v18002_v51  ;;  %v14082_v52 = vmul.f32 %v7576_v27, %v18369_v36  ;;  %v3876_v5 = vmul.f32 %v13527_v59, %v18370_v31  ;;  %v18373_v31 = vld [vmem:[#allocation114_spill] sm:$0xff] }
 0x5fc   :  { %vm4026_vm2 = vcmp.ge.f32.partialorder %v3953_v3, 0.0  ;;  %vm4027_vm9 = vcmp.ge.f32.partialorder %v3954_v60, 0.0  ;;  %vm4039_vm10 = vcmp.ge.f32.partialorder %v13768_v49, 0.0  ;;  %vm4040_vm6 = vcmp.ge.f32.partialorder %v13771_v30, 0.0  ;;  %v18372_v60 = vld [vmem:[#allocation113_spill] sm:$0xff] }
 0x5fd   :  { %v7577_v16 = vsel %vm4026_vm2, 1.0, %v18002_v51  ;;  %v7578_v18 = vsel %vm4027_vm9, 1.0, %v18002_v51  ;;  %vm4028_vm13 = vcmp.ge.f32.partialorder %v3955_v12, 0.0  ;;  %vm4029_vm4 = vcmp.ge.f32.partialorder %v3956_v55, 0.0 }
 0x5fe   :  { %v14094_v3 = vmul.f32 %v7577_v16, %v18371_v2  ;;  %v14097_v27 = vmul.f32 %v7578_v18, %v18372_v60  ;;  %v7579_v1 = vsel %vm4028_vm13, 1.0, %v18002_v51  ;;  %vm4041_vm7 = vcmp.ge.f32.partialorder %v13774_v24, 0.0  ;;  %v18374_v18 = vld [vmem:[#allocation115_spill] sm:$0xff]  ;;  %v18375_v60 = vld [vmem:[#allocation60_spill] sm:$0xff] }
 0x5ff   :  { %v7580_v36 = vsel %vm4029_vm4, 1.0, %v18002_v51  ;;  %v14103_v12 = vmul.f32 %v7579_v1, %v18373_v31  ;;  %v3957_v55 = vadd.f32 %v13566_v38, %v3875_v61  ;;  %v3958_v37 = vadd.f32 %v13566_v38, %v3876_v5  ;;  %v18377_v61 = vld [vmem:[#allocation62_spill] sm:$0xff]  ;;  %v18378_v31 = vld [vmem:[#allocation63_spill] sm:$0xff] }
 0x600   :  { %vm4042_vm8 = vcmp.ge.f32.partialorder %v13777_v28, 0.0  ;;  %vm4043_vm12 = vcmp.ge.f32.partialorder %v13780_v11, 0.0  ;;  %v14112_v2 = vmul.f32 %v7580_v36, %v18374_v18  ;;  %v3877_v21 = vmul.f32 %v13527_v59, %v18375_v60 }
 0x601   :  { %v3878_v1 = vmul.f32 %v13527_v59, %v18376_v46  ;;  %vm4030_vm5 = vcmp.ge.f32.partialorder %v3957_v55, 0.0  ;;  %vm4031_vm2 = vcmp.ge.f32.partialorder %v3958_v37, 0.0  ;;  %v3879_v5 = vmul.f32 %v13527_v59, %v18377_v61  ;;  %v18379_v37 = vld [vmem:[#allocation116_spill] sm:$0xff] }
 0x602   :  { %v3880_v16 = vmul.f32 %v13527_v59, %v18378_v31  ;;  %v7581_v18 = vsel %vm4030_vm5, 1.0, %v18002_v51  ;;  %v7582_v46 = vsel %vm4031_vm2, 1.0, %v18002_v51  ;;  %v3959_v60 = vadd.f32 %v13566_v38, %v3877_v21  ;;  %8821 = vmatmul.mubr.bf16.gmra.mrb[156].mxu1 %v4464_v14  ;;  %v18380_v59 = vld [vmem:[#allocation117_spill] sm:$0xff] }
 0x603   :  { %v14133_v55 = vmul.f32 %v7581_v18, %v18379_v37  ;;  %v14136_v61 = vmul.f32 %v7582_v46, %v18380_v59  ;;  %v3960_v31 = vadd.f32 %v13566_v38, %v3878_v1  ;;  %v3961_v36 = vadd.f32 %v13566_v38, %v3879_v5  ;;  %8824 = vmatprep.mubr.msk.bf16.mxu1 %vm18355_vm11, %v18002_v51  ;;  %v18382_v46 = vld [vmem:[#allocation43_spill] sm:$0xff]  ;;  %v18383_v59 = vld [vmem:[#allocation44_spill] sm:$0xff] }
 0x604   :  { %vm4032_vm2 = vcmp.ge.f32.partialorder %v3959_v60, 0.0  ;;  %v3962_v21 = vadd.f32 %v13566_v38, %v3880_v16  ;;  %v7587_v14 = vsel %vm4036_vm15, 1.0, %v18002_v51  ;;  %v7588_v18 = vsel %vm4037_vm0, 1.0, %v18002_v51  ;;  %v18381_v16 = vld [vmem:[#allocation118_spill] sm:$0xff] }
 0x605   :  { %vm4050_vm4 = vcmp.ge.f32.partialorder %v13801_v25, 0.0  ;;  %vm4051_vm13 = vcmp.ge.f32.partialorder %v13804_v62, 0.0  ;;  %vm4052_vm5 = vcmp.ge.f32.partialorder %v13807_v57, 0.0  ;;  %vm4033_vm9 = vcmp.ge.f32.partialorder %v3960_v31, 0.0  ;;  %v18416_v57 = vld [vmem:[#allocation26_spill] sm:$0xff] }
 0x606   :  { %v7583_v38 = vsel %vm4032_vm2, 1.0, %v18002_v51  ;;  %vm4034_vm3 = vcmp.ge.f32.partialorder %v3961_v36, 0.0  ;;  %vm4053_vm14 = vcmp.ge.f32.partialorder %v13810_v7, 0.0  ;;  %v7584_v33 = vsel %vm4033_vm9, 1.0, %v18002_v51  ;;  %v18384_v36 = vld [vmem:[#allocation120_spill] sm:$0xff] }
 0x607   :  { %v14159_v35 = vmul.f32 %v7583_v38, %v18381_v16  ;;  %vm4035_vm15 = vcmp.ge.f32.partialorder %v3962_v21, 0.0  ;;  %v7585_v5 = vsel %vm4034_vm3, 1.0, %v18002_v51  ;;  %vm4054_vm0 = vcmp.ge.f32.partialorder %v13813_v29, 0.0  ;;  %v18385_v21 = vld [vmem:[#allocation119_spill] sm:$0xff]  ;;  %v18386_v16 = vld [vmem:[#allocation121_spill] sm:$0xff] }
 0x608   :  { %v14164_v60 = vmul.f32 %v7584_v33, %v18382_v46  ;;  %v7586_v37 = vsel %vm4035_vm15, 1.0, %v18002_v51  ;;  %v14168_v31 = vmul.f32 %v7585_v5, %v18383_v59  ;;  %v14171_v1 = vmul.f32 %v7587_v14, %v18384_v36  ;;  %v18387_v46 = vld [vmem:[#allocation122_spill] sm:$0xff] }
 0x609   :  { %vm4055_vm9 = vcmp.ge.f32.partialorder %v13816_v22, 0.0  ;;  %vm4056_vm2 = vcmp.ge.f32.partialorder %v13819_v53, 0.0  ;;  %v14176_v38 = vmul.f32 %v7586_v37, %v18385_v21  ;;  %v14179_v44 = vmul.f32 %v7588_v18, %v18386_v16  ;;  %v18388_v37 = vld [vmem:[#allocation45_spill] sm:$0xff]  ;;  %v18389_v16 = vld [vmem:[#allocation123_spill] sm:$0xff]  ;;  %v18401_v18 = vld [vmem:[#allocation64_spill] sm:$0xff] }
 0x60a   :  { %v7589_v33 = vsel %vm4038_vm1, 1.0, %v18002_v51  ;;  %v7590_v5 = vsel %vm4039_vm10, 1.0, %v18002_v51  ;;  %vm4057_vm3 = vcmp.ge.f32.partialorder %v13822_v41, 0.0  ;;  %v7591_v48 = vsel %vm4040_vm6, 1.0, %v18002_v51 }
 0x60b   :  { %v14191_v59 = vmul.f32 %v7589_v33, %v18387_v46  ;;  %v14194_v36 = vmul.f32 %v7590_v5, %v18388_v37  ;;  %vm4058_vm1 = vcmp.ge.f32.partialorder %v13825_v42, 0.0  ;;  %vm4059_vm15 = vcmp.ge.f32.partialorder %v13832_v10, 0.0  ;;  %v18391_v46 = vld [vmem:[#allocation124_spill] sm:$0xff]  ;;  %v18403_v5 = vld [vmem:[#allocation19_spill] sm:$0xff] }
 0x60c   :  { %v7592_v21 = vsel %vm4041_vm7, 1.0, %v18002_v51  ;;  %v14210_v33 = vmul.f32 %v7591_v48, %v18389_v16  ;;  %v18390_v30 = vpack.c.bf16 %v14052_v56, %v14049_v8  ;;  %v7593_v24 = vsel %vm4042_vm8, 1.0, %v18002_v51  ;;  %v18392_v8 = vld [vmem:[#allocation17_spill] sm:$0xff] }
 0x60d   :  { %v14219_v37 = vmul.f32 %v7592_v21, %v18391_v46  ;;  %v7594_v48 = vsel %vm4043_vm12, 1.0, %v18002_v51  ;;  %v14231_v56 = vmul.f32 %v7593_v24, %v18392_v8  ;;  %v18393_v16 = vld [vmem:[#allocation125_spill] sm:$0xff]  ;;  %vm18394_vm6 = vcmp.ge.f32.partialorder %v13783_v50, 0.0  ;;  %v18396_v21 = vld [vmem:[#allocation46_spill] sm:$0xff]  ;;  %v18397_v46 = vld [vmem:[#allocation47_spill] sm:$0xff] }
 0x60e   :  { %8825 = vmatmul.mubr.bf16.gmra.mrb[160].mxu1 %v18390_v30  ;;  %v14234_v30 = vmul.f32 %v7594_v48, %v18393_v16  ;;  %v7595_v28 = vsel %vm18394_vm6, 1.0, %v18002_v51  ;;  %vm18395_vm8 = vcmp.ge.f32.partialorder %v13786_v19, 0.0  ;;  %v18398_v24 = vld [vmem:[#allocation126_spill] sm:$0xff]  ;;  %vm18400_vm6 = vcmp.ge.f32.partialorder %v13789_v15, 0.0  ;;  %v18408_v19 = vld [vmem:[#allocation20_spill] sm:$0xff] }
 0x60f   :  { %8828 = vmatprep.mubr.msk.bf16.mxu1 %vm18355_vm11, %v18002_v51  ;;  %v7596_v11 = vsel %vm18395_vm8, 1.0, %v18002_v51  ;;  %v14247_v8 = vmul.f32 %v7595_v28, %v18398_v24  ;;  %v18399_v48 = vld [vmem:[#allocation18_spill] sm:$0xff]  ;;  %v7597_v50 = vsel %vm18400_vm6, 1.0, %v18002_v51  ;;  %vm18402_vm8 = vcmp.ge.f32.partialorder %v13792_v54, 0.0  ;;  %v18407_v24 = vld [vmem:[#allocation67_spill] sm:$0xff] }
 0x610   :  { %v14250_v16 = vmul.f32 %v7596_v11, %v18399_v48  ;;  %v7598_v49 = vsel %vm18402_vm8, 1.0, %v18002_v51  ;;  %v14262_v14 = vmul.f32 %v7597_v50, %v18403_v5  ;;  %vm18404_vm7 = vcmp.ge.f32.partialorder %v13795_v0, 0.0  ;;  %v18405_v11 = vld [vmem:[#allocation65_spill] sm:$0xff]  ;;  %v18406_v15 = vld [vmem:[#allocation66_spill] sm:$0xff]  ;;  %v18411_v0 = vld [vmem:[#allocation68_spill] sm:$0xff] }
 0x611   :  { %v7599_v28 = vsel %vm18404_vm7, 1.0, %v18002_v51  ;;  %vm4066_vm12 = vcmp.ge.f32.partialorder %v18405_v11, 0.0  ;;  %vm4067_vm6 = vcmp.ge.f32.partialorder %v18406_v15, 0.0  ;;  %vm4068_vm10 = vcmp.ge.f32.partialorder %v18407_v24, 0.0  ;;  %v18410_v5 = vld [vmem:[#allocation21_spill] sm:$0xff] }
 0x612   :  { %v14273_v34 = vmul.f32 %v7598_v49, %v18408_v19  ;;  %vm18409_vm8 = vcmp.ge.f32.partialorder %v13798_v45, 0.0  ;;  %v14279_v50 = vmul.f32 %v7599_v28, %v18410_v5  ;;  %vm4069_vm7 = vcmp.ge.f32.partialorder %v18411_v0, 0.0  ;;  %v18413_v28 = vld [vmem:[#allocation23_spill] sm:$0xff]  ;;  %v18415_v48 = vld [vmem:[#allocation25_spill] sm:$0xff] }
 0x613   :  { %v7600_v54 = vsel %vm18409_vm8, 1.0, %v18002_v51  ;;  %v7601_v20 = vsel %vm4050_vm4, 1.0, %v18002_v51  ;;  %v7602_v49 = vsel %vm4051_vm13, 1.0, %v18002_v51  ;;  %v7603_v45 = vsel %vm4052_vm5, 1.0, %v18002_v51 }
 0x614   :  { %v14283_v6 = vmul.f32 %v7600_v54, %v18412_v17  ;;  %v4477_v19 = vpack.c.bf16 %v14273_v34, %v14262_v14  ;;  %v14297_v5 = vmul.f32 %v7601_v20, %v18413_v28  ;;  %v18414_v17 = vld [vmem:[#allocation24_spill] sm:$0xff]  ;;  %v7604_v25 = vsel %vm4053_vm14, 1.0, %v18002_v51 }
 0x615   :  { %v14300_v54 = vmul.f32 %v7602_v49, %v18414_v17  ;;  %v14308_v13 = vmul.f32 %v7603_v45, %v18415_v48  ;;  %v14311_v58 = vmul.f32 %v7604_v25, %v18416_v57  ;;  %v7605_v20 = vsel %vm4054_vm0, 1.0, %v18002_v51  ;;  %v18418_v48 = vld [vmem:[#allocation27_spill] sm:$0xff]  ;;  %v18420_v25 = vld [vmem:[#allocation29_spill] sm:$0xff] }
 0x616   :  { %v4478_v62 = vpack.c.bf16 %v14283_v6, %v14279_v50  ;;  %v18417_v49 = vpack.c.bf16 %v14082_v52, %v14075_v9  ;;  %v7606_v28 = vsel %vm4055_vm9, 1.0, %v18002_v51  ;;  %v14325_v45 = vmul.f32 %v7605_v20, %v18418_v48  ;;  %v18419_v9 = vld [vmem:[#allocation28_spill] sm:$0xff]  ;;  %v18421_v20 = vld [vmem:[#allocation30_spill] sm:$0xff] }
 0x617   :  { %v7607_v17 = vsel %vm4056_vm2, 1.0, %v18002_v51  ;;  %v14335_v52 = vmul.f32 %v7606_v28, %v18419_v9  ;;  %v7608_v22 = vsel %vm4057_vm3, 1.0, %v18002_v51  ;;  %v7609_v53 = vsel %vm4058_vm1, 1.0, %v18002_v51  ;;  %v6278_v6 = vld [vmem:[%s17545_s8] sm:$0xff] }
 0x618   :  { %8829 = vmatmul.mubr.bf16.gmra.mrb[164].mxu1 %v18417_v49  ;;  %v14341_v57 = vmul.f32 %v7607_v17, %v18420_v25  ;;  %v14344_v49 = vmul.f32 %v7608_v22, %v18421_v20  ;;  %v7610_v48 = vsel %vm4059_vm15, 1.0, %v18002_v51  ;;  %vm18422_vm14 = vcmp.ge.f32.partialorder %v13835_v39, 0.0  ;;  %v18423_v17 = vld [vmem:[#allocation31_spill] sm:$0xff]  ;;  %v18424_v22 = vld [vmem:[#allocation2_spill] sm:$0xff]  ;;  %v18427_v39 = vld [vmem:[#allocation4_spill] sm:$0xff] }
 0x619   :  { %8832 = vmatprep.mubr.msk.bf16.mxu1 %vm18355_vm11, %v18002_v51  ;;  %v7611_v28 = vsel %vm18422_vm14, 1.0, %v18002_v51  ;;  %v4481_v41 = vpack.c.bf16 %v14335_v52, %v14325_v45  ;;  %v14358_v9 = vmul.f32 %v7609_v53, %v18423_v17  ;;  %v14361_v25 = vmul.f32 %v7610_v48, %v18424_v22  ;;  %v18426_v20 = vld [vmem:[#allocation3_spill] sm:$0xff]  ;;  %v18430_v53 = vld [vmem:[#allocation5_spill] sm:$0xff] }
 0x61a   :  { %vm18425_vm13 = vcmp.ge.f32.partialorder %v13838_v63, 0.0  ;;  %v4482_v10 = vpack.c.bf16 %v14344_v49, %v14341_v57  ;;  %v14369_v29 = vmul.f32 %v7611_v28, %v18426_v20  ;;  %vm18428_vm4 = vcmp.ge.f32.partialorder %v13841_v40, 0.0  ;;  %v18432_v28 = vld [vmem:[#allocation6_spill] sm:$0xff]  ;;  %v18437_v20 = vld [vmem:[#allocation9_spill] sm:$0xff] }
 0x61b   :  { %v7612_v42 = vsel %vm18425_vm13, 1.0, %v18002_v51  ;;  %v7613_v45 = vsel %vm18428_vm4, 1.0, %v18002_v51  ;;  %v4483_v52 = vpack.c.bf16 %v14361_v25, %v14358_v9  ;;  %vm18429_vm5 = vcmp.ge.f32.partialorder %v18396_v21, 0.0  ;;  %v18434_v9 = vld [vmem:[#allocation7_spill] sm:$0xff]  ;;  %v18435_v25 = vld [vmem:[#allocation8_spill] sm:$0xff] }
 0x61c   :  { %v14372_v7 = vmul.f32 %v7612_v42, %v18427_v39  ;;  %v7614_v63 = vsel %vm18429_vm5, 1.0, %v18002_v51  ;;  %v4435_v48 = vmul.f32 %v7613_v45, %v18430_v53  ;;  %vm18431_vm0 = vcmp.ge.f32.partialorder %v18397_v46, 0.0  ;;  %v18438_v45 = vld [vmem:[#allocation10_spill] sm:$0xff]  ;;  %v18439_v53 = vld [vmem:[#allocation11_spill] sm:$0xff] }
 0x61d   :  { %v7615_v57 = vsel %vm18431_vm0, 1.0, %v18002_v51  ;;  %v4436_v17 = vmul.f32 %v7614_v63, %v18432_v28  ;;  %vm18433_vm9 = vcmp.ge.f32.partialorder %v18401_v18, 0.0  ;;  %v7617_v42 = vsel %vm4066_vm12, 1.0, %v18002_v51 }
 0x61e   :  { %v4484_v49 = vpack.c.bf16 %v14372_v7, %v14369_v29  ;;  %v7616_v40 = vsel %vm18433_vm9, 1.0, %v18002_v51  ;;  %v4437_v22 = vmul.f32 %v7615_v57, %v18434_v9  ;;  %v7618_v46 = vsel %vm4067_vm6, 1.0, %v18002_v51  ;;  %v18440_v57 = vld [vmem:[#allocation12_spill] sm:$0xff]  ;;  %v6282_v9 = vld [vmem:[%s17545_s8 + $0x20] sm:$0xff] }
 0x61f   :  { %v4438_v21 = vmul.f32 %v7616_v40, %v18435_v25  ;;  %v7619_v7 = vsel %vm4068_vm10, 1.0, %v18002_v51  ;;  %v18436_v18 = vpack.c.bf16 %v14097_v27, %v14094_v3  ;;  %v4485_v29 = vpack.c.bf16 %v4436_v17, %v4435_v48 }
 0x620   :  { %v4439_v39 = vmul.f32 %v7617_v42, %v18437_v20  ;;  %v4440_v63 = vmul.f32 %v7618_v46, %v18438_v45  ;;  %v7620_v11 = vsel %vm4069_vm7, 1.0, %v18002_v51  ;;  %v4441_v24 = vmul.f32 %v7619_v7, %v18439_v53 }
 0x621   :  { %8833 = vmatmul.mubr.bf16.gmra.mrb[168].mxu1 %v18436_v18  ;;  %v4486_v15 = vpack.c.bf16 %v4438_v21, %v4437_v22  ;;  %v4442_v28 = vmul.f32 %v7620_v11, %v18440_v57  ;;  %v18441_v27 = vpack.c.bf16 %v14112_v2, %v14103_v12  ;;  %v18442_v0 = vpack.c.bf16 %v14136_v61, %v14133_v55  ;;  %v6283_v22 = vld [vmem:[%s17545_s8 + $0x28] sm:$0xff] }
 0x622   :  { %8836 = vmatprep.mubr.msk.bf16.mxu1 %vm18355_vm11, %v18002_v51  ;;  %v4487_v40 = vpack.c.bf16 %v4440_v63, %v4439_v39  ;;  %v18443_v48 = vpack.c.bf16 %v14164_v60, %v14159_v35  ;;  %v18444_v12 = vpack.c.bf16 %v14176_v38, %v14168_v31  ;;  %v18445_v2 = vpack.c.bf16 %v14179_v44, %v14171_v1  ;;  %v6279_v60 = vld [vmem:[%s17545_s8 + $0x8] sm:$0xff] }
 0x623   :  { %v4488_v3 = vpack.c.bf16 %v4442_v28, %v4441_v24  ;;  %v18446_v55 = vpack.c.bf16 %v14194_v36, %v14191_v59  ;;  %v18447_v61 = vpack.c.bf16 %v14219_v37, %v14210_v33  ;;  %v18448_v44 = vpack.c.bf16 %v14234_v30, %v14231_v56 }
 0x624   :  { %v18449_v1 = vpack.c.bf16 %v14250_v16, %v14247_v8  ;;  %v18450_v35 = vpack.c.bf16 %v14300_v54, %v14297_v5  ;;  %v18451_v34 = vpack.c.bf16 %v14311_v58, %v14308_v13  ;;  %v9236_v31 = vpack.c.bf16 %v6279_v60, %v6278_v6  ;;  %v6280_v13 = vld [vmem:[%s17545_s8 + $0x10] sm:$0xff]  ;;  %v6281_v58 = vld [vmem:[%s17545_s8 + $0x18] sm:$0xff] }
 0x625   :  { %v18452_v38 = vmov 0.0|0.0   ;;  %v9239_v14 = vpack.c.bf16 %v6281_v58, %v6280_v13  ;;  %v18453_v50 = vpack.c.bf16 %v13932_v43, %v13929_v47  ;;  %v18454_v17 = vpack.c.bf16 %v13938_v32, %v13935_v4  ;;  %v18459_v60 = vld [vmem:[#allocation72_spill] sm:$0xff] }
 0x626   :  { %9237 = vmatpush3.bf16.msra.mxu0 %v9236_v31  ;;  %v9242_v25 = vpack.c.bf16 %v6283_v22, %v6282_v9  ;;  %v18455_v45 = vpack.c.bf16 %v13944_v26, %v13941_v23  ;;  %v18460_v31 = vld [vmem:[#allocation71_spill] sm:$0xff]  ;;  %vm18507_vm2 = vcmask 1041408  }
 0x627   :  { %9238 = vmatprep.subr.bf16.mxu0 %v18452_v38  ;;  %v18461_v13 = vpack.c.bf16 %v18459_v60, %v18460_v31  ;;  %vm18508_vm3 = vmmov %vm18507_vm2 }
 0x628   :  { %vm18662_vm1 = vmmov %vm18507_vm2 }
 0x629   :  { %8837 = vmatmul.mubr.bf16.gmra.mrb[172].mxu1 %v18441_v27  ;;  %v18457_v27 = vld [vmem:[#allocation69_spill] sm:$0xff] }
 0x62a   :  { %8840 = vmatprep.mubr.msk.bf16.mxu1 %vm18355_vm11, %v18002_v51  ;;  %9240 = vmatpush3.bf16.msra.mxu0 %v9239_v14 }
 0x62b   :  { %9241 = vmatprep.subr.bf16.mxu0 %v18452_v38 }
 0x62e   :  { %9243 = vmatpush3.bf16.msra.mxu0 %v9242_v25 }
 0x62f   :  { %9244 = vmatprep.subr.bf16.mxu0 %v18452_v38 }
 0x631   :  { %8841 = vmatmul.mubr.bf16.gmra.mrb[176].mxu1 %v18442_v0 }
 0x632   :  { %8844 = vmatprep.mubr.msk.bf16.mxu1 %vm18355_vm11, %v18002_v51 }
 0x639   :  { %8845 = vmatmul.mubr.bf16.gmra.mrb[180].mxu1 %v18443_v48 }
 0x63a   :  { %8848 = vmatprep.mubr.msk.bf16.mxu1 %vm18355_vm11, %v18002_v51 }
 0x641   :  { %8849 = vmatmul.mubr.bf16.gmra.mrb[184].mxu1 %v18444_v12 }
 0x642   :  { %8852 = vmatprep.mubr.msk.bf16.mxu1 %vm18355_vm11, %v18002_v51 }
 0x649   :  { %8853 = vmatmul.mubr.bf16.gmra.mrb[188].mxu1 %v18445_v2 }
 0x64a   :  { %8856 = vmatprep.mubr.msk.bf16.mxu1 %vm18355_vm11, %v18002_v51 }
 0x651   :  { %8857 = vmatmul.mubr.bf16.gmra.mrb[192].mxu1 %v18446_v55 }
 0x652   :  { %8860 = vmatprep.mubr.msk.bf16.mxu1 %vm18355_vm11, %v18002_v51 }
 0x659   :  { %8861 = vmatmul.mubr.bf16.gmra.mrb[196].mxu1 %v18447_v61 }
 0x65a   :  { %8864 = vmatprep.mubr.msk.bf16.mxu1 %vm18355_vm11, %v18002_v51 }
 0x661   :  { %8865 = vmatmul.mubr.bf16.gmra.mrb[200].mxu1 %v18448_v44 }
 0x662   :  { %8868 = vmatprep.mubr.msk.bf16.mxu1 %vm18355_vm11, %v18002_v51 }
 0x669   :  { %8869 = vmatmul.mubr.bf16.gmra.mrb[204].mxu1 %v18449_v1 }
 0x66a   :  { %8872 = vmatprep.mubr.msk.bf16.mxu1 %vm18355_vm11, %v18002_v51 }
 0x671   :  { %8873 = vmatmul.mubr.bf16.gmra.mrb[208].mxu1 %v4477_v19 }
 0x672   :  { %8876 = vmatprep.mubr.msk.bf16.mxu1 %vm18355_vm11, %v18002_v51 }
 0x679   :  { %8877 = vmatmul.mubr.bf16.gmra.mrb[212].mxu1 %v4478_v62 }
 0x67a   :  { %8880 = vmatprep.mubr.msk.bf16.mxu1 %vm18355_vm11, %v18002_v51 }
 0x681   :  { %8881 = vmatmul.mubr.bf16.gmra.mrb[216].mxu1 %v18450_v35 }
 0x682   :  { %8884 = vmatprep.mubr.msk.bf16.mxu1 %vm18355_vm11, %v18002_v51 }
 0x689   :  { %8885 = vmatmul.mubr.bf16.gmra.mrb[220].mxu1 %v18451_v34 }
 0x68a   :  { %8888 = vmatprep.mubr.msk.bf16.mxu1 %vm18355_vm11, %v18002_v51 }
 0x691   :  { %8889 = vmatmul.mubr.bf16.gmra.mrb[224].mxu1 %v4481_v41 }
 0x692   :  { %8892 = vmatprep.mubr.msk.bf16.mxu1 %vm18355_vm11, %v18002_v51 }
 0x699   :  { %8893 = vmatmul.mubr.bf16.gmra.mrb[228].mxu1 %v4482_v10 }
 0x69a   :  { %8896 = vmatprep.mubr.msk.bf16.mxu1 %vm18355_vm11, %v18002_v51 }
 0x6a1   :  { %8897 = vmatmul.mubr.bf16.gmra.mrb[232].mxu1 %v4483_v52 }
 0x6a2   :  { %8900 = vmatprep.mubr.msk.bf16.mxu1 %vm18355_vm11, %v18002_v51 }
 0x6a9   :  { %8901 = vmatmul.mubr.bf16.gmra.mrb[236].mxu1 %v4484_v49 }
 0x6aa   :  { %8904 = vmatprep.mubr.msk.bf16.mxu1 %vm18355_vm11, %v18002_v51 }
 0x6b1   :  { %8905 = vmatmul.mubr.bf16.gmra.mrb[240].mxu1 %v4485_v29 }
 0x6b2   :  { %8908 = vmatprep.mubr.msk.bf16.mxu1 %vm18355_vm11, %v18002_v51 }
 0x6b9   :  { %8909 = vmatmul.mubr.bf16.gmra.mrb[244].mxu1 %v4486_v15 }
 0x6ba   :  { %8912 = vmatprep.mubr.msk.bf16.mxu1 %vm18355_vm11, %v18002_v51 }
 0x6c1   :  { %8913 = vmatmul.mubr.bf16.gmra.mrb[248].mxu1 %v4487_v40 }
 0x6c2   :  { %8916 = vmatprep.mubr.msk.bf16.mxu1 %vm18355_vm11, %v18002_v51 }
 0x6c5   :  { %v14510_v59 = vpop.f32.mrb[148].mxu1 }
 0x6c6   :  { %v8814_v36 = vpop.f32.mrb[149].mxu1  ;;  %v5303_v37 = vmul.f32 %v14510_v59, %v14510_v59 }
 0x6c7   :  { %v14512_v33 = vpop.f32.mrb[150].mxu1 }
 0x6c8   :  { %v5223_v56 = vadd.f32 %v14512_v33, %v14510_v59  ;;  %v5304_v30 = vmul.f32 %v14512_v33, %v14512_v33  ;;  %v8815_v8 = vpop.f32.mrb[151].mxu1 }
 0x6c9   :  { %8917 = vmatmul.mubr.bf16.gmra.mrb[252].mxu1 %v4488_v3  ;;  %v18456_v3 = vld [vmem:[#allocation70_spill] sm:$0xff] }
 0x6ca   :  { %8920 = vmatprep.mubr.msk.bf16.mxu1 %vm18355_vm11, %v18002_v51  ;;  %v5376_v16 = vadd.f32 %v5304_v30, %v5303_v37  ;;  %v18458_v0 = vpack.c.bf16 %v18456_v3, %v18457_v27  ;;  %v18468_v27 = vld [vmem:[#allocation78_spill] sm:$0xff] }
 0x6cd   :  { %v14525_v19 = vpop.f32.mrb[152].mxu1 }
 0x6ce   :  { %v5224_v5 = vadd.f32 %v5223_v56, %v14525_v19  ;;  %v5305_v54 = vmul.f32 %v14525_v19, %v14525_v19  ;;  %v8818_v62 = vpop.f32.mrb[153].mxu1 }
 0x6cf   :  { %v14530_v41 = vpop.f32.mrb[154].mxu1  ;;  %v18463_v62 = vld [vmem:[#allocation73_spill] sm:$0xff] }
 0x6d0   :  { %v5377_v10 = vadd.f32 %v5376_v16, %v5305_v54  ;;  %v5225_v52 = vadd.f32 %v5224_v5, %v14530_v41  ;;  %v5306_v47 = vmul.f32 %v14530_v41, %v14530_v41  ;;  %v8819_v43 = vpop.f32.mrb[155].mxu1  ;;  %v18462_v54 = vld [vmem:[#allocation74_spill] sm:$0xff] }
 0x6d1   :  { %8921 = vmatmul.mubr.bf16.gmra.mrb[0].mxu1 %v18453_v50 }
 0x6d2   :  { %8924 = vmatprep.mubr.msk.bf16.mxu1 %vm18355_vm11, %v18002_v51  ;;  %v5378_v49 = vadd.f32 %v5377_v10, %v5306_v47  ;;  %v18464_v10 = vpack.c.bf16 %v18462_v54, %v18463_v62  ;;  %v18474_v54 = vld [vmem:[#allocation136_spill] sm:$0xff] }
 0x6d3   :  { %v4498_v62 = vpack.c.bf16 %v18474_v54, %v18474_v54 }
 0x6d5   :  { %v14546_v21 = vpop.f32.mrb[156].mxu1 }
 0x6d6   :  { %v5226_v42 = vadd.f32 %v5225_v52, %v14546_v21  ;;  %v5307_v32 = vmul.f32 %v14546_v21, %v14546_v21  ;;  %v8822_v4 = vpop.f32.mrb[157].mxu1 }
 0x6d7   :  { %v14552_v46 = vpop.f32.mrb[158].mxu1  ;;  %v18465_v4 = vld [vmem:[#allocation76_spill] sm:$0xff] }
 0x6d8   :  { %v5379_v7 = vadd.f32 %v5378_v49, %v5307_v32  ;;  %v5227_v18 = vadd.f32 %v5226_v42, %v14552_v46  ;;  %v5308_v29 = vmul.f32 %v14552_v46, %v14552_v46  ;;  %v8823_v20 = vpop.f32.mrb[159].mxu1 }
 0x6d9   :  { %8925 = vmatmul.mubr.bf16.gmra.mrb[4].mxu1 %v18454_v17  ;;  %v6285_v20 = vld [vmem:[%s17545_s8 + $0x38] sm:$0xff] }
 0x6da   :  { %8928 = vmatprep.mubr.msk.bf16.mxu1 %vm18355_vm11, %v18002_v51  ;;  %v5380_v39 = vadd.f32 %v5379_v7, %v5308_v29  ;;  %v18466_v7 = vld [vmem:[#allocation75_spill] sm:$0xff]  ;;  %v6284_v29 = vld [vmem:[%s17545_s8 + $0x30] sm:$0xff] }
 0x6e1   :  { %8929 = vmatmul.mubr.bf16.gmra.mrb[8].mxu1 %v18455_v45  ;;  %v14562_v63 = vpop.f32.mrb[160].mxu1 }
 0x6e2   :  { %8932 = vmatprep.mubr.msk.bf16.mxu1 %vm18355_vm11, %v18002_v51  ;;  %v5228_v11 = vadd.f32 %v5227_v18, %v14562_v63  ;;  %v5309_v15 = vmul.f32 %v14562_v63, %v14562_v63  ;;  %v8826_v53 = vpop.f32.mrb[161].mxu1  ;;  %v18467_v18 = vpack.c.bf16 %v18465_v4, %v18466_v7 }
 0x6e3   :  { %v14567_v24 = vpop.f32.mrb[162].mxu1 }
 0x6e4   :  { %v5381_v57 = vadd.f32 %v5380_v39, %v5309_v15  ;;  %v5229_v28 = vadd.f32 %v5228_v11, %v14567_v24  ;;  %v5310_v26 = vmul.f32 %v14567_v24, %v14567_v24  ;;  %v8827_v23 = vpop.f32.mrb[163].mxu1  ;;  %v9245_v39 = vpack.c.bf16 %v6285_v20, %v6284_v29 }
 0x6e6   :  { %v5382_v40 = vadd.f32 %v5381_v57, %v5310_v26  ;;  %9246 = vmatpush3.bf16.msra.mxu0 %v9245_v39 }
 0x6e7   :  { %9247 = vmatprep.subr.bf16.mxu0 %v18452_v38 }
 0x6e9   :  { %8933 = vmatmul.mubr.bf16.gmra.mrb[12].mxu1 %v18458_v0  ;;  %v18469_v0 = vld [vmem:[#allocation77_spill] sm:$0xff] }
 0x6ea   :  { %8936 = vmatprep.mubr.msk.bf16.mxu1 %vm18355_vm11, %v18002_v51 }
 0x6eb   :  { %v14577_v48 = vpop.f32.mrb[164].mxu1 }
 0x6ec   :  { %v5230_v12 = vadd.f32 %v5229_v28, %v14577_v48  ;;  %v5311_v2 = vmul.f32 %v14577_v48, %v14577_v48  ;;  %v8830_v55 = vpop.f32.mrb[165].mxu1 }
 0x6ed   :  { %v14582_v61 = vpop.f32.mrb[166].mxu1 }
 0x6ee   :  { %v5383_v44 = vadd.f32 %v5382_v40, %v5311_v2  ;;  %v5231_v1 = vadd.f32 %v5230_v12, %v14582_v61  ;;  %v5312_v35 = vmul.f32 %v14582_v61, %v14582_v61  ;;  %v8831_v34 = vpop.f32.mrb[167].mxu1  ;;  %v18470_v12 = vpack.c.bf16 %v18468_v27, %v18469_v0 }
 0x6f0   :  { %v5384_v6 = vadd.f32 %v5383_v44, %v5312_v35 }
 0x6f1   :  { %8937 = vmatmul.mubr.bf16.gmra.mrb[16].mxu1 %v18461_v13 }
 0x6f2   :  { %8940 = vmatprep.mubr.msk.bf16.mxu1 %vm18355_vm11, %v18002_v51 }
 0x6f4   :  { %v14592_v58 = vpop.f32.mrb[168].mxu1 }
 0x6f5   :  { %v5232_v14 = vadd.f32 %v5231_v1, %v14592_v58  ;;  %v5313_v36 = vmul.f32 %v14592_v58, %v14592_v58  ;;  %v8834_v37 = vpop.f32.mrb[169].mxu1 }
 0x6f6   :  { %v14597_v56 = vpop.f32.mrb[170].mxu1 }
 0x6f7   :  { %v5385_v30 = vadd.f32 %v5384_v6, %v5313_v36  ;;  %v5233_v8 = vadd.f32 %v5232_v14, %v14597_v56  ;;  %v5314_v16 = vmul.f32 %v14597_v56, %v14597_v56  ;;  %v8835_v50 = vpop.f32.mrb[171].mxu1  ;;  %v18471_v14 = vld [vmem:[#allocation80_spill] sm:$0xff]  ;;  %v18472_v36 = vld [vmem:[#allocation79_spill] sm:$0xff] }
 0x6f8   :  { %v18473_v37 = vpack.c.bf16 %v18471_v14, %v18472_v36 }
 0x6f9   :  { %v5386_v5 = vadd.f32 %v5385_v30, %v5314_v16  ;;  %8941 = vmatmul.mubr.bf16.gmra.mrb[20].mxu1 %v18464_v10 }
 0x6fa   :  { %8944 = vmatprep.mubr.msk.bf16.mxu1 %vm18355_vm11, %v18002_v51 }
 0x6fc   :  { %v14607_v52 = vpop.f32.mrb[172].mxu1 }
 0x6fd   :  { %v5234_v47 = vadd.f32 %v5233_v8, %v14607_v52  ;;  %v5315_v43 = vmul.f32 %v14607_v52, %v14607_v52  ;;  %v8838_v49 = vpop.f32.mrb[173].mxu1 }
 0x6fe   :  { %v14612_v17 = vpop.f32.mrb[174].mxu1 }
 0x6ff   :  { %v5387_v9 = vadd.f32 %v5386_v5, %v5315_v43  ;;  %v5235_v22 = vadd.f32 %v5234_v47, %v14612_v17  ;;  %v5316_v25 = vmul.f32 %v14612_v17, %v14612_v17  ;;  %v8839_v42 = vpop.f32.mrb[175].mxu1 }
 0x701   :  { %v5388_v32 = vadd.f32 %v5387_v9, %v5316_v25  ;;  %8945 = vmatmul.mubr.bf16.gmra.mrb[24].mxu1 %v18467_v18 }
 0x702   :  { %8948 = vmatprep.mubr.msk.bf16.mxu1 %vm18355_vm11, %v18002_v51 }
 0x704   :  { %v14628_v45 = vpop.f32.mrb[176].mxu1 }
 0x705   :  { %v5236_v11 = vadd.f32 %v5235_v22, %v14628_v45  ;;  %v5317_v15 = vmul.f32 %v14628_v45, %v14628_v45  ;;  %v8842_v53 = vpop.f32.mrb[177].mxu1 }
 0x706   :  { %v14634_v57 = vpop.f32.mrb[178].mxu1 }
 0x707   :  { %v5389_v28 = vadd.f32 %v5388_v32, %v5317_v15  ;;  %v5237_v26 = vadd.f32 %v5236_v11, %v14634_v57  ;;  %v5318_v23 = vmul.f32 %v14634_v57, %v14634_v57  ;;  %v8843_v40 = vpop.f32.mrb[179].mxu1  ;;  %v6286_v11 = vld [vmem:[%s17545_s8 + $0x40] sm:$0xff]  ;;  %v6287_v15 = vld [vmem:[%s17545_s8 + $0x48] sm:$0xff] }
 0x708   :  { %v9248_v53 = vpack.c.bf16 %v6287_v15, %v6286_v11 }
 0x709   :  { %v5390_v3 = vadd.f32 %v5389_v28, %v5318_v23  ;;  %8949 = vmatmul.mubr.bf16.gmra.mrb[28].mxu1 %v18470_v12 }
 0x70a   :  { %8952 = vmatprep.mubr.msk.bf16.mxu1 %vm18355_vm11, %v18002_v51  ;;  %9249 = vmatpush3.bf16.msra.mxu0 %v9248_v53 }
 0x70b   :  { %9250 = vmatprep.subr.bf16.mxu0 %v18452_v38 }
 0x70c   :  { %v14644_v2 = vpop.f32.mrb[180].mxu1 }
 0x70d   :  { %v5238_v55 = vadd.f32 %v5237_v26, %v14644_v2  ;;  %v5319_v44 = vmul.f32 %v14644_v2, %v14644_v2  ;;  %v8846_v1 = vpop.f32.mrb[181].mxu1 }
 0x70e   :  { %v14649_v35 = vpop.f32.mrb[182].mxu1 }
 0x70f   :  { %v5391_v34 = vadd.f32 %v5390_v3, %v5319_v44  ;;  %v5239_v6 = vadd.f32 %v5238_v55, %v14649_v35  ;;  %v5320_v60 = vmul.f32 %v14649_v35, %v14649_v35  ;;  %v8847_v31 = vpop.f32.mrb[183].mxu1 }
 0x711   :  { %v5392_v13 = vadd.f32 %v5391_v34, %v5320_v60  ;;  %8953 = vmatmul.mubr.bf16.gmra.mrb[32].mxu1 %v18473_v37 }
 0x712   :  { %8956 = vmatprep.mubr.msk.bf16.mxu1 %vm18355_vm11, %v18002_v51 }
 0x714   :  { %v14659_v30 = vpop.f32.mrb[184].mxu1 }
 0x715   :  { %v5240_v8 = vadd.f32 %v5239_v6, %v14659_v30  ;;  %v5321_v16 = vmul.f32 %v14659_v30, %v14659_v30  ;;  %v8850_v50 = vpop.f32.mrb[185].mxu1 }
 0x716   :  { %v14664_v5 = vpop.f32.mrb[186].mxu1 }
 0x717   :  { %v5393_v10 = vadd.f32 %v5392_v13, %v5321_v16  ;;  %v5241_v47 = vadd.f32 %v5240_v8, %v14664_v5  ;;  %v5322_v43 = vmul.f32 %v14664_v5, %v14664_v5  ;;  %v8851_v49 = vpop.f32.mrb[187].mxu1 }
 0x719   :  { %v5394_v9 = vadd.f32 %v5393_v10, %v5322_v43  ;;  %8957 = vmatmul.mubr.bf16.gmra.mrb[36].mxu1 %v4498_v62 }
 0x71c   :  { %v14671_v22 = vpop.f32.mrb[188].mxu1 }
 0x71d   :  { %v5242_v25 = vadd.f32 %v5241_v47, %v14671_v22  ;;  %v5323_v42 = vmul.f32 %v14671_v22, %v14671_v22  ;;  %v8854_v32 = vpop.f32.mrb[189].mxu1 }
 0x71e   :  { %v14676_v4 = vpop.f32.mrb[190].mxu1 }
 0x71f   :  { %v5395_v7 = vadd.f32 %v5394_v9, %v5323_v42  ;;  %v5243_v18 = vadd.f32 %v5242_v25, %v14676_v4  ;;  %v5324_v29 = vmul.f32 %v14676_v4, %v14676_v4  ;;  %v8855_v20 = vpop.f32.mrb[191].mxu1 }
 0x721   :  { %v5396_v39 = vadd.f32 %v5395_v7, %v5324_v29 }
 0x724   :  { %v14687_v28 = vpop.f32.mrb[192].mxu1 }
 0x725   :  { %v5244_v26 = vadd.f32 %v5243_v18, %v14687_v28  ;;  %v5325_v23 = vmul.f32 %v14687_v28, %v14687_v28  ;;  %v8858_v40 = vpop.f32.mrb[193].mxu1 }
 0x726   :  { %v14693_v3 = vpop.f32.mrb[194].mxu1 }
 0x727   :  { %v5397_v27 = vadd.f32 %v5396_v39, %v5325_v23  ;;  %v5245_v0 = vadd.f32 %v5244_v26, %v14693_v3  ;;  %v5326_v12 = vmul.f32 %v14693_v3, %v14693_v3  ;;  %v8859_v55 = vpop.f32.mrb[195].mxu1 }
 0x729   :  { %v5398_v44 = vadd.f32 %v5397_v27, %v5326_v12 }
 0x72c   :  { %v14698_v1 = vpop.f32.mrb[196].mxu1 }
 0x72d   :  { %v5246_v34 = vadd.f32 %v5245_v0, %v14698_v1  ;;  %v5327_v6 = vmul.f32 %v14698_v1, %v14698_v1  ;;  %v8862_v60 = vpop.f32.mrb[197].mxu1 }
 0x72e   :  { %v14703_v31 = vpop.f32.mrb[198].mxu1  ;;  %v6288_v60 = vld [vmem:[%s17545_s8 + $0x50] sm:$0xff] }
 0x72f   :  { %v5399_v13 = vadd.f32 %v5398_v44, %v5327_v6  ;;  %v5247_v14 = vadd.f32 %v5246_v34, %v14703_v31  ;;  %v5328_v36 = vmul.f32 %v14703_v31, %v14703_v31  ;;  %v8863_v37 = vpop.f32.mrb[199].mxu1 }
 0x731   :  { %v5400_v8 = vadd.f32 %v5399_v13, %v5328_v36  ;;  %v6289_v13 = vld [vmem:[%s17545_s8 + $0x58] sm:$0xff] }
 0x734   :  { %v14708_v16 = vpop.f32.mrb[200].mxu1 }
 0x735   :  { %v5248_v50 = vadd.f32 %v5247_v14, %v14708_v16  ;;  %v5329_v54 = vmul.f32 %v14708_v16, %v14708_v16  ;;  %v8866_v62 = vpop.f32.mrb[201].mxu1  ;;  %v9251_v14 = vpack.c.bf16 %v6289_v13, %v6288_v60 }
 0x736   :  { %v14713_v10 = vpop.f32.mrb[202].mxu1 }
 0x737   :  { %v5401_v47 = vadd.f32 %v5400_v8, %v5329_v54  ;;  %v5249_v43 = vadd.f32 %v5248_v50, %v14713_v10  ;;  %v5330_v49 = vmul.f32 %v14713_v10, %v14713_v10  ;;  %v8867_v9 = vpop.f32.mrb[203].mxu1  ;;  %9252 = vmatpush3.bf16.msra.mxu0 %v9251_v14 }
 0x738   :  { %9253 = vmatprep.subr.bf16.mxu0 %v18452_v38 }
 0x739   :  { %v5402_v25 = vadd.f32 %v5401_v47, %v5330_v49 }
 0x73c   :  { %v14718_v42 = vpop.f32.mrb[204].mxu1 }
 0x73d   :  { %v5250_v32 = vadd.f32 %v5249_v43, %v14718_v42  ;;  %v5331_v7 = vmul.f32 %v14718_v42, %v14718_v42  ;;  %v8870_v18 = vpop.f32.mrb[205].mxu1 }
 0x73e   :  { %v14723_v29 = vpop.f32.mrb[206].mxu1 }
 0x73f   :  { %v5403_v20 = vadd.f32 %v5402_v25, %v5331_v7  ;;  %v5251_v39 = vadd.f32 %v5250_v32, %v14723_v29  ;;  %v5332_v11 = vmul.f32 %v14723_v29, %v14723_v29  ;;  %v8871_v15 = vpop.f32.mrb[207].mxu1 }
 0x741   :  { %v5404_v53 = vadd.f32 %v5403_v20, %v5332_v11 }
 0x744   :  { %v14728_v26 = vpop.f32.mrb[208].mxu1 }
 0x745   :  { %v5252_v23 = vadd.f32 %v5251_v39, %v14728_v26  ;;  %v5333_v40 = vmul.f32 %v14728_v26, %v14728_v26  ;;  %v8874_v27 = vpop.f32.mrb[209].mxu1 }
 0x746   :  { %v14733_v0 = vpop.f32.mrb[210].mxu1 }
 0x747   :  { %v5405_v12 = vadd.f32 %v5404_v53, %v5333_v40  ;;  %v5253_v55 = vadd.f32 %v5252_v23, %v14733_v0  ;;  %v5334_v44 = vmul.f32 %v14733_v0, %v14733_v0  ;;  %v8875_v34 = vpop.f32.mrb[211].mxu1 }
 0x749   :  { %v5406_v6 = vadd.f32 %v5405_v12, %v5334_v44 }
 0x74c   :  { %v14744_v36 = vpop.f32.mrb[212].mxu1 }
 0x74d   :  { %v5254_v37 = vadd.f32 %v5253_v55, %v14744_v36  ;;  %v5335_v8 = vmul.f32 %v14744_v36, %v14744_v36  ;;  %v8878_v50 = vpop.f32.mrb[213].mxu1 }
 0x74e   :  { %v14750_v54 = vpop.f32.mrb[214].mxu1 }
 0x74f   :  { %v5407_v62 = vadd.f32 %v5406_v6, %v5335_v8  ;;  %v5255_v47 = vadd.f32 %v5254_v37, %v14750_v54  ;;  %v5336_v43 = vmul.f32 %v14750_v54, %v14750_v54  ;;  %v8879_v49 = vpop.f32.mrb[215].mxu1 }
 0x751   :  { %v5408_v9 = vadd.f32 %v5407_v62, %v5336_v43 }
 0x754   :  { %v14755_v25 = vpop.f32.mrb[216].mxu1 }
 0x755   :  { %v5256_v32 = vadd.f32 %v5255_v47, %v14755_v25  ;;  %v5337_v7 = vmul.f32 %v14755_v25, %v14755_v25  ;;  %v8882_v18 = vpop.f32.mrb[217].mxu1 }
 0x756   :  { %v14760_v20 = vpop.f32.mrb[218].mxu1 }
 0x757   :  { %v5409_v39 = vadd.f32 %v5408_v9, %v5337_v7  ;;  %v5257_v11 = vadd.f32 %v5256_v32, %v14760_v20  ;;  %v5338_v15 = vmul.f32 %v14760_v20, %v14760_v20  ;;  %v8883_v53 = vpop.f32.mrb[219].mxu1 }
 0x759   :  { %v5410_v23 = vadd.f32 %v5409_v39, %v5338_v15 }
 0x75c   :  { %v14765_v40 = vpop.f32.mrb[220].mxu1 }
 0x75d   :  { %v5258_v27 = vadd.f32 %v5257_v11, %v14765_v40  ;;  %v5339_v12 = vmul.f32 %v14765_v40, %v14765_v40  ;;  %v8886_v55 = vpop.f32.mrb[221].mxu1 }
 0x75e   :  { %v14770_v44 = vpop.f32.mrb[222].mxu1 }
 0x75f   :  { %v5411_v34 = vadd.f32 %v5410_v23, %v5339_v12  ;;  %v5259_v6 = vadd.f32 %v5258_v27, %v14770_v44  ;;  %v5340_v60 = vmul.f32 %v14770_v44, %v14770_v44  ;;  %v8887_v13 = vpop.f32.mrb[223].mxu1 }
 0x761   :  { %v5412_v14 = vadd.f32 %v5411_v34, %v5340_v60 }
 0x764   :  { %v14775_v37 = vpop.f32.mrb[224].mxu1 }
 0x765   :  { %v5260_v8 = vadd.f32 %v5259_v6, %v14775_v37  ;;  %v5341_v50 = vmul.f32 %v14775_v37, %v14775_v37  ;;  %v8890_v62 = vpop.f32.mrb[225].mxu1 }
 0x766   :  { %v14780_v47 = vpop.f32.mrb[226].mxu1 }
 0x767   :  { %v5413_v43 = vadd.f32 %v5412_v14, %v5341_v50  ;;  %v5261_v49 = vadd.f32 %v5260_v8, %v14780_v47  ;;  %v5342_v9 = vmul.f32 %v14780_v47, %v14780_v47  ;;  %v8891_v32 = vpop.f32.mrb[227].mxu1 }
 0x769   :  { %v5414_v7 = vadd.f32 %v5413_v43, %v5342_v9 }
 0x76c   :  { %v14785_v18 = vpop.f32.mrb[228].mxu1 }
 0x76d   :  { %18475 = vst [vmem:[#allocation81_spill] sm:$0xff] %v14785_v18  ;;  %v5262_v39 = vadd.f32 %v5261_v49, %v14785_v18  ;;  %v5343_v11 = vmul.f32 %v14785_v18, %v14785_v18  ;;  %v8894_v15 = vpop.f32.mrb[229].mxu1 }
 0x76e   :  { %v14790_v53 = vpop.f32.mrb[230].mxu1 }
 0x76f   :  { %18476 = vst [vmem:[#allocation82_spill] sm:$0xff] %v14790_v53  ;;  %v5415_v23 = vadd.f32 %v5414_v7, %v5343_v11  ;;  %v5263_v27 = vadd.f32 %v5262_v39, %v14790_v53  ;;  %v5344_v12 = vmul.f32 %v14790_v53, %v14790_v53  ;;  %v8895_v55 = vpop.f32.mrb[231].mxu1 }
 0x771   :  { %v5416_v34 = vadd.f32 %v5415_v23, %v5344_v12 }
 0x774   :  { %v14795_v6 = vpop.f32.mrb[232].mxu1 }
 0x775   :  { %18477 = vst [vmem:[#allocation83_spill] sm:$0xff] %v14795_v6  ;;  %v5264_v60 = vadd.f32 %v5263_v27, %v14795_v6  ;;  %v5345_v13 = vmul.f32 %v14795_v6, %v14795_v6  ;;  %v8898_v14 = vpop.f32.mrb[233].mxu1 }
 0x776   :  { %v14800_v8 = vpop.f32.mrb[234].mxu1 }
 0x777   :  { %18478 = vst [vmem:[#allocation84_spill] sm:$0xff] %v14800_v8  ;;  %v5417_v50 = vadd.f32 %v5416_v34, %v5345_v13  ;;  %v5265_v62 = vadd.f32 %v5264_v60, %v14800_v8  ;;  %v5346_v43 = vmul.f32 %v14800_v8, %v14800_v8  ;;  %v8899_v49 = vpop.f32.mrb[235].mxu1 }
 0x779   :  { %v5418_v9 = vadd.f32 %v5417_v50, %v5346_v43 }
 0x77c   :  { %v14805_v32 = vpop.f32.mrb[236].mxu1 }
 0x77d   :  { %18479 = vst [vmem:[#allocation85_spill] sm:$0xff] %v14805_v32  ;;  %v5266_v7 = vadd.f32 %v5265_v62, %v14805_v32  ;;  %v5347_v39 = vmul.f32 %v14805_v32, %v14805_v32  ;;  %v8902_v11 = vpop.f32.mrb[237].mxu1 }
 0x77e   :  { %v14810_v15 = vpop.f32.mrb[238].mxu1 }
 0x77f   :  { %18480 = vst [vmem:[#allocation86_spill] sm:$0xff] %v14810_v15  ;;  %v5419_v23 = vadd.f32 %v5418_v9, %v5347_v39  ;;  %v5267_v27 = vadd.f32 %v5266_v7, %v14810_v15  ;;  %v5348_v12 = vmul.f32 %v14810_v15, %v14810_v15  ;;  %v8903_v55 = vpop.f32.mrb[239].mxu1 }
 0x781   :  { %v5420_v34 = vadd.f32 %v5419_v23, %v5348_v12 }
 0x784   :  { %v14815_v60 = vpop.f32.mrb[240].mxu1 }
 0x785   :  { %18481 = vst [vmem:[#allocation87_spill] sm:$0xff] %v14815_v60  ;;  %v5268_v13 = vadd.f32 %v5267_v27, %v14815_v60  ;;  %v5349_v14 = vmul.f32 %v14815_v60, %v14815_v60  ;;  %v8906_v50 = vpop.f32.mrb[241].mxu1 }
 0x786   :  { %v14820_v62 = vpop.f32.mrb[242].mxu1 }
 0x787   :  { %18482 = vst [vmem:[#allocation88_spill] sm:$0xff] %v14820_v62  ;;  %v5421_v43 = vadd.f32 %v5420_v34, %v5349_v14  ;;  %v5269_v49 = vadd.f32 %v5268_v13, %v14820_v62  ;;  %v5350_v9 = vmul.f32 %v14820_v62, %v14820_v62  ;;  %v8907_v7 = vpop.f32.mrb[243].mxu1 }
 0x789   :  { %v5422_v39 = vadd.f32 %v5421_v43, %v5350_v9 }
 0x78c   :  { %v14825_v11 = vpop.f32.mrb[244].mxu1 }
 0x78d   :  { %18483 = vst [vmem:[#allocation89_spill] sm:$0xff] %v14825_v11  ;;  %v5270_v23 = vadd.f32 %v5269_v49, %v14825_v11  ;;  %v5351_v27 = vmul.f32 %v14825_v11, %v14825_v11  ;;  %v8910_v12 = vpop.f32.mrb[245].mxu1 }
 0x78e   :  { %v14830_v55 = vpop.f32.mrb[246].mxu1 }
 0x78f   :  { %18484 = vst [vmem:[#allocation90_spill] sm:$0xff] %v14830_v55  ;;  %v5423_v50 = vadd.f32 %v5422_v39, %v5351_v27  ;;  %v5271_v34 = vadd.f32 %v5270_v23, %v14830_v55  ;;  %v5352_v13 = vmul.f32 %v14830_v55, %v14830_v55  ;;  %v8911_v14 = vpop.f32.mrb[247].mxu1 }
 0x791   :  { %v5424_v51 = vadd.f32 %v5423_v50, %v5352_v13 }
 0x794   :  { %v14835_v7 = vpop.f32.mrb[248].mxu1 }
 0x795   :  { %18485 = vst [vmem:[#allocation91_spill] sm:$0xff] %v14835_v7  ;;  %v5272_v43 = vadd.f32 %v5271_v34, %v14835_v7  ;;  %v5353_v49 = vmul.f32 %v14835_v7, %v14835_v7  ;;  %v8914_v9 = vpop.f32.mrb[249].mxu1 }
 0x796   :  { %v14840_v11 = vpop.f32.mrb[250].mxu1 }
 0x797   :  { %18486 = vst [vmem:[#allocation92_spill] sm:$0xff] %v14840_v11  ;;  %v5425_v12 = vadd.f32 %v5424_v51, %v5353_v49  ;;  %v5273_v39 = vadd.f32 %v5272_v43, %v14840_v11  ;;  %v5354_v23 = vmul.f32 %v14840_v11, %v14840_v11  ;;  %v8915_v27 = vpop.f32.mrb[251].mxu1 }
 0x799   :  { %v5426_v55 = vadd.f32 %v5425_v12, %v5354_v23 }
 0x79c   :  { %v14845_v14 = vpop.f32.mrb[252].mxu1 }
 0x79d   :  { %18487 = vst [vmem:[#allocation93_spill] sm:$0xff] %v14845_v14  ;;  %v5274_v50 = vadd.f32 %v5273_v39, %v14845_v14  ;;  %v5355_v34 = vmul.f32 %v14845_v14, %v14845_v14  ;;  %v8918_v13 = vpop.f32.mrb[253].mxu1 }
 0x79e   :  { %v14850_v7 = vpop.f32.mrb[254].mxu1 }
 0x79f   :  { %18488 = vst [vmem:[#allocation94_spill] sm:$0xff] %v14850_v7  ;;  %v5427_v9 = vadd.f32 %v5426_v55, %v5355_v34  ;;  %v5275_v51 = vadd.f32 %v5274_v50, %v14850_v7  ;;  %v5356_v43 = vmul.f32 %v14850_v7, %v14850_v7  ;;  %v8919_v49 = vpop.f32.mrb[255].mxu1 }
 0x7a1   :  { %v5428_v11 = vadd.f32 %v5427_v9, %v5356_v43 }
 0x7a4   :  { %v14855_v27 = vpop.f32.mrb[0].mxu1 }
 0x7a5   :  { %18489 = vst [vmem:[#allocation95_spill] sm:$0xff] %v14855_v27  ;;  %v5276_v12 = vadd.f32 %v5275_v51, %v14855_v27  ;;  %v5357_v39 = vmul.f32 %v14855_v27, %v14855_v27  ;;  %v8922_v23 = vpop.f32.mrb[1].mxu1 }
 0x7a6   :  { %v14860_v14 = vpop.f32.mrb[2].mxu1 }
 0x7a7   :  { %18490 = vst [vmem:[#allocation96_spill] sm:$0xff] %v14860_v14  ;;  %v5429_v13 = vadd.f32 %v5428_v11, %v5357_v39  ;;  %v5277_v55 = vadd.f32 %v5276_v12, %v14860_v14  ;;  %v5358_v50 = vmul.f32 %v14860_v14, %v14860_v14  ;;  %v8923_v34 = vpop.f32.mrb[3].mxu1 }
 0x7a9   :  { %v5430_v7 = vadd.f32 %v5429_v13, %v5358_v50 }
 0x7ac   :  { %v14865_v49 = vpop.f32.mrb[4].mxu1 }
 0x7ad   :  { %18491 = vst [vmem:[#allocation97_spill] sm:$0xff] %v14865_v49  ;;  %v5278_v9 = vadd.f32 %v5277_v55, %v14865_v49  ;;  %v5359_v51 = vmul.f32 %v14865_v49, %v14865_v49  ;;  %v8926_v43 = vpop.f32.mrb[5].mxu1 }
 0x7ae   :  { %v14870_v27 = vpop.f32.mrb[6].mxu1 }
 0x7af   :  { %18492 = vst [vmem:[#allocation98_spill] sm:$0xff] %v14870_v27  ;;  %v5431_v23 = vadd.f32 %v5430_v7, %v5359_v51  ;;  %v5279_v11 = vadd.f32 %v5278_v9, %v14870_v27  ;;  %v5360_v12 = vmul.f32 %v14870_v27, %v14870_v27  ;;  %v8927_v39 = vpop.f32.mrb[7].mxu1 }
 0x7b1   :  { %v5432_v14 = vadd.f32 %v5431_v23, %v5360_v12 }
 0x7b4   :  { %v14875_v34 = vpop.f32.mrb[8].mxu1 }
 0x7b5   :  { %18493 = vst [vmem:[#allocation99_spill] sm:$0xff] %v14875_v34  ;;  %v5280_v13 = vadd.f32 %v5279_v11, %v14875_v34  ;;  %v5361_v55 = vmul.f32 %v14875_v34, %v14875_v34  ;;  %v8930_v50 = vpop.f32.mrb[9].mxu1 }
 0x7b6   :  { %v14880_v49 = vpop.f32.mrb[10].mxu1 }
 0x7b7   :  { %18494 = vst [vmem:[#allocation100_spill] sm:$0xff] %v14880_v49  ;;  %v5433_v43 = vadd.f32 %v5432_v14, %v5361_v55  ;;  %v5281_v7 = vadd.f32 %v5280_v13, %v14880_v49  ;;  %v5362_v9 = vmul.f32 %v14880_v49, %v14880_v49  ;;  %v8931_v51 = vpop.f32.mrb[11].mxu1 }
 0x7b9   :  { %v5434_v27 = vadd.f32 %v5433_v43, %v5362_v9 }
 0x7bc   :  { %v14885_v39 = vpop.f32.mrb[12].mxu1 }
 0x7bd   :  { %18495 = vst [vmem:[#allocation101_spill] sm:$0xff] %v14885_v39  ;;  %v5282_v23 = vadd.f32 %v5281_v7, %v14885_v39  ;;  %v5363_v11 = vmul.f32 %v14885_v39, %v14885_v39  ;;  %v8934_v12 = vpop.f32.mrb[13].mxu1 }
 0x7be   :  { %v14890_v34 = vpop.f32.mrb[14].mxu1 }
 0x7bf   :  { %18496 = vst [vmem:[#allocation102_spill] sm:$0xff] %v14890_v34  ;;  %v5435_v50 = vadd.f32 %v5434_v27, %v5363_v11  ;;  %v5283_v14 = vadd.f32 %v5282_v23, %v14890_v34  ;;  %v5364_v13 = vmul.f32 %v14890_v34, %v14890_v34  ;;  %v8935_v55 = vpop.f32.mrb[15].mxu1 }
 0x7c0   :  { %v6293_v55 = vld [vmem:[%s17545_s8 + $0x78] sm:$0xff] }
 0x7c1   :  { %v5436_v49 = vadd.f32 %v5435_v50, %v5364_v13  ;;  %v6290_v50 = vld [vmem:[%s17545_s8 + $0x60] sm:$0xff]  ;;  %v6292_v13 = vld [vmem:[%s17545_s8 + $0x70] sm:$0xff] }
 0x7c4   :  { %v14895_v51 = vpop.f32.mrb[16].mxu1 }
 0x7c5   :  { %18497 = vst [vmem:[#allocation103_spill] sm:$0xff] %v14895_v51  ;;  %v5284_v43 = vadd.f32 %v5283_v14, %v14895_v51  ;;  %v5365_v7 = vmul.f32 %v14895_v51, %v14895_v51  ;;  %v8938_v9 = vpop.f32.mrb[17].mxu1  ;;  %v6291_v14 = vld [vmem:[%s17545_s8 + $0x68] sm:$0xff] }
 0x7c6   :  { %v14900_v39 = vpop.f32.mrb[18].mxu1 }
 0x7c7   :  { %18498 = vst [vmem:[#allocation104_spill] sm:$0xff] %v14900_v39  ;;  %v5437_v12 = vadd.f32 %v5436_v49, %v5365_v7  ;;  %v5285_v27 = vadd.f32 %v5284_v43, %v14900_v39  ;;  %v5366_v23 = vmul.f32 %v14900_v39, %v14900_v39  ;;  %v8939_v11 = vpop.f32.mrb[19].mxu1  ;;  %v9254_v49 = vpack.c.bf16 %v6291_v14, %v6290_v50 }
 0x7c8   :  { %v9257_v7 = vpack.c.bf16 %v6293_v55, %v6292_v13 }
 0x7c9   :  { %v5438_v34 = vadd.f32 %v5437_v12, %v5366_v23  ;;  %9255 = vmatpush3.bf16.msra.mxu0 %v9254_v49 }
 0x7ca   :  { %9256 = vmatprep.subr.bf16.mxu0 %v18452_v38 }
 0x7cc   :  { %v14917_v43 = vpop.f32.mrb[20].mxu1 }
 0x7cd   :  { %18499 = vst [vmem:[#allocation105_spill] sm:$0xff] %v14917_v43  ;;  %v5286_v9 = vadd.f32 %v5285_v27, %v14917_v43  ;;  %v5367_v12 = vmul.f32 %v14917_v43, %v14917_v43  ;;  %v8942_v23 = vpop.f32.mrb[21].mxu1  ;;  %9258 = vmatpush3.bf16.msra.mxu0 %v9257_v7 }
 0x7ce   :  { %v14923_v11 = vpop.f32.mrb[22].mxu1 }
 0x7cf   :  { %18500 = vst [vmem:[#allocation13_spill] sm:$0xff] %v14923_v11  ;;  %v5439_v39 = vadd.f32 %v5438_v34, %v5367_v12  ;;  %v5287_v50 = vadd.f32 %v5286_v9, %v14923_v11  ;;  %v5368_v14 = vmul.f32 %v14923_v11, %v14923_v11  ;;  %v8943_v51 = vpop.f32.mrb[23].mxu1 }
 0x7d1   :  { %v5440_v49 = vadd.f32 %v5439_v39, %v5368_v14 }
 0x7d4   :  { %v14928_v13 = vpop.f32.mrb[24].mxu1 }
 0x7d5   :  { %18501 = vst [vmem:[#allocation14_spill] sm:$0xff] %v14928_v13  ;;  %v5288_v27 = vadd.f32 %v5287_v50, %v14928_v13  ;;  %v5369_v55 = vmul.f32 %v14928_v13, %v14928_v13  ;;  %v8946_v23 = vpop.f32.mrb[25].mxu1 }
 0x7d6   :  { %v14933_v38 = vpop.f32.mrb[26].mxu1 }
 0x7d7   :  { %18502 = vst [vmem:[#allocation15_spill] sm:$0xff] %v14933_v38  ;;  %v5441_v43 = vadd.f32 %v5440_v49, %v5369_v55  ;;  %v5289_v34 = vadd.f32 %v5288_v27, %v14933_v38  ;;  %v5370_v9 = vmul.f32 %v14933_v38, %v14933_v38  ;;  %v8947_v12 = vpop.f32.mrb[27].mxu1 }
 0x7d9   :  { %v5442_v51 = vadd.f32 %v5441_v43, %v5370_v9 }
 0x7dc   :  { %v14938_v7 = vpop.f32.mrb[28].mxu1 }
 0x7dd   :  { %18503 = vst [vmem:[#allocation16_spill] sm:$0xff] %v14938_v7  ;;  %v5290_v39 = vadd.f32 %v5289_v34, %v14938_v7  ;;  %v5371_v50 = vmul.f32 %v14938_v7, %v14938_v7  ;;  %v8950_v14 = vpop.f32.mrb[29].mxu1 }
 0x7de   :  { %v14943_v13 = vpop.f32.mrb[30].mxu1 }
 0x7df   :  { %18504 = vst [vmem:[#allocation127_spill] sm:$0xff] %v14943_v13  ;;  %v5443_v23 = vadd.f32 %v5442_v51, %v5371_v50  ;;  %v5291_v49 = vadd.f32 %v5290_v39, %v14943_v13  ;;  %v5372_v27 = vmul.f32 %v14943_v13, %v14943_v13  ;;  %v8951_v55 = vpop.f32.mrb[31].mxu1 }
 0x7e1   :  { %v5444_v38 = vadd.f32 %v5443_v23, %v5372_v27 }
 0x7e4   :  { %v14948_v12 = vpop.f32.mrb[32].mxu1 }
 0x7e5   :  { %18505 = vst [vmem:[#allocation36_spill] sm:$0xff] %v14948_v12  ;;  %v5292_v43 = vadd.f32 %v5291_v49, %v14948_v12  ;;  %v5373_v34 = vmul.f32 %v14948_v12, %v14948_v12  ;;  %v8954_v9 = vpop.f32.mrb[33].mxu1 }
 0x7e6   :  { %v14953_v7 = vpop.f32.mrb[34].mxu1 }
 0x7e7   :  { %18506 = vst [vmem:[#allocation37_spill] sm:$0xff] %v14953_v7  ;;  %v5445_v14 = vadd.f32 %v5444_v38, %v5373_v34  ;;  %v5293_v51 = vadd.f32 %v5292_v43, %v14953_v7  ;;  %v5374_v39 = vmul.f32 %v14953_v7, %v14953_v7  ;;  %v8955_v50 = vpop.f32.mrb[35].mxu1 }
 0x7e9   :  { %v5446_v13 = vadd.f32 %v5445_v14, %v5374_v39 }
 0x7ec   :  { %v5217_v55 = vpop.f32.mrb[36].mxu1 }
 0x7ed   :  { %v5294_v23 = vsel %vm18507_vm2, %v5217_v55, 0.0  ;;  %v5375_v27 = vmul.f32 %v5217_v55, %v5217_v55  ;;  %v8958_v11 = vpop.f32.mrb[37].mxu1 }
 0x7ee   :  { %v5295_v49 = vadd.f32 %v5294_v23, %v5293_v51  ;;  %v5220_v62 = vpop.f32.mrb[38].mxu1 }
 0x7ef   :  { %v5447_v12 = vsel %vm18508_vm3, %v5375_v27, 0.0  ;;  %v8959_v9 = vpop.f32.mrb[39].mxu1 }
 0x7f0   :  { %v5296_v60 = vrot.slane %v5295_v49, 4  ;;  %v5448_v15 = vadd.f32 %v5447_v12, %v5446_v13  ;;  %v18509_v9 = vld [vmem:[#allocation34_spill] sm:$0xff] }
 0x7f1   :  { %v5464_v13 = vsub.s32 4, %v18509_v9 }
 0x7f2   :  { %v5297_v38 = vadd.f32 %v5296_v60, %v5295_v49  ;;  %v5449_v34 = vrot.slane %v5448_v15, 4 }
 0x7f4   :  { %v5298_v43 = vrot.slane %v5297_v38, 2  ;;  %v5450_v32 = vadd.f32 %v5449_v34, %v5448_v15  ;;  %v9983_v15 = vld [vmem:[%s17542_s9] sm:$0xff] }
 0x7f6   :  { %v5299_v8 = vadd.f32 %v5298_v43, %v5297_v38  ;;  %v5451_v7 = vrot.slane %v5450_v32, 2 }
 0x7f8   :  { %v5300_v50 = vrot.slane %v5299_v8, 1  ;;  %v5452_v14 = vadd.f32 %v5451_v7, %v5450_v32  ;;  %v5546_v32 = vsub.s32 5, %v18509_v9  ;;  %v18530_v9 = vld [vmem:[#allocation96_spill] sm:$0xff] }
 0x7fa   :  { %v5301_v39 = vadd.f32 %v5300_v50, %v5299_v8  ;;  %v5453_v6 = vrot.slane %v5452_v14, 1 }
 0x7fc   :  { %v5302_v53 = vmul.f32 0.0017301039, %v5301_v39  ;;  %v5454_v18 = vadd.f32 %v5453_v6, %v5452_v14  ;;  %v18511_v39 = vld [vmem:[#allocation81_spill] sm:$0xff] }
 0x7fe   :  { %v5455_v11 = vmul.f32 0.0017301039, %v5454_v18  ;;  %v5456_v51 = vmul.f32 %v5302_v53, %v5302_v53 }
 0x800   :  { %v5457_v62 = vsub.f32 %v5455_v11, %v5456_v51  ;;  %v18512_v11 = vld [vmem:[#allocation82_spill] sm:$0xff]  ;;  %v18513_v51 = vld [vmem:[#allocation83_spill] sm:$0xff] }
 0x802   :  { %v5458_v23 = vmax.f32 %v5457_v62, 0.0  ;;  %v18514_v62 = vld [vmem:[#allocation84_spill] sm:$0xff] }
 0x804   :  { %v5459_v27 = vadd.f32 1e-05, %v5458_v23  ;;  %v18515_v23 = vld [vmem:[#allocation85_spill] sm:$0xff] }
 0x806   :  { %9794 = vrsqrt.f32 %v5459_v27  ;;  %v18516_v27 = vld [vmem:[#allocation86_spill] sm:$0xff] }
 0x810   :  { %v9795_v60 = vpop.eup %9794 }
 0x811   :  { %v5461_v12 = vmul.f32 %v9983_v15, %v9795_v60  ;;  %v18517_v60 = vld [vmem:[#allocation87_spill] sm:$0xff] }
 0x813   :  { %v14964_v49 = vrot.slane %v5461_v12, %v5464_v13  ;;  %v5539_v8 = vmul.f32 %v5461_v12, %v5302_v53  ;;  %v18518_v12 = vld [vmem:[#allocation88_spill] sm:$0xff] }
 0x815   :  { %v5538_v18 = vmul.f32 %v14964_v49, %v5217_v55  ;;  %v5541_v6 = vrot.slane %v5539_v8, 7  ;;  %v14970_v7 = vmul.f32 %v14964_v49, %v14510_v59  ;;  %v14974_v38 = vmul.f32 %v14964_v49, %v14512_v33 }
 0x816   :  { %v14978_v34 = vmul.f32 %v14964_v49, %v14525_v19  ;;  %v14982_v53 = vmul.f32 %v14964_v49, %v14530_v41  ;;  %v14986_v55 = vmul.f32 %v14964_v49, %v14546_v21  ;;  %v14990_v59 = vmul.f32 %v14964_v49, %v14552_v46 }
 0x817   :  { %v5543_v43 = vsub.f32 %v9983_v15, %v5541_v6  ;;  %v14994_v33 = vmul.f32 %v14964_v49, %v14562_v63  ;;  %v14998_v19 = vmul.f32 %v14964_v49, %v14567_v24  ;;  %v15002_v41 = vmul.f32 %v14964_v49, %v14577_v48  ;;  %v18520_v6 = vld [vmem:[#allocation90_spill] sm:$0xff] }
 0x818   :  { %v15006_v21 = vmul.f32 %v14964_v49, %v14582_v61  ;;  %v15010_v46 = vmul.f32 %v14964_v49, %v14592_v58  ;;  %v15014_v63 = vmul.f32 %v14964_v49, %v14597_v56  ;;  %v15018_v24 = vmul.f32 %v14964_v49, %v14607_v52 }
 0x819   :  { %v15020_v50 = vrot.slane %v5543_v43, %v5546_v32  ;;  %v15024_v48 = vmul.f32 %v14964_v49, %v14612_v17  ;;  %v15028_v61 = vmul.f32 %v14964_v49, %v14628_v45  ;;  %v15032_v58 = vmul.f32 %v14964_v49, %v14634_v57  ;;  %v18519_v32 = vld [vmem:[#allocation89_spill] sm:$0xff] }
 0x81a   :  { %v15036_v56 = vmul.f32 %v14964_v49, %v14644_v2  ;;  %v15040_v52 = vmul.f32 %v14964_v49, %v14649_v35  ;;  %v15044_v17 = vmul.f32 %v14964_v49, %v14659_v30  ;;  %v15048_v45 = vmul.f32 %v14964_v49, %v14664_v5 }
 0x81b   :  { %v15051_v14 = vadd.f32 %v15020_v50, %v5538_v18  ;;  %v15055_v57 = vmul.f32 %v14964_v49, %v14671_v22  ;;  %v15059_v2 = vmul.f32 %v14964_v49, %v14676_v4  ;;  %v15063_v35 = vmul.f32 %v14964_v49, %v14687_v28 }
 0x81c   :  { %v15067_v30 = vmul.f32 %v14964_v49, %v14693_v3  ;;  %v15071_v5 = vmul.f32 %v14964_v49, %v14698_v1  ;;  %v15075_v22 = vmul.f32 %v14964_v49, %v14703_v31  ;;  %v15079_v4 = vmul.f32 %v14964_v49, %v14708_v16 }
 0x81d   :  { %18510 = vst [vmem:[#allocation38_spill] sm:$0xff] %v15051_v14  ;;  %v15083_v28 = vmul.f32 %v14964_v49, %v14713_v10  ;;  %v15087_v3 = vmul.f32 %v14964_v49, %v14718_v42  ;;  %v15091_v1 = vmul.f32 %v14964_v49, %v14723_v29  ;;  %v15095_v31 = vmul.f32 %v14964_v49, %v14728_v26  ;;  %v18532_v14 = vld [vmem:[#allocation97_spill] sm:$0xff] }
 0x81e   :  { %v15099_v16 = vmul.f32 %v14964_v49, %v14733_v0  ;;  %v15103_v10 = vmul.f32 %v14964_v49, %v14744_v36  ;;  %v15107_v42 = vmul.f32 %v14964_v49, %v14750_v54  ;;  %v15111_v29 = vmul.f32 %v14964_v49, %v14755_v25 }
 0x81f   :  { %v15115_v26 = vmul.f32 %v14964_v49, %v14760_v20  ;;  %v15119_v0 = vmul.f32 %v14964_v49, %v14765_v40  ;;  %v15123_v36 = vmul.f32 %v14964_v49, %v14770_v44  ;;  %v15127_v54 = vmul.f32 %v14964_v49, %v14775_v37 }
 0x820   :  { %v15131_v25 = vmul.f32 %v14964_v49, %v14780_v47  ;;  %v15135_v20 = vmul.f32 %v14964_v49, %v18511_v39  ;;  %v15139_v40 = vmul.f32 %v14964_v49, %v18512_v11  ;;  %v15143_v44 = vmul.f32 %v14964_v49, %v18513_v51  ;;  %v18521_v39 = vld [vmem:[#allocation91_spill] sm:$0xff]  ;;  %v18522_v51 = vld [vmem:[#allocation92_spill] sm:$0xff] }
 0x821   :  { %v15147_v37 = vmul.f32 %v14964_v49, %v18514_v62  ;;  %v15151_v47 = vmul.f32 %v14964_v49, %v18515_v23  ;;  %v15155_v13 = vmul.f32 %v14964_v49, %v18516_v27  ;;  %v15159_v15 = vmul.f32 %v14964_v49, %v18517_v60  ;;  %v18524_v23 = vld [vmem:[#allocation93_spill] sm:$0xff]  ;;  %v18526_v60 = vld [vmem:[#allocation94_spill] sm:$0xff] }
 0x822   :  { %v15163_v8 = vmul.f32 %v14964_v49, %v18518_v12  ;;  %v15167_v18 = vmul.f32 %v14964_v49, %v18519_v32  ;;  %v15171_v43 = vmul.f32 %v14964_v49, %v18520_v6  ;;  %v15175_v11 = vmul.f32 %v14964_v49, %v18521_v39  ;;  %v18528_v32 = vld [vmem:[#allocation95_spill] sm:$0xff] }
 0x823   :  { %v15179_v62 = vmul.f32 %v14964_v49, %v18522_v51  ;;  %v15183_v27 = vmul.f32 %v14964_v49, %v18524_v23  ;;  %v15187_v12 = vmul.f32 %v14964_v49, %v18526_v60  ;;  %v15191_v6 = vmul.f32 %v14964_v49, %v18528_v32 }
 0x824   :  { %v15195_v39 = vmul.f32 %v14964_v49, %v18530_v9  ;;  %v15199_v51 = vmul.f32 %v14964_v49, %v18532_v14 }
 0x825   :  { %18523 = vst [vmem:[#allocation39_spill] sm:$0xff] %v15179_v62  ;;  %18525 = vst [vmem:[#allocation128_spill] sm:$0xff] %v15183_v27  ;;  %v18534_v62 = vld [vmem:[#allocation98_spill] sm:$0xff]  ;;  %v18536_v27 = vld [vmem:[#allocation99_spill] sm:$0xff] }
 0x826   :  { %18527 = vst [vmem:[#allocation129_spill] sm:$0xff] %v15187_v12  ;;  %18529 = vst [vmem:[#allocation130_spill] sm:$0xff] %v15191_v6  ;;  %v15203_v23 = vmul.f32 %v14964_v49, %v18534_v62  ;;  %v15207_v60 = vmul.f32 %v14964_v49, %v18536_v27  ;;  %v18538_v12 = vld [vmem:[#allocation100_spill] sm:$0xff]  ;;  %v18540_v6 = vld [vmem:[#allocation101_spill] sm:$0xff] }
 0x827   :  { %18531 = vst [vmem:[#allocation131_spill] sm:$0xff] %v15195_v39  ;;  %18533 = vst [vmem:[#allocation132_spill] sm:$0xff] %v15199_v51  ;;  %v15211_v32 = vmul.f32 %v14964_v49, %v18538_v12  ;;  %v15215_v9 = vmul.f32 %v14964_v49, %v18540_v6  ;;  %v18542_v39 = vld [vmem:[#allocation102_spill] sm:$0xff]  ;;  %v18544_v51 = vld [vmem:[#allocation103_spill] sm:$0xff] }
 0x828   :  { %18535 = vst [vmem:[#allocation133_spill] sm:$0xff] %v15203_v23  ;;  %18537 = vst [vmem:[#allocation134_spill] sm:$0xff] %v15207_v60  ;;  %v15219_v14 = vmul.f32 %v14964_v49, %v18542_v39  ;;  %v15223_v62 = vmul.f32 %v14964_v49, %v18544_v51  ;;  %v18546_v23 = vld [vmem:[#allocation104_spill] sm:$0xff]  ;;  %v18548_v60 = vld [vmem:[#allocation105_spill] sm:$0xff] }
 0x829   :  { %18539 = vst [vmem:[#allocation135_spill] sm:$0xff] %v15211_v32  ;;  %18541 = vst [vmem:[#allocation137_spill] sm:$0xff] %v15215_v9  ;;  %v15227_v27 = vmul.f32 %v14964_v49, %v18546_v23  ;;  %v15231_v12 = vmul.f32 %v14964_v49, %v18548_v60  ;;  %v18550_v32 = vld [vmem:[#allocation13_spill] sm:$0xff]  ;;  %v18552_v9 = vld [vmem:[#allocation14_spill] sm:$0xff] }
 0x82a   :  { %18543 = vst [vmem:[#allocation48_spill] sm:$0xff] %v15219_v14  ;;  %18545 = vst [vmem:[#allocation49_spill] sm:$0xff] %v15223_v62  ;;  %v15235_v6 = vmul.f32 %v14964_v49, %v18550_v32  ;;  %v15239_v39 = vmul.f32 %v14964_v49, %v18552_v9  ;;  %v18553_v14 = vld [vmem:[#allocation15_spill] sm:$0xff]  ;;  %v18554_v62 = vld [vmem:[#allocation16_spill] sm:$0xff] }
 0x82b   :  { %18547 = vst [vmem:[#allocation32_spill] sm:$0xff] %v15227_v27  ;;  %18549 = vst [vmem:[#allocation41_spill] sm:$0xff] %v15231_v12  ;;  %v15243_v51 = vmul.f32 %v14964_v49, %v18553_v14  ;;  %v15247_v23 = vmul.f32 %v14964_v49, %v18554_v62  ;;  %v18555_v27 = vld [vmem:[#allocation127_spill] sm:$0xff]  ;;  %v18556_v12 = vld [vmem:[#allocation36_spill] sm:$0xff]  ;;  %v15263_v14 = vadd.f32 %v15020_v50, %v14970_v7 }
 0x82c   :  { %18551 = vst [vmem:[#allocation50_spill] sm:$0xff] %v15235_v6  ;;  %v15251_v60 = vmul.f32 %v14964_v49, %v18555_v27  ;;  %v15255_v32 = vmul.f32 %v14964_v49, %v18556_v12  ;;  %v18557_v6 = vld [vmem:[#allocation37_spill] sm:$0xff]  ;;  %v15267_v62 = vadd.f32 %v15020_v50, %v14974_v38  ;;  %v15271_v27 = vadd.f32 %v15020_v50, %v14978_v34 }
 0x82d   :  { %v15259_v9 = vmul.f32 %v14964_v49, %v18557_v6  ;;  %v15275_v12 = vadd.f32 %v15020_v50, %v14982_v53  ;;  %v15279_v49 = vadd.f32 %v15020_v50, %v14986_v55  ;;  %v15283_v7 = vadd.f32 %v15020_v50, %v14990_v59  ;;  %v18564_v6 = vld [vmem:[#allocation39_spill] sm:$0xff] }
 0x82e   :  { %v15287_v38 = vadd.f32 %v15020_v50, %v14994_v33  ;;  %v15291_v34 = vadd.f32 %v15020_v50, %v14998_v19  ;;  %v15295_v53 = vadd.f32 %v15020_v50, %v15002_v41  ;;  %v15299_v55 = vadd.f32 %v15020_v50, %v15006_v21 }
 0x82f   :  { %v15303_v59 = vadd.f32 %v15020_v50, %v15010_v46  ;;  %v15307_v33 = vadd.f32 %v15020_v50, %v15014_v63  ;;  %v15311_v19 = vadd.f32 %v15020_v50, %v15018_v24  ;;  %v15315_v41 = vadd.f32 %v15020_v50, %v15024_v48 }
 0x830   :  { %v15319_v21 = vadd.f32 %v15020_v50, %v15028_v61  ;;  %v15323_v46 = vadd.f32 %v15020_v50, %v15032_v58  ;;  %v15327_v63 = vadd.f32 %v15020_v50, %v15036_v56  ;;  %v15331_v24 = vadd.f32 %v15020_v50, %v15040_v52 }
 0x831   :  { %v15335_v48 = vadd.f32 %v15020_v50, %v15044_v17  ;;  %v15339_v61 = vadd.f32 %v15020_v50, %v15048_v45  ;;  %v15343_v58 = vadd.f32 %v15020_v50, %v15055_v57  ;;  %v15347_v56 = vadd.f32 %v15020_v50, %v15059_v2 }
 0x832   :  { %v15351_v52 = vadd.f32 %v15020_v50, %v15063_v35  ;;  %v15355_v17 = vadd.f32 %v15020_v50, %v15067_v30  ;;  %v15359_v45 = vadd.f32 %v15020_v50, %v15071_v5  ;;  %v15363_v57 = vadd.f32 %v15020_v50, %v15075_v22 }
 0x833   :  { %v15367_v2 = vadd.f32 %v15020_v50, %v15079_v4  ;;  %v15371_v35 = vadd.f32 %v15020_v50, %v15083_v28  ;;  %v15375_v30 = vadd.f32 %v15020_v50, %v15087_v3  ;;  %v15379_v5 = vadd.f32 %v15020_v50, %v15091_v1 }
 0x834   :  { %v15383_v22 = vadd.f32 %v15020_v50, %v15095_v31  ;;  %v15387_v4 = vadd.f32 %v15020_v50, %v15099_v16  ;;  %v15391_v28 = vadd.f32 %v15020_v50, %v15103_v10  ;;  %v15395_v3 = vadd.f32 %v15020_v50, %v15107_v42 }
 0x835   :  { %v15399_v1 = vadd.f32 %v15020_v50, %v15111_v29  ;;  %v15403_v31 = vadd.f32 %v15020_v50, %v15115_v26  ;;  %v15407_v16 = vadd.f32 %v15020_v50, %v15119_v0  ;;  %v15411_v10 = vadd.f32 %v15020_v50, %v15123_v36 }
 0x836   :  { %v15415_v42 = vadd.f32 %v15020_v50, %v15127_v54  ;;  %v15419_v29 = vadd.f32 %v15020_v50, %v15131_v25  ;;  %v15423_v26 = vadd.f32 %v15020_v50, %v15135_v20  ;;  %v15427_v0 = vadd.f32 %v15020_v50, %v15139_v40 }
 0x837   :  { %v15431_v36 = vadd.f32 %v15020_v50, %v15143_v44  ;;  %v15435_v54 = vadd.f32 %v15020_v50, %v15147_v37  ;;  %v15439_v25 = vadd.f32 %v15020_v50, %v15151_v47  ;;  %v15443_v20 = vadd.f32 %v15020_v50, %v15155_v13 }
 0x838   :  { %v15447_v40 = vadd.f32 %v15020_v50, %v15159_v15  ;;  %v15451_v44 = vadd.f32 %v15020_v50, %v15163_v8  ;;  %v15455_v37 = vadd.f32 %v15020_v50, %v15167_v18  ;;  %v15459_v47 = vadd.f32 %v15020_v50, %v15171_v43 }
 0x839   :  { %18558 = vst [vmem:[#allocation51_spill] sm:$0xff] %v15443_v20  ;;  %v15463_v13 = vadd.f32 %v15020_v50, %v15175_v11  ;;  %v15467_v15 = vadd.f32 %v15020_v50, %v18564_v6 }
 0x83a   :  { %18559 = vst [vmem:[#allocation52_spill] sm:$0xff] %v15447_v40  ;;  %18560 = vst [vmem:[#allocation53_spill] sm:$0xff] %v15451_v44  ;;  %v18566_v40 = vld [vmem:[#allocation128_spill] sm:$0xff]  ;;  %v18568_v44 = vld [vmem:[#allocation129_spill] sm:$0xff] }
 0x83b   :  { %18561 = vst [vmem:[#allocation40_spill] sm:$0xff] %v15455_v37  ;;  %18562 = vst [vmem:[#allocation42_spill] sm:$0xff] %v15459_v47  ;;  %v15471_v8 = vadd.f32 %v15020_v50, %v18566_v40  ;;  %v15475_v18 = vadd.f32 %v15020_v50, %v18568_v44  ;;  %v18570_v37 = vld [vmem:[#allocation130_spill] sm:$0xff]  ;;  %v18572_v47 = vld [vmem:[#allocation131_spill] sm:$0xff] }
 0x83c   :  { %18563 = vst [vmem:[#allocation33_spill] sm:$0xff] %v15463_v13  ;;  %18565 = vst [vmem:[#allocation106_spill] sm:$0xff] %v15467_v15  ;;  %v15479_v43 = vadd.f32 %v15020_v50, %v18570_v37  ;;  %v15483_v11 = vadd.f32 %v15020_v50, %v18572_v47  ;;  %v18574_v13 = vld [vmem:[#allocation132_spill] sm:$0xff]  ;;  %v18576_v15 = vld [vmem:[#allocation133_spill] sm:$0xff] }
 0x83d   :  { %18567 = vst [vmem:[#allocation107_spill] sm:$0xff] %v15471_v8  ;;  %18569 = vst [vmem:[#allocation35_spill] sm:$0xff] %v15475_v18  ;;  %v15487_v6 = vadd.f32 %v15020_v50, %v18574_v13  ;;  %v15491_v40 = vadd.f32 %v15020_v50, %v18576_v15  ;;  %v18578_v8 = vld [vmem:[#allocation134_spill] sm:$0xff]  ;;  %v18580_v18 = vld [vmem:[#allocation135_spill] sm:$0xff] }
 0x83e   :  { %18571 = vst [vmem:[#allocation108_spill] sm:$0xff] %v15479_v43  ;;  %18573 = vst [vmem:[#allocation109_spill] sm:$0xff] %v15483_v11  ;;  %v15495_v44 = vadd.f32 %v15020_v50, %v18578_v8  ;;  %v15499_v37 = vadd.f32 %v15020_v50, %v18580_v18  ;;  %v18582_v43 = vld [vmem:[#allocation137_spill] sm:$0xff]  ;;  %v18584_v11 = vld [vmem:[#allocation48_spill] sm:$0xff] }
 0x83f   :  { %18575 = vst [vmem:[#allocation54_spill] sm:$0xff] %v15487_v6  ;;  %18577 = vst [vmem:[#allocation55_spill] sm:$0xff] %v15491_v40  ;;  %v15503_v47 = vadd.f32 %v15020_v50, %v18582_v43  ;;  %v15507_v13 = vadd.f32 %v15020_v50, %v18584_v11  ;;  %v18586_v6 = vld [vmem:[#allocation49_spill] sm:$0xff]  ;;  %v18588_v40 = vld [vmem:[#allocation32_spill] sm:$0xff]  ;;  %v15527_v11 = vadd.f32 %v15020_v50, %v15239_v39 }
 0x840   :  { %18579 = vst [vmem:[#allocation56_spill] sm:$0xff] %v15495_v44  ;;  %18581 = vst [vmem:[#allocation57_spill] sm:$0xff] %v15499_v37  ;;  %v15511_v15 = vadd.f32 %v15020_v50, %v18586_v6  ;;  %v15515_v8 = vadd.f32 %v15020_v50, %v18588_v40  ;;  %v18590_v44 = vld [vmem:[#allocation41_spill] sm:$0xff]  ;;  %v18592_v37 = vld [vmem:[#allocation50_spill] sm:$0xff]  ;;  %v15531_v6 = vadd.f32 %v15020_v50, %v15243_v51 }
 0x841   :  { %18583 = vst [vmem:[#allocation58_spill] sm:$0xff] %v15503_v47  ;;  %18585 = vst [vmem:[#allocation110_spill] sm:$0xff] %v15507_v13  ;;  %v15519_v18 = vadd.f32 %v15020_v50, %v18590_v44  ;;  %v15523_v43 = vadd.f32 %v15020_v50, %v18592_v37  ;;  %v15535_v40 = vadd.f32 %v15020_v50, %v15247_v23  ;;  %v5623_v47 = vmul.f32 0.5, %v15271_v27 }
 0x842   :  { %18587 = vst [vmem:[#allocation111_spill] sm:$0xff] %v15511_v15  ;;  %18589 = vst [vmem:[#allocation59_spill] sm:$0xff] %v15515_v8  ;;  %v15539_v44 = vadd.f32 %v15020_v50, %v15251_v60  ;;  %v15543_v37 = vadd.f32 %v15020_v50, %v15255_v32  ;;  %v15547_v39 = vadd.f32 %v15020_v50, %v15259_v9  ;;  %v5696_v60 = vmul.f32 0.044715, %v15271_v27 }
 0x843   :  { %18591 = vst [vmem:[#allocation112_spill] sm:$0xff] %v15519_v18  ;;  %18593 = vst [vmem:[#allocation113_spill] sm:$0xff] %v15523_v43  ;;  %v5698_v50 = vmul.f32 0.044715, %v15279_v49 }
 0x844   :  { %18594 = vst [vmem:[#allocation114_spill] sm:$0xff] %v15527_v11  ;;  %18595 = vst [vmem:[#allocation115_spill] sm:$0xff] %v15531_v6  ;;  %v5694_v11 = vmul.f32 0.044715, %v15263_v14  ;;  %v5769_v9 = vmul.f32 %v5696_v60, %v15271_v27 }
 0x845   :  { %18596 = vst [vmem:[#allocation60_spill] sm:$0xff] %v15535_v40  ;;  %18597 = vst [vmem:[#allocation61_spill] sm:$0xff] %v15539_v44  ;;  %v5695_v40 = vmul.f32 0.044715, %v15267_v62  ;;  %v5697_v44 = vmul.f32 0.044715, %v15275_v12 }
 0x846   :  { %18598 = vst [vmem:[#allocation62_spill] sm:$0xff] %v15543_v37  ;;  %18599 = vst [vmem:[#allocation63_spill] sm:$0xff] %v15547_v39  ;;  %v5767_v51 = vmul.f32 %v5694_v11, %v15263_v14  ;;  %v5699_v11 = vmul.f32 0.044715, %v15283_v7  ;;  %v5842_v43 = vmul.f32 %v5769_v9, %v15271_v27  ;;  %v5701_v9 = vmul.f32 0.044715, %v15291_v34 }
 0x847   :  { %v5768_v37 = vmul.f32 %v5695_v40, %v15267_v62  ;;  %v5770_v39 = vmul.f32 %v5697_v44, %v15275_v12 }
 0x848   :  { %v5840_v6 = vmul.f32 %v5767_v51, %v15263_v14  ;;  %v5771_v51 = vmul.f32 %v5698_v50, %v15279_v49  ;;  %v5772_v60 = vmul.f32 %v5699_v11, %v15283_v7  ;;  %v5915_v44 = vadd.f32 %v5842_v43, %v15271_v27 }
 0x849   :  { %v5843_v18 = vmul.f32 %v5770_v39, %v15275_v12  ;;  %v5774_v11 = vmul.f32 %v5701_v9, %v15291_v34  ;;  %v5703_v9 = vmul.f32 0.044715, %v15299_v55  ;;  %v5706_v27 = vmul.f32 0.044715, %v15311_v19 }
 0x84a   :  { %v5913_v23 = vadd.f32 %v5840_v6, %v15263_v14  ;;  %v5841_v6 = vmul.f32 %v5768_v37, %v15267_v62  ;;  %v5844_v8 = vmul.f32 %v5771_v51, %v15279_v49  ;;  %v5988_v37 = vmul.f32 0.7978846, %v5915_v44 }
 0x84b   :  { %v5621_v44 = vmul.f32 0.5, %v15263_v14  ;;  %v5622_v14 = vmul.f32 0.5, %v15267_v62 }
 0x84c   :  { %v5986_v32 = vmul.f32 0.7978846, %v5913_v23  ;;  %v5700_v23 = vmul.f32 0.044715, %v15287_v38  ;;  %v5914_v40 = vadd.f32 %v5841_v6, %v15267_v62  ;;  %v5917_v13 = vadd.f32 %v5844_v8, %v15279_v49 }
 0x84d   :  { %v5845_v6 = vmul.f32 %v5772_v60, %v15283_v7  ;;  %v5847_v60 = vmul.f32 %v5774_v11, %v15291_v34 }
 0x84e   :  { %9796 = vtanh.f32 %v5986_v32  ;;  %v5916_v32 = vadd.f32 %v5843_v18, %v15275_v12  ;;  %v5987_v15 = vmul.f32 0.7978846, %v5914_v40  ;;  %v5773_v50 = vmul.f32 %v5700_v23, %v15287_v38 }
 0x84f   :  { %v5990_v18 = vmul.f32 0.7978846, %v5917_v13  ;;  %v5918_v40 = vadd.f32 %v5845_v6, %v15283_v7  ;;  %v5702_v23 = vmul.f32 0.044715, %v15295_v53 }
 0x850   :  { %9798 = vtanh.f32 %v5987_v15  ;;  %v5989_v39 = vmul.f32 0.7978846, %v5916_v32  ;;  %v5846_v51 = vmul.f32 %v5773_v50, %v15287_v38 }
 0x851   :  { %9800 = vtanh.f32 %v5988_v37  ;;  %v5991_v37 = vmul.f32 0.7978846, %v5918_v40  ;;  %v5775_v50 = vmul.f32 %v5702_v23, %v15295_v53  ;;  %v5704_v40 = vmul.f32 0.044715, %v15303_v59 }
 0x852   :  { %9802 = vtanh.f32 %v5989_v39  ;;  %v5919_v8 = vadd.f32 %v5846_v51, %v15287_v38  ;;  %v18600_v39 = vmov 0.0   ;;  %v5920_v51 = vadd.f32 %v5847_v60, %v15291_v34 }
 0x853   :  { %9804 = vtanh.f32 %v5990_v18  ;;  %v5848_v11 = vmul.f32 %v5775_v50, %v15295_v53  ;;  %v5776_v18 = vmul.f32 %v5703_v9, %v15299_v55  ;;  %v5777_v60 = vmul.f32 %v5704_v40, %v15303_v59 }
 0x854   :  { %9806 = vtanh.f32 %v5991_v37  ;;  %v5993_v20 = vmul.f32 0.7978846, %v5920_v51  ;;  %v5705_v37 = vmul.f32 0.044715, %v15307_v33  ;;  %v5625_v40 = vmul.f32 0.5, %v15279_v49 }
 0x855   :  { %v5921_v62 = vadd.f32 %v5848_v11, %v15295_v53 }
 0x856   :  { %v5778_v51 = vmul.f32 %v5705_v37, %v15307_v33  ;;  %v5626_v37 = vmul.f32 0.5, %v15283_v7 }
 0x858   :  { %v9797_v43 = vpop.eup %9796 }
 0x859   :  { %v6132_v15 = vadd.f32 1.0, %v9797_v43 }
 0x85a   :  { %v9799_v13 = vpop.eup %9798 }
 0x85b   :  { %v6205_v32 = vmul.f32 %v6132_v15, %v5621_v44  ;;  %v9801_v6 = vpop.eup %9800  ;;  %v6133_v43 = vadd.f32 1.0, %v9799_v13  ;;  %v5992_v44 = vmul.f32 0.7978846, %v5919_v8  ;;  %v5849_v8 = vmul.f32 %v5776_v18, %v15299_v55 }
 0x85c   :  { %v6134_v15 = vadd.f32 1.0, %v9801_v6  ;;  %v5624_v6 = vmul.f32 0.5, %v15275_v12  ;;  %v5779_v12 = vmul.f32 %v5706_v27, %v15311_v19 }
 0x85d   :  { %8993 = vmatmul.mubr.f32.vlgmr.msra.gmra.mrb[148].mxu0 %v6205_v32  ;;  %v6206_v23 = vmul.f32 %v6133_v43, %v5622_v14  ;;  %v9803_v32 = vpop.eup %9802  ;;  %9808 = vtanh.f32 %v5992_v44  ;;  %v5994_v14 = vmul.f32 0.7978846, %v5921_v62  ;;  %v5922_v43 = vadd.f32 %v5849_v8, %v15299_v55 }
 0x85e   :  { %8995 = vmatprep.mubr.msk.f32.mxu0 %vm18355_vm11, %v18600_v39  ;;  %v6207_v50 = vmul.f32 %v6134_v15, %v5623_v47  ;;  %v6135_v9 = vadd.f32 1.0, %v9803_v32  ;;  %v9805_v13 = vpop.eup %9804  ;;  %9810 = vtanh.f32 %v5993_v20  ;;  %v5850_v44 = vmul.f32 %v5777_v60, %v15303_v59 }
 0x85f   :  { %v6136_v47 = vadd.f32 1.0, %v9805_v13  ;;  %v9807_v18 = vpop.eup %9806  ;;  %v5707_v20 = vmul.f32 0.044715, %v15315_v41  ;;  %9812 = vtanh.f32 %v5994_v14  ;;  %v5851_v32 = vmul.f32 %v5778_v51, %v15307_v33 }
 0x860   :  { %v6208_v11 = vmul.f32 %v6135_v9, %v5624_v6  ;;  %v5923_v15 = vadd.f32 %v5850_v44, %v15303_v59  ;;  %v6137_v60 = vadd.f32 1.0, %v9807_v18  ;;  %v5852_v49 = vmul.f32 %v5779_v12, %v15311_v19 }
 0x861   :  { %8996 = vmatmul.mubr.f32.gmra.mrb[150].mxu0 %v6206_v23  ;;  %v5995_v23 = vmul.f32 0.7978846, %v5922_v43  ;;  %v6209_v8 = vmul.f32 %v6136_v47, %v5625_v40  ;;  %v5924_v13 = vadd.f32 %v5851_v32, %v15307_v33  ;;  %v5708_v6 = vmul.f32 0.044715, %v15319_v21 }
 0x862   :  { %8998 = vmatprep.mubr.msk.f32.mxu0 %vm18355_vm11, %v18600_v39  ;;  %v5996_v9 = vmul.f32 0.7978846, %v5923_v15  ;;  %v6210_v14 = vmul.f32 %v6137_v60, %v5626_v37  ;;  %v5627_v44 = vmul.f32 0.5, %v15287_v38  ;;  %v5925_v7 = vadd.f32 %v5852_v49, %v15311_v19 }
 0x863   :  { %9814 = vtanh.f32 %v5995_v23  ;;  %v5781_v47 = vmul.f32 %v5708_v6, %v15319_v21  ;;  %v5709_v18 = vmul.f32 0.044715, %v15323_v46  ;;  %v5628_v23 = vmul.f32 0.5, %v15291_v34 }
 0x864   :  { %9816 = vtanh.f32 %v5996_v9  ;;  %v5998_v38 = vmul.f32 0.7978846, %v5925_v7  ;;  %v5630_v7 = vmul.f32 0.5, %v15299_v55 }
 0x865   :  { %8999 = vmatmul.mubr.f32.gmra.mrb[152].mxu0 %v6207_v50  ;;  %v5780_v50 = vmul.f32 %v5707_v20, %v15315_v41  ;;  %v5854_v32 = vmul.f32 %v5781_v47, %v15319_v21 }
 0x866   :  { %9001 = vmatprep.mubr.msk.f32.mxu0 %vm18355_vm11, %v18600_v39 }
 0x867   :  { %v9809_v62 = vpop.eup %9808  ;;  %v5853_v51 = vmul.f32 %v5780_v50, %v15315_v41  ;;  %v5629_v50 = vmul.f32 0.5, %v15295_v53  ;;  %v5927_v9 = vadd.f32 %v5854_v32, %v15319_v21  ;;  %v5712_v53 = vmul.f32 0.044715, %v15335_v48 }
 0x868   :  { %v9811_v27 = vpop.eup %9810  ;;  %v6138_v43 = vadd.f32 1.0, %v9809_v62  ;;  %v5782_v62 = vmul.f32 %v5709_v18, %v15323_v46 }
 0x869   :  { %9002 = vmatmul.mubr.f32.gmra.mrb[154].mxu0 %v6208_v11  ;;  %v5997_v11 = vmul.f32 0.7978846, %v5924_v13  ;;  %v6139_v12 = vadd.f32 1.0, %v9811_v27  ;;  %v9813_v20 = vpop.eup %9812  ;;  %v5926_v15 = vadd.f32 %v5853_v51, %v15315_v41  ;;  %v5711_v27 = vmul.f32 0.044715, %v15331_v24 }
 0x86a   :  { %9004 = vmatprep.mubr.msk.f32.mxu0 %vm18355_vm11, %v18600_v39  ;;  %v6211_v40 = vmul.f32 %v6138_v43, %v5627_v44  ;;  %v6140_v37 = vadd.f32 1.0, %v9813_v20  ;;  %v5855_v13 = vmul.f32 %v5782_v62, %v15323_v46  ;;  %v6000_v51 = vmul.f32 0.7978846, %v5927_v9 }
 0x86b   :  { %9818 = vtanh.f32 %v5997_v11  ;;  %v6212_v60 = vmul.f32 %v6139_v12, %v5628_v23  ;;  %v5999_v34 = vmul.f32 0.7978846, %v5926_v15  ;;  %v5784_v18 = vmul.f32 %v5711_v27, %v15331_v24 }
 0x86c   :  { %9820 = vtanh.f32 %v5998_v38  ;;  %v5928_v11 = vadd.f32 %v5855_v13, %v15323_v46  ;;  %v5631_v23 = vmul.f32 0.5, %v15303_v59  ;;  %v5785_v55 = vmul.f32 %v5712_v53, %v15335_v48 }
 0x86d   :  { %9005 = vmatmul.mubr.f32.gmra.mrb[156].mxu0 %v6209_v8  ;;  %v5710_v8 = vmul.f32 0.044715, %v15327_v63  ;;  %v9815_v49 = vpop.eup %9814  ;;  %9822 = vtanh.f32 %v5999_v34  ;;  %v5713_v38 = vmul.f32 0.044715, %v15339_v61  ;;  %v5857_v62 = vmul.f32 %v5784_v18, %v15331_v24 }
 0x86e   :  { %9007 = vmatprep.mubr.msk.f32.mxu0 %vm18355_vm11, %v18600_v39  ;;  %v6141_v43 = vadd.f32 1.0, %v9815_v49  ;;  %v9817_v44 = vpop.eup %9816  ;;  %9824 = vtanh.f32 %v6000_v51  ;;  %v6001_v15 = vmul.f32 0.7978846, %v5928_v11  ;;  %v5632_v49 = vmul.f32 0.5, %v15307_v33 }
 0x86f   :  { %v5783_v6 = vmul.f32 %v5710_v8, %v15327_v63  ;;  %v6142_v12 = vadd.f32 1.0, %v9817_v44  ;;  %v5858_v59 = vmul.f32 %v5785_v55, %v15335_v48  ;;  %v5930_v9 = vadd.f32 %v5857_v62, %v15331_v24 }
 0x870   :  { %9826 = vtanh.f32 %v6001_v15  ;;  %v5714_v13 = vmul.f32 0.044715, %v15343_v58  ;;  %v5715_v51 = vmul.f32 0.044715, %v15347_v56  ;;  %v5716_v55 = vmul.f32 0.044715, %v15351_v52 }
 0x871   :  { %9008 = vmatmul.mubr.f32.gmra.mrb[158].mxu0 %v6210_v14  ;;  %v6213_v14 = vmul.f32 %v6140_v37, %v5629_v50  ;;  %v5856_v47 = vmul.f32 %v5783_v6, %v15327_v63  ;;  %v5786_v50 = vmul.f32 %v5713_v38, %v15339_v61  ;;  %v5931_v33 = vadd.f32 %v5858_v59, %v15335_v48 }
 0x872   :  { %9010 = vmatprep.mubr.msk.f32.mxu0 %vm18355_vm11, %v18600_v39  ;;  %v5787_v53 = vmul.f32 %v5714_v13, %v15343_v58  ;;  %v5635_v62 = vmul.f32 0.5, %v15319_v21  ;;  %v5718_v21 = vmul.f32 0.044715, %v15359_v45 }
 0x873   :  { %v5929_v32 = vadd.f32 %v5856_v47, %v15327_v63  ;;  %v5859_v44 = vmul.f32 %v5786_v50, %v15339_v61 }
 0x875   :  { %9011 = vmatmul.mubr.f32.gmra.mrb[160].mxu0 %v6211_v40  ;;  %v6214_v40 = vmul.f32 %v6141_v43, %v5630_v7  ;;  %v9819_v20 = vpop.eup %9818  ;;  %v6002_v34 = vmul.f32 0.7978846, %v5929_v32  ;;  %v5633_v43 = vmul.f32 0.5, %v15311_v19  ;;  %v6003_v7 = vmul.f32 0.7978846, %v5930_v9 }
 0x876   :  { %9013 = vmatprep.mubr.msk.f32.mxu0 %vm18355_vm11, %v18600_v39  ;;  %v9821_v8 = vpop.eup %9820  ;;  %v6143_v37 = vadd.f32 1.0, %v9819_v20  ;;  %v6004_v19 = vmul.f32 0.7978846, %v5931_v33  ;;  %v5860_v20 = vmul.f32 %v5787_v53, %v15343_v58  ;;  %v5636_v9 = vmul.f32 0.5, %v15323_v46 }
 0x877   :  { %v9823_v6 = vpop.eup %9822  ;;  %9828 = vtanh.f32 %v6002_v34  ;;  %v5791_v46 = vmul.f32 %v5718_v21, %v15359_v45  ;;  %v5719_v53 = vmul.f32 0.044715, %v15363_v57 }
 0x878   :  { %v6216_v27 = vmul.f32 %v6143_v37, %v5632_v49  ;;  %v6145_v47 = vadd.f32 1.0, %v9823_v6  ;;  %v9825_v18 = vpop.eup %9824  ;;  %9830 = vtanh.f32 %v6003_v7  ;;  %v5789_v37 = vmul.f32 %v5716_v55, %v15351_v52 }
 0x879   :  { %9014 = vmatmul.mubr.f32.gmra.mrb[162].mxu0 %v6212_v60  ;;  %v6215_v60 = vmul.f32 %v6142_v12, %v5631_v23  ;;  %v5932_v12 = vadd.f32 %v5859_v44, %v15339_v61  ;;  %v5788_v23 = vmul.f32 %v5715_v51, %v15347_v56  ;;  %v6146_v15 = vadd.f32 1.0, %v9825_v18 }
 0x87a   :  { %9016 = vmatprep.mubr.msk.f32.mxu0 %vm18355_vm11, %v18600_v39  ;;  %v9827_v32 = vpop.eup %9826  ;;  %9832 = vtanh.f32 %v6004_v19  ;;  %v5717_v49 = vmul.f32 0.044715, %v15355_v17  ;;  %v5637_v7 = vmul.f32 0.5, %v15327_v63  ;;  %v5864_v63 = vmul.f32 %v5791_v46, %v15359_v45 }
 0x87b   :  { %v6219_v59 = vmul.f32 %v6146_v15, %v5635_v62  ;;  %v6147_v50 = vadd.f32 1.0, %v9827_v32 }
 0x87d   :  { %9017 = vmatmul.mubr.f32.gmra.mrb[164].mxu0 %v6213_v14  ;;  %v6144_v14 = vadd.f32 1.0, %v9821_v8  ;;  %v5933_v8 = vadd.f32 %v5860_v20, %v15343_v58  ;;  %v5792_v20 = vmul.f32 %v5719_v53, %v15363_v57 }
 0x87e   :  { %9019 = vmatprep.mubr.msk.f32.mxu0 %vm18355_vm11, %v18600_v39 }
 0x87f   :  { %v6217_v11 = vmul.f32 %v6144_v14, %v5633_v43  ;;  %v6006_v13 = vmul.f32 0.7978846, %v5933_v8  ;;  %v5790_v14 = vmul.f32 %v5717_v49, %v15355_v17  ;;  %v6220_v43 = vmul.f32 %v6147_v50, %v5636_v9 }
 0x880   :  { %v5865_v8 = vmul.f32 %v5792_v20, %v15363_v57  ;;  %v5721_v49 = vmul.f32 0.044715, %v15371_v35  ;;  %v5640_v9 = vmul.f32 0.5, %v15339_v61 }
 0x881   :  { %9020 = vmatmul.mubr.f32.gmra.mrb[166].mxu0 %v6214_v40  ;;  %v5634_v40 = vmul.f32 0.5, %v15315_v41  ;;  %v6005_v41 = vmul.f32 0.7978846, %v5932_v12  ;;  %v9829_v34 = vpop.eup %9828  ;;  %v5638_v12 = vmul.f32 0.5, %v15331_v24  ;;  %v5937_v24 = vadd.f32 %v5864_v63, %v15359_v45 }
 0x882   :  { %9022 = vmatprep.mubr.msk.f32.mxu0 %vm18355_vm11, %v18600_v39  ;;  %v6148_v33 = vadd.f32 1.0, %v9829_v34  ;;  %v9831_v44 = vpop.eup %9830  ;;  %v5938_v21 = vadd.f32 %v5865_v8, %v15363_v57 }
 0x883   :  { %v6218_v38 = vmul.f32 %v6145_v47, %v5634_v40  ;;  %9834 = vtanh.f32 %v6005_v41  ;;  %v5863_v47 = vmul.f32 %v5790_v14, %v15355_v17  ;;  %v6149_v19 = vadd.f32 1.0, %v9831_v44 }
 0x884   :  { %9836 = vtanh.f32 %v6006_v13  ;;  %v9833_v18 = vpop.eup %9832  ;;  %v6221_v40 = vmul.f32 %v6148_v33, %v5637_v7  ;;  %v5639_v41 = vmul.f32 0.5, %v15335_v48  ;;  %v6010_v48 = vmul.f32 0.7978846, %v5937_v24 }
 0x885   :  { %9023 = vmatmul.mubr.f32.gmra.mrb[168].mxu0 %v6215_v60  ;;  %v5861_v60 = vmul.f32 %v5788_v23, %v15347_v56  ;;  %v5936_v55 = vadd.f32 %v5863_v47, %v15355_v17  ;;  %v6222_v32 = vmul.f32 %v6149_v19, %v5638_v12  ;;  %v6150_v62 = vadd.f32 1.0, %v9833_v18 }
 0x886   :  { %9025 = vmatprep.mubr.msk.f32.mxu0 %vm18355_vm11, %v18600_v39  ;;  %v5641_v44 = vmul.f32 0.5, %v15343_v58  ;;  %v6011_v61 = vmul.f32 0.7978846, %v5938_v21  ;;  %v5724_v58 = vmul.f32 0.044715, %v15383_v22 }
 0x887   :  { %v5934_v6 = vadd.f32 %v5861_v60, %v15347_v56  ;;  %v6009_v60 = vmul.f32 0.7978846, %v5936_v55 }
 0x889   :  { %9026 = vmatmul.mubr.f32.gmra.mrb[170].mxu0 %v6216_v27  ;;  %v5862_v27 = vmul.f32 %v5789_v37, %v15351_v52  ;;  %v6007_v51 = vmul.f32 0.7978846, %v5934_v6  ;;  %v5794_v6 = vmul.f32 %v5721_v49, %v15371_v35  ;;  %v5644_v49 = vmul.f32 0.5, %v15355_v17 }
 0x88a   :  { %9028 = vmatprep.mubr.msk.f32.mxu0 %vm18355_vm11, %v18600_v39 }
 0x88b   :  { %9838 = vtanh.f32 %v6007_v51  ;;  %v5867_v46 = vmul.f32 %v5794_v6, %v15371_v35  ;;  %v5723_v51 = vmul.f32 0.044715, %v15379_v5  ;;  %v5645_v6 = vmul.f32 0.5, %v15359_v45 }
 0x88d   :  { %9029 = vmatmul.mubr.f32.gmra.mrb[172].mxu0 %v6217_v11  ;;  %v5935_v11 = vadd.f32 %v5862_v27, %v15351_v52  ;;  %v9835_v15 = vpop.eup %9834  ;;  %v5722_v27 = vmul.f32 0.044715, %v15375_v30  ;;  %v5940_v12 = vadd.f32 %v5867_v46, %v15371_v35  ;;  %v5796_v20 = vmul.f32 %v5723_v51, %v15379_v5 }
 0x88e   :  { %9031 = vmatprep.mubr.msk.f32.mxu0 %vm18355_vm11, %v18600_v39  ;;  %v6151_v50 = vadd.f32 1.0, %v9835_v15  ;;  %v9837_v34 = vpop.eup %9836  ;;  %v5643_v15 = vmul.f32 0.5, %v15351_v52  ;;  %v5646_v46 = vmul.f32 0.5, %v15363_v57 }
 0x88f   :  { %v6008_v23 = vmul.f32 0.7978846, %v5935_v11  ;;  %v5795_v53 = vmul.f32 %v5722_v27, %v15375_v30  ;;  %v5869_v24 = vmul.f32 %v5796_v20, %v15379_v5 }
 0x890   :  { %v6224_v14 = vmul.f32 %v6151_v50, %v5640_v9  ;;  %v5726_v9 = vmul.f32 0.044715, %v15391_v28 }
 0x891   :  { %9032 = vmatmul.mubr.f32.gmra.mrb[174].mxu0 %v6218_v38  ;;  %v5720_v38 = vmul.f32 0.044715, %v15367_v2  ;;  %9840 = vtanh.f32 %v6008_v23  ;;  %v5868_v63 = vmul.f32 %v5795_v53, %v15375_v30 }
 0x892   :  { %9034 = vmatprep.mubr.msk.f32.mxu0 %vm18355_vm11, %v18600_v39  ;;  %9842 = vtanh.f32 %v6009_v60 }
 0x893   :  { %v5793_v37 = vmul.f32 %v5720_v38, %v15367_v2  ;;  %9844 = vtanh.f32 %v6010_v48 }
 0x894   :  { %9846 = vtanh.f32 %v6011_v61 }
 0x895   :  { %9035 = vmatmul.mubr.f32.gmra.mrb[176].mxu0 %v6219_v59  ;;  %v6223_v59 = vmul.f32 %v6150_v62, %v5639_v41  ;;  %v5866_v13 = vmul.f32 %v5793_v37, %v15367_v2  ;;  %v9839_v33 = vpop.eup %9838  ;;  %v6013_v62 = vmul.f32 0.7978846, %v5940_v12  ;;  %v5941_v41 = vadd.f32 %v5868_v63, %v15375_v30 }
 0x896   :  { %9037 = vmatprep.mubr.msk.f32.mxu0 %vm18355_vm11, %v18600_v39  ;;  %v6153_v47 = vadd.f32 1.0, %v9839_v33  ;;  %v5727_v33 = vmul.f32 0.044715, %v15395_v3 }
 0x897   :  { %v5939_v7 = vadd.f32 %v5866_v13, %v15367_v2  ;;  %v6014_v50 = vmul.f32 0.7978846, %v5941_v41 }
 0x899   :  { %9038 = vmatmul.mubr.f32.gmra.mrb[178].mxu0 %v6220_v43  ;;  %v6152_v43 = vadd.f32 1.0, %v9837_v34  ;;  %v6012_v19 = vmul.f32 0.7978846, %v5939_v7  ;;  %v5942_v34 = vadd.f32 %v5869_v24, %v15379_v5 }
 0x89a   :  { %9040 = vmatprep.mubr.msk.f32.mxu0 %vm18355_vm11, %v18600_v39 }
 0x89b   :  { %v6225_v11 = vmul.f32 %v6152_v43, %v5641_v44  ;;  %v9841_v18 = vpop.eup %9840  ;;  %9848 = vtanh.f32 %v6012_v19  ;;  %v5799_v43 = vmul.f32 %v5726_v9, %v15391_v28  ;;  %v5647_v19 = vmul.f32 0.5, %v15367_v2 }
 0x89c   :  { %v6154_v55 = vadd.f32 1.0, %v9841_v18  ;;  %v9843_v38 = vpop.eup %9842  ;;  %9850 = vtanh.f32 %v6013_v62  ;;  %v5730_v2 = vmul.f32 0.044715, %v15407_v16 }
 0x89d   :  { %9041 = vmatmul.mubr.f32.gmra.mrb[180].mxu0 %v6221_v40  ;;  %v5642_v40 = vmul.f32 0.5, %v15347_v56  ;;  %v5797_v56 = vmul.f32 %v5724_v58, %v15383_v22  ;;  %v9845_v8 = vpop.eup %9844  ;;  %v6155_v37 = vadd.f32 1.0, %v9843_v38  ;;  %9852 = vtanh.f32 %v6014_v50 }
 0x89e   :  { %9043 = vmatprep.mubr.msk.f32.mxu0 %vm18355_vm11, %v18600_v39  ;;  %v6227_v60 = vmul.f32 %v6154_v55, %v5643_v15  ;;  %v9847_v48 = vpop.eup %9846  ;;  %v6156_v13 = vadd.f32 1.0, %v9845_v8  ;;  %v5872_v51 = vmul.f32 %v5799_v43, %v15391_v28 }
 0x89f   :  { %v6226_v23 = vmul.f32 %v6153_v47, %v5642_v40  ;;  %v5870_v52 = vmul.f32 %v5797_v56, %v15383_v22  ;;  %v6228_v21 = vmul.f32 %v6155_v37, %v5644_v49  ;;  %v6157_v61 = vadd.f32 1.0, %v9847_v48 }
 0x8a0   :  { %v6229_v44 = vmul.f32 %v6156_v13, %v5645_v6  ;;  %v5728_v47 = vmul.f32 0.044715, %v15399_v1  ;;  %v5945_v12 = vadd.f32 %v5872_v51, %v15391_v28  ;;  %v5648_v56 = vmul.f32 0.5, %v15371_v35 }
 0x8a1   :  { %9044 = vmatmul.mubr.f32.gmra.mrb[182].mxu0 %v6222_v32  ;;  %v5725_v32 = vmul.f32 0.044715, %v15387_v4  ;;  %v5943_v17 = vadd.f32 %v5870_v52, %v15383_v22  ;;  %v6230_v18 = vmul.f32 %v6157_v61, %v5646_v46  ;;  %v5649_v49 = vmul.f32 0.5, %v15375_v30 }
 0x8a2   :  { %9046 = vmatprep.mubr.msk.f32.mxu0 %vm18355_vm11, %v18600_v39  ;;  %v5801_v20 = vmul.f32 %v5728_v47, %v15399_v1  ;;  %v5803_v35 = vmul.f32 %v5730_v2, %v15407_v16  ;;  %v5731_v52 = vmul.f32 0.044715, %v15411_v10  ;;  %v5650_v13 = vmul.f32 0.5, %v15379_v5 }
 0x8a3   :  { %v6016_v45 = vmul.f32 0.7978846, %v5943_v17  ;;  %v5651_v61 = vmul.f32 0.5, %v15383_v22 }
 0x8a4   :  { %v5874_v41 = vmul.f32 %v5801_v20, %v15399_v1  ;;  %v5876_v30 = vmul.f32 %v5803_v35, %v15407_v16  ;;  %v5804_v6 = vmul.f32 %v5731_v52, %v15411_v10 }
 0x8a5   :  { %9047 = vmatmul.mubr.f32.gmra.mrb[184].mxu0 %v6223_v59  ;;  %v5798_v59 = vmul.f32 %v5725_v32, %v15387_v4  ;;  %v9849_v7 = vpop.eup %9848  ;;  %v6018_v32 = vmul.f32 0.7978846, %v5945_v12 }
 0x8a6   :  { %9049 = vmatprep.mubr.msk.f32.mxu0 %vm18355_vm11, %v18600_v39  ;;  %v6158_v40 = vadd.f32 1.0, %v9849_v7  ;;  %v9851_v58 = vpop.eup %9850  ;;  %v5947_v50 = vadd.f32 %v5874_v41, %v15399_v1  ;;  %v5949_v5 = vadd.f32 %v5876_v30, %v15407_v16  ;;  %v5877_v7 = vmul.f32 %v5804_v6, %v15411_v10 }
 0x8a7   :  { %v5871_v27 = vmul.f32 %v5798_v59, %v15387_v4  ;;  %v6159_v38 = vadd.f32 1.0, %v9851_v58  ;;  %v9853_v15 = vpop.eup %9852  ;;  %v5654_v41 = vmul.f32 0.5, %v15395_v3  ;;  %v5656_v6 = vmul.f32 0.5, %v15403_v31 }
 0x8a8   :  { %v6231_v55 = vmul.f32 %v6158_v40, %v5647_v19  ;;  %v6020_v17 = vmul.f32 0.7978846, %v5947_v50  ;;  %v6022_v22 = vmul.f32 0.7978846, %v5949_v5  ;;  %v5950_v40 = vadd.f32 %v5877_v7, %v15411_v10 }
 0x8a9   :  { %9050 = vmatmul.mubr.f32.gmra.mrb[186].mxu0 %v6224_v14  ;;  %v6015_v14 = vmul.f32 0.7978846, %v5942_v34  ;;  %v5944_v53 = vadd.f32 %v5871_v27, %v15387_v4  ;;  %v6232_v8 = vmul.f32 %v6159_v38, %v5648_v56  ;;  %v5735_v56 = vmul.f32 0.044715, %v15427_v0 }
 0x8aa   :  { %9052 = vmatprep.mubr.msk.f32.mxu0 %vm18355_vm11, %v18600_v39  ;;  %v5737_v50 = vmul.f32 0.044715, %v15435_v54  ;;  %v5657_v5 = vmul.f32 0.5, %v15407_v16 }
 0x8ab   :  { %9854 = vtanh.f32 %v6015_v14  ;;  %v6017_v57 = vmul.f32 0.7978846, %v5944_v53  ;;  %v5732_v14 = vmul.f32 0.044715, %v15415_v42  ;;  %v5733_v53 = vmul.f32 0.044715, %v15419_v29 }
 0x8ac   :  { %9856 = vtanh.f32 %v6016_v45 }
 0x8ad   :  { %9053 = vmatmul.mubr.f32.gmra.mrb[188].mxu0 %v6225_v11  ;;  %v5800_v11 = vmul.f32 %v5727_v33, %v15395_v3  ;;  %9858 = vtanh.f32 %v6017_v57  ;;  %v5805_v45 = vmul.f32 %v5732_v14, %v15415_v42  ;;  %v5806_v19 = vmul.f32 %v5733_v53, %v15419_v29  ;;  %v18601_v53 = vld [vmem:[#allocation51_spill] sm:$0xff] }
 0x8ae   :  { %9055 = vmatprep.mubr.msk.f32.mxu0 %vm18355_vm11, %v18600_v39  ;;  %9860 = vtanh.f32 %v6018_v32  ;;  %v5734_v57 = vmul.f32 0.044715, %v15423_v26 }
 0x8af   :  { %v5873_v63 = vmul.f32 %v5800_v11, %v15395_v3  ;;  %v5878_v58 = vmul.f32 %v5805_v45, %v15415_v42  ;;  %v5879_v38 = vmul.f32 %v5806_v19, %v15419_v29 }
 0x8b1   :  { %9056 = vmatmul.mubr.f32.gmra.mrb[190].mxu0 %v6226_v23  ;;  %v5729_v23 = vmul.f32 0.044715, %v15403_v31  ;;  %v5946_v62 = vadd.f32 %v5873_v63, %v15395_v3 }
 0x8b2   :  { %9058 = vmatprep.mubr.msk.f32.mxu0 %vm18355_vm11, %v18600_v39 }
 0x8b3   :  { %v5802_v24 = vmul.f32 %v5729_v23, %v15403_v31  ;;  %v6019_v59 = vmul.f32 0.7978846, %v5946_v62  ;;  %v5653_v23 = vmul.f32 0.5, %v15391_v28  ;;  %v5736_v28 = vmul.f32 0.044715, %v15431_v36 }
 0x8b5   :  { %9059 = vmatmul.mubr.f32.gmra.mrb[192].mxu0 %v6227_v60  ;;  %v6160_v60 = vadd.f32 1.0, %v9853_v15  ;;  %v9855_v37 = vpop.eup %9854  ;;  %v5875_v34 = vmul.f32 %v5802_v24, %v15403_v31  ;;  %9862 = vtanh.f32 %v6019_v59  ;;  %v5807_v15 = vmul.f32 %v5734_v57, %v15423_v26  ;;  %v18602_v57 = vld [vmem:[#allocation52_spill] sm:$0xff] }
 0x8b6   :  { %9061 = vmatprep.mubr.msk.f32.mxu0 %vm18355_vm11, %v18600_v39  ;;  %v9857_v9 = vpop.eup %9856  ;;  %9864 = vtanh.f32 %v6020_v17  ;;  %v5655_v59 = vmul.f32 0.5, %v15399_v1  ;;  %v5809_v3 = vmul.f32 %v5736_v28, %v15431_v36  ;;  %v5810_v17 = vmul.f32 %v5737_v50, %v15435_v54  ;;  %v18605_v50 = vld [vmem:[#allocation42_spill] sm:$0xff] }
 0x8b7   :  { %v6233_v48 = vmul.f32 %v6160_v60, %v5649_v49  ;;  %v5948_v27 = vadd.f32 %v5875_v34, %v15403_v31  ;;  %v9859_v43 = vpop.eup %9858  ;;  %v5880_v60 = vmul.f32 %v5807_v15, %v15423_v26  ;;  %v5660_v28 = vmul.f32 0.5, %v15419_v29 }
 0x8b8   :  { %v6163_v11 = vadd.f32 1.0, %v9859_v43  ;;  %v9861_v47 = vpop.eup %9860  ;;  %v5882_v1 = vmul.f32 %v5809_v3, %v15431_v36  ;;  %v5738_v43 = vmul.f32 0.044715, %v15439_v25  ;;  %v5883_v7 = vmul.f32 %v5810_v17, %v15435_v54 }
 0x8b9   :  { %9062 = vmatmul.mubr.f32.gmra.mrb[194].mxu0 %v6228_v21  ;;  %v6161_v21 = vadd.f32 1.0, %v9855_v37  ;;  %v6021_v46 = vmul.f32 0.7978846, %v5948_v27  ;;  %v6164_v63 = vadd.f32 1.0, %v9861_v47  ;;  %v5808_v37 = vmul.f32 %v5735_v56, %v15427_v0  ;;  %v18603_v56 = vld [vmem:[#allocation53_spill] sm:$0xff] }
 0x8ba   :  { %9064 = vmatprep.mubr.msk.f32.mxu0 %vm18355_vm11, %v18600_v39  ;;  %v5955_v31 = vadd.f32 %v5882_v1, %v15431_v36  ;;  %v5811_v45 = vmul.f32 %v5738_v43, %v15439_v25  ;;  %v5661_v3 = vmul.f32 0.5, %v15423_v26  ;;  %v5662_v1 = vmul.f32 0.5, %v15427_v0  ;;  %v18606_v43 = vld [vmem:[#allocation33_spill] sm:$0xff] }
 0x8bb   :  { %v6234_v33 = vmul.f32 %v6161_v21, %v5650_v13  ;;  %9866 = vtanh.f32 %v6021_v46  ;;  %v6237_v2 = vmul.f32 %v6164_v63, %v5653_v23 }
 0x8bc   :  { %9868 = vtanh.f32 %v6022_v22  ;;  %v5658_v22 = vmul.f32 0.5, %v15411_v10  ;;  %v6028_v16 = vmul.f32 0.7978846, %v5955_v31  ;;  %v5663_v31 = vmul.f32 0.5, %v15431_v36 }
 0x8bd   :  { %9065 = vmatmul.mubr.f32.gmra.mrb[196].mxu0 %v6229_v44  ;;  %v6162_v44 = vadd.f32 1.0, %v9857_v9  ;;  %v5953_v9 = vadd.f32 %v5880_v60, %v15423_v26 }
 0x8be   :  { %9067 = vmatprep.mubr.msk.f32.mxu0 %vm18355_vm11, %v18600_v39 }
 0x8bf   :  { %v6235_v51 = vmul.f32 %v6162_v44, %v5651_v61  ;;  %v9863_v20 = vpop.eup %9862  ;;  %v6026_v27 = vmul.f32 0.7978846, %v5953_v9 }
 0x8c0   :  { %v6165_v32 = vadd.f32 1.0, %v9863_v20  ;;  %v9865_v62 = vpop.eup %9864 }
 0x8c1   :  { %9068 = vmatmul.mubr.f32.gmra.mrb[198].mxu0 %v6230_v18  ;;  %v5652_v18 = vmul.f32 0.5, %v15387_v4  ;;  %v6023_v4 = vmul.f32 0.7978846, %v5950_v40  ;;  %v6166_v35 = vadd.f32 1.0, %v9865_v62  ;;  %v5956_v40 = vadd.f32 %v5883_v7, %v15435_v54 }
 0x8c2   :  { %9070 = vmatprep.mubr.msk.f32.mxu0 %vm18355_vm11, %v18600_v39  ;;  %v6238_v49 = vmul.f32 %v6165_v32, %v5654_v41 }
 0x8c3   :  { %v6236_v12 = vmul.f32 %v6163_v11, %v5652_v18  ;;  %9870 = vtanh.f32 %v6023_v4  ;;  %v6239_v13 = vmul.f32 %v6166_v35, %v5655_v59  ;;  %v5659_v4 = vmul.f32 0.5, %v15415_v42 }
 0x8c4   :  { %v6029_v10 = vmul.f32 0.7978846, %v5956_v40 }
 0x8c5   :  { %9071 = vmatmul.mubr.f32.gmra.mrb[200].mxu0 %v6231_v55  ;;  %v5951_v55 = vadd.f32 %v5878_v58, %v15415_v42  ;;  %v9867_v52 = vpop.eup %9866  ;;  %v5884_v58 = vmul.f32 %v5811_v45, %v15439_v25  ;;  %v18604_v42 = vld [vmem:[#allocation40_spill] sm:$0xff] }
 0x8c6   :  { %9073 = vmatprep.mubr.msk.f32.mxu0 %vm18355_vm11, %v18600_v39  ;;  %v9869_v21 = vpop.eup %9868  ;;  %v6167_v30 = vadd.f32 1.0, %v9867_v52 }
 0x8c7   :  { %v6024_v24 = vmul.f32 0.7978846, %v5951_v55  ;;  %v6168_v61 = vadd.f32 1.0, %v9869_v21  ;;  %v5957_v55 = vadd.f32 %v5884_v58, %v15439_v25 }
 0x8c8   :  { %v6240_v44 = vmul.f32 %v6167_v30, %v5656_v6 }
 0x8c9   :  { %9074 = vmatmul.mubr.f32.gmra.mrb[202].mxu0 %v6232_v8  ;;  %v5952_v8 = vadd.f32 %v5879_v38, %v15419_v29  ;;  %9872 = vtanh.f32 %v6024_v24  ;;  %v6241_v11 = vmul.f32 %v6168_v61, %v5657_v5  ;;  %v5742_v24 = vmul.f32 0.044715, %v18604_v42 }
 0x8ca   :  { %9076 = vmatprep.mubr.msk.f32.mxu0 %vm18355_vm11, %v18600_v39 }
 0x8cb   :  { %v6025_v34 = vmul.f32 0.7978846, %v5952_v8  ;;  %v6030_v8 = vmul.f32 0.7978846, %v5957_v55  ;;  %v5815_v29 = vmul.f32 %v5742_v24, %v18604_v42  ;;  %v18610_v24 = vld [vmem:[#allocation108_spill] sm:$0xff] }
 0x8cd   :  { %9077 = vmatmul.mubr.f32.gmra.mrb[204].mxu0 %v6233_v48  ;;  %v5881_v48 = vmul.f32 %v5808_v37, %v15427_v0  ;;  %9874 = vtanh.f32 %v6025_v34  ;;  %v5743_v34 = vmul.f32 0.044715, %v18605_v50  ;;  %v5888_v26 = vmul.f32 %v5815_v29, %v18604_v42  ;;  %v18611_v29 = vld [vmem:[#allocation109_spill] sm:$0xff] }
 0x8ce   :  { %9079 = vmatprep.mubr.msk.f32.mxu0 %vm18355_vm11, %v18600_v39  ;;  %9876 = vtanh.f32 %v6026_v27 }
 0x8cf   :  { %v5954_v14 = vadd.f32 %v5881_v48, %v15427_v0  ;;  %v5816_v17 = vmul.f32 %v5743_v34, %v18605_v50  ;;  %v5961_v0 = vadd.f32 %v5888_v26, %v18604_v42  ;;  %v5749_v34 = vmul.f32 0.044715, %v18611_v29  ;;  %v18612_v26 = vld [vmem:[#allocation54_spill] sm:$0xff] }
 0x8d1   :  { %9080 = vmatmul.mubr.f32.gmra.mrb[206].mxu0 %v6234_v33  ;;  %v9871_v33 = vpop.eup %9870  ;;  %v6027_v46 = vmul.f32 0.7978846, %v5954_v14  ;;  %v5889_v7 = vmul.f32 %v5816_v17, %v18605_v50  ;;  %v6034_v36 = vmul.f32 0.7978846, %v5961_v0  ;;  %v5750_v17 = vmul.f32 0.044715, %v18612_v26 }
 0x8d2   :  { %9082 = vmatprep.mubr.msk.f32.mxu0 %vm18355_vm11, %v18600_v39  ;;  %v6169_v47 = vadd.f32 1.0, %v9871_v33  ;;  %v5744_v33 = vmul.f32 0.044715, %v18606_v43  ;;  %v18613_v0 = vld [vmem:[#allocation55_spill] sm:$0xff] }
 0x8d3   :  { %v9873_v18 = vpop.eup %9872  ;;  %9878 = vtanh.f32 %v6027_v46  ;;  %v5962_v40 = vadd.f32 %v5889_v7, %v18605_v50  ;;  %v5751_v7 = vmul.f32 0.044715, %v18613_v0 }
 0x8d4   :  { %v6242_v63 = vmul.f32 %v6169_v47, %v5658_v22  ;;  %v6170_v20 = vadd.f32 1.0, %v9873_v18  ;;  %9880 = vtanh.f32 %v6028_v16  ;;  %v5817_v45 = vmul.f32 %v5744_v33, %v18606_v43 }
 0x8d5   :  { %9083 = vmatmul.mubr.f32.gmra.mrb[208].mxu0 %v6235_v51  ;;  %v5739_v51 = vmul.f32 0.044715, %v18601_v53  ;;  %9882 = vtanh.f32 %v6029_v10  ;;  %v5664_v16 = vmul.f32 0.5, %v15435_v54  ;;  %v5665_v10 = vmul.f32 0.5, %v15439_v25 }
 0x8d6   :  { %9085 = vmatprep.mubr.msk.f32.mxu0 %vm18355_vm11, %v18600_v39  ;;  %v6243_v32 = vmul.f32 %v6170_v20, %v5659_v4  ;;  %9884 = vtanh.f32 %v6030_v8  ;;  %v5890_v58 = vmul.f32 %v5817_v45, %v18606_v43  ;;  %v6035_v54 = vmul.f32 0.7978846, %v5962_v40 }
 0x8d7   :  { %v5812_v19 = vmul.f32 %v5739_v51, %v18601_v53  ;;  %v9875_v23 = vpop.eup %9874  ;;  %v18607_v51 = vld [vmem:[#allocation106_spill] sm:$0xff]  ;;  %v5748_v8 = vmul.f32 0.044715, %v18610_v24  ;;  %v5666_v25 = vmul.f32 0.5, %v18601_v53  ;;  %v5669_v45 = vmul.f32 0.5, %v18604_v42 }
 0x8d8   :  { %v6171_v62 = vadd.f32 1.0, %v9875_v23  ;;  %v9877_v41 = vpop.eup %9876  ;;  %v5963_v55 = vadd.f32 %v5890_v58, %v18606_v43  ;;  %v5824_v58 = vmul.f32 %v5751_v7, %v18613_v0 }
 0x8d9   :  { %9086 = vmatmul.mubr.f32.gmra.mrb[210].mxu0 %v6236_v12  ;;  %v5740_v12 = vmul.f32 0.044715, %v18602_v57  ;;  %v5885_v38 = vmul.f32 %v5812_v19, %v18601_v53  ;;  %v6172_v52 = vadd.f32 1.0, %v9877_v41 }
 0x8da   :  { %9088 = vmatprep.mubr.msk.f32.mxu0 %vm18355_vm11, %v18600_v39  ;;  %v6244_v35 = vmul.f32 %v6171_v62, %v5660_v28 }
 0x8db   :  { %v5813_v15 = vmul.f32 %v5740_v12, %v18602_v57  ;;  %v5958_v60 = vadd.f32 %v5885_v38, %v18601_v53  ;;  %v6245_v30 = vmul.f32 %v6172_v52, %v5661_v3  ;;  %v18608_v12 = vld [vmem:[#allocation107_spill] sm:$0xff]  ;;  %v5667_v53 = vmul.f32 0.5, %v18602_v57 }
 0x8dd   :  { %9089 = vmatmul.mubr.f32.gmra.mrb[212].mxu0 %v6237_v2  ;;  %v5741_v2 = vmul.f32 0.044715, %v18603_v56  ;;  %v5886_v37 = vmul.f32 %v5813_v15, %v18602_v57  ;;  %v9879_v59 = vpop.eup %9878  ;;  %v6031_v9 = vmul.f32 0.7978846, %v5958_v60  ;;  %v6036_v60 = vmul.f32 0.7978846, %v5963_v55 }
 0x8de   :  { %9091 = vmatprep.mubr.msk.f32.mxu0 %vm18355_vm11, %v18600_v39  ;;  %v6173_v6 = vadd.f32 1.0, %v9879_v59 }
 0x8df   :  { %v5959_v48 = vadd.f32 %v5886_v37, %v18602_v57  ;;  %9886 = vtanh.f32 %v6031_v9  ;;  %v5821_v9 = vmul.f32 %v5748_v8, %v18610_v24 }
 0x8e0   :  { %v6246_v61 = vmul.f32 %v6173_v6, %v5662_v1 }
 0x8e1   :  { %9092 = vmatmul.mubr.f32.gmra.mrb[214].mxu0 %v6238_v49  ;;  %v5814_v49 = vmul.f32 %v5741_v2, %v18603_v56  ;;  %v6032_v27 = vmul.f32 0.7978846, %v5959_v48  ;;  %v18609_v2 = vld [vmem:[#allocation35_spill] sm:$0xff]  ;;  %v5894_v57 = vmul.f32 %v5821_v9, %v18610_v24  ;;  %v18617_v9 = vld [vmem:[#allocation110_spill] sm:$0xff] }
 0x8e2   :  { %9094 = vmatprep.mubr.msk.f32.mxu0 %vm18355_vm11, %v18600_v39 }
 0x8e3   :  { %v5887_v21 = vmul.f32 %v5814_v49, %v18603_v56  ;;  %9888 = vtanh.f32 %v6032_v27  ;;  %v5822_v27 = vmul.f32 %v5749_v34, %v18611_v29 }
 0x8e5   :  { %9095 = vmatmul.mubr.f32.gmra.mrb[216].mxu0 %v6239_v13  ;;  %v9881_v13 = vpop.eup %9880  ;;  %v5960_v14 = vadd.f32 %v5887_v21, %v18603_v56 }
 0x8e6   :  { %9097 = vmatprep.mubr.msk.f32.mxu0 %vm18355_vm11, %v18600_v39  ;;  %v6174_v5 = vadd.f32 1.0, %v9881_v13 }
 0x8e7   :  { %v6033_v46 = vmul.f32 0.7978846, %v5960_v14  ;;  %v5668_v14 = vmul.f32 0.5, %v18603_v56  ;;  %v5895_v56 = vmul.f32 %v5822_v27, %v18611_v29  ;;  %v18618_v27 = vld [vmem:[#allocation111_spill] sm:$0xff] }
 0x8e8   :  { %v6247_v47 = vmul.f32 %v6174_v5, %v5663_v31 }
 0x8e9   :  { %9098 = vmatmul.mubr.f32.gmra.mrb[218].mxu0 %v6240_v44  ;;  %v9883_v44 = vpop.eup %9882  ;;  %9890 = vtanh.f32 %v6033_v46  ;;  %v5823_v46 = vmul.f32 %v5750_v17, %v18612_v26 }
 0x8ea   :  { %9100 = vmatprep.mubr.msk.f32.mxu0 %vm18355_vm11, %v18600_v39  ;;  %v6175_v18 = vadd.f32 1.0, %v9883_v44  ;;  %v9885_v22 = vpop.eup %9884  ;;  %9892 = vtanh.f32 %v6034_v36  ;;  %v18614_v36 = vld [vmem:[#allocation56_spill] sm:$0xff] }
 0x8eb   :  { %v6176_v23 = vadd.f32 1.0, %v9885_v22  ;;  %v9887_v4 = vpop.eup %9886  ;;  %9894 = vtanh.f32 %v6035_v54  ;;  %v5752_v40 = vmul.f32 0.044715, %v18614_v36  ;;  %v5896_v42 = vmul.f32 %v5823_v46, %v18612_v26  ;;  %v18615_v54 = vld [vmem:[#allocation57_spill] sm:$0xff] }
 0x8ec   :  { %v6248_v20 = vmul.f32 %v6175_v18, %v5664_v16  ;;  %v6177_v41 = vadd.f32 1.0, %v9887_v4  ;;  %9896 = vtanh.f32 %v6036_v60  ;;  %v5753_v55 = vmul.f32 0.044715, %v18615_v54 }
 0x8ed   :  { %9101 = vmatmul.mubr.f32.gmra.mrb[220].mxu0 %v6241_v11  ;;  %v5745_v11 = vmul.f32 0.044715, %v18607_v51  ;;  %v6249_v62 = vmul.f32 %v6176_v23, %v5665_v10  ;;  %v9889_v28 = vpop.eup %9888 }
 0x8ee   :  { %9103 = vmatprep.mubr.msk.f32.mxu0 %vm18355_vm11, %v18600_v39  ;;  %v6250_v52 = vmul.f32 %v6177_v41, %v5666_v25  ;;  %v6178_v59 = vadd.f32 1.0, %v9889_v28  ;;  %v18616_v25 = vld [vmem:[#allocation58_spill] sm:$0xff] }
 0x8ef   :  { %v5818_v19 = vmul.f32 %v5745_v11, %v18607_v51  ;;  %v5754_v60 = vmul.f32 0.044715, %v18616_v25 }
 0x8f0   :  { %v6251_v6 = vmul.f32 %v6178_v59, %v5667_v53  ;;  %v5755_v53 = vmul.f32 0.044715, %v18617_v9 }
 0x8f1   :  { %9104 = vmatmul.mubr.f32.gmra.mrb[222].mxu0 %v6242_v63  ;;  %v5746_v63 = vmul.f32 0.044715, %v18608_v12  ;;  %v5891_v38 = vmul.f32 %v5818_v19, %v18607_v51  ;;  %v5670_v19 = vmul.f32 0.5, %v18605_v50  ;;  %v5897_v50 = vmul.f32 %v5824_v58, %v18613_v0 }
 0x8f2   :  { %9106 = vmatprep.mubr.msk.f32.mxu0 %vm18355_vm11, %v18600_v39 }
 0x8f3   :  { %v5819_v15 = vmul.f32 %v5746_v63, %v18608_v12  ;;  %v5964_v37 = vadd.f32 %v5891_v38, %v18607_v51  ;;  %v9891_v3 = vpop.eup %9890  ;;  %v5825_v38 = vmul.f32 %v5752_v40, %v18614_v36 }
 0x8f4   :  { %v6179_v1 = vadd.f32 1.0, %v9891_v3 }
 0x8f5   :  { %9107 = vmatmul.mubr.f32.gmra.mrb[224].mxu0 %v6243_v32  ;;  %v5747_v32 = vmul.f32 0.044715, %v18609_v2  ;;  %v5892_v49 = vmul.f32 %v5819_v15, %v18608_v12  ;;  %v6037_v48 = vmul.f32 0.7978846, %v5964_v37  ;;  %v5671_v15 = vmul.f32 0.5, %v18606_v43 }
 0x8f6   :  { %9109 = vmatprep.mubr.msk.f32.mxu0 %vm18355_vm11, %v18600_v39  ;;  %v6252_v5 = vmul.f32 %v6179_v1, %v5668_v14  ;;  %v5826_v37 = vmul.f32 %v5753_v55, %v18615_v54  ;;  %v5898_v43 = vmul.f32 %v5825_v38, %v18614_v36  ;;  %v5756_v14 = vmul.f32 0.044715, %v18618_v27 }
 0x8f7   :  { %v5965_v21 = vadd.f32 %v5892_v49, %v18608_v12  ;;  %9898 = vtanh.f32 %v6037_v48  ;;  %v5672_v49 = vmul.f32 0.5, %v18607_v51  ;;  %v5827_v48 = vmul.f32 %v5754_v60, %v18616_v25  ;;  %v18621_v60 = vld [vmem:[#allocation113_spill] sm:$0xff] }
 0x8f8   :  { %v5899_v51 = vmul.f32 %v5826_v37, %v18615_v54  ;;  %v5676_v38 = vmul.f32 0.5, %v18611_v29  ;;  %v5759_v37 = vmul.f32 0.044715, %v18621_v60 }
 0x8f9   :  { %9110 = vmatmul.mubr.f32.gmra.mrb[226].mxu0 %v6244_v35  ;;  %v5820_v35 = vmul.f32 %v5747_v32, %v18609_v2  ;;  %v6038_v33 = vmul.f32 0.7978846, %v5965_v21  ;;  %v5673_v21 = vmul.f32 0.5, %v18608_v12  ;;  %v5900_v12 = vmul.f32 %v5827_v48, %v18616_v25 }
 0x8fa   :  { %9112 = vmatprep.mubr.msk.f32.mxu0 %vm18355_vm11, %v18600_v39 }
 0x8fb   :  { %v5893_v13 = vmul.f32 %v5820_v35, %v18609_v2  ;;  %9900 = vtanh.f32 %v6038_v33  ;;  %v5674_v33 = vmul.f32 0.5, %v18609_v2 }
 0x8fd   :  { %9113 = vmatmul.mubr.f32.gmra.mrb[228].mxu0 %v6245_v30  ;;  %v9893_v30 = vpop.eup %9892  ;;  %v5966_v44 = vadd.f32 %v5893_v13, %v18609_v2  ;;  %v5675_v2 = vmul.f32 0.5, %v18610_v24 }
 0x8fe   :  { %9115 = vmatprep.mubr.msk.f32.mxu0 %vm18355_vm11, %v18600_v39  ;;  %v6180_v31 = vadd.f32 1.0, %v9893_v30  ;;  %v5971_v30 = vadd.f32 %v5898_v43, %v18614_v36 }
 0x8ff   :  { %v6039_v11 = vmul.f32 0.7978846, %v5966_v44 }
 0x900   :  { %v6253_v18 = vmul.f32 %v6180_v31, %v5669_v45 }
 0x901   :  { %9116 = vmatmul.mubr.f32.gmra.mrb[230].mxu0 %v6246_v61  ;;  %v9895_v61 = vpop.eup %9894  ;;  %9902 = vtanh.f32 %v6039_v11 }
 0x902   :  { %9118 = vmatprep.mubr.msk.f32.mxu0 %vm18355_vm11, %v18600_v39  ;;  %v6181_v22 = vadd.f32 1.0, %v9895_v61  ;;  %v9897_v16 = vpop.eup %9896  ;;  %v6044_v61 = vmul.f32 0.7978846, %v5971_v30  ;;  %v18622_v30 = vld [vmem:[#allocation114_spill] sm:$0xff] }
 0x903   :  { %v6182_v4 = vadd.f32 1.0, %v9897_v16  ;;  %v9899_v10 = vpop.eup %9898  ;;  %v5973_v16 = vadd.f32 %v5900_v12, %v18616_v25 }
 0x904   :  { %v6254_v23 = vmul.f32 %v6181_v22, %v5670_v19  ;;  %v6183_v28 = vadd.f32 1.0, %v9899_v10 }
 0x905   :  { %9119 = vmatmul.mubr.f32.gmra.mrb[232].mxu0 %v6247_v47  ;;  %v5967_v47 = vadd.f32 %v5894_v57, %v18610_v24  ;;  %v6255_v41 = vmul.f32 %v6182_v4, %v5671_v15  ;;  %v9901_v8 = vpop.eup %9900  ;;  %v5828_v57 = vmul.f32 %v5755_v53, %v18617_v9 }
 0x906   :  { %9121 = vmatprep.mubr.msk.f32.mxu0 %vm18355_vm11, %v18600_v39  ;;  %v6256_v59 = vmul.f32 %v6183_v28, %v5672_v49  ;;  %v6184_v3 = vadd.f32 1.0, %v9901_v8 }
 0x907   :  { %v6040_v63 = vmul.f32 0.7978846, %v5967_v47  ;;  %v5829_v47 = vmul.f32 %v5756_v14, %v18618_v27 }
 0x909   :  { %9122 = vmatmul.mubr.f32.gmra.mrb[234].mxu0 %v6248_v20  ;;  %v5968_v20 = vadd.f32 %v5895_v56, %v18611_v29  ;;  %9904 = vtanh.f32 %v6040_v63  ;;  %v18619_v56 = vld [vmem:[#allocation59_spill] sm:$0xff]  ;;  %v5902_v15 = vmul.f32 %v5829_v47, %v18618_v27 }
 0x90a   :  { %9124 = vmatprep.mubr.msk.f32.mxu0 %vm18355_vm11, %v18600_v39  ;;  %v5757_v11 = vmul.f32 0.044715, %v18619_v56 }
 0x90b   :  { %v6041_v32 = vmul.f32 0.7978846, %v5968_v20  ;;  %v9903_v34 = vpop.eup %9902  ;;  %v5975_v53 = vadd.f32 %v5902_v15, %v18618_v27 }
 0x90c   :  { %v6185_v1 = vadd.f32 1.0, %v9903_v34  ;;  %v5830_v20 = vmul.f32 %v5757_v11, %v18619_v56  ;;  %v18623_v11 = vld [vmem:[#allocation115_spill] sm:$0xff] }
 0x90d   :  { %9125 = vmatmul.mubr.f32.gmra.mrb[236].mxu0 %v6249_v62  ;;  %v5969_v62 = vadd.f32 %v5896_v42, %v18612_v26  ;;  %9906 = vtanh.f32 %v6041_v32  ;;  %v18620_v42 = vld [vmem:[#allocation112_spill] sm:$0xff]  ;;  %v5761_v47 = vmul.f32 0.044715, %v18623_v11 }
 0x90e   :  { %9127 = vmatprep.mubr.msk.f32.mxu0 %vm18355_vm11, %v18600_v39  ;;  %v6258_v7 = vmul.f32 %v6185_v1, %v5674_v33  ;;  %v5758_v63 = vmul.f32 0.044715, %v18620_v42  ;;  %v5678_v33 = vmul.f32 0.5, %v18613_v0 }
 0x90f   :  { %v6042_v35 = vmul.f32 0.7978846, %v5969_v62 }
 0x910   :  { %v5831_v43 = vmul.f32 %v5758_v63, %v18620_v42 }
 0x911   :  { %9128 = vmatmul.mubr.f32.gmra.mrb[238].mxu0 %v6250_v52  ;;  %v5970_v52 = vadd.f32 %v5897_v50, %v18613_v0  ;;  %9908 = vtanh.f32 %v6042_v35  ;;  %v6046_v50 = vmul.f32 0.7978846, %v5973_v16 }
 0x912   :  { %9130 = vmatprep.mubr.msk.f32.mxu0 %vm18355_vm11, %v18600_v39  ;;  %v5904_v12 = vmul.f32 %v5831_v43, %v18620_v42 }
 0x913   :  { %v6043_v13 = vmul.f32 0.7978846, %v5970_v52  ;;  %v9905_v17 = vpop.eup %9904 }
 0x914   :  { %v6186_v46 = vadd.f32 1.0, %v9905_v17  ;;  %v5832_v17 = vmul.f32 %v5759_v37, %v18621_v60  ;;  %v5977_v63 = vadd.f32 %v5904_v12, %v18620_v42  ;;  %v18626_v12 = vld [vmem:[#allocation62_spill] sm:$0xff] }
 0x915   :  { %9131 = vmatmul.mubr.f32.gmra.mrb[240].mxu0 %v6251_v6  ;;  %v6257_v6 = vmul.f32 %v6184_v3, %v5673_v21  ;;  %9910 = vtanh.f32 %v6043_v13  ;;  %v5903_v3 = vmul.f32 %v5830_v20, %v18619_v56 }
 0x916   :  { %9133 = vmatprep.mubr.msk.f32.mxu0 %vm18355_vm11, %v18600_v39  ;;  %9912 = vtanh.f32 %v6044_v61  ;;  %v6259_v40 = vmul.f32 %v6186_v46, %v5675_v2  ;;  %v6048_v61 = vmul.f32 0.7978846, %v5975_v53 }
 0x917   :  { %v9907_v45 = vpop.eup %9906 }
 0x918   :  { %v6187_v58 = vadd.f32 1.0, %v9907_v45 }
 0x919   :  { %9134 = vmatmul.mubr.f32.gmra.mrb[242].mxu0 %v6252_v5  ;;  %v5972_v5 = vadd.f32 %v5899_v51, %v18615_v54 }
 0x91a   :  { %9136 = vmatprep.mubr.msk.f32.mxu0 %vm18355_vm11, %v18600_v39 }
 0x91b   :  { %v6045_v22 = vmul.f32 0.7978846, %v5972_v5  ;;  %v9909_v19 = vpop.eup %9908  ;;  %v5976_v5 = vadd.f32 %v5903_v3, %v18619_v56 }
 0x91c   :  { %v6188_v28 = vadd.f32 1.0, %v9909_v19 }
 0x91d   :  { %9137 = vmatmul.mubr.f32.gmra.mrb[244].mxu0 %v6253_v18  ;;  %v5901_v18 = vmul.f32 %v5828_v57, %v18617_v9  ;;  %9914 = vtanh.f32 %v6045_v22  ;;  %v6049_v19 = vmul.f32 0.7978846, %v5976_v5 }
 0x91e   :  { %9139 = vmatprep.mubr.msk.f32.mxu0 %vm18355_vm11, %v18600_v39  ;;  %9916 = vtanh.f32 %v6046_v50  ;;  %v5834_v50 = vmul.f32 %v5761_v47, %v18623_v11 }
 0x91f   :  { %v5974_v32 = vadd.f32 %v5901_v18, %v18617_v9  ;;  %v9911_v8 = vpop.eup %9910 }
 0x920   :  { %v6189_v51 = vadd.f32 1.0, %v9911_v8  ;;  %v9913_v13 = vpop.eup %9912  ;;  %v6050_v8 = vmul.f32 0.7978846, %v5977_v63 }
 0x921   :  { %9140 = vmatmul.mubr.f32.gmra.mrb[246].mxu0 %v6254_v23  ;;  %v6047_v34 = vmul.f32 0.7978846, %v5974_v32  ;;  %v6190_v46 = vadd.f32 1.0, %v9913_v13  ;;  %v5907_v13 = vmul.f32 %v5834_v50, %v18623_v11 }
 0x922   :  { %9142 = vmatprep.mubr.msk.f32.mxu0 %vm18355_vm11, %v18600_v39 }
 0x923   :  { %9918 = vtanh.f32 %v6047_v34 }
 0x924   :  { %9920 = vtanh.f32 %v6048_v61  ;;  %v5764_v61 = vmul.f32 0.044715, %v18626_v12 }
 0x925   :  { %9143 = vmatmul.mubr.f32.gmra.mrb[248].mxu0 %v6255_v41  ;;  %v6260_v41 = vmul.f32 %v6187_v58, %v5676_v38  ;;  %v5905_v58 = vmul.f32 %v5832_v17, %v18621_v60  ;;  %9922 = vtanh.f32 %v6049_v19  ;;  %v18627_v19 = vld [vmem:[#allocation63_spill] sm:$0xff] }
 0x926   :  { %9145 = vmatprep.mubr.msk.f32.mxu0 %vm18355_vm11, %v18600_v39  ;;  %9924 = vtanh.f32 %v6050_v8  ;;  %v5765_v63 = vmul.f32 0.044715, %v18627_v19 }
 0x927   :  { %v9915_v45 = vpop.eup %9914  ;;  %v5978_v37 = vadd.f32 %v5905_v58, %v18621_v60 }
 0x929   :  { %9146 = vmatmul.mubr.f32.gmra.mrb[250].mxu0 %v6256_v59  ;;  %v5677_v59 = vmul.f32 0.5, %v18612_v26 }
 0x92a   :  { %9148 = vmatprep.mubr.msk.f32.mxu0 %vm18355_vm11, %v18600_v39 }
 0x92b   :  { %v6261_v21 = vmul.f32 %v6188_v28, %v5677_v59  ;;  %v18625_v59 = vld [vmem:[#allocation61_spill] sm:$0xff] }
 0x92c   :  { %v5763_v3 = vmul.f32 0.044715, %v18625_v59 }
 0x92d   :  { %9149 = vmatmul.mubr.f32.gmra.mrb[252].mxu0 %v6257_v6  ;;  %v5760_v6 = vmul.f32 0.044715, %v18622_v30 }
 0x92e   :  { %9151 = vmatprep.mubr.msk.f32.mxu0 %vm18355_vm11, %v18600_v39 }
 0x92f   :  { %v5833_v18 = vmul.f32 %v5760_v6, %v18622_v30  ;;  %v6051_v6 = vmul.f32 0.7978846, %v5978_v37  ;;  %v18628_v37 = vld [vmem:[#allocation38_spill] sm:$0xff] }
 0x930   :  { %v15952_v44 = vpop.f32.mrb[148].mxu0 }
 0x931   :  { %v8994_v31 = vpop.f32.mrb[149].mxu0  ;;  %9152 = vmatmul.mubr.f32.gmra.mrb[254].mxu0 %v6258_v7  ;;  %v6804_v24 = vmul.f32 %v15952_v44, %v15952_v44  ;;  %v6262_v7 = vmul.f32 %v6189_v51, %v5678_v33  ;;  %v5906_v28 = vmul.f32 %v5833_v18, %v18622_v30  ;;  %v5681_v51 = vmul.f32 0.5, %v18616_v25 }
 0x932   :  { %9154 = vmatprep.mubr.msk.f32.mxu0 %vm18355_vm11, %v18600_v39  ;;  %9926 = vtanh.f32 %v6051_v6 }
 0x933   :  { %v5979_v17 = vadd.f32 %v5906_v28, %v18622_v30 }
 0x934   :  { %v15966_v23 = vpop.f32.mrb[150].mxu0 }
 0x935   :  { %v6724_v4 = vadd.f32 %v15966_v23, %v15952_v44  ;;  %v6805_v10 = vmul.f32 %v15966_v23, %v15966_v23  ;;  %v8997_v55 = vpop.f32.mrb[151].mxu0  ;;  %9155 = vmatmul.mubr.f32.gmra.mrb[0].mxu0 %v6259_v40  ;;  %v5679_v40 = vmul.f32 0.5, %v18614_v36  ;;  %v6052_v18 = vmul.f32 0.7978846, %v5979_v17 }
 0x936   :  { %9157 = vmatprep.mubr.msk.f32.mxu0 %vm18355_vm11, %v18600_v39  ;;  %v18624_v55 = vld [vmem:[#allocation60_spill] sm:$0xff] }
 0x937   :  { %v6877_v62 = vadd.f32 %v6805_v10, %v6804_v24  ;;  %v6263_v24 = vmul.f32 %v6190_v46, %v5679_v40  ;;  %v9917_v10 = vpop.eup %9916  ;;  %v5762_v38 = vmul.f32 0.044715, %v18624_v55  ;;  %9928 = vtanh.f32 %v6052_v18 }
 0x938   :  { %v15980_v49 = vpop.f32.mrb[152].mxu0 }
 0x939   :  { %v6725_v29 = vadd.f32 %v6724_v4, %v15980_v49  ;;  %v6806_v35 = vmul.f32 %v15980_v49, %v15980_v49  ;;  %v9000_v52 = vpop.f32.mrb[153].mxu0  ;;  %9158 = vmatmul.mubr.f32.gmra.mrb[2].mxu0 %v6260_v41  ;;  %v6191_v4 = vadd.f32 1.0, %v9915_v45  ;;  %v5680_v41 = vmul.f32 0.5, %v18615_v54 }
 0x93a   :  { %9160 = vmatprep.mubr.msk.f32.mxu0 %vm18355_vm11, %v18600_v39  ;;  %v9919_v52 = vpop.eup %9918  ;;  %v5835_v53 = vmul.f32 %v5762_v38, %v18624_v55  ;;  %v5682_v45 = vmul.f32 0.5, %v18617_v9  ;;  %v5683_v38 = vmul.f32 0.5, %v18618_v27 }
 0x93b   :  { %v6878_v48 = vadd.f32 %v6877_v62, %v6806_v35  ;;  %v6192_v35 = vadd.f32 1.0, %v9917_v10  ;;  %v9921_v33 = vpop.eup %9920 }
 0x93c   :  { %v15992_v1 = vpop.f32.mrb[154].mxu0  ;;  %v5908_v47 = vmul.f32 %v5835_v53, %v18624_v55  ;;  %v6194_v40 = vadd.f32 1.0, %v9921_v33  ;;  %v9923_v58 = vpop.eup %9922  ;;  %v5684_v53 = vmul.f32 0.5, %v18619_v56 }
 0x93d   :  { %v6726_v26 = vadd.f32 %v6725_v29, %v15992_v1  ;;  %v6807_v14 = vmul.f32 %v15992_v1, %v15992_v1  ;;  %v9003_v57 = vpop.f32.mrb[155].mxu0  ;;  %9161 = vmatmul.mubr.f32.gmra.mrb[4].mxu0 %v6261_v21  ;;  %v6264_v29 = vmul.f32 %v6191_v4, %v5680_v41  ;;  %v6195_v28 = vadd.f32 1.0, %v9923_v58  ;;  %v9925_v8 = vpop.eup %9924 }
 0x93e   :  { %9163 = vmatprep.mubr.msk.f32.mxu0 %vm18355_vm11, %v18600_v39  ;;  %v6193_v57 = vadd.f32 1.0, %v9919_v52  ;;  %v6267_v41 = vmul.f32 %v6194_v40, %v5683_v38  ;;  %v6196_v6 = vadd.f32 1.0, %v9925_v8  ;;  %v9927_v17 = vpop.eup %9926  ;;  %v5686_v40 = vmul.f32 0.5, %v18621_v60 }
 0x93f   :  { %v6879_v31 = vadd.f32 %v6878_v48, %v6807_v14  ;;  %v6265_v14 = vmul.f32 %v6192_v35, %v5681_v51  ;;  %v5838_v35 = vmul.f32 %v5765_v63, %v18627_v19 }
 0x940   :  { %v16004_v2 = vpop.f32.mrb[156].mxu0 }
 0x941   :  { %v6727_v0 = vadd.f32 %v6726_v26, %v16004_v2  ;;  %v6808_v22 = vmul.f32 %v16004_v2, %v16004_v2  ;;  %v9006_v16 = vpop.f32.mrb[157].mxu0  ;;  %9164 = vmatmul.mubr.f32.gmra.mrb[6].mxu0 %v6262_v7  ;;  %v9929_v18 = vpop.eup %9928 }
 0x942   :  { %9166 = vmatprep.mubr.msk.f32.mxu0 %vm18355_vm11, %v18600_v39  ;;  %v6266_v16 = vmul.f32 %v6193_v57, %v5682_v45 }
 0x943   :  { %v6880_v20 = vadd.f32 %v6879_v31, %v6808_v22  ;;  %v5836_v31 = vmul.f32 %v5763_v3, %v18625_v59 }
 0x944   :  { %v16016_v15 = vpop.f32.mrb[158].mxu0 }
 0x945   :  { %v6728_v36 = vadd.f32 %v6727_v0, %v16016_v15  ;;  %v6809_v32 = vmul.f32 %v16016_v15, %v16016_v15  ;;  %v9009_v62 = vpop.f32.mrb[159].mxu0  ;;  %9167 = vmatmul.mubr.f32.gmra.mrb[8].mxu0 %v6263_v24  ;;  %v5980_v0 = vadd.f32 %v5907_v13, %v18623_v11  ;;  %v5837_v24 = vmul.f32 %v5764_v61, %v18626_v12 }
 0x946   :  { %9169 = vmatprep.mubr.msk.f32.mxu0 %vm18355_vm11, %v18600_v39  ;;  %v5909_v50 = vmul.f32 %v5836_v31, %v18625_v59  ;;  %v6268_v13 = vmul.f32 %v6195_v28, %v5684_v53  ;;  %v5685_v61 = vmul.f32 0.5, %v18620_v42  ;;  %v5911_v31 = vmul.f32 %v5838_v35, %v18627_v19 }
 0x947   :  { %v6881_v43 = vadd.f32 %v6880_v20, %v6809_v32  ;;  %v5981_v32 = vadd.f32 %v5908_v47, %v18624_v55  ;;  %v6197_v47 = vadd.f32 1.0, %v9927_v17 }
 0x948   :  { %v16028_v34 = vpop.f32.mrb[160].mxu0  ;;  %v6269_v45 = vmul.f32 %v6196_v6, %v5685_v61 }
 0x949   :  { %v6729_v54 = vadd.f32 %v6728_v36, %v16028_v34  ;;  %v6810_v48 = vmul.f32 %v16028_v34, %v16028_v34  ;;  %v9012_v21 = vpop.f32.mrb[161].mxu0  ;;  %9170 = vmatmul.mubr.f32.gmra.mrb[10].mxu0 %v6264_v29  ;;  %v6053_v36 = vmul.f32 0.7978846, %v5980_v0 }
 0x94a   :  { %9172 = vmatprep.mubr.msk.f32.mxu0 %vm18355_vm11, %v18600_v39  ;;  %v5982_v21 = vadd.f32 %v5909_v50, %v18625_v59 }
 0x94b   :  { %v6882_v26 = vadd.f32 %v6881_v43, %v6810_v48  ;;  %v5766_v43 = vmul.f32 0.044715, %v18628_v37  ;;  %9930 = vtanh.f32 %v6053_v36  ;;  %v6054_v48 = vmul.f32 0.7978846, %v5981_v32 }
 0x94c   :  { %v16040_v5 = vpop.f32.mrb[162].mxu0 }
 0x94d   :  { %v6730_v25 = vadd.f32 %v6729_v54, %v16040_v5  ;;  %v6811_v7 = vmul.f32 %v16040_v5, %v16040_v5  ;;  %v9015_v46 = vpop.f32.mrb[163].mxu0  ;;  %9173 = vmatmul.mubr.f32.gmra.mrb[12].mxu0 %v6265_v14  ;;  %v5910_v54 = vmul.f32 %v5837_v24, %v18626_v12  ;;  %v5839_v14 = vmul.f32 %v5766_v43, %v18628_v37 }
 0x94e   :  { %9175 = vmatprep.mubr.msk.f32.mxu0 %vm18355_vm11, %v18600_v39  ;;  %9932 = vtanh.f32 %v6054_v48  ;;  %v5984_v24 = vadd.f32 %v5911_v31, %v18627_v19 }
 0x94f   :  { %v6883_v22 = vadd.f32 %v6882_v26, %v6811_v7  ;;  %v5983_v7 = vadd.f32 %v5910_v54, %v18626_v12  ;;  %v5912_v58 = vmul.f32 %v5839_v14, %v18628_v37 }
 0x950   :  { %v16052_v20 = vpop.f32.mrb[164].mxu0 }
 0x951   :  { %v6731_v9 = vadd.f32 %v6730_v25, %v16052_v20  ;;  %v6812_v4 = vmul.f32 %v16052_v20, %v16052_v20  ;;  %v9018_v10 = vpop.f32.mrb[165].mxu0  ;;  %9176 = vmatmul.mubr.f32.gmra.mrb[14].mxu0 %v6266_v16  ;;  %v6055_v25 = vmul.f32 0.7978846, %v5982_v21  ;;  %v6056_v63 = vmul.f32 0.7978846, %v5983_v7 }
 0x952   :  { %9178 = vmatprep.mubr.msk.f32.mxu0 %vm18355_vm11, %v18600_v39  ;;  %v6198_v10 = vadd.f32 1.0, %v9929_v18  ;;  %v5985_v28 = vadd.f32 %v5912_v58, %v18628_v37  ;;  %v5690_v18 = vmul.f32 0.5, %v18625_v59 }
 0x953   :  { %v6884_v62 = vadd.f32 %v6883_v22, %v6812_v4  ;;  %9934 = vtanh.f32 %v6055_v25  ;;  %v6270_v4 = vmul.f32 %v6197_v47, %v5686_v40 }
 0x954   :  { %v16064_v29 = vpop.f32.mrb[166].mxu0  ;;  %9936 = vtanh.f32 %v6056_v63  ;;  %v6058_v48 = vmul.f32 0.7978846, %v5985_v28 }
 0x955   :  { %v6732_v27 = vadd.f32 %v6731_v9, %v16064_v29  ;;  %v6813_v52 = vmul.f32 %v16064_v29, %v16064_v29  ;;  %v9021_v3 = vpop.f32.mrb[167].mxu0  ;;  %9179 = vmatmul.mubr.f32.gmra.mrb[16].mxu0 %v6267_v41  ;;  %v9931_v38 = vpop.eup %9930  ;;  %v6057_v41 = vmul.f32 0.7978846, %v5984_v24 }
 0x956   :  { %9181 = vmatprep.mubr.msk.f32.mxu0 %vm18355_vm11, %v18600_v39  ;;  %v6199_v35 = vadd.f32 1.0, %v9931_v38 }
 0x957   :  { %v6885_v51 = vadd.f32 %v6884_v62, %v6813_v52  ;;  %v5687_v62 = vmul.f32 0.5, %v18622_v30  ;;  %v5688_v30 = vmul.f32 0.5, %v18623_v11  ;;  %9938 = vtanh.f32 %v6057_v41 }
 0x958   :  { %v16075_v26 = vpop.f32.mrb[168].mxu0  ;;  %v5689_v11 = vmul.f32 0.5, %v18624_v55  ;;  %9940 = vtanh.f32 %v6058_v48  ;;  %v5692_v41 = vmul.f32 0.5, %v18627_v19 }
 0x959   :  { %v6733_v57 = vadd.f32 %v6732_v27, %v16075_v26  ;;  %v6814_v56 = vmul.f32 %v16075_v26, %v16075_v26  ;;  %v9024_v33 = vpop.f32.mrb[169].mxu0  ;;  %9182 = vmatmul.mubr.f32.gmra.mrb[18].mxu0 %v6268_v13  ;;  %v6271_v43 = vmul.f32 %v6198_v10, %v5687_v62  ;;  %v9933_v27 = vpop.eup %9932 }
 0x95a   :  { %9184 = vmatprep.mubr.msk.f32.mxu0 %vm18355_vm11, %v18600_v39  ;;  %v6200_v13 = vadd.f32 1.0, %v9933_v27 }
 0x95b   :  { %v6886_v46 = vadd.f32 %v6885_v51, %v6814_v56  ;;  %v6272_v51 = vmul.f32 %v6199_v35, %v5688_v30 }
 0x95c   :  { %v16086_v0 = vpop.f32.mrb[170].mxu0  ;;  %v6273_v61 = vmul.f32 %v6200_v13, %v5689_v11 }
 0x95d   :  { %v6734_v22 = vadd.f32 %v6733_v57, %v16086_v0  ;;  %v6815_v42 = vmul.f32 %v16086_v0, %v16086_v0  ;;  %v9027_v16 = vpop.f32.mrb[171].mxu0  ;;  %9185 = vmatmul.mubr.f32.gmra.mrb[20].mxu0 %v6269_v45  ;;  %v9935_v6 = vpop.eup %9934 }
 0x95e   :  { %9187 = vmatprep.mubr.msk.f32.mxu0 %vm18355_vm11, %v18600_v39  ;;  %v6201_v31 = vadd.f32 1.0, %v9935_v6  ;;  %v9937_v25 = vpop.eup %9936 }
 0x95f   :  { %v6887_v9 = vadd.f32 %v6886_v46, %v6815_v42  ;;  %v6202_v42 = vadd.f32 1.0, %v9937_v25 }
 0x960   :  { %v16096_v50 = vpop.f32.mrb[172].mxu0 }
 0x961   :  { %v6735_v36 = vadd.f32 %v6734_v22, %v16096_v50  ;;  %v6816_v60 = vmul.f32 %v16096_v50, %v16096_v50  ;;  %v9030_v32 = vpop.f32.mrb[173].mxu0  ;;  %9188 = vmatmul.mubr.f32.gmra.mrb[22].mxu0 %v6270_v4  ;;  %v6274_v22 = vmul.f32 %v6201_v31, %v5690_v18  ;;  %v9939_v16 = vpop.eup %9938 }
 0x962   :  { %9190 = vmatprep.mubr.msk.f32.mxu0 %vm18355_vm11, %v18600_v39  ;;  %v6203_v10 = vadd.f32 1.0, %v9939_v16  ;;  %v9941_v38 = vpop.eup %9940 }
 0x963   :  { %v6888_v8 = vadd.f32 %v6887_v9, %v6816_v60  ;;  %v5691_v9 = vmul.f32 0.5, %v18626_v12 }
 0x964   :  { %v16105_v52 = vpop.f32.mrb[174].mxu0  ;;  %v6276_v28 = vmul.f32 %v6203_v10, %v5692_v41 }
 0x965   :  { %v6736_v3 = vadd.f32 %v6735_v36, %v16105_v52  ;;  %v6817_v53 = vmul.f32 %v16105_v52, %v16105_v52  ;;  %v9033_v54 = vpop.f32.mrb[175].mxu0  ;;  %9191 = vmatmul.mubr.f32.gmra.mrb[24].mxu0 %v6271_v43  ;;  %v6275_v4 = vmul.f32 %v6202_v42, %v5691_v9 }
 0x966   :  { %9193 = vmatprep.mubr.msk.f32.mxu0 %vm18355_vm11, %v18600_v39 }
 0x967   :  { %v6889_v21 = vadd.f32 %v6888_v8, %v6817_v53  ;;  %v6204_v8 = vadd.f32 1.0, %v9941_v38  ;;  %v5693_v53 = vmul.f32 0.5, %v18628_v37 }
 0x968   :  { %v16113_v17 = vpop.f32.mrb[176].mxu0 }
 0x969   :  { %v6737_v14 = vadd.f32 %v6736_v3, %v16113_v17  ;;  %v6818_v57 = vmul.f32 %v16113_v17, %v16113_v17  ;;  %v9036_v56 = vpop.f32.mrb[177].mxu0  ;;  %9194 = vmatmul.mubr.f32.gmra.mrb[26].mxu0 %v6272_v51  ;;  %v6277_v54 = vmul.f32 %v6204_v8, %v5693_v53 }
 0x96a   :  { %9196 = vmatprep.mubr.msk.f32.mxu0 %vm18355_vm11, %v18600_v39 }
 0x96b   :  { %v6890_v33 = vadd.f32 %v6889_v21, %v6818_v57 }
 0x96c   :  { %v16121_v7 = vpop.f32.mrb[178].mxu0 }
 0x96d   :  { %v6738_v46 = vadd.f32 %v6737_v14, %v16121_v7  ;;  %v6819_v45 = vmul.f32 %v16121_v7, %v16121_v7  ;;  %v9039_v47 = vpop.f32.mrb[179].mxu0  ;;  %9197 = vmatmul.mubr.f32.gmra.mrb[28].mxu0 %v6273_v61 }
 0x96e   :  { %9199 = vmatprep.mubr.msk.f32.mxu0 %vm18355_vm11, %v18600_v39 }
 0x96f   :  { %v6891_v55 = vadd.f32 %v6890_v33, %v6819_v45 }
 0x970   :  { %v16129_v40 = vpop.f32.mrb[180].mxu0 }
 0x971   :  { %v6739_v58 = vadd.f32 %v6738_v46, %v16129_v40  ;;  %v6820_v63 = vmul.f32 %v16129_v40, %v16129_v40  ;;  %v9042_v24 = vpop.f32.mrb[181].mxu0  ;;  %9200 = vmatmul.mubr.f32.gmra.mrb[30].mxu0 %v6274_v22 }
 0x972   :  { %9202 = vmatprep.mubr.msk.f32.mxu0 %vm18355_vm11, %v18600_v39 }
 0x973   :  { %v6892_v59 = vadd.f32 %v6891_v55, %v6820_v63 }
 0x974   :  { %v16137_v36 = vpop.f32.mrb[182].mxu0 }
 0x975   :  { %v6740_v60 = vadd.f32 %v6739_v58, %v16137_v36  ;;  %v6821_v32 = vmul.f32 %v16137_v36, %v16137_v36  ;;  %v9045_v62 = vpop.f32.mrb[183].mxu0  ;;  %9203 = vmatmul.mubr.f32.gmra.mrb[32].mxu0 %v6275_v4 }
 0x976   :  { %9205 = vmatprep.mubr.msk.f32.mxu0 %vm18355_vm11, %v18600_v39 }
 0x977   :  { %v6893_v12 = vadd.f32 %v6892_v59, %v6821_v32 }
 0x978   :  { %v16145_v43 = vpop.f32.mrb[184].mxu0 }
 0x979   :  { %v6741_v35 = vadd.f32 %v6740_v60, %v16145_v43  ;;  %v6822_v27 = vmul.f32 %v16145_v43, %v16145_v43  ;;  %v9048_v3 = vpop.f32.mrb[185].mxu0  ;;  %9206 = vmatmul.mubr.f32.gmra.mrb[34].mxu0 %v6276_v28 }
 0x97a   :  { %9208 = vmatprep.mubr.msk.f32.mxu0 %vm18355_vm11, %v18600_v39  ;;  %vm18661_vm11 = vmmov %vm18507_vm2 }
 0x97b   :  { %v6894_v19 = vadd.f32 %v6893_v12, %v6822_v27 }
 0x97c   :  { %v16153_v30 = vpop.f32.mrb[186].mxu0 }
 0x97d   :  { %v6742_v48 = vadd.f32 %v6741_v35, %v16153_v30  ;;  %v6823_v21 = vmul.f32 %v16153_v30, %v16153_v30  ;;  %v9051_v51 = vpop.f32.mrb[187].mxu0  ;;  %9209 = vmatmul.mubr.f32.gmra.mrb[36].mxu0 %v6277_v54 }
 0x97f   :  { %v6895_v13 = vadd.f32 %v6894_v19, %v6823_v21 }
 0x980   :  { %v16158_v6 = vpop.f32.mrb[188].mxu0 }
 0x981   :  { %v6743_v14 = vadd.f32 %v6742_v48, %v16158_v6  ;;  %v6824_v37 = vmul.f32 %v16158_v6, %v16158_v6  ;;  %v9054_v57 = vpop.f32.mrb[189].mxu0 }
 0x983   :  { %v6896_v56 = vadd.f32 %v6895_v13, %v6824_v37 }
 0x984   :  { %v16163_v11 = vpop.f32.mrb[190].mxu0 }
 0x985   :  { %v6744_v33 = vadd.f32 %v6743_v14, %v16163_v11  ;;  %v6825_v61 = vmul.f32 %v16163_v11, %v16163_v11  ;;  %v9057_v31 = vpop.f32.mrb[191].mxu0 }
 0x987   :  { %v6897_v25 = vadd.f32 %v6896_v56, %v6825_v61 }
 0x988   :  { %v16168_v46 = vpop.f32.mrb[192].mxu0 }
 0x989   :  { %v6745_v45 = vadd.f32 %v6744_v33, %v16168_v46  ;;  %v6826_v47 = vmul.f32 %v16168_v46, %v16168_v46  ;;  %v9060_v18 = vpop.f32.mrb[193].mxu0 }
 0x98b   :  { %v6898_v55 = vadd.f32 %v6897_v25, %v6826_v47 }
 0x98c   :  { %v16173_v22 = vpop.f32.mrb[194].mxu0 }
 0x98d   :  { %v6746_v42 = vadd.f32 %v6745_v45, %v16173_v22  ;;  %v6827_v16 = vmul.f32 %v16173_v22, %v16173_v22  ;;  %v9063_v58 = vpop.f32.mrb[195].mxu0 }
 0x98f   :  { %v6899_v63 = vadd.f32 %v6898_v55, %v6827_v16 }
 0x990   :  { %v16178_v24 = vpop.f32.mrb[196].mxu0 }
 0x991   :  { %v6747_v9 = vadd.f32 %v6746_v42, %v16178_v24  ;;  %v6828_v59 = vmul.f32 %v16178_v24, %v16178_v24  ;;  %v9066_v4 = vpop.f32.mrb[197].mxu0 }
 0x993   :  { %v6900_v10 = vadd.f32 %v6899_v63, %v6828_v59 }
 0x994   :  { %v16183_v38 = vpop.f32.mrb[198].mxu0 }
 0x995   :  { %v6748_v60 = vadd.f32 %v6747_v9, %v16183_v38  ;;  %v6829_v32 = vmul.f32 %v16183_v38, %v16183_v38  ;;  %v9069_v62 = vpop.f32.mrb[199].mxu0 }
 0x997   :  { %v6901_v41 = vadd.f32 %v6900_v10, %v6829_v32 }
 0x998   :  { %v16188_v12 = vpop.f32.mrb[200].mxu0 }
 0x999   :  { %v6749_v28 = vadd.f32 %v6748_v60, %v16188_v12  ;;  %v6830_v8 = vmul.f32 %v16188_v12, %v16188_v12  ;;  %v9072_v35 = vpop.f32.mrb[201].mxu0 }
 0x99b   :  { %v6902_v27 = vadd.f32 %v6901_v41, %v6830_v8 }
 0x99c   :  { %v16193_v3 = vpop.f32.mrb[202].mxu0 }
 0x99d   :  { %v6750_v53 = vadd.f32 %v6749_v28, %v16193_v3  ;;  %v6831_v19 = vmul.f32 %v16193_v3, %v16193_v3  ;;  %v9075_v54 = vpop.f32.mrb[203].mxu0 }
 0x99f   :  { %v6903_v48 = vadd.f32 %v6902_v27, %v6831_v19 }
 0x9a0   :  { %v16198_v21 = vpop.f32.mrb[204].mxu0 }
 0x9a1   :  { %v6751_v51 = vadd.f32 %v6750_v53, %v16198_v21  ;;  %v6832_v13 = vmul.f32 %v16198_v21, %v16198_v21  ;;  %v9078_v14 = vpop.f32.mrb[205].mxu0 }
 0x9a3   :  { %v6904_v37 = vadd.f32 %v6903_v48, %v6832_v13 }
 0x9a4   :  { %v16203_v57 = vpop.f32.mrb[206].mxu0 }
 0x9a5   :  { %v6752_v56 = vadd.f32 %v6751_v51, %v16203_v57  ;;  %v6833_v33 = vmul.f32 %v16203_v57, %v16203_v57  ;;  %v9081_v61 = vpop.f32.mrb[207].mxu0 }
 0x9a7   :  { %v6905_v31 = vadd.f32 %v6904_v37, %v6833_v33 }
 0x9a8   :  { %v16208_v25 = vpop.f32.mrb[208].mxu0 }
 0x9a9   :  { %v6753_v45 = vadd.f32 %v6752_v56, %v16208_v25  ;;  %v6834_v47 = vmul.f32 %v16208_v25, %v16208_v25  ;;  %v9084_v18 = vpop.f32.mrb[209].mxu0 }
 0x9ab   :  { %v6906_v55 = vadd.f32 %v6905_v31, %v6834_v47 }
 0x9ac   :  { %v16213_v42 = vpop.f32.mrb[210].mxu0 }
 0x9ad   :  { %v6754_v16 = vadd.f32 %v6753_v45, %v16213_v42  ;;  %v6835_v58 = vmul.f32 %v16213_v42, %v16213_v42  ;;  %v9087_v63 = vpop.f32.mrb[211].mxu0 }
 0x9af   :  { %v6907_v9 = vadd.f32 %v6906_v55, %v6835_v58 }
 0x9b0   :  { %v16218_v59 = vpop.f32.mrb[212].mxu0 }
 0x9b1   :  { %v6755_v4 = vadd.f32 %v6754_v16, %v16218_v59  ;;  %v6836_v10 = vmul.f32 %v16218_v59, %v16218_v59  ;;  %v9090_v60 = vpop.f32.mrb[213].mxu0 }
 0x9b3   :  { %v6908_v32 = vadd.f32 %v6907_v9, %v6836_v10 }
 0x9b4   :  { %v16223_v62 = vpop.f32.mrb[214].mxu0 }
 0x9b5   :  { %v6756_v41 = vadd.f32 %v6755_v4, %v16223_v62  ;;  %v6837_v28 = vmul.f32 %v16223_v62, %v16223_v62  ;;  %v9093_v8 = vpop.f32.mrb[215].mxu0 }
 0x9b7   :  { %v6909_v35 = vadd.f32 %v6908_v32, %v6837_v28 }
 0x9b8   :  { %v16228_v27 = vpop.f32.mrb[216].mxu0 }
 0x9b9   :  { %v6757_v53 = vadd.f32 %v6756_v41, %v16228_v27  ;;  %v6838_v19 = vmul.f32 %v16228_v27, %v16228_v27  ;;  %v9096_v54 = vpop.f32.mrb[217].mxu0 }
 0x9bb   :  { %v6910_v48 = vadd.f32 %v6909_v35, %v6838_v19 }
 0x9bc   :  { %v16233_v51 = vpop.f32.mrb[218].mxu0 }
 0x9bd   :  { %v6758_v13 = vadd.f32 %v6757_v53, %v16233_v51  ;;  %v6839_v14 = vmul.f32 %v16233_v51, %v16233_v51  ;;  %v9099_v37 = vpop.f32.mrb[219].mxu0 }
 0x9bf   :  { %v6911_v56 = vadd.f32 %v6910_v48, %v6839_v14 }
 0x9c0   :  { %v16238_v33 = vpop.f32.mrb[220].mxu0 }
 0x9c1   :  { %v6759_v61 = vadd.f32 %v6758_v13, %v16238_v33  ;;  %v6840_v31 = vmul.f32 %v16238_v33, %v16238_v33  ;;  %v9102_v45 = vpop.f32.mrb[221].mxu0 }
 0x9c3   :  { %v6912_v47 = vadd.f32 %v6911_v56, %v6840_v31 }
 0x9c4   :  { %v16243_v18 = vpop.f32.mrb[222].mxu0 }
 0x9c5   :  { %v6760_v55 = vadd.f32 %v6759_v61, %v16243_v18  ;;  %v6841_v16 = vmul.f32 %v16243_v18, %v16243_v18  ;;  %v9105_v58 = vpop.f32.mrb[223].mxu0 }
 0x9c7   :  { %v6913_v63 = vadd.f32 %v6912_v47, %v6841_v16 }
 0x9c8   :  { %v16248_v9 = vpop.f32.mrb[224].mxu0 }
 0x9c9   :  { %v6761_v4 = vadd.f32 %v6760_v55, %v16248_v9  ;;  %v6842_v10 = vmul.f32 %v16248_v9, %v16248_v9  ;;  %v9108_v60 = vpop.f32.mrb[225].mxu0 }
 0x9cb   :  { %v6914_v32 = vadd.f32 %v6913_v63, %v6842_v10 }
 0x9cc   :  { %v16253_v41 = vpop.f32.mrb[226].mxu0 }
 0x9cd   :  { %v6762_v28 = vadd.f32 %v6761_v4, %v16253_v41  ;;  %v6843_v8 = vmul.f32 %v16253_v41, %v16253_v41  ;;  %v9111_v35 = vpop.f32.mrb[227].mxu0 }
 0x9cf   :  { %v6915_v53 = vadd.f32 %v6914_v32, %v6843_v8 }
 0x9d0   :  { %v16258_v19 = vpop.f32.mrb[228].mxu0 }
 0x9d1   :  { %v6763_v54 = vadd.f32 %v6762_v28, %v16258_v19  ;;  %v6844_v48 = vmul.f32 %v16258_v19, %v16258_v19  ;;  %v9114_v13 = vpop.f32.mrb[229].mxu0 }
 0x9d3   :  { %v6916_v14 = vadd.f32 %v6915_v53, %v6844_v48 }
 0x9d4   :  { %v16263_v37 = vpop.f32.mrb[230].mxu0 }
 0x9d5   :  { %18629 = vst [vmem:[#allocation116_spill] sm:$0xff] %v16263_v37  ;;  %v6764_v56 = vadd.f32 %v6763_v54, %v16263_v37  ;;  %v6845_v61 = vmul.f32 %v16263_v37, %v16263_v37  ;;  %v9117_v31 = vpop.f32.mrb[231].mxu0 }
 0x9d7   :  { %v6917_v45 = vadd.f32 %v6916_v14, %v6845_v61 }
 0x9d8   :  { %v16268_v47 = vpop.f32.mrb[232].mxu0 }
 0x9d9   :  { %18630 = vst [vmem:[#allocation117_spill] sm:$0xff] %v16268_v47  ;;  %v6765_v55 = vadd.f32 %v6764_v56, %v16268_v47  ;;  %v6846_v16 = vmul.f32 %v16268_v47, %v16268_v47  ;;  %v9120_v58 = vpop.f32.mrb[233].mxu0 }
 0x9db   :  { %v6918_v63 = vadd.f32 %v6917_v45, %v6846_v16 }
 0x9dc   :  { %v16273_v4 = vpop.f32.mrb[234].mxu0 }
 0x9dd   :  { %18631 = vst [vmem:[#allocation118_spill] sm:$0xff] %v16273_v4  ;;  %v6766_v10 = vadd.f32 %v6765_v55, %v16273_v4  ;;  %v6847_v60 = vmul.f32 %v16273_v4, %v16273_v4  ;;  %v9123_v32 = vpop.f32.mrb[235].mxu0 }
 0x9df   :  { %v6919_v28 = vadd.f32 %v6918_v63, %v6847_v60 }
 0x9e0   :  { %v16278_v8 = vpop.f32.mrb[236].mxu0 }
 0x9e1   :  { %18632 = vst [vmem:[#allocation43_spill] sm:$0xff] %v16278_v8  ;;  %v6767_v35 = vadd.f32 %v6766_v10, %v16278_v8  ;;  %v6848_v53 = vmul.f32 %v16278_v8, %v16278_v8  ;;  %v9126_v54 = vpop.f32.mrb[237].mxu0 }
 0x9e3   :  { %v6920_v48 = vadd.f32 %v6919_v28, %v6848_v53 }
 0x9e4   :  { %v16283_v13 = vpop.f32.mrb[238].mxu0 }
 0x9e5   :  { %18633 = vst [vmem:[#allocation44_spill] sm:$0xff] %v16283_v13  ;;  %v6768_v14 = vadd.f32 %v6767_v35, %v16283_v13  ;;  %v6849_v56 = vmul.f32 %v16283_v13, %v16283_v13  ;;  %v9129_v61 = vpop.f32.mrb[239].mxu0 }
 0x9e7   :  { %v6921_v31 = vadd.f32 %v6920_v48, %v6849_v56 }
 0x9e8   :  { %v16288_v45 = vpop.f32.mrb[240].mxu0 }
 0x9e9   :  { %18634 = vst [vmem:[#allocation120_spill] sm:$0xff] %v16288_v45  ;;  %v6769_v55 = vadd.f32 %v6768_v14, %v16288_v45  ;;  %v6850_v16 = vmul.f32 %v16288_v45, %v16288_v45  ;;  %v9132_v58 = vpop.f32.mrb[241].mxu0 }
 0x9eb   :  { %v6922_v63 = vadd.f32 %v6921_v31, %v6850_v16 }
 0x9ec   :  { %v16293_v10 = vpop.f32.mrb[242].mxu0 }
 0x9ed   :  { %18635 = vst [vmem:[#allocation119_spill] sm:$0xff] %v16293_v10  ;;  %v6770_v60 = vadd.f32 %v6769_v55, %v16293_v10  ;;  %v6851_v32 = vmul.f32 %v16293_v10, %v16293_v10  ;;  %v9135_v28 = vpop.f32.mrb[243].mxu0 }
 0x9ef   :  { %v6923_v35 = vadd.f32 %v6922_v63, %v6851_v32 }
 0x9f0   :  { %v16298_v53 = vpop.f32.mrb[244].mxu0 }
 0x9f1   :  { %18636 = vst [vmem:[#allocation121_spill] sm:$0xff] %v16298_v53  ;;  %v6771_v54 = vadd.f32 %v6770_v60, %v16298_v53  ;;  %v6852_v48 = vmul.f32 %v16298_v53, %v16298_v53  ;;  %v9138_v14 = vpop.f32.mrb[245].mxu0 }
 0x9f3   :  { %v6924_v56 = vadd.f32 %v6923_v35, %v6852_v48 }
 0x9f4   :  { %v16303_v61 = vpop.f32.mrb[246].mxu0 }
 0x9f5   :  { %18637 = vst [vmem:[#allocation122_spill] sm:$0xff] %v16303_v61  ;;  %v6772_v31 = vadd.f32 %v6771_v54, %v16303_v61  ;;  %v6853_v55 = vmul.f32 %v16303_v61, %v16303_v61  ;;  %v9141_v16 = vpop.f32.mrb[247].mxu0 }
 0x9f7   :  { %v6925_v58 = vadd.f32 %v6924_v56, %v6853_v55 }
 0x9f8   :  { %v16308_v28 = vpop.f32.mrb[248].mxu0 }
 0x9f9   :  { %18638 = vst [vmem:[#allocation45_spill] sm:$0xff] %v16308_v28  ;;  %v6773_v63 = vadd.f32 %v6772_v31, %v16308_v28  ;;  %v6854_v60 = vmul.f32 %v16308_v28, %v16308_v28  ;;  %v9144_v32 = vpop.f32.mrb[249].mxu0 }
 0x9fb   :  { %v6926_v39 = vadd.f32 %v6925_v58, %v6854_v60 }
 0x9fc   :  { %v16313_v14 = vpop.f32.mrb[250].mxu0 }
 0x9fd   :  { %18639 = vst [vmem:[#allocation123_spill] sm:$0xff] %v16313_v14  ;;  %v6774_v35 = vadd.f32 %v6773_v63, %v16313_v14  ;;  %v6855_v54 = vmul.f32 %v16313_v14, %v16313_v14  ;;  %v9147_v48 = vpop.f32.mrb[251].mxu0 }
 0x9ff   :  { %v6927_v61 = vadd.f32 %v6926_v39, %v6855_v54 }
 0xa00   :  { %v16318_v16 = vpop.f32.mrb[252].mxu0 }
 0xa01   :  { %18640 = vst [vmem:[#allocation124_spill] sm:$0xff] %v16318_v16  ;;  %v6775_v56 = vadd.f32 %v6774_v35, %v16318_v16  ;;  %v6856_v31 = vmul.f32 %v16318_v16, %v16318_v16  ;;  %v9150_v55 = vpop.f32.mrb[253].mxu0 }
 0xa03   :  { %v6928_v28 = vadd.f32 %v6927_v61, %v6856_v31 }
 0xa04   :  { %v16323_v32 = vpop.f32.mrb[254].mxu0 }
 0xa05   :  { %18641 = vst [vmem:[#allocation17_spill] sm:$0xff] %v16323_v32  ;;  %v6776_v58 = vadd.f32 %v6775_v56, %v16323_v32  ;;  %v6857_v63 = vmul.f32 %v16323_v32, %v16323_v32  ;;  %v9153_v60 = vpop.f32.mrb[255].mxu0 }
 0xa07   :  { %v6929_v14 = vadd.f32 %v6928_v28, %v6857_v63 }
 0xa08   :  { %v16328_v48 = vpop.f32.mrb[0].mxu0 }
 0xa09   :  { %18642 = vst [vmem:[#allocation125_spill] sm:$0xff] %v16328_v48  ;;  %v6777_v39 = vadd.f32 %v6776_v58, %v16328_v48  ;;  %v6858_v35 = vmul.f32 %v16328_v48, %v16328_v48  ;;  %v9156_v54 = vpop.f32.mrb[1].mxu0 }
 0xa0b   :  { %v6930_v16 = vadd.f32 %v6929_v14, %v6858_v35 }
 0xa0c   :  { %v16333_v55 = vpop.f32.mrb[2].mxu0 }
 0xa0d   :  { %18643 = vst [vmem:[#allocation46_spill] sm:$0xff] %v16333_v55  ;;  %v6778_v61 = vadd.f32 %v6777_v39, %v16333_v55  ;;  %v6859_v56 = vmul.f32 %v16333_v55, %v16333_v55  ;;  %v9159_v31 = vpop.f32.mrb[3].mxu0 }
 0xa0f   :  { %v6931_v32 = vadd.f32 %v6930_v16, %v6859_v56 }
 0xa10   :  { %v16338_v60 = vpop.f32.mrb[4].mxu0 }
 0xa11   :  { %18644 = vst [vmem:[#allocation47_spill] sm:$0xff] %v16338_v60  ;;  %v6779_v28 = vadd.f32 %v6778_v61, %v16338_v60  ;;  %v6860_v58 = vmul.f32 %v16338_v60, %v16338_v60  ;;  %v9162_v63 = vpop.f32.mrb[5].mxu0 }
 0xa13   :  { %v6932_v48 = vadd.f32 %v6931_v32, %v6860_v58 }
 0xa14   :  { %v16343_v54 = vpop.f32.mrb[6].mxu0 }
 0xa15   :  { %18645 = vst [vmem:[#allocation126_spill] sm:$0xff] %v16343_v54  ;;  %v6780_v14 = vadd.f32 %v6779_v28, %v16343_v54  ;;  %v6861_v39 = vmul.f32 %v16343_v54, %v16343_v54  ;;  %v9165_v35 = vpop.f32.mrb[7].mxu0 }
 0xa17   :  { %v6933_v55 = vadd.f32 %v6932_v48, %v6861_v39 }
 0xa18   :  { %v16348_v31 = vpop.f32.mrb[8].mxu0 }
 0xa19   :  { %18646 = vst [vmem:[#allocation18_spill] sm:$0xff] %v16348_v31  ;;  %v6781_v16 = vadd.f32 %v6780_v14, %v16348_v31  ;;  %v6862_v61 = vmul.f32 %v16348_v31, %v16348_v31  ;;  %v9168_v56 = vpop.f32.mrb[9].mxu0 }
 0xa1b   :  { %v6934_v60 = vadd.f32 %v6933_v55, %v6862_v61 }
 0xa1c   :  { %v16353_v63 = vpop.f32.mrb[10].mxu0 }
 0xa1d   :  { %18647 = vst [vmem:[#allocation64_spill] sm:$0xff] %v16353_v63  ;;  %v6782_v32 = vadd.f32 %v6781_v16, %v16353_v63  ;;  %v6863_v28 = vmul.f32 %v16353_v63, %v16353_v63  ;;  %v9171_v58 = vpop.f32.mrb[11].mxu0 }
 0xa1f   :  { %v6935_v54 = vadd.f32 %v6934_v60, %v6863_v28 }
 0xa20   :  { %v16358_v35 = vpop.f32.mrb[12].mxu0 }
 0xa21   :  { %18648 = vst [vmem:[#allocation19_spill] sm:$0xff] %v16358_v35  ;;  %v6783_v48 = vadd.f32 %v6782_v32, %v16358_v35  ;;  %v6864_v14 = vmul.f32 %v16358_v35, %v16358_v35  ;;  %v9174_v39 = vpop.f32.mrb[13].mxu0 }
 0xa23   :  { %v6936_v31 = vadd.f32 %v6935_v54, %v6864_v14 }
 0xa24   :  { %v16363_v56 = vpop.f32.mrb[14].mxu0 }
 0xa25   :  { %18649 = vst [vmem:[#allocation65_spill] sm:$0xff] %v16363_v56  ;;  %v6784_v55 = vadd.f32 %v6783_v48, %v16363_v56  ;;  %v6865_v16 = vmul.f32 %v16363_v56, %v16363_v56  ;;  %v9177_v61 = vpop.f32.mrb[15].mxu0 }
 0xa27   :  { %v6937_v63 = vadd.f32 %v6936_v31, %v6865_v16 }
 0xa28   :  { %v16368_v58 = vpop.f32.mrb[16].mxu0 }
 0xa29   :  { %18650 = vst [vmem:[#allocation66_spill] sm:$0xff] %v16368_v58  ;;  %v6785_v60 = vadd.f32 %v6784_v55, %v16368_v58  ;;  %v6866_v32 = vmul.f32 %v16368_v58, %v16368_v58  ;;  %v9180_v28 = vpop.f32.mrb[17].mxu0 }
 0xa2b   :  { %v6938_v35 = vadd.f32 %v6937_v63, %v6866_v32 }
 0xa2c   :  { %v16373_v39 = vpop.f32.mrb[18].mxu0 }
 0xa2d   :  { %18651 = vst [vmem:[#allocation67_spill] sm:$0xff] %v16373_v39  ;;  %v6786_v54 = vadd.f32 %v6785_v60, %v16373_v39  ;;  %v6867_v48 = vmul.f32 %v16373_v39, %v16373_v39  ;;  %v9183_v14 = vpop.f32.mrb[19].mxu0 }
 0xa2f   :  { %v6939_v56 = vadd.f32 %v6938_v35, %v6867_v48 }
 0xa30   :  { %v16378_v61 = vpop.f32.mrb[20].mxu0 }
 0xa31   :  { %18652 = vst [vmem:[#allocation20_spill] sm:$0xff] %v16378_v61  ;;  %v6787_v31 = vadd.f32 %v6786_v54, %v16378_v61  ;;  %v6868_v55 = vmul.f32 %v16378_v61, %v16378_v61  ;;  %v9186_v16 = vpop.f32.mrb[21].mxu0 }
 0xa33   :  { %v6940_v58 = vadd.f32 %v6939_v56, %v6868_v55 }
 0xa34   :  { %v16383_v28 = vpop.f32.mrb[22].mxu0 }
 0xa35   :  { %18653 = vst [vmem:[#allocation21_spill] sm:$0xff] %v16383_v28  ;;  %v6788_v63 = vadd.f32 %v6787_v31, %v16383_v28  ;;  %v6869_v60 = vmul.f32 %v16383_v28, %v16383_v28  ;;  %v9189_v32 = vpop.f32.mrb[23].mxu0 }
 0xa37   :  { %v6941_v39 = vadd.f32 %v6940_v58, %v6869_v60 }
 0xa38   :  { %v16388_v14 = vpop.f32.mrb[24].mxu0 }
 0xa39   :  { %18654 = vst [vmem:[#allocation68_spill] sm:$0xff] %v16388_v14  ;;  %v6789_v35 = vadd.f32 %v6788_v63, %v16388_v14  ;;  %v6870_v54 = vmul.f32 %v16388_v14, %v16388_v14  ;;  %v9192_v48 = vpop.f32.mrb[25].mxu0 }
 0xa3b   :  { %v6942_v61 = vadd.f32 %v6941_v39, %v6870_v54 }
 0xa3c   :  { %v16393_v16 = vpop.f32.mrb[26].mxu0 }
 0xa3d   :  { %18655 = vst [vmem:[#allocation22_spill] sm:$0xff] %v16393_v16  ;;  %v6790_v56 = vadd.f32 %v6789_v35, %v16393_v16  ;;  %v6871_v31 = vmul.f32 %v16393_v16, %v16393_v16  ;;  %v9195_v55 = vpop.f32.mrb[27].mxu0 }
 0xa3f   :  { %v6943_v28 = vadd.f32 %v6942_v61, %v6871_v31 }
 0xa40   :  { %v16398_v32 = vpop.f32.mrb[28].mxu0 }
 0xa41   :  { %18656 = vst [vmem:[#allocation23_spill] sm:$0xff] %v16398_v32  ;;  %v6791_v58 = vadd.f32 %v6790_v56, %v16398_v32  ;;  %v6872_v63 = vmul.f32 %v16398_v32, %v16398_v32  ;;  %v9198_v60 = vpop.f32.mrb[29].mxu0 }
 0xa43   :  { %v6944_v14 = vadd.f32 %v6943_v28, %v6872_v63 }
 0xa44   :  { %v16403_v48 = vpop.f32.mrb[30].mxu0 }
 0xa45   :  { %18657 = vst [vmem:[#allocation24_spill] sm:$0xff] %v16403_v48  ;;  %v6792_v39 = vadd.f32 %v6791_v58, %v16403_v48  ;;  %v6873_v35 = vmul.f32 %v16403_v48, %v16403_v48  ;;  %v9201_v54 = vpop.f32.mrb[31].mxu0 }
 0xa47   :  { %v6945_v16 = vadd.f32 %v6944_v14, %v6873_v35 }
 0xa48   :  { %v16408_v55 = vpop.f32.mrb[32].mxu0 }
 0xa49   :  { %18658 = vst [vmem:[#allocation25_spill] sm:$0xff] %v16408_v55  ;;  %v6793_v61 = vadd.f32 %v6792_v39, %v16408_v55  ;;  %v6874_v56 = vmul.f32 %v16408_v55, %v16408_v55  ;;  %v9204_v31 = vpop.f32.mrb[33].mxu0 }
 0xa4b   :  { %v6946_v32 = vadd.f32 %v6945_v16, %v6874_v56 }
 0xa4c   :  { %v16413_v60 = vpop.f32.mrb[34].mxu0 }
 0xa4d   :  { %18659 = vst [vmem:[#allocation26_spill] sm:$0xff] %v16413_v60  ;;  %v6794_v28 = vadd.f32 %v6793_v61, %v16413_v60  ;;  %v6875_v58 = vmul.f32 %v16413_v60, %v16413_v60  ;;  %v9207_v63 = vpop.f32.mrb[35].mxu0 }
 0xa4f   :  { %v6947_v48 = vadd.f32 %v6946_v32, %v6875_v58 }
 0xa50   :  { %v16418_v54 = vpop.f32.mrb[36].mxu0 }
 0xa51   :  { %18660 = vst [vmem:[#allocation27_spill] sm:$0xff] %v16418_v54  ;;  %v6795_v14 = vsel %vm18661_vm11, %v16418_v54, 0.0  ;;  %v6876_v39 = vmul.f32 %v16418_v54, %v16418_v54  ;;  %v9210_v35 = vpop.f32.mrb[37].mxu0 }
 0xa52   :  { %v6796_v31 = vadd.f32 %v6795_v14, %v6794_v28 }
 0xa53   :  { %v6948_v16 = vsel %vm18662_vm1, %v6876_v39, 0.0  ;;  %v18663_v39 = vld [vmem:[#allocation34_spill] sm:$0xff] }
 0xa54   :  { %v6797_v56 = vrot.slane %v6796_v31, 4  ;;  %v6949_v55 = vadd.f32 %v6948_v16, %v6947_v48  ;;  %v6965_v48 = vsub.s32 6, %v18663_v39  ;;  %v18666_v16 = vld [vmem:[#allocation118_spill] sm:$0xff] }
 0xa56   :  { %v6798_v61 = vadd.f32 %v6797_v56, %v6796_v31  ;;  %v6950_v53 = vrot.slane %v6949_v55, 4  ;;  %v18667_v56 = vld [vmem:[#allocation43_spill] sm:$0xff] }
 0xa58   :  { %v6799_v10 = vrot.slane %v6798_v61, 2  ;;  %v6951_v60 = vadd.f32 %v6950_v53, %v6949_v55 }
 0xa5a   :  { %v6800_v63 = vadd.f32 %v6799_v10, %v6798_v61  ;;  %v6952_v32 = vrot.slane %v6951_v60, 2  ;;  %v16429_v10 = vld [vmem:[%s17542_s9] sm:$0xff]  ;;  %v18668_v61 = vld [vmem:[#allocation44_spill] sm:$0xff] }
 0xa5c   :  { %v6801_v58 = vrot.slane %v6800_v63, 1  ;;  %v6953_v45 = vadd.f32 %v6952_v32, %v6951_v60  ;;  %v18664_v60 = vld [vmem:[#allocation116_spill] sm:$0xff] }
 0xa5e   :  { %v6802_v13 = vadd.f32 %v6801_v58, %v6800_v63  ;;  %v6954_v8 = vrot.slane %v6953_v45, 1  ;;  %v18669_v63 = vld [vmem:[#allocation120_spill] sm:$0xff]  ;;  %v18670_v58 = vld [vmem:[#allocation119_spill] sm:$0xff] }
 0xa60   :  { %v6803_v4 = vmul.f32 0.0017301039, %v6802_v13  ;;  %v6955_v47 = vadd.f32 %v6954_v8, %v6953_v45 }
 0xa62   :  { %v6956_v37 = vmul.f32 0.0017301039, %v6955_v47  ;;  %v6957_v54 = vmul.f32 %v6803_v4, %v6803_v4 }
 0xa64   :  { %v6958_v35 = vsub.f32 %v6956_v37, %v6957_v54  ;;  %v18665_v54 = vld [vmem:[#allocation117_spill] sm:$0xff] }
 0xa66   :  { %v6959_v28 = vmax.f32 %v6958_v35, 0.0 }
 0xa68   :  { %v6960_v14 = vadd.f32 1e-05, %v6959_v28  ;;  %v18671_v28 = vld [vmem:[#allocation121_spill] sm:$0xff] }
 0xa6a   :  { %9942 = vrsqrt.f32 %v6960_v14 }
 0xa74   :  { %v9943_v31 = vpop.eup %9942 }
 0xa75   :  { %v6962_v53 = vmul.f32 %v16429_v10, %v9943_v31 }
 0xa77   :  { %v16432_v55 = vrot.slane %v6962_v53, %v6965_v48  ;;  %v16434_v13 = vmul.f32 %v6962_v53, %v6803_v4  ;;  %v18672_v48 = vld [vmem:[#allocation122_spill] sm:$0xff]  ;;  %v18674_v53 = vld [vmem:[#allocation45_spill] sm:$0xff] }
 0xa79   :  { %v16438_v37 = vmul.f32 %v16432_v55, %v15952_v44  ;;  %v16442_v47 = vmul.f32 %v16432_v55, %v15966_v23  ;;  %v16446_v8 = vmul.f32 %v16432_v55, %v15980_v49  ;;  %v16450_v45 = vmul.f32 %v16432_v55, %v15992_v1 }
 0xa7a   :  { %v16454_v4 = vmul.f32 %v16432_v55, %v16004_v2  ;;  %v16458_v44 = vmul.f32 %v16432_v55, %v16016_v15  ;;  %v16462_v23 = vmul.f32 %v16432_v55, %v16028_v34  ;;  %v16466_v49 = vmul.f32 %v16432_v55, %v16040_v5 }
 0xa7b   :  { %v16470_v1 = vmul.f32 %v16432_v55, %v16052_v20  ;;  %v16474_v2 = vmul.f32 %v16432_v55, %v16064_v29  ;;  %v16478_v15 = vmul.f32 %v16432_v55, %v16075_v26  ;;  %v16482_v34 = vmul.f32 %v16432_v55, %v16086_v0 }
 0xa7c   :  { %v16486_v5 = vmul.f32 %v16432_v55, %v16096_v50  ;;  %v16490_v20 = vmul.f32 %v16432_v55, %v16105_v52  ;;  %v16494_v29 = vmul.f32 %v16432_v55, %v16113_v17  ;;  %v16498_v26 = vmul.f32 %v16432_v55, %v16121_v7 }
 0xa7d   :  { %v16502_v0 = vmul.f32 %v16432_v55, %v16129_v40  ;;  %v16506_v50 = vmul.f32 %v16432_v55, %v16137_v36  ;;  %v16510_v52 = vmul.f32 %v16432_v55, %v16145_v43  ;;  %v16514_v17 = vmul.f32 %v16432_v55, %v16153_v30 }
 0xa7e   :  { %v16518_v7 = vmul.f32 %v16432_v55, %v16158_v6  ;;  %v16522_v40 = vmul.f32 %v16432_v55, %v16163_v11  ;;  %v16526_v36 = vmul.f32 %v16432_v55, %v16168_v46  ;;  %v16530_v43 = vmul.f32 %v16432_v55, %v16173_v22 }
 0xa7f   :  { %v16534_v30 = vmul.f32 %v16432_v55, %v16178_v24  ;;  %v16538_v6 = vmul.f32 %v16432_v55, %v16183_v38  ;;  %v16542_v11 = vmul.f32 %v16432_v55, %v16188_v12  ;;  %v16546_v46 = vmul.f32 %v16432_v55, %v16193_v3 }
 0xa80   :  { %v16550_v22 = vmul.f32 %v16432_v55, %v16198_v21  ;;  %v16554_v24 = vmul.f32 %v16432_v55, %v16203_v57  ;;  %v16558_v38 = vmul.f32 %v16432_v55, %v16208_v25  ;;  %v16562_v12 = vmul.f32 %v16432_v55, %v16213_v42 }
 0xa81   :  { %v16566_v3 = vmul.f32 %v16432_v55, %v16218_v59  ;;  %v16570_v21 = vmul.f32 %v16432_v55, %v16223_v62  ;;  %v16574_v57 = vmul.f32 %v16432_v55, %v16228_v27  ;;  %v16578_v25 = vmul.f32 %v16432_v55, %v16233_v51 }
 0xa82   :  { %v16582_v42 = vmul.f32 %v16432_v55, %v16238_v33  ;;  %v16586_v59 = vmul.f32 %v16432_v55, %v16243_v18  ;;  %v16590_v62 = vmul.f32 %v16432_v55, %v16248_v9  ;;  %v16594_v27 = vmul.f32 %v16432_v55, %v16253_v41 }
 0xa83   :  { %v16598_v51 = vmul.f32 %v16432_v55, %v16258_v19  ;;  %v16602_v33 = vmul.f32 %v16432_v55, %v18664_v60  ;;  %v16606_v18 = vmul.f32 %v16432_v55, %v18665_v54  ;;  %v16610_v9 = vmul.f32 %v16432_v55, %v18666_v16  ;;  %v18676_v54 = vld [vmem:[#allocation123_spill] sm:$0xff] }
 0xa84   :  { %v16614_v41 = vmul.f32 %v16432_v55, %v18667_v56  ;;  %v16618_v19 = vmul.f32 %v16432_v55, %v18668_v61  ;;  %v16622_v32 = vmul.f32 %v16432_v55, %v18669_v63  ;;  %v16626_v35 = vmul.f32 %v16432_v55, %v18670_v58  ;;  %v18678_v56 = vld [vmem:[#allocation124_spill] sm:$0xff]  ;;  %v18680_v63 = vld [vmem:[#allocation17_spill] sm:$0xff] }
 0xa85   :  { %v16630_v14 = vmul.f32 %v16432_v55, %v18671_v28  ;;  %v16634_v31 = vmul.f32 %v16432_v55, %v18672_v48  ;;  %v16638_v60 = vmul.f32 %v16432_v55, %v18674_v53  ;;  %v16642_v16 = vmul.f32 %v16432_v55, %v18676_v54  ;;  %v18682_v28 = vld [vmem:[#allocation125_spill] sm:$0xff] }
 0xa86   :  { %v16646_v61 = vmul.f32 %v16432_v55, %v18678_v56  ;;  %v16650_v58 = vmul.f32 %v16432_v55, %v18680_v63  ;;  %v16654_v48 = vmul.f32 %v16432_v55, %v18682_v28 }
 0xa87   :  { %18673 = vst [vmem:[#allocation28_spill] sm:$0xff] %v16634_v31  ;;  %18675 = vst [vmem:[#allocation29_spill] sm:$0xff] %v16638_v60  ;;  %v18684_v31 = vld [vmem:[#allocation46_spill] sm:$0xff]  ;;  %v18686_v60 = vld [vmem:[#allocation47_spill] sm:$0xff] }
 0xa88   :  { %18677 = vst [vmem:[#allocation30_spill] sm:$0xff] %v16642_v16  ;;  %18679 = vst [vmem:[#allocation31_spill] sm:$0xff] %v16646_v61  ;;  %v16658_v53 = vmul.f32 %v16432_v55, %v18684_v31  ;;  %v16662_v54 = vmul.f32 %v16432_v55, %v18686_v60  ;;  %v18688_v16 = vld [vmem:[#allocation126_spill] sm:$0xff] }
 0xa89   :  { %18681 = vst [vmem:[#allocation2_spill] sm:$0xff] %v16650_v58  ;;  %18683 = vst [vmem:[#allocation3_spill] sm:$0xff] %v16654_v48  ;;  %v16666_v56 = vmul.f32 %v16432_v55, %v18688_v16  ;;  %v18690_v61 = vld [vmem:[#allocation18_spill] sm:$0xff]  ;;  %v18692_v58 = vld [vmem:[#allocation64_spill] sm:$0xff] }
 0xa8a   :  { %18685 = vst [vmem:[#allocation4_spill] sm:$0xff] %v16658_v53  ;;  %18687 = vst [vmem:[#allocation5_spill] sm:$0xff] %v16662_v54  ;;  %v16670_v63 = vmul.f32 %v16432_v55, %v18690_v61  ;;  %v16674_v28 = vmul.f32 %v16432_v55, %v18692_v58  ;;  %v18694_v48 = vld [vmem:[#allocation19_spill] sm:$0xff]  ;;  %v18696_v53 = vld [vmem:[#allocation65_spill] sm:$0xff] }
 0xa8b   :  { %18689 = vst [vmem:[#allocation6_spill] sm:$0xff] %v16666_v56  ;;  %v16678_v31 = vmul.f32 %v16432_v55, %v18694_v48  ;;  %v16682_v60 = vmul.f32 %v16432_v55, %v18696_v53  ;;  %v18698_v54 = vld [vmem:[#allocation66_spill] sm:$0xff]  ;;  %v18700_v56 = vld [vmem:[#allocation67_spill] sm:$0xff] }
 0xa8c   :  { %18691 = vst [vmem:[#allocation7_spill] sm:$0xff] %v16670_v63  ;;  %18693 = vst [vmem:[#allocation8_spill] sm:$0xff] %v16674_v28  ;;  %v16686_v16 = vmul.f32 %v16432_v55, %v18698_v54  ;;  %v16690_v61 = vmul.f32 %v16432_v55, %v18700_v56  ;;  %v18702_v63 = vld [vmem:[#allocation20_spill] sm:$0xff]  ;;  %v18704_v28 = vld [vmem:[#allocation21_spill] sm:$0xff] }
 0xa8d   :  { %18695 = vst [vmem:[#allocation9_spill] sm:$0xff] %v16678_v31  ;;  %18697 = vst [vmem:[#allocation10_spill] sm:$0xff] %v16682_v60  ;;  %v16694_v58 = vmul.f32 %v16432_v55, %v18702_v63  ;;  %v16698_v48 = vmul.f32 %v16432_v55, %v18704_v28  ;;  %v18706_v31 = vld [vmem:[#allocation68_spill] sm:$0xff]  ;;  %v18708_v60 = vld [vmem:[#allocation22_spill] sm:$0xff] }
 0xa8e   :  { %18699 = vst [vmem:[#allocation11_spill] sm:$0xff] %v16686_v16  ;;  %18701 = vst [vmem:[#allocation12_spill] sm:$0xff] %v16690_v61  ;;  %v16702_v53 = vmul.f32 %v16432_v55, %v18706_v31  ;;  %v16706_v54 = vmul.f32 %v16432_v55, %v18708_v60  ;;  %v18710_v16 = vld [vmem:[#allocation23_spill] sm:$0xff]  ;;  %v18712_v61 = vld [vmem:[#allocation24_spill] sm:$0xff] }
 0xa8f   :  { %18703 = vst [vmem:[#allocation70_spill] sm:$0xff] %v16694_v58  ;;  %18705 = vst [vmem:[#allocation69_spill] sm:$0xff] %v16698_v48  ;;  %v16710_v56 = vmul.f32 %v16432_v55, %v18710_v16  ;;  %v16714_v63 = vmul.f32 %v16432_v55, %v18712_v61  ;;  %v18713_v58 = vld [vmem:[#allocation25_spill] sm:$0xff]  ;;  %v18714_v48 = vld [vmem:[#allocation26_spill] sm:$0xff]  ;;  %v7047_v16 = vsub.s32 7, %v18663_v39 }
 0xa90   :  { %18707 = vst [vmem:[#allocation72_spill] sm:$0xff] %v16702_v53  ;;  %18709 = vst [vmem:[#allocation71_spill] sm:$0xff] %v16706_v54  ;;  %v16718_v28 = vmul.f32 %v16432_v55, %v18713_v58  ;;  %v16722_v31 = vmul.f32 %v16432_v55, %v18714_v48  ;;  %v18715_v53 = vld [vmem:[#allocation27_spill] sm:$0xff]  ;;  %v7042_v54 = vrot.slane %v16434_v13, 7 }
 0xa91   :  { %18711 = vst [vmem:[#allocation74_spill] sm:$0xff] %v16710_v56  ;;  %v16726_v60 = vmul.f32 %v16432_v55, %v18715_v53  ;;  %v18720_v53 = vld [vmem:[#allocation29_spill] sm:$0xff] }
 0xa92   :  { %v7044_v56 = vsub.f32 %v16429_v10, %v7042_v54  ;;  %v18722_v54 = vld [vmem:[#allocation30_spill] sm:$0xff] }
 0xa94   :  { %v16731_v61 = vrot.slane %v7044_v56, %v7047_v16  ;;  %v18724_v56 = vld [vmem:[#allocation31_spill] sm:$0xff]  ;;  %v18726_v16 = vld [vmem:[#allocation2_spill] sm:$0xff] }
 0xa96   :  { %v16735_v58 = vadd.f32 %v16731_v61, %v16438_v37  ;;  %v16739_v48 = vadd.f32 %v16731_v61, %v16442_v47  ;;  %v16743_v55 = vadd.f32 %v16731_v61, %v16446_v8  ;;  %v16747_v13 = vadd.f32 %v16731_v61, %v16450_v45 }
 0xa97   :  { %v16751_v39 = vadd.f32 %v16731_v61, %v16454_v4  ;;  %v16755_v10 = vadd.f32 %v16731_v61, %v16458_v44  ;;  %v16759_v37 = vadd.f32 %v16731_v61, %v16462_v23  ;;  %v16763_v47 = vadd.f32 %v16731_v61, %v16466_v49 }
 0xa98   :  { %v16767_v8 = vadd.f32 %v16731_v61, %v16470_v1  ;;  %v16771_v45 = vadd.f32 %v16731_v61, %v16474_v2  ;;  %v16775_v4 = vadd.f32 %v16731_v61, %v16478_v15  ;;  %v16779_v44 = vadd.f32 %v16731_v61, %v16482_v34 }
 0xa99   :  { %v16783_v23 = vadd.f32 %v16731_v61, %v16486_v5  ;;  %v16787_v49 = vadd.f32 %v16731_v61, %v16490_v20  ;;  %v16791_v1 = vadd.f32 %v16731_v61, %v16494_v29  ;;  %v16795_v2 = vadd.f32 %v16731_v61, %v16498_v26 }
 0xa9a   :  { %v16799_v15 = vadd.f32 %v16731_v61, %v16502_v0  ;;  %v16803_v34 = vadd.f32 %v16731_v61, %v16506_v50  ;;  %v16807_v5 = vadd.f32 %v16731_v61, %v16510_v52  ;;  %v16811_v20 = vadd.f32 %v16731_v61, %v16514_v17 }
 0xa9b   :  { %v16815_v29 = vadd.f32 %v16731_v61, %v16518_v7  ;;  %v16819_v26 = vadd.f32 %v16731_v61, %v16522_v40  ;;  %v16823_v0 = vadd.f32 %v16731_v61, %v16526_v36  ;;  %v16827_v50 = vadd.f32 %v16731_v61, %v16530_v43 }
 0xa9c   :  { %v16831_v52 = vadd.f32 %v16731_v61, %v16534_v30  ;;  %v16835_v17 = vadd.f32 %v16731_v61, %v16538_v6  ;;  %v16839_v7 = vadd.f32 %v16731_v61, %v16542_v11  ;;  %v16843_v40 = vadd.f32 %v16731_v61, %v16546_v46 }
 0xa9d   :  { %v16847_v36 = vadd.f32 %v16731_v61, %v16550_v22  ;;  %v16851_v43 = vadd.f32 %v16731_v61, %v16554_v24  ;;  %v16855_v30 = vadd.f32 %v16731_v61, %v16558_v38  ;;  %v16859_v6 = vadd.f32 %v16731_v61, %v16562_v12 }
 0xa9e   :  { %v16863_v11 = vadd.f32 %v16731_v61, %v16566_v3  ;;  %v16867_v46 = vadd.f32 %v16731_v61, %v16570_v21  ;;  %v16871_v22 = vadd.f32 %v16731_v61, %v16574_v57  ;;  %v16875_v24 = vadd.f32 %v16731_v61, %v16578_v25 }
 0xa9f   :  { %v16879_v38 = vadd.f32 %v16731_v61, %v16582_v42  ;;  %v16883_v12 = vadd.f32 %v16731_v61, %v16586_v59  ;;  %v16887_v3 = vadd.f32 %v16731_v61, %v16590_v62  ;;  %v16891_v21 = vadd.f32 %v16731_v61, %v16594_v27 }
 0xaa0   :  { %v16895_v57 = vadd.f32 %v16731_v61, %v16598_v51  ;;  %v16899_v25 = vadd.f32 %v16731_v61, %v16602_v33  ;;  %v16903_v42 = vadd.f32 %v16731_v61, %v16606_v18  ;;  %v16907_v59 = vadd.f32 %v16731_v61, %v16610_v9  ;;  %v18718_v9 = vld [vmem:[#allocation28_spill] sm:$0xff] }
 0xaa1   :  { %v16911_v62 = vadd.f32 %v16731_v61, %v16614_v41  ;;  %v16915_v27 = vadd.f32 %v16731_v61, %v16618_v19  ;;  %v16919_v51 = vadd.f32 %v16731_v61, %v16622_v32  ;;  %v16923_v33 = vadd.f32 %v16731_v61, %v16626_v35 }
 0xaa2   :  { %v16927_v18 = vadd.f32 %v16731_v61, %v16630_v14  ;;  %v16931_v41 = vadd.f32 %v16731_v61, %v18718_v9  ;;  %v16935_v19 = vadd.f32 %v16731_v61, %v18720_v53  ;;  %v16939_v32 = vadd.f32 %v16731_v61, %v18722_v54 }
 0xaa3   :  { %18716 = vst [vmem:[#allocation73_spill] sm:$0xff] %v16923_v33  ;;  %v16943_v35 = vadd.f32 %v16731_v61, %v18724_v56  ;;  %v16947_v14 = vadd.f32 %v16731_v61, %v18726_v16  ;;  %vm7122_vm15 = vcmp.ge.f32.partialorder %v16735_v58, 0.0  ;;  %vm7123_vm10 = vcmp.ge.f32.partialorder %v16739_v48, 0.0 }
 0xaa4   :  { %18717 = vst [vmem:[#allocation76_spill] sm:$0xff] %v16927_v18  ;;  %18719 = vst [vmem:[#allocation75_spill] sm:$0xff] %v16931_v41  ;;  %v18728_v18 = vld [vmem:[#allocation3_spill] sm:$0xff]  ;;  %v18730_v41 = vld [vmem:[#allocation4_spill] sm:$0xff]  ;;  %vm7124_vm12 = vcmp.ge.f32.partialorder %v16743_v55, 0.0  ;;  %vm7125_vm6 = vcmp.ge.f32.partialorder %v16747_v13, 0.0 }
 0xaa5   :  { %18721 = vst [vmem:[#allocation78_spill] sm:$0xff] %v16935_v19  ;;  %18723 = vst [vmem:[#allocation77_spill] sm:$0xff] %v16939_v32  ;;  %v16951_v9 = vadd.f32 %v16731_v61, %v18728_v18  ;;  %v16955_v53 = vadd.f32 %v16731_v61, %v18730_v41  ;;  %v18732_v19 = vld [vmem:[#allocation5_spill] sm:$0xff]  ;;  %v18734_v32 = vld [vmem:[#allocation6_spill] sm:$0xff]  ;;  %vm7126_vm8 = vcmp.ge.f32.partialorder %v16751_v39, 0.0  ;;  %vm7127_vm7 = vcmp.ge.f32.partialorder %v16755_v10, 0.0 }
 0xaa6   :  { %18725 = vst [vmem:[#allocation80_spill] sm:$0xff] %v16943_v35  ;;  %18727 = vst [vmem:[#allocation79_spill] sm:$0xff] %v16947_v14  ;;  %v16959_v54 = vadd.f32 %v16731_v61, %v18732_v19  ;;  %v16963_v56 = vadd.f32 %v16731_v61, %v18734_v32  ;;  %v18736_v35 = vld [vmem:[#allocation7_spill] sm:$0xff]  ;;  %v18738_v14 = vld [vmem:[#allocation8_spill] sm:$0xff]  ;;  %vm7158_vm14 = vcmp.ge.f32.partialorder %v16879_v38, 0.0  ;;  %vm7159_vm13 = vcmp.ge.f32.partialorder %v16883_v12, 0.0 }
 0xaa7   :  { %18729 = vst [vmem:[#allocation136_spill] sm:$0xff] %v16951_v9  ;;  %18731 = vst [vmem:[#allocation81_spill] sm:$0xff] %v16955_v53  ;;  %v16967_v16 = vadd.f32 %v16731_v61, %v18736_v35  ;;  %v16971_v18 = vadd.f32 %v16731_v61, %v18738_v14  ;;  %v18740_v9 = vld [vmem:[#allocation9_spill] sm:$0xff]  ;;  %v18742_v53 = vld [vmem:[#allocation10_spill] sm:$0xff]  ;;  %vm7160_vm4 = vcmp.ge.f32.partialorder %v16887_v3, 0.0  ;;  %vm7161_vm5 = vcmp.ge.f32.partialorder %v16891_v21, 0.0 }
 0xaa8   :  { %18733 = vst [vmem:[#allocation82_spill] sm:$0xff] %v16959_v54  ;;  %18735 = vst [vmem:[#allocation83_spill] sm:$0xff] %v16963_v56  ;;  %v16975_v41 = vadd.f32 %v16731_v61, %v18740_v9  ;;  %v16979_v19 = vadd.f32 %v16731_v61, %v18742_v53  ;;  %v18744_v54 = vld [vmem:[#allocation11_spill] sm:$0xff]  ;;  %v18746_v56 = vld [vmem:[#allocation12_spill] sm:$0xff]  ;;  %vm7166_vm11 = vcmp.ge.f32.partialorder %v16911_v62, 0.0  ;;  %vm7167_vm1 = vcmp.ge.f32.partialorder %v16915_v27, 0.0 }
 0xaa9   :  { %18737 = vst [vmem:[#allocation84_spill] sm:$0xff] %v16967_v16  ;;  %18739 = vst [vmem:[#allocation85_spill] sm:$0xff] %v16971_v18  ;;  %v16983_v32 = vadd.f32 %v16731_v61, %v18744_v54  ;;  %v16987_v35 = vadd.f32 %v16731_v61, %v18746_v56  ;;  %v18747_v16 = vld [vmem:[#allocation70_spill] sm:$0xff]  ;;  %v18748_v18 = vld [vmem:[#allocation69_spill] sm:$0xff]  ;;  %vm7168_vm0 = vcmp.ge.f32.partialorder %v16919_v51, 0.0  ;;  %vm7169_vm9 = vcmp.ge.f32.partialorder %v16923_v33, 0.0 }
 0xaaa   :  { %18741 = vst [vmem:[#allocation86_spill] sm:$0xff] %v16975_v41  ;;  %18743 = vst [vmem:[#allocation87_spill] sm:$0xff] %v16979_v19  ;;  %v16991_v14 = vadd.f32 %v16731_v61, %v18747_v16  ;;  %v16995_v9 = vadd.f32 %v16731_v61, %v18748_v18  ;;  %v18749_v41 = vld [vmem:[#allocation72_spill] sm:$0xff]  ;;  %v18750_v19 = vld [vmem:[#allocation71_spill] sm:$0xff]  ;;  %v17011_v16 = vadd.f32 %v16731_v61, %v16714_v63  ;;  %v18752_v63 = vmov 0.0  }
 0xaab   :  { %18745 = vst [vmem:[#allocation88_spill] sm:$0xff] %v16983_v32  ;;  %v16999_v53 = vadd.f32 %v16731_v61, %v18749_v41  ;;  %v17003_v54 = vadd.f32 %v16731_v61, %v18750_v19  ;;  %v18751_v32 = vld [vmem:[#allocation74_spill] sm:$0xff]  ;;  %v17015_v18 = vadd.f32 %v16731_v61, %v16718_v28  ;;  %v17019_v41 = vadd.f32 %v16731_v61, %v16722_v31 }
 0xaac   :  { %v17007_v56 = vadd.f32 %v16731_v61, %v18751_v32  ;;  %v17023_v19 = vadd.f32 %v16731_v61, %v16726_v60  ;;  %v7685_v28 = vsel %vm7122_vm15, 1.0, %v18752_v63  ;;  %v7686_v31 = vsel %vm7123_vm10, 1.0, %v18752_v63  ;;  %v18753_v60 = vld [vmem:[#allocation76_spill] sm:$0xff]  ;;  %v18755_v55 = vld [vmem:[#allocation78_spill] sm:$0xff] }
 0xaad   :  { %vm7170_vm2 = vcmp.ge.f32.partialorder %v18753_v60, 0.0  ;;  %v7687_v32 = vsel %vm7124_vm12, 1.0, %v18752_v63  ;;  %v7688_v58 = vsel %vm7125_vm6, 1.0, %v18752_v63  ;;  %v7689_v48 = vsel %vm7126_vm8, 1.0, %v18752_v63  ;;  %7341 = vst [vmem:[%s17546_s10] sm:$0xff] %v7685_v28  ;;  %7342 = vst [vmem:[%s17546_s10 + $0x8] sm:$0xff] %v7686_v31  ;;  %v18757_v61 = vld [vmem:[#allocation80_spill] sm:$0xff] }
 0xaae   :  { %v7690_v33 = vsel %vm7127_vm7, 1.0, %v18752_v63  ;;  %v18758_v39 = vld [vmem:[#allocation79_spill] sm:$0xff]  ;;  %vm18759_vm8 = vcmp.ge.f32.partialorder %v16759_v37, 0.0  ;;  %vm18760_vm7 = vcmp.ge.f32.partialorder %v16763_v47, 0.0  ;;  %vm18761_vm3 = vcmp.ge.f32.partialorder %v16767_v8, 0.0  ;;  %7343 = vst [vmem:[%s17546_s10 + $0x10] sm:$0xff] %v7687_v32 }
 0xaaf   :  { %v7691_v10 = vsel %vm18759_vm8, 1.0, %v18752_v63  ;;  %v7692_v28 = vsel %vm18760_vm7, 1.0, %v18752_v63  ;;  %v7693_v31 = vsel %vm18761_vm3, 1.0, %v18752_v63  ;;  %vm18762_vm15 = vcmp.ge.f32.partialorder %v16771_v45, 0.0  ;;  %7344 = vst [vmem:[%s17546_s10 + $0x18] sm:$0xff] %v7688_v58  ;;  %7345 = vst [vmem:[%s17546_s10 + $0x20] sm:$0xff] %v7689_v48 }
 0xab0   :  { %v7694_v13 = vsel %vm18762_vm15, 1.0, %v18752_v63  ;;  %7346 = vst [vmem:[%s17546_s10 + $0x28] sm:$0xff] %v7690_v33  ;;  %v18763_v37 = vld [vmem:[#allocation136_spill] sm:$0xff]  ;;  %v18764_v47 = vld [vmem:[#allocation81_spill] sm:$0xff]  ;;  %v18765_v8 = vld [vmem:[#allocation82_spill] sm:$0xff]  ;;  %vm18767_vm6 = vcmp.ge.f32.partialorder %v16775_v4, 0.0 }
 0xab1   :  { %v18766_v45 = vld [vmem:[#allocation83_spill] sm:$0xff]  ;;  %v7695_v32 = vsel %vm18767_vm6, 1.0, %v18752_v63  ;;  %vm18768_vm12 = vcmp.ge.f32.partialorder %v16779_v44, 0.0  ;;  %vm18769_vm10 = vcmp.ge.f32.partialorder %v16783_v23, 0.0  ;;  %vm18770_vm3 = vcmp.ge.f32.partialorder %v16787_v49, 0.0  ;;  %7347 = vst [vmem:[%s17546_s10 + $0x30] sm:$0xff] %v7691_v10 }
 0xab2   :  { %v7696_v58 = vsel %vm18768_vm12, 1.0, %v18752_v63  ;;  %v7697_v33 = vsel %vm18769_vm10, 1.0, %v18752_v63  ;;  %v7698_v48 = vsel %vm18770_vm3, 1.0, %v18752_v63  ;;  %7348 = vst [vmem:[%s17546_s10 + $0x38] sm:$0xff] %v7692_v28  ;;  %7349 = vst [vmem:[%s17546_s10 + $0x40] sm:$0xff] %v7693_v31  ;;  %v18771_v4 = vld [vmem:[#allocation84_spill] sm:$0xff] }
 0xab3   :  { %7350 = vst [vmem:[%s17546_s10 + $0x48] sm:$0xff] %v7694_v13  ;;  %v18772_v44 = vld [vmem:[#allocation85_spill] sm:$0xff]  ;;  %v18773_v23 = vld [vmem:[#allocation86_spill] sm:$0xff]  ;;  %v18774_v49 = vld [vmem:[#allocation87_spill] sm:$0xff]  ;;  %vm18775_vm7 = vcmp.ge.f32.partialorder %v16791_v1, 0.0  ;;  %vm18776_vm8 = vcmp.ge.f32.partialorder %v16795_v2, 0.0 }
 0xab4   :  { %v7699_v10 = vsel %vm18775_vm7, 1.0, %v18752_v63  ;;  %v7700_v28 = vsel %vm18776_vm8, 1.0, %v18752_v63  ;;  %vm18777_vm15 = vcmp.ge.f32.partialorder %v16799_v15, 0.0  ;;  %vm18778_vm10 = vcmp.ge.f32.partialorder %v16803_v34, 0.0  ;;  %7351 = vst [vmem:[%s17546_s10 + $0x50] sm:$0xff] %v7695_v32  ;;  %7352 = vst [vmem:[%s17546_s10 + $0x58] sm:$0xff] %v7696_v58 }
 0xab5   :  { %v7701_v13 = vsel %vm18777_vm15, 1.0, %v18752_v63  ;;  %v7702_v31 = vsel %vm18778_vm10, 1.0, %v18752_v63  ;;  %7353 = vst [vmem:[%s17546_s10 + $0x60] sm:$0xff] %v7697_v33  ;;  %7354 = vst [vmem:[%s17546_s10 + $0x68] sm:$0xff] %v7698_v48  ;;  %v18779_v1 = vld [vmem:[#allocation88_spill] sm:$0xff]  ;;  %vm18780_vm3 = vcmp.ge.f32.partialorder %v16807_v5, 0.0 }
 0xab6   :  { %v7703_v2 = vsel %vm18780_vm3, 1.0, %v18752_v63  ;;  %vm18781_vm6 = vcmp.ge.f32.partialorder %v16811_v20, 0.0  ;;  %vm18782_vm12 = vcmp.ge.f32.partialorder %v16815_v29, 0.0  ;;  %vm18783_vm15 = vcmp.ge.f32.partialorder %v16819_v26, 0.0  ;;  %7355 = vst [vmem:[%s17546_s10 + $0x70] sm:$0xff] %v7699_v10  ;;  %7356 = vst [vmem:[%s17546_s10 + $0x78] sm:$0xff] %v7700_v28 }
 0xab7   :  { %v7704_v15 = vsel %vm18781_vm6, 1.0, %v18752_v63  ;;  %v7705_v34 = vsel %vm18782_vm12, 1.0, %v18752_v63  ;;  %v7706_v32 = vsel %vm18783_vm15, 1.0, %v18752_v63  ;;  %7357 = vst [vmem:[%s17546_s10 + $0x80] sm:$0xff] %v7701_v13  ;;  %7358 = vst [vmem:[%s17546_s10 + $0x88] sm:$0xff] %v7702_v31  ;;  %vm18784_vm10 = vcmp.ge.f32.partialorder %v16823_v0, 0.0 }
 0xab8   :  { %v7707_v5 = vsel %vm18784_vm10, 1.0, %v18752_v63  ;;  %vm18785_vm7 = vcmp.ge.f32.partialorder %v16827_v50, 0.0  ;;  %vm18786_vm8 = vcmp.ge.f32.partialorder %v16831_v52, 0.0  ;;  %vm18787_vm12 = vcmp.ge.f32.partialorder %v16835_v17, 0.0  ;;  %7359 = vst [vmem:[%s17546_s10 + $0x90] sm:$0xff] %v7703_v2  ;;  %7360 = vst [vmem:[%s17546_s10 + $0x98] sm:$0xff] %v7704_v15 }
 0xab9   :  { %v7708_v20 = vsel %vm18785_vm7, 1.0, %v18752_v63  ;;  %v7709_v29 = vsel %vm18786_vm8, 1.0, %v18752_v63  ;;  %v7710_v26 = vsel %vm18787_vm12, 1.0, %v18752_v63  ;;  %7361 = vst [vmem:[%s17546_s10 + $0xa0] sm:$0xff] %v7705_v34  ;;  %7362 = vst [vmem:[%s17546_s10 + $0xa8] sm:$0xff] %v7706_v32  ;;  %vm7192_vm8 = vcmp.ge.f32.partialorder %v17015_v18, 0.0 }
 0xaba   :  { %vm7193_vm7 = vcmp.ge.f32.partialorder %v17019_v41, 0.0  ;;  %vm7194_vm10 = vcmp.ge.f32.partialorder %v17023_v19, 0.0  ;;  %vm18788_vm12 = vcmp.ge.f32.partialorder %v16839_v7, 0.0  ;;  %vm18789_vm15 = vcmp.ge.f32.partialorder %v16843_v40, 0.0  ;;  %7363 = vst [vmem:[%s17546_s10 + $0xb0] sm:$0xff] %v7707_v5  ;;  %7364 = vst [vmem:[%s17546_s10 + $0xb8] sm:$0xff] %v7708_v20 }
 0xabb   :  { %v7711_v0 = vsel %vm18788_vm12, 1.0, %v18752_v63  ;;  %v7712_v50 = vsel %vm18789_vm15, 1.0, %v18752_v63  ;;  %vm18790_vm3 = vcmp.ge.f32.partialorder %v16847_v36, 0.0  ;;  %vm18791_vm6 = vcmp.ge.f32.partialorder %v16851_v43, 0.0  ;;  %7365 = vst [vmem:[%s17546_s10 + $0xc0] sm:$0xff] %v7709_v29  ;;  %7366 = vst [vmem:[%s17546_s10 + $0xc8] sm:$0xff] %v7710_v26 }
 0xabc   :  { %v7713_v52 = vsel %vm18790_vm3, 1.0, %v18752_v63  ;;  %v7714_v17 = vsel %vm18791_vm6, 1.0, %v18752_v63  ;;  %vm18792_vm3 = vcmp.ge.f32.partialorder %v16855_v30, 0.0  ;;  %vm18793_vm6 = vcmp.ge.f32.partialorder %v16859_v6, 0.0  ;;  %7367 = vst [vmem:[%s17546_s10 + $0xd0] sm:$0xff] %v7711_v0  ;;  %7368 = vst [vmem:[%s17546_s10 + $0xd8] sm:$0xff] %v7712_v50 }
 0xabd   :  { %v7715_v7 = vsel %vm18792_vm3, 1.0, %v18752_v63  ;;  %v7716_v40 = vsel %vm18793_vm6, 1.0, %v18752_v63  ;;  %vm18794_vm15 = vcmp.ge.f32.partialorder %v16863_v11, 0.0  ;;  %vm18795_vm12 = vcmp.ge.f32.partialorder %v16867_v46, 0.0  ;;  %7369 = vst [vmem:[%s17546_s10 + $0xe0] sm:$0xff] %v7713_v52  ;;  %7370 = vst [vmem:[%s17546_s10 + $0xe8] sm:$0xff] %v7714_v17 }
 0xabe   :  { %v7717_v36 = vsel %vm18794_vm15, 1.0, %v18752_v63  ;;  %v7718_v43 = vsel %vm18795_vm12, 1.0, %v18752_v63  ;;  %vm18796_vm3 = vcmp.ge.f32.partialorder %v16871_v22, 0.0  ;;  %vm18797_vm6 = vcmp.ge.f32.partialorder %v16875_v24, 0.0  ;;  %7371 = vst [vmem:[%s17546_s10 + $0xf0] sm:$0xff] %v7715_v7  ;;  %7372 = vst [vmem:[%s17546_s10 + $0xf8] sm:$0xff] %v7716_v40 }
 0xabf   :  { %v7719_v30 = vsel %vm18796_vm3, 1.0, %v18752_v63  ;;  %v7720_v6 = vsel %vm18797_vm6, 1.0, %v18752_v63  ;;  %v7721_v11 = vsel %vm7158_vm14, 1.0, %v18752_v63  ;;  %v7722_v46 = vsel %vm7159_vm13, 1.0, %v18752_v63  ;;  %7373 = vst [vmem:[%s17546_s10 + $0x100] sm:$0xff] %v7717_v36  ;;  %7374 = vst [vmem:[%s17546_s10 + $0x108] sm:$0xff] %v7718_v43 }
 0xac0   :  { %v7723_v22 = vsel %vm7160_vm4, 1.0, %v18752_v63  ;;  %v7724_v24 = vsel %vm7161_vm5, 1.0, %v18752_v63  ;;  %vm18798_vm14 = vcmp.ge.f32.partialorder %v16895_v57, 0.0  ;;  %vm18799_vm13 = vcmp.ge.f32.partialorder %v16899_v25, 0.0  ;;  %7375 = vst [vmem:[%s17546_s10 + $0x110] sm:$0xff] %v7719_v30  ;;  %7376 = vst [vmem:[%s17546_s10 + $0x118] sm:$0xff] %v7720_v6 }
 0xac1   :  { %v7725_v38 = vsel %vm18798_vm14, 1.0, %v18752_v63  ;;  %v7726_v12 = vsel %vm18799_vm13, 1.0, %v18752_v63  ;;  %7377 = vst [vmem:[%s17546_s10 + $0x120] sm:$0xff] %v7721_v11  ;;  %7378 = vst [vmem:[%s17546_s10 + $0x128] sm:$0xff] %v7722_v46  ;;  %vm18800_vm4 = vcmp.ge.f32.partialorder %v16903_v42, 0.0  ;;  %vm18801_vm5 = vcmp.ge.f32.partialorder %v16907_v59, 0.0 }
 0xac2   :  { %v7727_v3 = vsel %vm18800_vm4, 1.0, %v18752_v63  ;;  %v7728_v21 = vsel %vm18801_vm5, 1.0, %v18752_v63  ;;  %v7729_v57 = vsel %vm7166_vm11, 1.0, %v18752_v63  ;;  %v7730_v25 = vsel %vm7167_vm1, 1.0, %v18752_v63  ;;  %7379 = vst [vmem:[%s17546_s10 + $0x130] sm:$0xff] %v7723_v22  ;;  %7380 = vst [vmem:[%s17546_s10 + $0x138] sm:$0xff] %v7724_v24 }
 0xac3   :  { %7381 = vst [vmem:[%s17546_s10 + $0x140] sm:$0xff] %v7725_v38  ;;  %7382 = vst [vmem:[%s17546_s10 + $0x148] sm:$0xff] %v7726_v12  ;;  %v7731_v42 = vsel %vm7168_vm0, 1.0, %v18752_v63  ;;  %v7732_v62 = vsel %vm7169_vm9, 1.0, %v18752_v63  ;;  %v7733_v27 = vsel %vm7170_vm2, 1.0, %v18752_v63  ;;  %v18803_v58 = vld [vmem:[#allocation75_spill] sm:$0xff] }
 0xac4   :  { %vm18804_vm11 = vcmp.ge.f32.partialorder %v18803_v58, 0.0  ;;  %7383 = vst [vmem:[%s17546_s10 + $0x150] sm:$0xff] %v7727_v3  ;;  %7384 = vst [vmem:[%s17546_s10 + $0x158] sm:$0xff] %v7728_v21  ;;  %vm18805_vm0 = vcmp.ge.f32.partialorder %v18755_v55, 0.0  ;;  %v18806_v60 = vld [vmem:[#allocation77_spill] sm:$0xff]  ;;  %vm18808_vm2 = vcmp.ge.f32.partialorder %v18757_v61, 0.0 }
 0xac5   :  { %v7734_v33 = vsel %vm18804_vm11, 1.0, %v18752_v63  ;;  %7385 = vst [vmem:[%s17546_s10 + $0x160] sm:$0xff] %v7729_v57  ;;  %7386 = vst [vmem:[%s17546_s10 + $0x168] sm:$0xff] %v7730_v25  ;;  %v7735_v51 = vsel %vm18805_vm0, 1.0, %v18752_v63  ;;  %vm18807_vm9 = vcmp.ge.f32.partialorder %v18806_v60, 0.0  ;;  %v7737_v10 = vsel %vm18808_vm2, 1.0, %v18752_v63 }
 0xac6   :  { %v7736_v48 = vsel %vm18807_vm9, 1.0, %v18752_v63  ;;  %vm18809_vm1 = vcmp.ge.f32.partialorder %v18758_v39, 0.0  ;;  %7387 = vst [vmem:[%s17546_s10 + $0x170] sm:$0xff] %v7731_v42  ;;  %7388 = vst [vmem:[%s17546_s10 + $0x178] sm:$0xff] %v7732_v62  ;;  %vm18810_vm15 = vcmp.ge.f32.partialorder %v18763_v37, 0.0  ;;  %vm18811_vm12 = vcmp.ge.f32.partialorder %v18764_v47, 0.0 }
 0xac7   :  { %v7738_v28 = vsel %vm18809_vm1, 1.0, %v18752_v63  ;;  %7389 = vst [vmem:[%s17546_s10 + $0x180] sm:$0xff] %v7733_v27  ;;  %7390 = vst [vmem:[%s17546_s10 + $0x188] sm:$0xff] %v7734_v33  ;;  %v7739_v61 = vsel %vm18810_vm15, 1.0, %v18752_v63  ;;  %v7740_v55 = vsel %vm18811_vm12, 1.0, %v18752_v63  ;;  %vm18812_vm3 = vcmp.ge.f32.partialorder %v18765_v8, 0.0 }
 0xac8   :  { %v7741_v39 = vsel %vm18812_vm3, 1.0, %v18752_v63  ;;  %vm18813_vm6 = vcmp.ge.f32.partialorder %v18766_v45, 0.0  ;;  %7391 = vst [vmem:[%s17546_s10 + $0x190] sm:$0xff] %v7735_v51  ;;  %7392 = vst [vmem:[%s17546_s10 + $0x198] sm:$0xff] %v7736_v48  ;;  %vm18814_vm14 = vcmp.ge.f32.partialorder %v18771_v4, 0.0  ;;  %vm18815_vm13 = vcmp.ge.f32.partialorder %v18772_v44, 0.0 }
 0xac9   :  { %v7742_v13 = vsel %vm18813_vm6, 1.0, %v18752_v63  ;;  %7393 = vst [vmem:[%s17546_s10 + $0x1a0] sm:$0xff] %v7737_v10  ;;  %7394 = vst [vmem:[%s17546_s10 + $0x1a8] sm:$0xff] %v7738_v28  ;;  %v7743_v37 = vsel %vm18814_vm14, 1.0, %v18752_v63  ;;  %v7744_v47 = vsel %vm18815_vm13, 1.0, %v18752_v63  ;;  %vm18816_vm4 = vcmp.ge.f32.partialorder %v18773_v23, 0.0 }
 0xaca   :  { %v7745_v8 = vsel %vm18816_vm4, 1.0, %v18752_v63  ;;  %vm18817_vm5 = vcmp.ge.f32.partialorder %v18774_v49, 0.0  ;;  %7395 = vst [vmem:[%s17546_s10 + $0x1b0] sm:$0xff] %v7739_v61  ;;  %7396 = vst [vmem:[%s17546_s10 + $0x1b8] sm:$0xff] %v7740_v55  ;;  %vm18818_vm11 = vcmp.ge.f32.partialorder %v18779_v1, 0.0  ;;  %vm18819_vm0 = vcmp.ge.f32.partialorder %v16987_v35, 0.0 }
 0xacb   :  { %v7746_v45 = vsel %vm18817_vm5, 1.0, %v18752_v63  ;;  %7397 = vst [vmem:[%s17546_s10 + $0x1c0] sm:$0xff] %v7741_v39  ;;  %7398 = vst [vmem:[%s17546_s10 + $0x1c8] sm:$0xff] %v7742_v13  ;;  %v7747_v4 = vsel %vm18818_vm11, 1.0, %v18752_v63  ;;  %v7748_v44 = vsel %vm18819_vm0, 1.0, %v18752_v63  ;;  %vm18820_vm9 = vcmp.ge.f32.partialorder %v16991_v14, 0.0 }
 0xacc   :  { %v7749_v23 = vsel %vm18820_vm9, 1.0, %v18752_v63  ;;  %vm18821_vm2 = vcmp.ge.f32.partialorder %v16995_v9, 0.0  ;;  %7399 = vst [vmem:[%s17546_s10 + $0x1d0] sm:$0xff] %v7743_v37  ;;  %7400 = vst [vmem:[%s17546_s10 + $0x1d8] sm:$0xff] %v7744_v47  ;;  %vm18822_vm1 = vcmp.ge.f32.partialorder %v16999_v53, 0.0  ;;  %vm18823_vm15 = vcmp.ge.f32.partialorder %v17003_v54, 0.0 }
 0xacd   :  { %v7750_v49 = vsel %vm18821_vm2, 1.0, %v18752_v63  ;;  %7401 = vst [vmem:[%s17546_s10 + $0x1e0] sm:$0xff] %v7745_v8  ;;  %7402 = vst [vmem:[%s17546_s10 + $0x1e8] sm:$0xff] %v7746_v45  ;;  %v7751_v35 = vsel %vm18822_vm1, 1.0, %v18752_v63  ;;  %v7752_v14 = vsel %vm18823_vm15, 1.0, %v18752_v63  ;;  %vm18824_vm12 = vcmp.ge.f32.partialorder %v17007_v56, 0.0 }
 0xace   :  { %v7753_v9 = vsel %vm18824_vm12, 1.0, %v18752_v63  ;;  %vm18825_vm3 = vcmp.ge.f32.partialorder %v17011_v16, 0.0  ;;  %7403 = vst [vmem:[%s17546_s10 + $0x1f0] sm:$0xff] %v7747_v4  ;;  %7404 = vst [vmem:[%s17546_s10 + $0x1f8] sm:$0xff] %v7748_v44  ;;  %v7755_v53 = vsel %vm7192_vm8, 1.0, %v18752_v63  ;;  %v7756_v54 = vsel %vm7193_vm7, 1.0, %v18752_v63 }
 0xacf   :  { %v7754_v31 = vsel %vm18825_vm3, 1.0, %v18752_v63  ;;  %7405 = vst [vmem:[%s17546_s10 + $0x200] sm:$0xff] %v7749_v23  ;;  %7406 = vst [vmem:[%s17546_s10 + $0x208] sm:$0xff] %v7750_v49  ;;  %v7757_v56 = vsel %vm7194_vm10, 1.0, %v18752_v63 }
 0xad0   :  { %7407 = vst [vmem:[%s17546_s10 + $0x210] sm:$0xff] %v7751_v35  ;;  %7408 = vst [vmem:[%s17546_s10 + $0x218] sm:$0xff] %v7752_v14 }
 0xad1   :  { %7409 = vst [vmem:[%s17546_s10 + $0x220] sm:$0xff] %v7753_v9  ;;  %7410 = vst [vmem:[%s17546_s10 + $0x228] sm:$0xff] %v7754_v31 }
 0xad2   :  { %7411 = vst [vmem:[%s17546_s10 + $0x230] sm:$0xff] %v7755_v53  ;;  %7412 = vst [vmem:[%s17546_s10 + $0x238] sm:$0xff] %v7756_v54 }
 0xad3   :  { %7413 = vst [vmem:[%s17546_s10 + $0x240] sm:$0x3] %v7757_v56 }

</bundles_post_ra>
